<compile_context>
chip_gen: v6e
topology: v6e:2x2x1
jax: 0.10.0
libtpu: 0.0.40
codegen_flags: <defaults>
</compile_context>

<pallas_src>
import functools
import math

import jax
import jax.numpy as jnp
from jax.experimental import pallas as pl
from jax.experimental.pallas import tpu as pltpu

_EPS = 1e-5  # RMSNorm eps (matches the DiffTransformer-style RMSNorm default)


def lambda_init_fn(layer_idx: int) -> float:
    # Standard Differential-Transformer lambda_init schedule.
    return 0.8 - 0.6 * math.exp(-0.3 * (layer_idx - 1))


def _cdiv(a: int, b: int) -> int:
    return -(-a // b)


# ----------------------------------------------------------------------------
# Fused kernel: stream-batched Q/K/V projection + differential attention
#               + RMSNorm, for `block_bt` (batch*time) rows per grid step.
# ----------------------------------------------------------------------------
def _fused_diff_attn_kernel(x_ref, wg_ref, rmsw_ref, lam_ref, o_ref, *,
                            heads, head_dim, scale, eps, flat_out):
    tb, n, d = x_ref.shape
    hd2 = 2 * head_dim
    hid = heads * hd2
    n_qk = 2 * heads                      # number of q (= k) streams
    n_streams = 5 * heads                 # q1,q2 | k1,k2 | v

    # ---- fused Q/K/V projection (1x1 conv == per-position matmul) ----------
    # One stream-batched MXU matmul: x is broadcast across the stacked weight
    # streams, so q/k/v come out already stream-major -- no in-kernel
    # transposes are needed afterwards.  bf16 operands, f32 accumulation.
    x2 = x_ref[...].reshape(tb * n, d)                            # bf16
    xg = jnp.broadcast_to(x2, (n_streams, tb * n, d))
    qkv = jnp.einsum('gnd,gdc->gnc', xg, wg_ref[...],
                     preferred_element_type=jnp.float32)          # (G, tb*n, 2hd)

    # Stream layout (leading axis): [q1_h*, q2_h*, k1_h*, k2_h*, v_h*].
    # The q/k streams carry zero-padded upper halves, which contribute exactly
    # 0 to the score contraction below, so no lane slicing is required.
    q = qkv[0:n_qk].reshape(n_qk * tb, n, hd2).astype(jnp.bfloat16)
    k = qkv[n_qk:2 * n_qk].reshape(n_qk * tb, n, hd2).astype(jnp.bfloat16)
    v = qkv[2 * n_qk:2 * n_qk + heads].reshape(heads * tb, n,
                                               hd2).astype(jnp.bfloat16)

    # ---- differential attention (all heads + both branches batched) --------
    s = jnp.einsum('gqc,gkc->gqk', q, k,
                   preferred_element_type=jnp.float32) * scale    # (2H*tb, n, n)
    m = jnp.max(s, axis=-1, keepdims=True)
    e = jnp.exp(s - m)
    p = e * pl.reciprocal(jnp.sum(e, axis=-1, keepdims=True), approx=True)

    lam = lam_ref[0]                                   # lambda_full (SMEM scalar)
    p1 = p[:heads * tb].astype(jnp.bfloat16)           # softmax(q1 k1^T) streams
    p2 = p[heads * tb:].astype(jnp.bfloat16)           # softmax(q2 k2^T) streams
    a1 = jnp.einsum('gqk,gkc->gqc', p1, v, preferred_element_type=jnp.float32)
    a2 = jnp.einsum('gqk,gkc->gqc', p2, v, preferred_element_type=jnp.float32)
    o = a1 - lam * a2                                  # (heads*tb, n, 2hd) f32

    # ---- RMSNorm(2*head_dim) * weight * (1 - lambda_init) ------------------
    # out_drop with attn_drop=0.0 (eval) is the identity.
    # TODO(synk): training-time dropout (attn_drop > 0) is not implemented.
    ms = jnp.mean(o * o, axis=-1, keepdims=True)
    o = o * jax.lax.rsqrt(ms + eps) * rmsw_ref[...]    # rmsw already holds
                                                       # weight * (1 - lambda_init)

    # ---- head-major channel layout + lane-dense store ----------------------
    slab = jnp.concatenate([o[h * tb:(h + 1) * tb] for h in range(heads)],
                           axis=-1)                    # (tb, n, hid) head-major
    if flat_out:
        o_ref[...] = slab.reshape(tb, n * hid)         # dense (n*hid)-lane store
    else:
        o_ref[...] = slab                              # fallback (masked stores)


# ----------------------------------------------------------------------------
# VMEM budgeting & block-size selection
# ----------------------------------------------------------------------------
def _vmem_budget_and_limit():
    try:
        cap = int(pltpu.get_tpu_info().vmem_capacity_bytes)
    except Exception:
        cap = 64 * 1024 * 1024            # conservative: v7x has 64 MiB / TensorCore
    vmem_limit = min(int(0.75 * cap), 100 * 1024 * 1024)   # 48 MiB v7x, ~96-100 MiB v5e/v6e
    budget = vmem_limit // 2              # headroom for double-buffering slack / scratch
    return budget, vmem_limit


def _per_row_bytes(n, d, hid, heads):
    """Rough in-kernel live-set per (batch*time) row (bytes)."""
    hd2 = hid // heads
    g = 5 * heads
    return int(
        2 * n * d * (g + 1)                 # bf16 x tile + per-stream broadcast copies
        + (4 + 2) * g * n * hd2             # qkv (f32) + bf16 q/k/v casts
        + 10 * (2 * heads) * n * n          # scores f32 + probs f32 + probs bf16
        + 16 * heads * n * hd2              # a1, a2, o, normalized o (f32)
        + 8 * n * hid                       # head-major slab + flattened store copy
    )


def _io_row_bytes(n, d, hid):
    """Double-buffered BlockSpec I/O per row, incl. 128-lane VMEM tile padding."""
    lane = 128
    x_row = n * _cdiv(d, lane) * lane * 2             # bf16 input block
    o_row = _cdiv(n * hid, lane) * lane * 4           # f32 lane-dense output block
    return 2 * (x_row + o_row)


def _choose_block_bt(bt, n, d, hid, heads, budget_bytes):
    per_row = _per_row_bytes(n, d, hid, heads) + _io_row_bytes(n, d, hid)
    max_rows = max(1, int(budget_bytes) // max(per_row, 1))
    if bt <= max_rows and bt < 16:
        return bt                                     # tiny problem: one block
    # Prefer >=2 grid steps (DMA/compute overlap + megacore sharding) and a
    # multiple-of-8 block (keeps the lane-dense 2-D out spec (8,128)-legal).
    cap = max(8, min(max_rows, bt // 2))
    blk = max(8, (cap // 8) * 8)
    for b in range(blk, 7, -8):                       # largest mult-of-8 divisor of bt
        if bt % b == 0:
            return b
    return blk                                        # ragged BT: wrapper pads (rare)


# ----------------------------------------------------------------------------
# Wrapper
# ----------------------------------------------------------------------------
def spatial_diff_attn(x, params, *, heads, layer_idx, block_bt=None):
    """x: (B, T, N, D) float32.  Returns (B, T, N, hid_dim) float32.

    params["wq"|"wk"|"wv"]: (D, hid_dim) = Conv2d 1x1 weight (hid, D, 1, 1),
    squeezed and transposed.
    """
    B, T, N, D = x.shape
    wq, wk, wv = params["wq"], params["wk"], params["wv"]
    hid = wq.shape[1]
    assert hid % (2 * heads) == 0
    hd = hid // heads // 2
    hd2 = 2 * hd
    scale = hd ** (-0.5)
    li = lambda_init_fn(layer_idx)

    # lambda_full: tiny scalar glue, computed once outside the kernel.
    lam1 = jnp.exp(jnp.sum(params["lambda_q1"] * params["lambda_k1"]))
    lam2 = jnp.exp(jnp.sum(params["lambda_q2"] * params["lambda_k2"]))
    lam_full = (lam1 - lam2 + li).reshape(1).astype(jnp.float32)

    # Stream-stacked projection weights: G = 5*heads streams of width 2*hd.
    #   streams [0, 2H)   : q  (q1 for all heads, then q2), zero-padded to 2*hd
    #   streams [2H, 4H)  : k  (same ordering / padding)
    #   streams [4H, 5H)  : v  (per head, full 2*hd)
    def _qk_streams(w):
        w4 = w.reshape(D, heads, 2, hd)                 # channel = h*2hd + j*hd + c
        w4 = jnp.transpose(w4, (2, 1, 0, 3))            # (j, h, D, hd)
        w4 = w4.reshape(2 * heads, D, hd)
        return jnp.pad(w4, ((0, 0), (0, 0), (0, hd)))   # zero-pad channels -> 2*hd

    v_streams = jnp.transpose(wv.reshape(D, heads, hd2), (1, 0, 2))
    w_g = jnp.concatenate([_qk_streams(wq), _qk_streams(wk), v_streams],
                          axis=0).astype(jnp.bfloat16)  # (5*heads, D, 2*hd)

    # Fold (1 - lambda_init) into the RMSNorm weight (both multiplicative).
    rms_w = params["rms_weight"].reshape(1, hd2).astype(jnp.float32) * (1.0 - li)

    BT = B * T
    x_bt = x.reshape(BT, N, D).astype(jnp.bfloat16)     # bf16 input DMA (MXU-only use)

    budget, vmem_limit = _vmem_budget_and_limit()
    if block_bt is None:
        block_bt = _choose_block_bt(BT, N, D, hid, heads, budget)
    n_blocks = _cdiv(BT, block_bt)
    BT_pad = n_blocks * block_bt
    if BT_pad != BT:   # only when BT has no suitable multiple-of-8 divisor
        x_bt = jnp.pad(x_bt, ((0, BT_pad - BT), (0, 0), (0, 0)))

    def _build_and_run(flat_out):
        kern = functools.partial(_fused_diff_attn_kernel, heads=heads,
                                 head_dim=hd, scale=scale, eps=_EPS,
                                 flat_out=flat_out)
        if flat_out:
            out_shape = jax.ShapeDtypeStruct((BT_pad, N * hid), jnp.float32)
            out_spec = pl.BlockSpec((block_bt, N * hid), lambda i: (i, 0))
        else:
            out_shape = jax.ShapeDtypeStruct((BT_pad, N, hid), jnp.float32)
            out_spec = pl.BlockSpec((block_bt, N, hid), lambda i: (i, 0, 0))
        return pl.pallas_call(
            kern,
            out_shape=out_shape,
            grid=(n_blocks,),
            in_specs=[
                pl.BlockSpec((block_bt, N, D), lambda i: (i, 0, 0)),      # x tile
                pl.BlockSpec((5 * heads, D, hd2), lambda i: (0, 0, 0)),   # W streams
                pl.BlockSpec((1, hd2), lambda i: (0, 0)),                 # RMS weight
                pl.BlockSpec(memory_space=pltpu.MemorySpace.SMEM),        # lambda_full
            ],
            out_specs=out_spec,
            compiler_params=pltpu.CompilerParams(
                dimension_semantics=("parallel",),
                vmem_limit_bytes=vmem_limit),
        )(x_bt, w_g, rms_w, lam_full)

    try:
        out = jax.block_until_ready(_build_and_run(flat_out=True))
    except Exception:
        # Portability guard: if this Mosaic version cannot lower the in-kernel
        # (tb, n, hid) -> (tb, n*hid) lane-flatten, fall back to the (slower,
        # masked-store) 3-D output layout that is known to compile.
        out = _build_and_run(flat_out=False)

    if BT_pad != BT:
        out = out[:BT]
    return out.reshape(B, T, N, hid)   # pure reshape (free)


# ----------------------------------------------------------------------------
# Pure-JAX f32 reference (mirrors the PyTorch module, eval mode)
# ----------------------------------------------------------------------------
def spatial_diff_attn_reference(x, params, *, heads, layer_idx, eps=_EPS):
    B, T, N, D = x.shape
    hid = params["wq"].shape[1]
    hd = hid // heads // 2
    scale = hd ** (-0.5)
    li = lambda_init_fn(layer_idx)

    x2 = x.reshape(B * T, N, D)
    q = (x2 @ params["wq"]).reshape(B * T, N, heads, 2 * hd)
    k = (x2 @ params["wk"]).reshape(B * T, N, heads, 2 * hd)
    v = (x2 @ params["wv"]).reshape(B * T, N, heads, 2 * hd)
    q1, q2 = q[..., :hd], q[..., hd:]
    k1, k2 = k[..., :hd], k[..., hd:]

    def _attn(qq, kk):
        s = jnp.einsum('bihd,bjhd->bhij', qq, kk) * scale
        p = jax.nn.softmax(s, axis=-1)
        return jnp.einsum('bhij,bjhc->bihc', p, v)          # (BT, N, heads, 2hd)

    a1 = _attn(q1, k1)
    a2 = _attn(q2, k2)
    lam = (jnp.exp(jnp.sum(params["lambda_q1"] * params["lambda_k1"]))
           - jnp.exp(jnp.sum(params["lambda_q2"] * params["lambda_k2"])) + li)
    o = a1 - lam * a2
    o = o * jax.lax.rsqrt(jnp.mean(o * o, axis=-1, keepdims=True) + eps)
    o = o * params["rms_weight"] * (1.0 - li)
    return o.reshape(B, T, N, hid)


if __name__ == "__main__":
    key = jax.random.PRNGKey(0)
    B, T, N, D = 2, 4, 16, 8          # q_dim = kv_dim = D
    hid_dim, heads, layer_idx = 32, 2, 2
    head_dim = hid_dim // heads // 2  # = 8

    ks = jax.random.split(key, 8)
    x = jax.random.normal(ks[0], (B, T, N, D), dtype=jnp.float32)

    # Deterministic synthetic parameters (Conv2d 1x1 weight (hid,D,1,1) -> (D,hid)).
    params = {
        "wq": 0.1 * jax.random.normal(ks[1], (D, hid_dim), jnp.float32),
        "wk": 0.1 * jax.random.normal(ks[2], (D, hid_dim), jnp.float32),
        "wv": 0.1 * jax.random.normal(ks[3], (D, hid_dim), jnp.float32),
        "lambda_q1": 0.1 * jax.random.normal(ks[4], (head_dim,), jnp.float32),
        "lambda_k1": 0.1 * jax.random.normal(ks[5], (head_dim,), jnp.float32),
        "lambda_q2": 0.1 * jax.random.normal(ks[6], (head_dim,), jnp.float32),
        "lambda_k2": 0.1 * jax.random.normal(ks[7], (head_dim,), jnp.float32),
        "rms_weight": jnp.ones((2 * head_dim,), jnp.float32),
    }

    out = spatial_diff_attn(x, params, heads=heads, layer_idx=layer_idx)
    out = jax.block_until_ready(out)
    assert out.shape == (B, T, N, hid_dim), out.shape
    assert bool(jnp.all(jnp.isfinite(out)))

    # Tolerance check vs a pure-JAX f32 reference (the kernel, like the PyTorch
    # module's fp16 flash-attention path, uses reduced-precision MXU operands).
    ref = spatial_diff_attn_reference(x, params, heads=heads, layer_idx=layer_idx)
    assert bool(jnp.allclose(out, ref, rtol=5e-2, atol=5e-2)), (
        float(jnp.max(jnp.abs(out - ref))))

    print("KERNEL_OK")
</pallas_src>

<mosaic_0001>
module attributes {stable_mosaic.version = 11 : i64} {
  func.func @_fused_diff_attn_kernel(%arg0: i32, %arg1: memref<8x16x8xbf16, #tpu.memory_space<vmem>>, %arg2: memref<10x8x16xbf16, #tpu.memory_space<vmem>>, %arg3: memref<1x16xf32, #tpu.memory_space<vmem>>, %arg4: memref<1xf32, #tpu.memory_space<smem>>, %arg5: memref<8x512xf32, #tpu.memory_space<vmem>>) attributes {dimension_semantics = [#tpu.dimension_semantics<parallel>], iteration_bounds = array<i64: 1>, scalar_prefetch = 0 : i64, scratch_operands = 0 : i64, tpu.core_type = #tpu.core_type<tc>, window_params = [{transform_indices = @transform_0, window_bounds = array<i64: 8, 16, 8>}, {pipeline_mode = #tpu.pipeline_mode<synchronous>, transform_indices = @transform_1, window_bounds = array<i64: 10, 8, 16>}, {pipeline_mode = #tpu.pipeline_mode<synchronous>, transform_indices = @transform_2, window_bounds = array<i64: 1, 16>}, {transform_indices = @transform_3, window_bounds = array<i64: 1>}, {transform_indices = @transform_4, window_bounds = array<i64: 8, 512>}]} {
    %c0 = arith.constant 0 : index
    %c0_0 = arith.constant 0 : index
    %c0_1 = arith.constant 0 : index
    %0 = vector.load %arg1[%c0, %c0_0, %c0_1] : memref<8x16x8xbf16, #tpu.memory_space<vmem>>, vector<8x16x8xbf16>
    %1 = vector.shape_cast %0 : vector<8x16x8xbf16> to vector<128x8xbf16>
    %2 = vector.shape_cast %1 : vector<128x8xbf16> to vector<1x128x8xbf16>
    %3 = vector.broadcast %2 : vector<1x128x8xbf16> to vector<10x128x8xbf16>
    %c0_2 = arith.constant 0 : index
    %c0_3 = arith.constant 0 : index
    %c0_4 = arith.constant 0 : index
    %4 = vector.load %arg2[%c0_2, %c0_3, %c0_4] : memref<10x8x16xbf16, #tpu.memory_space<vmem>>, vector<10x8x16xbf16>
    "tpu.trace_start"() <{level = 10 : i32, message = "gnd,gdc->gnc"}> : () -> ()
    %cst = arith.constant dense<0.000000e+00> : vector<10x128x16xf32>
    %5 = tpu.matmul %3, %4, %cst {dimension_numbers = #tpu.dot_dimension_numbers<[2], [1], [1], [2], [0, 0, 0, 1, 1, 2], [0], [0]>} : vector<10x128x8xbf16>, vector<10x8x16xbf16>, vector<10x128x16xf32> -> vector<10x128x16xf32>
    "tpu.trace_stop"() : () -> ()
    %6 = vector.extract_strided_slice %5 {offsets = [0, 0, 0], sizes = [4, 128, 16], strides = [1, 1, 1]} : vector<10x128x16xf32> to vector<4x128x16xf32>
    %7 = vector.shape_cast %6 : vector<4x128x16xf32> to vector<32x16x16xf32>
    %8 = arith.truncf %7 : vector<32x16x16xf32> to vector<32x16x16xbf16>
    %9 = vector.extract_strided_slice %5 {offsets = [4, 0, 0], sizes = [4, 128, 16], strides = [1, 1, 1]} : vector<10x128x16xf32> to vector<4x128x16xf32>
    %10 = vector.shape_cast %9 : vector<4x128x16xf32> to vector<32x16x16xf32>
    %11 = arith.truncf %10 : vector<32x16x16xf32> to vector<32x16x16xbf16>
    %12 = vector.extract_strided_slice %5 {offsets = [8, 0, 0], sizes = [2, 128, 16], strides = [1, 1, 1]} : vector<10x128x16xf32> to vector<2x128x16xf32>
    %13 = vector.shape_cast %12 : vector<2x128x16xf32> to vector<16x16x16xf32>
    %14 = arith.truncf %13 : vector<16x16x16xf32> to vector<16x16x16xbf16>
    "tpu.trace_start"() <{level = 10 : i32, message = "gqc,gkc->gqk"}> : () -> ()
    %cst_5 = arith.constant dense<0.000000e+00> : vector<32x16x16xf32>
    %15 = tpu.matmul %8, %11, %cst_5 {dimension_numbers = #tpu.dot_dimension_numbers<[2], [2], [1], [1], [0, 0, 0, 1, 1, 1], [0], [0]>} : vector<32x16x16xbf16>, vector<32x16x16xbf16>, vector<32x16x16xf32> -> vector<32x16x16xf32>
    "tpu.trace_stop"() : () -> ()
    %cst_6 = arith.constant 0.353553385 : f32
    %16 = vector.broadcast %cst_6 : f32 to vector<32x16x16xf32>
    %17 = arith.mulf %15, %16 : vector<32x16x16xf32>
    %cst_7 = arith.constant dense<0xFF800000> : vector<32x16xf32>
    %18 = vector.multi_reduction <maximumf>, %17, %cst_7 [2] : vector<32x16x16xf32> to vector<32x16xf32>
    %19 = vector.shape_cast %18 : vector<32x16xf32> to vector<32x16x1xf32>
    %20 = vector.broadcast %19 : vector<32x16x1xf32> to vector<32x16x16xf32>
    %21 = arith.subf %17, %20 : vector<32x16x16xf32>
    %22 = math.exp %21 : vector<32x16x16xf32>
    %cst_8 = arith.constant dense<0.000000e+00> : vector<32x16xf32>
    %23 = vector.multi_reduction <add>, %22, %cst_8 [2] : vector<32x16x16xf32> to vector<32x16xf32>
    %24 = vector.shape_cast %23 : vector<32x16xf32> to vector<32x16x1xf32>
    %25 = tpu.reciprocal %24 {approx = true} : vector<32x16x1xf32> -> vector<32x16x1xf32>
    %26 = vector.broadcast %25 : vector<32x16x1xf32> to vector<32x16x16xf32>
    %27 = arith.mulf %22, %26 : vector<32x16x16xf32>
    %c0_9 = arith.constant 0 : index
    %28 = memref.load %arg4[%c0_9] : memref<1xf32, #tpu.memory_space<smem>>
    %29 = vector.extract_strided_slice %27 {offsets = [0, 0, 0], sizes = [16, 16, 16], strides = [1, 1, 1]} : vector<32x16x16xf32> to vector<16x16x16xf32>
    %30 = arith.truncf %29 : vector<16x16x16xf32> to vector<16x16x16xbf16>
    %31 = vector.extract_strided_slice %27 {offsets = [16, 0, 0], sizes = [16, 16, 16], strides = [1, 1, 1]} : vector<32x16x16xf32> to vector<16x16x16xf32>
    %32 = arith.truncf %31 : vector<16x16x16xf32> to vector<16x16x16xbf16>
    "tpu.trace_start"() <{level = 10 : i32, message = "gqk,gkc->gqc"}> : () -> ()
    %cst_10 = arith.constant dense<0.000000e+00> : vector<16x16x16xf32>
    %33 = tpu.matmul %30, %14, %cst_10 {dimension_numbers = #tpu.dot_dimension_numbers<[2], [1], [1], [2], [0, 0, 0, 1, 1, 2], [0], [0]>} : vector<16x16x16xbf16>, vector<16x16x16xbf16>, vector<16x16x16xf32> -> vector<16x16x16xf32>
    %cst_11 = arith.constant dense<0.000000e+00> : vector<16x16x16xf32>
    %34 = tpu.matmul %32, %14, %cst_11 {dimension_numbers = #tpu.dot_dimension_numbers<[2], [1], [1], [2], [0, 0, 0, 1, 1, 2], [0], [0]>} : vector<16x16x16xbf16>, vector<16x16x16xbf16>, vector<16x16x16xf32> -> vector<16x16x16xf32>
    "tpu.trace_stop"() : () -> ()
    %35 = vector.broadcast %28 : f32 to vector<16x16x16xf32>
    %36 = arith.mulf %35, %34 : vector<16x16x16xf32>
    %37 = arith.subf %33, %36 : vector<16x16x16xf32>
    %38 = arith.mulf %37, %37 : vector<16x16x16xf32>
    %cst_12 = arith.constant dense<0.000000e+00> : vector<16x16xf32>
    %39 = vector.multi_reduction <add>, %38, %cst_12 [2] : vector<16x16x16xf32> to vector<16x16xf32>
    %40 = vector.shape_cast %39 : vector<16x16xf32> to vector<16x16x1xf32>
    %cst_13 = arith.constant 1.600000e+01 : f32
    %41 = vector.broadcast %cst_13 : f32 to vector<16x16x1xf32>
    %42 = arith.divf %40, %41 : vector<16x16x1xf32>
    %cst_14 = arith.constant 9.99999974E-6 : f32
    %43 = vector.broadcast %cst_14 : f32 to vector<16x16x1xf32>
    %44 = arith.addf %42, %43 : vector<16x16x1xf32>
    %45 = math.rsqrt %44 : vector<16x16x1xf32>
    %46 = vector.broadcast %45 : vector<16x16x1xf32> to vector<16x16x16xf32>
    %47 = arith.mulf %37, %46 : vector<16x16x16xf32>
    %c0_15 = arith.constant 0 : index
    %c0_16 = arith.constant 0 : index
    %48 = vector.load %arg3[%c0_15, %c0_16] : memref<1x16xf32, #tpu.memory_space<vmem>>, vector<1x16xf32>
    %49 = vector.shape_cast %48 : vector<1x16xf32> to vector<1x1x16xf32>
    %50 = vector.broadcast %49 : vector<1x1x16xf32> to vector<16x16x16xf32>
    %51 = arith.mulf %47, %50 : vector<16x16x16xf32>
    %52 = vector.extract_strided_slice %51 {offsets = [0, 0, 0], sizes = [8, 16, 16], strides = [1, 1, 1]} : vector<16x16x16xf32> to vector<8x16x16xf32>
    %53 = vector.extract_strided_slice %51 {offsets = [8, 0, 0], sizes = [8, 16, 16], strides = [1, 1, 1]} : vector<16x16x16xf32> to vector<8x16x16xf32>
    %54 = tpu.concatenate %52, %53 in 2 : vector<8x16x16xf32>, vector<8x16x16xf32> -> vector<8x16x32xf32>
    %55 = vector.shape_cast %54 : vector<8x16x32xf32> to vector<8x512xf32>
    %c0_17 = arith.constant 0 : index
    %c0_18 = arith.constant 0 : index
    %56 = vector.load %arg5[%c0_17, %c0_18] : memref<8x512xf32, #tpu.memory_space<vmem>>, vector<8x512xf32>
    tpu.vector_store %arg5[%c0_17, %c0_18], %55 {strides = array<i32>} : memref<8x512xf32, #tpu.memory_space<vmem>>, vector<8x512xf32>,
    return
  }
  func.func @transform_0(%arg0: i32) -> (i32, i32, i32) {
    %c0_i32 = arith.constant 0 : i32
    %c0_i32_0 = arith.constant 0 : i32
    %c0_i32_1 = arith.constant 0 : i32
    return %arg0, %c0_i32, %c0_i32_0 : i32, i32, i32
  }
  func.func @transform_1(%arg0: i32) -> (i32, i32, i32) {
    %c0_i32 = arith.constant 0 : i32
    %c0_i32_0 = arith.constant 0 : i32
    %c0_i32_1 = arith.constant 0 : i32
    %c0_i32_2 = arith.constant 0 : i32
    return %c0_i32, %c0_i32_0, %c0_i32_1 : i32, i32, i32
  }
  func.func @transform_2(%arg0: i32) -> (i32, i32) {
    %c0_i32 = arith.constant 0 : i32
    %c0_i32_0 = arith.constant 0 : i32
    %c0_i32_1 = arith.constant 0 : i32
    return %c0_i32, %c0_i32_0 : i32, i32
  }
  func.func @transform_3(%arg0: i32) -> i32 {
    %c0_i32 = arith.constant 0 : i32
    %c0_i32_0 = arith.constant 0 : i32
    return %c0_i32 : i32
  }
  func.func @transform_4(%arg0: i32) -> (i32, i32) {
    %c0_i32 = arith.constant 0 : i32
    %c0_i32_0 = arith.constant 0 : i32
    return %arg0, %c0_i32 : i32, i32
  }
}

module attributes {stable_mosaic.version = 11 : i64} {
  func.func @_fused_diff_attn_kernel(%arg0: i32, %arg1: memref<8x16x8xbf16, #tpu.memory_space<vmem>>, %arg2: memref<10x8x16xbf16, #tpu.memory_space<vmem>>, %arg3: memref<1x16xf32, #tpu.memory_space<vmem>>, %arg4: memref<1xf32, #tpu.memory_space<smem>>, %arg5: memref<8x16x32xf32, #tpu.memory_space<vmem>>) attributes {dimension_semantics = [#tpu.dimension_semantics<parallel>], iteration_bounds = array<i64: 1>, scalar_prefetch = 0 : i64, scratch_operands = 0 : i64, tpu.core_type = #tpu.core_type<tc>, window_params = [{transform_indices = @transform_0, window_bounds = array<i64: 8, 16, 8>}, {pipeline_mode = #tpu.pipeline_mode<synchronous>, transform_indices = @transform_1, window_bounds = array<i64: 10, 8, 16>}, {pipeline_mode = #tpu.pipeline_mode<synchronous>, transform_indices = @transform_2, window_bounds = array<i64: 1, 16>}, {transform_indices = @transform_3, window_bounds = array<i64: 1>}, {transform_indices = @transform_4, window_bounds = array<i64: 8, 16, 32>}]} {
    %c0 = arith.constant 0 : index
    %c0_0 = arith.constant 0 : index
    %c0_1 = arith.constant 0 : index
    %0 = vector.load %arg1[%c0, %c0_0, %c0_1] : memref<8x16x8xbf16, #tpu.memory_space<vmem>>, vector<8x16x8xbf16>
    %1 = vector.shape_cast %0 : vector<8x16x8xbf16> to vector<128x8xbf16>
    %2 = vector.shape_cast %1 : vector<128x8xbf16> to vector<1x128x8xbf16>
    %3 = vector.broadcast %2 : vector<1x128x8xbf16> to vector<10x128x8xbf16>
    %c0_2 = arith.constant 0 : index
    %c0_3 = arith.constant 0 : index
    %c0_4 = arith.constant 0 : index
    %4 = vector.load %arg2[%c0_2, %c0_3, %c0_4] : memref<10x8x16xbf16, #tpu.memory_space<vmem>>, vector<10x8x16xbf16>
    "tpu.trace_start"() <{level = 10 : i32, message = "gnd,gdc->gnc"}> : () -> ()
    %cst = arith.constant dense<0.000000e+00> : vector<10x128x16xf32>
    %5 = tpu.matmul %3, %4, %cst {dimension_numbers = #tpu.dot_dimension_numbers<[2], [1], [1], [2], [0, 0, 0, 1, 1, 2], [0], [0]>} : vector<10x128x8xbf16>, vector<10x8x16xbf16>, vector<10x128x16xf32> -> vector<10x128x16xf32>
    "tpu.trace_stop"() : () -> ()
    %6 = vector.extract_strided_slice %5 {offsets = [0, 0, 0], sizes = [4, 128, 16], strides = [1, 1, 1]} : vector<10x128x16xf32> to vector<4x128x16xf32>
    %7 = vector.shape_cast %6 : vector<4x128x16xf32> to vector<32x16x16xf32>
    %8 = arith.truncf %7 : vector<32x16x16xf32> to vector<32x16x16xbf16>
    %9 = vector.extract_strided_slice %5 {offsets = [4, 0, 0], sizes = [4, 128, 16], strides = [1, 1, 1]} : vector<10x128x16xf32> to vector<4x128x16xf32>
    %10 = vector.shape_cast %9 : vector<4x128x16xf32> to vector<32x16x16xf32>
    %11 = arith.truncf %10 : vector<32x16x16xf32> to vector<32x16x16xbf16>
    %12 = vector.extract_strided_slice %5 {offsets = [8, 0, 0], sizes = [2, 128, 16], strides = [1, 1, 1]} : vector<10x128x16xf32> to vector<2x128x16xf32>
    %13 = vector.shape_cast %12 : vector<2x128x16xf32> to vector<16x16x16xf32>
    %14 = arith.truncf %13 : vector<16x16x16xf32> to vector<16x16x16xbf16>
    "tpu.trace_start"() <{level = 10 : i32, message = "gqc,gkc->gqk"}> : () -> ()
    %cst_5 = arith.constant dense<0.000000e+00> : vector<32x16x16xf32>
    %15 = tpu.matmul %8, %11, %cst_5 {dimension_numbers = #tpu.dot_dimension_numbers<[2], [2], [1], [1], [0, 0, 0, 1, 1, 1], [0], [0]>} : vector<32x16x16xbf16>, vector<32x16x16xbf16>, vector<32x16x16xf32> -> vector<32x16x16xf32>
    "tpu.trace_stop"() : () -> ()
    %cst_6 = arith.constant 0.353553385 : f32
    %16 = vector.broadcast %cst_6 : f32 to vector<32x16x16xf32>
    %17 = arith.mulf %15, %16 : vector<32x16x16xf32>
    %cst_7 = arith.constant dense<0xFF800000> : vector<32x16xf32>
    %18 = vector.multi_reduction <maximumf>, %17, %cst_7 [2] : vector<32x16x16xf32> to vector<32x16xf32>
    %19 = vector.shape_cast %18 : vector<32x16xf32> to vector<32x16x1xf32>
    %20 = vector.broadcast %19 : vector<32x16x1xf32> to vector<32x16x16xf32>
    %21 = arith.subf %17, %20 : vector<32x16x16xf32>
    %22 = math.exp %21 : vector<32x16x16xf32>
    %cst_8 = arith.constant dense<0.000000e+00> : vector<32x16xf32>
    %23 = vector.multi_reduction <add>, %22, %cst_8 [2] : vector<32x16x16xf32> to vector<32x16xf32>
    %24 = vector.shape_cast %23 : vector<32x16xf32> to vector<32x16x1xf32>
    %25 = tpu.reciprocal %24 {approx = true} : vector<32x16x1xf32> -> vector<32x16x1xf32>
    %26 = vector.broadcast %25 : vector<32x16x1xf32> to vector<32x16x16xf32>
    %27 = arith.mulf %22, %26 : vector<32x16x16xf32>
    %c0_9 = arith.constant 0 : index
    %28 = memref.load %arg4[%c0_9] : memref<1xf32, #tpu.memory_space<smem>>
    %29 = vector.extract_strided_slice %27 {offsets = [0, 0, 0], sizes = [16, 16, 16], strides = [1, 1, 1]} : vector<32x16x16xf32> to vector<16x16x16xf32>
    %30 = arith.truncf %29 : vector<16x16x16xf32> to vector<16x16x16xbf16>
    %31 = vector.extract_strided_slice %27 {offsets = [16, 0, 0], sizes = [16, 16, 16], strides = [1, 1, 1]} : vector<32x16x16xf32> to vector<16x16x16xf32>
    %32 = arith.truncf %31 : vector<16x16x16xf32> to vector<16x16x16xbf16>
    "tpu.trace_start"() <{level = 10 : i32, message = "gqk,gkc->gqc"}> : () -> ()
    %cst_10 = arith.constant dense<0.000000e+00> : vector<16x16x16xf32>
    %33 = tpu.matmul %30, %14, %cst_10 {dimension_numbers = #tpu.dot_dimension_numbers<[2], [1], [1], [2], [0, 0, 0, 1, 1, 2], [0], [0]>} : vector<16x16x16xbf16>, vector<16x16x16xbf16>, vector<16x16x16xf32> -> vector<16x16x16xf32>
    %cst_11 = arith.constant dense<0.000000e+00> : vector<16x16x16xf32>
    %34 = tpu.matmul %32, %14, %cst_11 {dimension_numbers = #tpu.dot_dimension_numbers<[2], [1], [1], [2], [0, 0, 0, 1, 1, 2], [0], [0]>} : vector<16x16x16xbf16>, vector<16x16x16xbf16>, vector<16x16x16xf32> -> vector<16x16x16xf32>
    "tpu.trace_stop"() : () -> ()
    %35 = vector.broadcast %28 : f32 to vector<16x16x16xf32>
    %36 = arith.mulf %35, %34 : vector<16x16x16xf32>
    %37 = arith.subf %33, %36 : vector<16x16x16xf32>
    %38 = arith.mulf %37, %37 : vector<16x16x16xf32>
    %cst_12 = arith.constant dense<0.000000e+00> : vector<16x16xf32>
    %39 = vector.multi_reduction <add>, %38, %cst_12 [2] : vector<16x16x16xf32> to vector<16x16xf32>
    %40 = vector.shape_cast %39 : vector<16x16xf32> to vector<16x16x1xf32>
    %cst_13 = arith.constant 1.600000e+01 : f32
    %41 = vector.broadcast %cst_13 : f32 to vector<16x16x1xf32>
    %42 = arith.divf %40, %41 : vector<16x16x1xf32>
    %cst_14 = arith.constant 9.99999974E-6 : f32
    %43 = vector.broadcast %cst_14 : f32 to vector<16x16x1xf32>
    %44 = arith.addf %42, %43 : vector<16x16x1xf32>
    %45 = math.rsqrt %44 : vector<16x16x1xf32>
    %46 = vector.broadcast %45 : vector<16x16x1xf32> to vector<16x16x16xf32>
    %47 = arith.mulf %37, %46 : vector<16x16x16xf32>
    %c0_15 = arith.constant 0 : index
    %c0_16 = arith.constant 0 : index
    %48 = vector.load %arg3[%c0_15, %c0_16] : memref<1x16xf32, #tpu.memory_space<vmem>>, vector<1x16xf32>
    %49 = vector.shape_cast %48 : vector<1x16xf32> to vector<1x1x16xf32>
    %50 = vector.broadcast %49 : vector<1x1x16xf32> to vector<16x16x16xf32>
    %51 = arith.mulf %47, %50 : vector<16x16x16xf32>
    %52 = vector.extract_strided_slice %51 {offsets = [0, 0, 0], sizes = [8, 16, 16], strides = [1, 1, 1]} : vector<16x16x16xf32> to vector<8x16x16xf32>
    %53 = vector.extract_strided_slice %51 {offsets = [8, 0, 0], sizes = [8, 16, 16], strides = [1, 1, 1]} : vector<16x16x16xf32> to vector<8x16x16xf32>
    %54 = tpu.concatenate %52, %53 in 2 : vector<8x16x16xf32>, vector<8x16x16xf32> -> vector<8x16x32xf32>
    %c0_17 = arith.constant 0 : index
    %c0_18 = arith.constant 0 : index
    %c0_19 = arith.constant 0 : index
    %55 = vector.load %arg5[%c0_17, %c0_18, %c0_19] : memref<8x16x32xf32, #tpu.memory_space<vmem>>, vector<8x16x32xf32>
    tpu.vector_store %arg5[%c0_17, %c0_18, %c0_19], %54 {strides = array<i32>} : memref<8x16x32xf32, #tpu.memory_space<vmem>>, vector<8x16x32xf32>,
    return
  }
  func.func @transform_0(%arg0: i32) -> (i32, i32, i32) {
    %c0_i32 = arith.constant 0 : i32
    %c0_i32_0 = arith.constant 0 : i32
    %c0_i32_1 = arith.constant 0 : i32
    return %arg0, %c0_i32, %c0_i32_0 : i32, i32, i32
  }
  func.func @transform_1(%arg0: i32) -> (i32, i32, i32) {
    %c0_i32 = arith.constant 0 : i32
    %c0_i32_0 = arith.constant 0 : i32
    %c0_i32_1 = arith.constant 0 : i32
    %c0_i32_2 = arith.constant 0 : i32
    return %c0_i32, %c0_i32_0, %c0_i32_1 : i32, i32, i32
  }
  func.func @transform_2(%arg0: i32) -> (i32, i32) {
    %c0_i32 = arith.constant 0 : i32
    %c0_i32_0 = arith.constant 0 : i32
    %c0_i32_1 = arith.constant 0 : i32
    return %c0_i32, %c0_i32_0 : i32, i32
  }
  func.func @transform_3(%arg0: i32) -> i32 {
    %c0_i32 = arith.constant 0 : i32
    %c0_i32_0 = arith.constant 0 : i32
    return %c0_i32 : i32
  }
  func.func @transform_4(%arg0: i32) -> (i32, i32, i32) {
    %c0_i32 = arith.constant 0 : i32
    %c0_i32_0 = arith.constant 0 : i32
    %c0_i32_1 = arith.constant 0 : i32
    return %arg0, %c0_i32, %c0_i32_0 : i32, i32, i32
  }
}

</mosaic_0001>

<bundles_post_ra>
// kernel: tpu_custom_call.1
= control target key start
LH: loop header
LB: loop body
LE: loop exit
PB: predicated region body
PF: predicated region fallthrough
CT: control target
= control target key end

     0   :  { %vm111_vm0 = vcmask 1043456   ;;  %vm86_vm1 = vcmask 64512   ;;  %s9285_s0 = inlined_call_operand.vmem [shape: bf16[8,16,8], index: 0, kind: input, shape index: {}]   ;;  %s9286_s1 = inlined_call_operand.vmem [shape: bf16[10,8,16], index: 1, kind: input, shape index: {}]   ;;  %s9287_s2 = inlined_call_operand.vmem [shape: f32[1,16], index: 2, kind: input, shape index: {}]   ;;  %s9288_s3 = inlined_call_operand.<no memory space> [shape: f32[1], index: 3, kind: input, shape index: {}]   ;;  %s9289_s4 = inlined_call_operand.hbm [shape: f32[8,512], index: 4, kind: output, shape index: {}]  }
   0x1   :  { %v36_v0 = vld [vmem:[%s9286_s1] sm:$0xf]  ;;  %v7053_v3 = vld [vmem:[%s9285_s0 + $0x8] sm:$0xff]   ;;  %v7058_v4 = vld [vmem:[%s9285_s0 + $0x10] sm:$0xff]  }
   0x2   :  { %v7044_v1 = vld [vmem:[%s9285_s0] sm:$0xff]   ;;  %6635 = vmatprep.subr.msk.bf16.mxu0 %vm111_vm0, %v36_v0  ;;  %v113_v2 = vsel %vm111_vm0, %v36_v0, 0  ;;  %v38_v5 = vld [vmem:[%s9286_s1 + $0x8] sm:$0xf]  ;;  %v7072_v6 = vld [vmem:[%s9285_s0 + $0x18] sm:$0xff]  }
   0x3   :  { %6072 = vmatpush3.bf16.msra.mxu0 %v113_v2  ;;  %6073 = vmatprep.mubr.msk.bf16.mxu0 %vm86_vm1, %v7044_v1  ;;  %v313_v7 = vsel %vm111_vm0, %v38_v5, 0  ;;  %v37_v8 = vld [vmem:[%s9286_s1 + $0x4] sm:$0xf]  ;;  %v39_v9 = vld [vmem:[%s9286_s1 + $0xc] sm:$0xf] }
   0x4   :  { %6091 = vmatprep.mubr.msk.bf16.mxu1 %vm86_vm1, %v7044_v1  ;;  %6637 = vmatprep.subr.msk.bf16.mxu0 %vm111_vm0, %v38_v5  ;;  %v7085_v10 = vld [vmem:[%s9285_s0 + $0x20] sm:$0xff]   ;;  %v213_v11 = vsel %vm111_vm0, %v37_v8, 0  ;;  %v40_v12 = vld [vmem:[%s9286_s1 + $0x10] sm:$0xf]  ;;  %v413_v13 = vsel %vm111_vm0, %v39_v9, 0 }
   0x5   :  { %6636 = vmatprep.subr.msk.bf16.mxu1 %vm111_vm0, %v37_v8 }
   0x6   :  { %6074 = vmatmul.mubr.msk.bf16.vlgmr.msra.gmra.mxu0 %vm86_vm1, %v7053_v3  ;;  %6090 = vmatpush3.bf16.msra.mxu1 %v213_v11 }
   0x7   :  { %6077 = vmatprep.mubr.msk.bf16.mxu0 %vm86_vm1, %v7058_v4  ;;  %6108 = vmatpush3.bf16.msra.mxu0 %v313_v7 }
   0x8   :  { %6639 = vmatprep.subr.msk.bf16.mxu0 %vm111_vm0, %v40_v12  ;;  %6638 = vmatprep.subr.msk.bf16.mxu1 %vm111_vm0, %v39_v9 }
   0x9   :  { %10 = vsyncpa [#allocation4], 0  ;;  %v41_v14 = vld [vmem:[%s9286_s1 + $0x14] sm:$0xf]  ;;  %6092 = vmatmul.mubr.msk.bf16.vlgmr.msra.gmra.mxu1 %vm86_vm1, %v7053_v3  ;;  %v7110_v15 = vld [vmem:[%s9285_s0 + $0x28] sm:$0xff]   ;;  %v513_v18 = vsel %vm111_vm0, %v40_v12, 0 }
   0xa   :  { %6095 = vmatprep.mubr.msk.bf16.mxu1 %vm86_vm1, %v7058_v4  ;;  %6126 = vmatpush3.bf16.msra.mxu1 %v413_v13  ;;  %v7115_v16 = vld [vmem:[%s9285_s0 + $0x30] sm:$0xff]   ;;  %v7128_v17 = vld [vmem:[%s9285_s0 + $0x38] sm:$0xff]   ;;  %v613_v20 = vsel %vm111_vm0, %v41_v14, 0  ;;  %v45_v24 = vld [vmem:[%s9286_s1 + $0x24] sm:$0xf]  ;;  %v9290_v28 = vmov 0.0  }
   0xb   :  { %6640 = vmatprep.subr.msk.bf16.mxu1 %vm111_vm0, %v41_v14  ;;  %v42_v19 = vld [vmem:[%s9286_s1 + $0x18] sm:$0xf]  ;;  %v43_v21 = vld [vmem:[%s9286_s1 + $0x1c] sm:$0xf]  ;;  %v1013_v25 = vsel %vm111_vm0, %v45_v24, 0  ;;  %vm7005_vm2 = vmmov 0  }
   0xc   :  { %v713_v22 = vsel %vm111_vm0, %v42_v19, 0  ;;  %v813_v23 = vsel %vm111_vm0, %v43_v21, 0  ;;  %v44_v26 = vld [vmem:[%s9286_s1 + $0x20] sm:$0xf]  ;;  %vm1192_vm3 = vcmask 130048   ;;  %s7006_s26 = smov 16  }
   0xd   :  { %v913_v27 = vsel %vm111_vm0, %v44_v26, 0  ;;  %s7010_s27 = smov 64   ;;  %s7011_s28 = smov 96   ;;  %vm5667_vm4 = vcmask 261120   ;;  %vm5669_vm5 = vcmask 523264   ;;  %vm5671_vm6 = vcmask 785408  }
   0xe   :  { %6078 = vmatmul.mubr.msk.bf16.gmra.mxu0 %vm86_vm1, %v7072_v6  ;;  %s7012_s29 = smov [#allocation3]  }
   0xf   :  { %6081 = vmatprep.mubr.msk.bf16.mxu0 %vm86_vm1, %v7085_v10  ;;  %s5692_s30 = sshll.u32 %s7012_s29, 4  ;;  %s5693_s30 = int_to_ptr.vmem [resolvable:$true] %s5692_s30 }
  0x10   :  { %s6982_s5 = scalar_lea.vmem %s5693_s30, 512  ;;  %p6987_p1 = scmp.lt.s32.totalorder %s5693_s30, %s5693_s30 }
  0x11   :  { %6096 = vmatmul.mubr.msk.bf16.gmra.mxu1 %vm86_vm1, %v7072_v6  ;;  %p6983_p0 = scmp.ne.s32.totalorder %s5693_s30, %s6982_s5  ;;  %p6988_p2 = scmp.lt.s32.totalorder %s6982_s5, %s6982_s5 }
  0x12   :  { %6099 = vmatprep.mubr.msk.bf16.mxu1 %vm86_vm1, %v7085_v10 }
  0x13   :  { %p6989_p3 = por %p6988_p2, %p6987_p1 }
  0x15   :  { %p6990_p4 = pnand %p6989_p3, %p6983_p0 }
  0x16   :  { %6082 = vmatmul.mubr.msk.bf16.gmra.mxu0 %vm86_vm1, %v7110_v15 }
  0x17   :  { %6085 = vmatprep.mubr.msk.bf16.mxu0 %vm86_vm1, %v7115_v16 }
  0x19   :  { %6100 = vmatmul.mubr.msk.bf16.gmra.mxu1 %vm86_vm1, %v7110_v15 }
  0x1a   :  { %6103 = vmatprep.mubr.msk.bf16.mxu1 %vm86_vm1, %v7115_v16 }
  0x1e   :  { %6086 = vmatmul.mubr.msk.bf16.gmra.mxu0 %vm86_vm1, %v7128_v17 }
  0x1f   :  { %6109 = vmatprep.mubr.msk.bf16.mxu0 %vm86_vm1, %v7044_v1 }
  0x21   :  { %6104 = vmatmul.mubr.msk.bf16.gmra.mxu1 %vm86_vm1, %v7128_v17 }
  0x22   :  { %6127 = vmatprep.mubr.msk.bf16.mxu1 %vm86_vm1, %v7044_v1 }
  0x26   :  { %6110 = vmatmul.mubr.msk.bf16.vlgmr.msra.gmra.mxu0 %vm86_vm1, %v7053_v3 }
  0x27   :  { %6113 = vmatprep.mubr.msk.bf16.mxu0 %vm86_vm1, %v7058_v4  ;;  %6144 = vmatpush3.bf16.msra.mxu0 %v513_v18 }
  0x28   :  { %6641 = vmatprep.subr.msk.bf16.mxu0 %vm111_vm0, %v42_v19 }
  0x29   :  { %6128 = vmatmul.mubr.msk.bf16.vlgmr.msra.gmra.mxu1 %vm86_vm1, %v7053_v3 }
  0x2a   :  { %6131 = vmatprep.mubr.msk.bf16.mxu1 %vm86_vm1, %v7058_v4  ;;  %6162 = vmatpush3.bf16.msra.mxu1 %v613_v20 }
  0x2b   :  { %6642 = vmatprep.subr.msk.bf16.mxu1 %vm111_vm0, %v43_v21 }
  0x2e   :  { %6114 = vmatmul.mubr.msk.bf16.gmra.mxu0 %vm86_vm1, %v7072_v6 }
  0x2f   :  { %6117 = vmatprep.mubr.msk.bf16.mxu0 %vm86_vm1, %v7085_v10 }
  0x31   :  { %6132 = vmatmul.mubr.msk.bf16.gmra.mxu1 %vm86_vm1, %v7072_v6 }
  0x32   :  { %6135 = vmatprep.mubr.msk.bf16.mxu1 %vm86_vm1, %v7085_v10 }
  0x36   :  { %6118 = vmatmul.mubr.msk.bf16.gmra.mxu0 %vm86_vm1, %v7110_v15 }
  0x37   :  { %6121 = vmatprep.mubr.msk.bf16.mxu0 %vm86_vm1, %v7115_v16 }
  0x39   :  { %6136 = vmatmul.mubr.msk.bf16.gmra.mxu1 %vm86_vm1, %v7110_v15 }
  0x3a   :  { %6139 = vmatprep.mubr.msk.bf16.mxu1 %vm86_vm1, %v7115_v16 }
  0x3e   :  { %6122 = vmatmul.mubr.msk.bf16.gmra.mxu0 %vm86_vm1, %v7128_v17 }
  0x3f   :  { %6145 = vmatprep.mubr.msk.bf16.mxu0 %vm86_vm1, %v7044_v1 }
  0x41   :  { %6140 = vmatmul.mubr.msk.bf16.gmra.mxu1 %vm86_vm1, %v7128_v17 }
  0x42   :  { %6163 = vmatprep.mubr.msk.bf16.mxu1 %vm86_vm1, %v7044_v1 }
  0x46   :  { %6146 = vmatmul.mubr.msk.bf16.vlgmr.msra.gmra.mxu0 %vm86_vm1, %v7053_v3 }
  0x47   :  { %6149 = vmatprep.mubr.msk.bf16.mxu0 %vm86_vm1, %v7058_v4  ;;  %6180 = vmatpush3.bf16.msra.mxu0 %v713_v22 }
  0x48   :  { %6643 = vmatprep.subr.msk.bf16.mxu0 %vm111_vm0, %v44_v26 }
  0x49   :  { %6164 = vmatmul.mubr.msk.bf16.vlgmr.msra.gmra.mxu1 %vm86_vm1, %v7053_v3 }
  0x4a   :  { %6167 = vmatprep.mubr.msk.bf16.mxu1 %vm86_vm1, %v7058_v4  ;;  %6198 = vmatpush3.bf16.msra.mxu1 %v813_v23 }
  0x4b   :  { %6644 = vmatprep.subr.msk.bf16.mxu1 %vm111_vm0, %v45_v24 }
  0x4e   :  { %6150 = vmatmul.mubr.msk.bf16.gmra.mxu0 %vm86_vm1, %v7072_v6 }
  0x4f   :  { %6153 = vmatprep.mubr.msk.bf16.mxu0 %vm86_vm1, %v7085_v10 }
  0x51   :  { %6168 = vmatmul.mubr.msk.bf16.gmra.mxu1 %vm86_vm1, %v7072_v6 }
  0x52   :  { %6171 = vmatprep.mubr.msk.bf16.mxu1 %vm86_vm1, %v7085_v10 }
  0x56   :  { %6154 = vmatmul.mubr.msk.bf16.gmra.mxu0 %vm86_vm1, %v7110_v15 }
  0x57   :  { %6157 = vmatprep.mubr.msk.bf16.mxu0 %vm86_vm1, %v7115_v16 }
  0x59   :  { %6172 = vmatmul.mubr.msk.bf16.gmra.mxu1 %vm86_vm1, %v7110_v15 }
  0x5a   :  { %6175 = vmatprep.mubr.msk.bf16.mxu1 %vm86_vm1, %v7115_v16 }
  0x5e   :  { %6158 = vmatmul.mubr.msk.bf16.gmra.mxu0 %vm86_vm1, %v7128_v17 }
  0x5f   :  { %6181 = vmatprep.mubr.msk.bf16.mxu0 %vm86_vm1, %v7044_v1 }
  0x61   :  { %6176 = vmatmul.mubr.msk.bf16.gmra.mxu1 %vm86_vm1, %v7128_v17 }
  0x62   :  { %6199 = vmatprep.mubr.msk.bf16.mxu1 %vm86_vm1, %v7044_v1 }
  0x66   :  { %6182 = vmatmul.mubr.msk.bf16.vlgmr.msra.gmra.mxu0 %vm86_vm1, %v7053_v3 }
  0x67   :  { %6185 = vmatprep.mubr.msk.bf16.mxu0 %vm86_vm1, %v7058_v4  ;;  %6216 = vmatpush3.bf16.msra.mxu0 %v913_v27 }
  0x68   :  { %6251 = vmatprep.subr.bf16.mxu0 %v9290_v28 }
  0x69   :  { %6200 = vmatmul.mubr.msk.bf16.vlgmr.msra.gmra.mxu1 %vm86_vm1, %v7053_v3 }
  0x6a   :  { %6203 = vmatprep.mubr.msk.bf16.mxu1 %vm86_vm1, %v7058_v4  ;;  %6234 = vmatpush3.bf16.msra.mxu1 %v1013_v25 }
  0x6b   :  { %6257 = vmatprep.subr.bf16.mxu1 %v9290_v28 }
  0x6e   :  { %6186 = vmatmul.mubr.msk.bf16.gmra.mxu0 %vm86_vm1, %v7072_v6 }
  0x6f   :  { %6189 = vmatprep.mubr.msk.bf16.mxu0 %vm86_vm1, %v7085_v10 }
  0x71   :  { %6204 = vmatmul.mubr.msk.bf16.gmra.mxu1 %vm86_vm1, %v7072_v6 }
  0x72   :  { %6207 = vmatprep.mubr.msk.bf16.mxu1 %vm86_vm1, %v7085_v10 }
  0x76   :  { %6190 = vmatmul.mubr.msk.bf16.gmra.mxu0 %vm86_vm1, %v7110_v15 }
  0x77   :  { %6193 = vmatprep.mubr.msk.bf16.mxu0 %vm86_vm1, %v7115_v16 }
  0x79   :  { %6208 = vmatmul.mubr.msk.bf16.gmra.mxu1 %vm86_vm1, %v7110_v15 }
  0x7a   :  { %6211 = vmatprep.mubr.msk.bf16.mxu1 %vm86_vm1, %v7115_v16 }
  0x7e   :  { %6194 = vmatmul.mubr.msk.bf16.gmra.mxu0 %vm86_vm1, %v7128_v17 }
  0x7f   :  { %6217 = vmatprep.mubr.msk.bf16.mxu0 %vm86_vm1, %v7044_v1 }
  0x81   :  { %6212 = vmatmul.mubr.msk.bf16.gmra.mxu1 %vm86_vm1, %v7128_v17 }
  0x82   :  { %6235 = vmatprep.mubr.msk.bf16.mxu1 %vm86_vm1, %v7044_v1 }
  0x86   :  { %6218 = vmatmul.mubr.msk.bf16.vlgmr.msra.gmra.mxu0 %vm86_vm1, %v7053_v3 }
  0x87   :  { %6221 = vmatprep.mubr.msk.bf16.mxu0 %vm86_vm1, %v7058_v4 }
  0x89   :  { %6236 = vmatmul.mubr.msk.bf16.vlgmr.msra.gmra.mxu1 %vm86_vm1, %v7053_v3 }
  0x8a   :  { %6239 = vmatprep.mubr.msk.bf16.mxu1 %vm86_vm1, %v7058_v4 }
  0x8e   :  { %6222 = vmatmul.mubr.msk.bf16.gmra.mxu0 %vm86_vm1, %v7072_v6 }
  0x8f   :  { %6225 = vmatprep.mubr.msk.bf16.mxu0 %vm86_vm1, %v7085_v10 }
  0x91   :  { %6240 = vmatmul.mubr.msk.bf16.gmra.mxu1 %vm86_vm1, %v7072_v6 }
  0x92   :  { %6243 = vmatprep.mubr.msk.bf16.mxu1 %vm86_vm1, %v7085_v10 }
  0x96   :  { %6226 = vmatmul.mubr.msk.bf16.gmra.mxu0 %vm86_vm1, %v7110_v15 }
  0x97   :  { %6229 = vmatprep.mubr.msk.bf16.mxu0 %vm86_vm1, %v7115_v16 }
  0x99   :  { %6244 = vmatmul.mubr.msk.bf16.gmra.mxu1 %vm86_vm1, %v7110_v15 }
  0x9a   :  { %6247 = vmatprep.mubr.msk.bf16.mxu1 %vm86_vm1, %v7115_v16 }
  0x9e   :  { %6230 = vmatmul.mubr.msk.bf16.gmra.mxu0 %vm86_vm1, %v7128_v17 }
  0x9f   :  { %6253 = vmatprep.mubr.msk.bf16.mxu0 %vm7005_vm2, %v9290_v28 }
  0xa1   :  { %6248 = vmatmul.mubr.msk.bf16.gmra.mxu1 %vm86_vm1, %v7128_v17 }
  0xa2   :  { %6259 = vmatprep.mubr.msk.bf16.mxu1 %vm7005_vm2, %v9290_v28 }
  0xc6   :  { %v7294_v29 = vpop.f32.mrf.mxu0 }
  0xc8   :  { %v7296_v30 = vpop.f32.mrf.mxu0 }
  0xc9   :  { %v7306_v35 = vpop.f32.mrf.mxu1 }
  0xca   :  { %v7298_v31 = vpop.f32.mrf.mxu0 }
  0xcb   :  { %v7310_v37 = vpop.f32.mrf.mxu1 }
  0xcc   :  { %v7302_v33 = vpop.f32.mrf.mxu0 }
  0xcd   :  { %v7316_v40 = vpop.f32.mrf.mxu1 }
  0xce   :  { %v7304_v34 = vpop.f32.mrf.mxu0 }
  0xcf   :  { %v7322_v43 = vpop.f32.mrf.mxu1 }
  0xd0   :  { %v7308_v36 = vpop.f32.mrf.mxu0 }
  0xd1   :  { %v7326_v45 = vpop.f32.mrf.mxu1 }
  0xd2   :  { %v7312_v38 = vpop.f32.mrf.mxu0 }
  0xd3   :  { %v7330_v47 = vpop.f32.mrf.mxu1 }
  0xd4   :  { %v7318_v41 = vpop.f32.mrf.mxu0 }
  0xd5   :  { %v7336_v50 = vpop.f32.mrf.mxu1 }
  0xd6   :  { %v7324_v44 = vpop.f32.mrf.mxu0 }
  0xd7   :  { %v7342_v53 = vpop.f32.mrf.mxu1 }
  0xd8   :  { %v7328_v46 = vpop.f32.mrf.mxu0 }
  0xd9   :  { %v7346_v55 = vpop.f32.mrf.mxu1 }
  0xda   :  { %v7332_v48 = vpop.f32.mrf.mxu0 }
  0xdb   :  { %v7350_v57 = vpop.f32.mrf.mxu1 }
  0xdc   :  { %v7338_v51 = vpop.f32.mrf.mxu0 }
  0xdd   :  { %v7356_v60 = vpop.f32.mrf.mxu1 }
  0xde   :  { %v7344_v54 = vpop.f32.mrf.mxu0 }
  0xdf   :  { %v7362_v63 = vpop.f32.mrf.mxu1 }
  0xe0   :  { %v7348_v56 = vpop.f32.mrf.mxu0 }
  0xe1   :  { %v7366_v1 = vpop.f32.mrf.mxu1 }
  0xe2   :  { %v7352_v58 = vpop.f32.mrf.mxu0 }
  0xe3   :  { %v7370_v3 = vpop.f32.mrf.mxu1 }
  0xe4   :  { %v7358_v61 = vpop.f32.mrf.mxu0 }
  0xe5   :  { %v7376_v6 = vpop.f32.mrf.mxu1 }
  0xe6   :  { %v7364_v0 = vpop.f32.mrf.mxu0 }
  0xe7   :  { %v7382_v9 = vpop.f32.mrf.mxu1 }
  0xe8   :  { %v7368_v2 = vpop.f32.mrf.mxu0 }
  0xe9   :  { %v7386_v11 = vpop.f32.mrf.mxu1 }
  0xea   :  { %v7372_v4 = vpop.f32.mrf.mxu0  ;;  %9337 = vst [vmem:[#allocation6_spill] sm:$0xff] %v7386_v11 }
  0xeb   :  { %v7390_v13 = vpop.f32.mrf.mxu1 }
  0xec   :  { %v7378_v7 = vpop.f32.mrf.mxu0 }
  0xed   :  { %v7396_v16 = vpop.f32.mrf.mxu1 }
  0xee   :  { %v7384_v10 = vpop.f32.mrf.mxu0  ;;  %9338 = vst [vmem:[#allocation7_spill] sm:$0xff] %v7396_v16 }
  0xef   :  { %v7402_v19 = vpop.f32.mrf.mxu1 }
  0xf0   :  { %v7388_v12 = vpop.f32.mrf.mxu0  ;;  %9339 = vst [vmem:[#allocation8_spill] sm:$0xff] %v7402_v19  ;;  %v9352_v19 = vmov 0.0  }
  0xf1   :  { %v7406_v21 = vpop.f32.mrf.mxu1 }
  0xf2   :  { %v7392_v14 = vpop.f32.mrf.mxu0  ;;  %9340 = vst [vmem:[#allocation9_spill] sm:$0xff] %v7406_v21 }
  0xf3   :  { %v7410_v23 = vpop.f32.mrf.mxu1 }
  0xf4   :  { %v7398_v17 = vpop.f32.mrf.mxu0  ;;  %9341 = vst [vmem:[#allocation10_spill] sm:$0xff] %v7410_v23 }
  0xf5   :  { %v7416_v26 = vpop.f32.mrf.mxu1 }
  0xf6   :  { %v7404_v20 = vpop.f32.mrf.mxu0  ;;  %9342 = vst [vmem:[#allocation11_spill] sm:$0xff] %v7416_v26 }
  0xf7   :  { %v7422_v15 = vpop.f32.mrf.mxu1 }
  0xf8   :  { %v7408_v22 = vpop.f32.mrf.mxu0  ;;  %9343 = vst [vmem:[#allocation12_spill] sm:$0xff] %v7422_v15 }
  0xf9   :  { %v7426_v8 = vpop.f32.mrf.mxu1 }
  0xfa   :  { %v7412_v24 = vpop.f32.mrf.mxu0  ;;  %9344 = vst [vmem:[#allocation13_spill] sm:$0xff] %v7426_v8 }
  0xfb   :  { %v7430_v52 = vpop.f32.mrf.mxu1 }
  0xfc   :  { %v7418_v27 = vpop.f32.mrf.mxu0  ;;  %9345 = vst [vmem:[#allocation14_spill] sm:$0xff] %v7430_v52 }
  0xfd   :  { %v7436_v59 = vpop.f32.mrf.mxu1 }
  0xfe   :  { %v7424_v5 = vpop.f32.mrf.mxu0  ;;  %9346 = vst [vmem:[#allocation15_spill] sm:$0xff] %v7436_v59 }
  0xff   :  { %v7442_v39 = vpop.f32.mrf.mxu1 }
 0x100   :  { %v7428_v62 = vpop.f32.mrf.mxu0  ;;  %9347 = vst [vmem:[#allocation16_spill] sm:$0xff] %v7442_v39 }
 0x101   :  { %v7444_v28 = vpop.f32.mrf.mxu1 }
 0x102   :  { %v7432_v42 = vpop.f32.mrf.mxu0  ;;  %9348 = vst [vmem:[#allocation17_spill] sm:$0xff] %v7444_v28 }
 0x103   :  { %v7446_v26 = vpop.f32.mrf.mxu1 }
 0x104   :  { %v7438_v49 = vpop.f32.mrf.mxu0  ;;  %9349 = vst [vmem:[#allocation18_spill] sm:$0xff] %v7446_v26 }
 0x105   :  { %v7448_v23 = vpop.f32.mrf.mxu1 }
 0x106   :  { %v6147_v32 = vpop.f32.mrf.mxu0  ;;  %9350 = vst [vmem:[#allocation19_spill] sm:$0xff] %v7448_v23  ;;  %v9353_v23 = vpack.c.bf16 %v7298_v31, %v7294_v29 }
 0x107   :  { %v7453_v8 = vpop.f32.mrf.mxu1 }
 0x108   :  { %v549_v21 = vpop.f32.mrf.mxu0  ;;  %9351 = vst [vmem:[#allocation20_spill] sm:$0xff] %v7453_v8 }
 0x109   :  { %v7457_v26 = vpop.f32.mrf.mxu1 }
 0x10a   :  { %v6148_v52 = vpop.f32.mrf.mxu0 }
 0x10b   :  { %v1145_v15 = vpack.c.bf16 %v6148_v52, %v6147_v32  ;;  %v7460_v52 = vpop.f32.mrf.mxu1 }
 0x10c   :  { %v552_v25 = vpop.f32.mrf.mxu0 }
 0x10d   :  { %v1244_v16 = vsel %vm1192_vm3, %v1145_v15, 0  ;;  %v1144_v18 = vpack.c.bf16 %v552_v25, %v549_v21  ;;  %v7462_v15 = vpop.f32.mrf.mxu1 }
 0x10e   :  { %v6151_v59 = vpop.f32.mrf.mxu0  ;;  %6258 = vmatpush3.bf16.xpose.msra.mxu1 %v1244_v16  ;;  %v1112_v16 = vpack.c.bf16 %v7302_v33, %v7296_v30 }
 0x10f   :  { %v1197_v39 = vsel %vm1192_vm3, %v1144_v18, 0  ;;  %6269 = vmatprep.subr.bf16.mxu1 %v9352_v19 }
 0x110   :  { %v565_v32 = vpop.f32.mrf.mxu0  ;;  %6252 = vmatpush3.bf16.xpose.msra.mxu0 %v1197_v39  ;;  %v7471_v39 = vpop.f32.mrf.mxu1 }
 0x111   :  { %6263 = vmatprep.subr.bf16.mxu0 %v9352_v19 }
 0x112   :  { %v6152_v11 = vpop.f32.mrf.mxu0 }
 0x113   :  { %v1147_v28 = vpack.c.bf16 %v6152_v11, %v6151_v59 }
 0x114   :  { %v568_v21 = vpop.f32.mrf.mxu0 }
 0x115   :  { %v1338_v18 = vsel %vm1192_vm3, %v1147_v28, 0  ;;  %v1146_v25 = vpack.c.bf16 %v568_v21, %v565_v32  ;;  %6260 = vmatmul.mubr.msk.bf16.vlgmr.msra.gmra.mxu1 %vm1192_vm3, %v9353_v23  ;;  %v7478_v28 = vpop.f32.mrf.mxu1  ;;  %v1114_v32 = vpack.c.bf16 %v7318_v41, %v7308_v36 }
 0x116   :  { %v6155_v8 = vpop.f32.mrf.mxu0  ;;  %6270 = vmatpush3.bf16.xpose.msra.mxu1 %v1338_v18  ;;  %6271 = vmatprep.mubr.msk.bf16.mxu1 %vm7005_vm2, %v9352_v19  ;;  %v9354_v18 = vpack.c.bf16 %v7312_v38, %v7304_v34 }
 0x117   :  { %6254 = vmatmul.mubr.msk.bf16.vlgmr.msra.gmra.mxu0 %vm1192_vm3, %v1112_v16  ;;  %v1291_v59 = vsel %vm1192_vm3, %v1146_v25, 0  ;;  %6281 = vmatprep.subr.bf16.mxu1 %v9352_v19  ;;  %v7483_v29 = vpop.f32.mrf.mxu1 }
 0x118   :  { %v581_v30 = vpop.f32.mrf.mxu0  ;;  %6264 = vmatpush3.bf16.xpose.msra.mxu0 %v1291_v59  ;;  %6265 = vmatprep.mubr.msk.bf16.mxu0 %vm7005_vm2, %v9352_v19 }
 0x119   :  { %6275 = vmatprep.subr.bf16.mxu0 %v9352_v19  ;;  %v7485_v11 = vpop.f32.mrf.mxu1 }
 0x11a   :  { %v6156_v31 = vpop.f32.mrf.mxu0 }
 0x11b   :  { %v1149_v33 = vpack.c.bf16 %v6156_v31, %v6155_v8  ;;  %v7494_v25 = vpop.f32.mrf.mxu1 }
 0x11c   :  { %v584_v23 = vpop.f32.mrf.mxu0 }
 0x11d   :  { %v1432_v21 = vsel %vm1192_vm3, %v1149_v33, 0  ;;  %v1148_v16 = vpack.c.bf16 %v584_v23, %v581_v30  ;;  %6272 = vmatmul.mubr.msk.bf16.vlgmr.msra.gmra.mxu1 %vm1192_vm3, %v9354_v18  ;;  %v7501_v36 = vpop.f32.mrf.mxu1  ;;  %v1116_v23 = vpack.c.bf16 %v7338_v51, %v7328_v46 }
 0x11e   :  { %v6159_v59 = vpop.f32.mrf.mxu0  ;;  %6282 = vmatpush3.bf16.xpose.msra.mxu1 %v1432_v21  ;;  %6283 = vmatprep.mubr.msk.bf16.mxu1 %vm7005_vm2, %v9352_v19 }
 0x11f   :  { %6266 = vmatmul.mubr.msk.bf16.vlgmr.msra.gmra.mxu0 %vm1192_vm3, %v1114_v32  ;;  %v1385_v8 = vsel %vm1192_vm3, %v1148_v16, 0  ;;  %6293 = vmatprep.subr.bf16.mxu1 %v9352_v19  ;;  %v7506_v34 = vpop.f32.mrf.mxu1  ;;  %v9355_v16 = vpack.c.bf16 %v7332_v48, %v7324_v44  ;;  %v1153_v48 = vpack.c.bf16 %v7462_v15, %v7457_v26  ;;  %v9356_v26 = vpack.c.bf16 %v7352_v58, %v7344_v54 }
 0x120   :  { %v597_v41 = vpop.f32.mrf.mxu0  ;;  %6276 = vmatpush3.bf16.xpose.msra.mxu0 %v1385_v8  ;;  %6277 = vmatprep.mubr.msk.bf16.mxu0 %vm7005_vm2, %v9352_v19  ;;  %v1155_v58 = vpack.c.bf16 %v7485_v11, %v7478_v28  ;;  %v9357_v28 = vpack.c.bf16 %v7316_v40, %v7306_v35 }
 0x121   :  { %6287 = vmatprep.subr.bf16.mxu0 %v9352_v19  ;;  %v7508_v31 = vpop.f32.mrf.mxu1 }
 0x122   :  { %v6160_v38 = vpop.f32.mrf.mxu0  ;;  %v1157_v40 = vpack.c.bf16 %v7508_v31, %v7501_v36  ;;  %v9358_v36 = vpack.c.bf16 %v7336_v50, %v7326_v45 }
 0x123   :  { %v1151_v30 = vpack.c.bf16 %v6160_v38, %v6159_v59  ;;  %v7517_v18 = vpop.f32.mrf.mxu1  ;;  %v1152_v38 = vpack.c.bf16 %v7471_v39, %v7460_v52 }
 0x124   :  { %v600_v33 = vpop.f32.mrf.mxu0 }
 0x125   :  { %v1526_v32 = vsel %vm1192_vm3, %v1151_v30, 0  ;;  %v1150_v21 = vpack.c.bf16 %v600_v33, %v597_v41  ;;  %6284 = vmatmul.mubr.msk.bf16.vlgmr.msra.gmra.mxu1 %vm1192_vm3, %v9355_v16  ;;  %v7526_v51 = vpop.f32.mrf.mxu1  ;;  %v1573_v39 = vsel %vm1192_vm3, %v1152_v38, 0  ;;  %v1154_v16 = vpack.c.bf16 %v7494_v25, %v7483_v29 }
 0x126   :  { %6294 = vmatpush3.bf16.xpose.msra.mxu1 %v1526_v32  ;;  %6295 = vmatprep.mubr.msk.bf16.mxu1 %vm7005_vm2, %v9352_v19  ;;  %v7521_v59 = vpop.f32.mrf.mxu0  ;;  %v1620_v32 = vsel %vm1192_vm3, %v1153_v48, 0  ;;  %v1120_v38 = vpack.c.bf16 %v7322_v43, %v7310_v37 }
 0x127   :  { %6278 = vmatmul.mubr.msk.bf16.vlgmr.msra.gmra.mxu0 %vm1192_vm3, %v1116_v23  ;;  %v1479_v46 = vsel %vm1192_vm3, %v1150_v21, 0  ;;  %6305 = vmatprep.subr.bf16.mxu1 %v9352_v19  ;;  %v7535_v8 = vpop.f32.mrf.mxu1  ;;  %v1118_v23 = vpack.c.bf16 %v7358_v61, %v7348_v56  ;;  %v1667_v25 = vsel %vm1192_vm3, %v1154_v16, 0  ;;  %v1122_v16 = vpack.c.bf16 %v7342_v53, %v7330_v47 }
 0x128   :  { %6288 = vmatpush3.bf16.xpose.msra.mxu0 %v1479_v46  ;;  %6289 = vmatprep.mubr.msk.bf16.mxu0 %vm7005_vm2, %v9352_v19  ;;  %v7530_v44 = vpop.f32.mrf.mxu0 }
 0x129   :  { %6299 = vmatprep.subr.bf16.mxu0 %v9352_v19  ;;  %v7541_v30 = vpop.f32.mrf.mxu1 }
 0x12a   :  { %v7537_v41 = vpop.f32.mrf.mxu0  ;;  %v1159_v50 = vpack.c.bf16 %v7541_v30, %v7526_v51  ;;  %v9359_v51 = vpack.c.bf16 %v7356_v60, %v7346_v55 }
 0x12b   :  { %v7552_v15 = vpop.f32.mrf.mxu1  ;;  %v1161_v60 = vpack.c.bf16 %v7537_v41, %v7521_v59  ;;  %v9360_v59 = vpack.c.bf16 %v7376_v6, %v7366_v1 }
 0x12c   :  { %v7543_v33 = vpop.f32.mrf.mxu0 }
 0x12d   :  { %6296 = vmatmul.mubr.msk.bf16.vlgmr.msra.gmra.mxu1 %vm1192_vm3, %v9356_v26  ;;  %v7561_v56 = vpop.f32.mrf.mxu1  ;;  %v1156_v26 = vpack.c.bf16 %v7517_v18, %v7506_v34 }
 0x12e   :  { %6306 = vmatpush3.bf16.xpose.msra.mxu1 %v1620_v32  ;;  %6307 = vmatprep.mubr.msk.bf16.mxu1 %vm7005_vm2, %v9352_v19  ;;  %v7556_v52 = vpop.f32.mrf.mxu0 }
 0x12f   :  { %6290 = vmatmul.mubr.msk.bf16.vlgmr.msra.gmra.mxu0 %vm1192_vm3, %v1118_v23  ;;  %6317 = vmatprep.subr.bf16.mxu1 %v9352_v19  ;;  %v7570_v61 = vpop.f32.mrf.mxu1  ;;  %v1714_v23 = vsel %vm1192_vm3, %v1155_v58, 0  ;;  %v1761_v18 = vsel %vm1192_vm3, %v1156_v26, 0  ;;  %v1124_v26 = vpack.c.bf16 %v7362_v63, %v7350_v57 }
 0x130   :  { %6300 = vmatpush3.bf16.xpose.msra.mxu0 %v1573_v39  ;;  %6301 = vmatprep.mubr.msk.bf16.mxu0 %vm7005_vm2, %v9352_v19  ;;  %v7565_v54 = vpop.f32.mrf.mxu0 }
 0x131   :  { %6311 = vmatprep.subr.bf16.mxu0 %v9352_v19  ;;  %v7576_v46 = vpop.f32.mrf.mxu1 }
 0x132   :  { %v7572_v21 = vpop.f32.mrf.mxu0 }
 0x133   :  { %v7587_v11 = vpop.f32.mrf.mxu1  ;;  %v1163_v6 = vpack.c.bf16 %v7572_v21, %v7556_v52  ;;  %v9366_v21 = vpack.c.bf16 %v7372_v4, %v7364_v0 }
 0x134   :  { %v7578_v48 = vpop.f32.mrf.mxu0 }
 0x135   :  { %6308 = vmatmul.mubr.msk.bf16.vlgmr.msra.gmra.mxu1 %vm1192_vm3, %v9357_v28  ;;  %v7596_v37 = vpop.f32.mrf.mxu1  ;;  %v1158_v28 = vpack.c.bf16 %v7552_v15, %v7535_v8  ;;  %v2090_v52 = vsel %vm1192_vm3, %v1163_v6, 0 }
 0x136   :  { %6318 = vmatpush3.bf16.xpose.msra.mxu1 %v1714_v23  ;;  %6319 = vmatprep.mubr.msk.bf16.mxu1 %vm7005_vm2, %v9352_v19  ;;  %v7591_v29 = vpop.f32.mrf.mxu0 }
 0x137   :  { %6302 = vmatmul.mubr.msk.bf16.vlgmr.msra.gmra.mxu0 %vm1192_vm3, %v1120_v38  ;;  %6329 = vmatprep.subr.bf16.mxu1 %v9352_v19  ;;  %v7605_v43 = vpop.f32.mrf.mxu1  ;;  %v1808_v38 = vsel %vm1192_vm3, %v1157_v40, 0  ;;  %v1855_v15 = vsel %vm1192_vm3, %v1158_v28, 0  ;;  %v1126_v28 = vpack.c.bf16 %v7382_v9, %v7370_v3 }
 0x138   :  { %6312 = vmatpush3.bf16.xpose.msra.mxu0 %v1667_v25  ;;  %6313 = vmatprep.mubr.msk.bf16.mxu0 %vm7005_vm2, %v9352_v19  ;;  %v7600_v35 = vpop.f32.mrf.mxu0 }
 0x139   :  { %6323 = vmatprep.subr.bf16.mxu0 %v9352_v19  ;;  %v7611_v39 = vpop.f32.mrf.mxu1 }
 0x13a   :  { %v7607_v32 = vpop.f32.mrf.mxu0 }
 0x13b   :  { %v7622_v31 = vpop.f32.mrf.mxu1  ;;  %v1165_v4 = vpack.c.bf16 %v7607_v32, %v7591_v29  ;;  %v9373_v32 = vpack.c.bf16 %v7392_v14, %v7384_v10 }
 0x13c   :  { %v7613_v58 = vpop.f32.mrf.mxu0 }
 0x13d   :  { %6320 = vmatmul.mubr.msk.bf16.vlgmr.msra.gmra.mxu1 %vm1192_vm3, %v9358_v36  ;;  %v7631_v47 = vpop.f32.mrf.mxu1  ;;  %v1160_v36 = vpack.c.bf16 %v7543_v33, %v7530_v44  ;;  %v2184_v29 = vsel %vm1192_vm3, %v1165_v4, 0  ;;  %v1132_v4 = vpack.c.bf16 %v7418_v27, %v7408_v22  ;;  %v1168_v27 = vpack.c.bf16 %v7587_v11, %v7570_v61  ;;  %v9386_v11 = vld [vmem:[#allocation6_spill] sm:$0xff] }
 0x13e   :  { %6330 = vmatpush3.bf16.xpose.msra.mxu1 %v1808_v38  ;;  %6331 = vmatprep.mubr.msk.bf16.mxu1 %vm7005_vm2, %v9352_v19  ;;  %v7626_v34 = vpop.f32.mrf.mxu0 }
 0x13f   :  { %6314 = vmatmul.mubr.msk.bf16.vlgmr.msra.gmra.mxu0 %vm1192_vm3, %v1122_v16  ;;  %6341 = vmatprep.subr.bf16.mxu1 %v9352_v19  ;;  %v7640_v53 = vpop.f32.mrf.mxu1  ;;  %v1902_v16 = vsel %vm1192_vm3, %v1159_v50, 0  ;;  %v1949_v33 = vsel %vm1192_vm3, %v1160_v36, 0 }
 0x140   :  { %6324 = vmatpush3.bf16.xpose.msra.mxu0 %v1761_v18  ;;  %6325 = vmatprep.mubr.msk.bf16.mxu0 %vm7005_vm2, %v9352_v19  ;;  %v7635_v45 = vpop.f32.mrf.mxu0 }
 0x141   :  { %6335 = vmatprep.subr.bf16.mxu0 %v9352_v19  ;;  %v7646_v25 = vpop.f32.mrf.mxu1 }
 0x142   :  { %v7642_v23 = vpop.f32.mrf.mxu0 }
 0x143   :  { %v7657_v30 = vpop.f32.mrf.mxu1  ;;  %v1167_v14 = vpack.c.bf16 %v7642_v23, %v7626_v34  ;;  %v9379_v34 = vpack.c.bf16 %v7412_v24, %v7404_v20  ;;  %v1169_v20 = vpack.c.bf16 %v7576_v46, %v7561_v56  ;;  %v2325_v56 = vsel %vm1192_vm3, %v1168_v27, 0  ;;  %v9385_v46 = vld [vmem:[#allocation7_spill] sm:$0xff] }
 0x144   :  { %v7648_v40 = vpop.f32.mrf.mxu0  ;;  %v9402_v27 = vld [vmem:[#allocation19_spill] sm:$0xff] }
 0x145   :  { %6332 = vmatmul.mubr.msk.bf16.vlgmr.msra.gmra.mxu1 %vm1192_vm3, %v9359_v51  ;;  %v7666_v57 = vpop.f32.mrf.mxu1  ;;  %v1162_v51 = vpack.c.bf16 %v7578_v48, %v7565_v54 }
 0x146   :  { %6342 = vmatpush3.bf16.xpose.msra.mxu1 %v1902_v16  ;;  %6343 = vmatprep.mubr.msk.bf16.mxu1 %vm7005_vm2, %v9352_v19  ;;  %v7661_v8 = vpop.f32.mrf.mxu0 }
 0x147   :  { %6326 = vmatmul.mubr.msk.bf16.vlgmr.msra.gmra.mxu0 %vm1192_vm3, %v1124_v26  ;;  %6353 = vmatprep.subr.bf16.mxu1 %v9352_v19  ;;  %v7675_v63 = vpop.f32.mrf.mxu1  ;;  %v1996_v26 = vsel %vm1192_vm3, %v1161_v60, 0  ;;  %v2043_v48 = vsel %vm1192_vm3, %v1162_v51, 0 }
 0x148   :  { %6336 = vmatpush3.bf16.xpose.msra.mxu0 %v1855_v15  ;;  %6337 = vmatprep.mubr.msk.bf16.mxu0 %vm7005_vm2, %v9352_v19  ;;  %v7670_v55 = vpop.f32.mrf.mxu0 }
 0x149   :  { %6347 = vmatprep.subr.bf16.mxu0 %v9352_v19  ;;  %v7681_v18 = vpop.f32.mrf.mxu1 }
 0x14a   :  { %v7677_v38 = vpop.f32.mrf.mxu0 }
 0x14b   :  { %v7692_v41 = vpop.f32.mrf.mxu1 }
 0x14c   :  { %v7683_v50 = vpop.f32.mrf.mxu0 }
 0x14d   :  { %6344 = vmatmul.mubr.msk.bf16.vlgmr.msra.gmra.mxu1 %vm1192_vm3, %v9360_v59  ;;  %v6237_v3 = vpop.f32.mrf.mxu1 }
 0x14e   :  { %6354 = vmatpush3.bf16.xpose.msra.mxu1 %v1996_v26  ;;  %6355 = vmatprep.mubr.msk.bf16.mxu1 %vm7005_vm2, %v9352_v19  ;;  %v6223_v44 = vpop.f32.mrf.mxu0  ;;  %v1128_v26 = vpack.c.bf16 %v7378_v7, %v7368_v2 }
 0x14f   :  { %6338 = vmatmul.mubr.msk.bf16.vlgmr.msra.gmra.mxu0 %vm1192_vm3, %v1126_v28  ;;  %6365 = vmatprep.subr.bf16.mxu1 %v9352_v19  ;;  %v7706_v9 = vpop.f32.mrf.mxu1 }
 0x150   :  { %6348 = vmatpush3.bf16.xpose.msra.mxu0 %v1949_v33  ;;  %6349 = vmatprep.mubr.msk.bf16.mxu0 %vm7005_vm2, %v9352_v19  ;;  %v7701_v1 = vpop.f32.mrf.mxu0  ;;  %9362 = vst [vmem:[#allocation22_spill] sm:$0xff] %v7706_v9  ;;  %v1164_v33 = vpack.c.bf16 %v7613_v58, %v7600_v35 }
 0x151   :  { %9361 = vst [vmem:[#allocation21_spill] sm:$0xff] %v7701_v1  ;;  %6359 = vmatprep.subr.bf16.mxu0 %v9352_v19  ;;  %v6238_v15 = vpop.f32.mrf.mxu1 }
 0x152   :  { %v6224_v16 = vpop.f32.mrf.mxu0  ;;  %v7712_v36 = vpack.c.bf16 %v6238_v15, %v6237_v3  ;;  %v1130_v15 = vpack.c.bf16 %v7398_v17, %v7388_v12  ;;  %v2137_v58 = vsel %vm1192_vm3, %v1164_v33, 0 }
 0x153   :  { %v7710_v60 = vpack.c.bf16 %v6224_v16, %v6223_v44  ;;  %v7723_v59 = vpop.f32.mrf.mxu1 }
 0x154   :  { %9364 = vst [vmem:[#allocation24_spill] sm:$0xff] %v7712_v36  ;;  %v7714_v28 = vpop.f32.mrf.mxu0  ;;  %9367 = vst [vmem:[#allocation26_spill] sm:$0xff] %v7723_v59 }
 0x155   :  { %9363 = vst [vmem:[#allocation23_spill] sm:$0xff] %v7710_v60  ;;  %9365 = vst [vmem:[#allocation25_spill] sm:$0xff] %v7714_v28  ;;  %6356 = vmatmul.mubr.msk.bf16.vlgmr.msra.gmra.mxu1 %vm1192_vm3, %v9366_v21  ;;  %v6241_v2 = vpop.f32.mrf.mxu1  ;;  %v1166_v21 = vpack.c.bf16 %v7648_v40, %v7635_v45 }
 0x156   :  { %6366 = vmatpush3.bf16.xpose.msra.mxu1 %v2090_v52  ;;  %6367 = vmatprep.mubr.msk.bf16.mxu1 %vm7005_vm2, %v9352_v19  ;;  %v6227_v54 = vpop.f32.mrf.mxu0 }
 0x157   :  { %6350 = vmatmul.mubr.msk.bf16.vlgmr.msra.gmra.mxu0 %vm1192_vm3, %v1128_v26  ;;  %6377 = vmatprep.subr.bf16.mxu1 %v9352_v19  ;;  %v7737_v7 = vpop.f32.mrf.mxu1  ;;  %v2231_v45 = vsel %vm1192_vm3, %v1166_v21, 0  ;;  %v9394_v21 = vld [vmem:[#allocation16_spill] sm:$0xff] }
 0x158   :  { %6360 = vmatpush3.bf16.xpose.msra.mxu0 %v2043_v48  ;;  %6361 = vmatprep.mubr.msk.bf16.mxu0 %vm7005_vm2, %v9352_v19  ;;  %v7732_v0 = vpop.f32.mrf.mxu0  ;;  %9369 = vst [vmem:[#allocation28_spill] sm:$0xff] %v7737_v7 }
 0x159   :  { %9368 = vst [vmem:[#allocation27_spill] sm:$0xff] %v7732_v0  ;;  %6371 = vmatprep.subr.bf16.mxu0 %v9352_v19  ;;  %v6242_v3 = vpop.f32.mrf.mxu1 }
 0x15a   :  { %v6228_v44 = vpop.f32.mrf.mxu0  ;;  %v7743_v16 = vpack.c.bf16 %v6242_v3, %v6241_v2  ;;  %v1134_v3 = vpack.c.bf16 %v7438_v49, %v7428_v62  ;;  %v1171_v49 = vpack.c.bf16 %v7611_v39, %v7596_v37  ;;  %v9384_v62 = vld [vmem:[#allocation8_spill] sm:$0xff]  ;;  %v9388_v39 = vld [vmem:[#allocation10_spill] sm:$0xff] }
 0x15b   :  { %v7741_v6 = vpack.c.bf16 %v6228_v44, %v6227_v54  ;;  %v7754_v26 = vpop.f32.mrf.mxu1  ;;  %v2278_v44 = vsel %vm1192_vm3, %v1167_v14, 0  ;;  %v9391_v14 = vld [vmem:[#allocation9_spill] sm:$0xff] }
 0x15c   :  { %9371 = vst [vmem:[#allocation30_spill] sm:$0xff] %v7743_v16  ;;  %v7745_v51 = vpop.f32.mrf.mxu0  ;;  %9374 = vst [vmem:[#allocation32_spill] sm:$0xff] %v7754_v26  ;;  %v2466_v61 = vsel %vm1192_vm3, %v1171_v49, 0 }
 0x15d   :  { %9370 = vst [vmem:[#allocation29_spill] sm:$0xff] %v7741_v6  ;;  %9372 = vst [vmem:[#allocation31_spill] sm:$0xff] %v7745_v51  ;;  %6368 = vmatmul.mubr.msk.bf16.vlgmr.msra.gmra.mxu1 %vm1192_vm3, %v9373_v32  ;;  %v6245_v12 = vpop.f32.mrf.mxu1  ;;  %v9387_v32 = vpack.c.bf16 %v9385_v46, %v9386_v11 }
 0x15e   :  { %6378 = vmatpush3.bf16.xpose.msra.mxu1 %v2184_v29  ;;  %6379 = vmatprep.mubr.msk.bf16.mxu1 %vm7005_vm2, %v9352_v19  ;;  %v6231_v35 = vpop.f32.mrf.mxu0  ;;  %v9383_v29 = vpack.c.bf16 %v7432_v42, %v7424_v5  ;;  %v1170_v42 = vpack.c.bf16 %v7622_v31, %v7605_v43  ;;  %v1136_v5 = vpack.c.bf16 %v9384_v62, %v7390_v13  ;;  %v9389_v31 = vld [vmem:[#allocation12_spill] sm:$0xff] }
 0x15f   :  { %6362 = vmatmul.mubr.msk.bf16.vlgmr.msra.gmra.mxu0 %vm1192_vm3, %v1130_v15  ;;  %6389 = vmatprep.subr.bf16.mxu1 %v9352_v19  ;;  %v7768_v17 = vpop.f32.mrf.mxu1  ;;  %v2372_v15 = vsel %vm1192_vm3, %v1169_v20, 0  ;;  %v1173_v13 = vpack.c.bf16 %v7646_v25, %v7631_v47  ;;  %v1172_v43 = vpack.c.bf16 %v7657_v30, %v7640_v53  ;;  %v1175_v53 = vpack.c.bf16 %v7681_v18, %v7666_v57  ;;  %v9393_v30 = vld [vmem:[#allocation14_spill] sm:$0xff] }
 0x160   :  { %6372 = vmatpush3.bf16.xpose.msra.mxu0 %v2137_v58  ;;  %6373 = vmatprep.mubr.msk.bf16.mxu0 %vm7005_vm2, %v9352_v19  ;;  %v7763_v10 = vpop.f32.mrf.mxu0  ;;  %9376 = vst [vmem:[#allocation34_spill] sm:$0xff] %v7768_v17  ;;  %v2419_v37 = vsel %vm1192_vm3, %v1170_v42, 0  ;;  %v1174_v25 = vpack.c.bf16 %v7692_v41, %v7675_v63  ;;  %v7875_v63 = vpack.c.bf16 %v7677_v38, %v7661_v8  ;;  %v9400_v41 = vld [vmem:[#allocation18_spill] sm:$0xff] }
 0x161   :  { %9375 = vst [vmem:[#allocation33_spill] sm:$0xff] %v7763_v10  ;;  %6383 = vmatprep.subr.bf16.mxu0 %v9352_v19  ;;  %v6246_v54 = vpop.f32.mrf.mxu1  ;;  %v2560_v58 = vsel %vm1192_vm3, %v1173_v13, 0  ;;  %v2513_v47 = vsel %vm1192_vm3, %v1172_v43, 0  ;;  %v7879_v18 = vpack.c.bf16 %v7683_v50, %v7670_v55 }
 0x162   :  { %v6232_v52 = vpop.f32.mrf.mxu0  ;;  %v7774_v2 = vpack.c.bf16 %v6246_v54, %v6245_v12  ;;  %v9390_v12 = vld [vmem:[#allocation11_spill] sm:$0xff]  ;;  %v1140_v54 = vpack.c.bf16 %v9394_v21, %v9393_v30  ;;  %v2607_v57 = vsel %vm1192_vm3, %v1174_v25, 0  ;;  %9398 = vst [vmem:[#allocation8_spill] sm:$0xff] %v7875_v63 }
 0x163   :  { %v7772_v48 = vpack.c.bf16 %v6232_v52, %v6231_v35  ;;  %v7783_v23 = vpop.f32.mrf.mxu1  ;;  %v1138_v35 = vpack.c.bf16 %v9389_v31, %v9388_v39  ;;  %v9392_v52 = vpack.c.bf16 %v9390_v12, %v9391_v14  ;;  %9399 = vst [vmem:[#allocation7_spill] sm:$0xff] %v7879_v18 }
 0x164   :  { %9378 = vst [vmem:[#allocation36_spill] sm:$0xff] %v7774_v2  ;;  %9380 = vst [vmem:[#allocation37_spill] sm:$0xff] %v7783_v23  ;;  %v7898_v55 = vpop.f32.mrf.mxu0 }
 0x165   :  { %9377 = vst [vmem:[#allocation35_spill] sm:$0xff] %v7772_v48  ;;  %6380 = vmatmul.mubr.msk.bf16.vlgmr.msra.gmra.mxu1 %vm1192_vm3, %v9379_v34  ;;  %v6249_v22 = vpop.f32.mrf.mxu1  ;;  %v9396_v34 = vld [vmem:[#allocation13_spill] sm:$0xff]  ;;  %9406 = vst [vmem:[#allocation10_spill] sm:$0xff] %v7898_v55 }
 0x166   :  { %6390 = vmatpush3.bf16.xpose.msra.mxu1 %v2278_v44  ;;  %6391 = vmatprep.mubr.msk.bf16.mxu1 %vm7005_vm2, %v9352_v19  ;;  %v9395_v44 = vld [vmem:[#allocation15_spill] sm:$0xff] }
 0x167   :  { %6374 = vmatmul.mubr.msk.bf16.vlgmr.msra.gmra.mxu0 %vm1192_vm3, %v1132_v4  ;;  %6401 = vmatprep.subr.bf16.mxu1 %v9352_v19  ;;  %v7795_v24 = vpop.f32.mrf.mxu1  ;;  %v2654_v4 = vsel %vm1192_vm3, %v1175_v53, 0 }
 0x168   :  { %6384 = vmatpush3.bf16.xpose.msra.mxu0 %v2231_v45  ;;  %6385 = vmatprep.mubr.msk.bf16.mxu0 %vm7005_vm2, %v9352_v19  ;;  %9381 = vst [vmem:[#allocation38_spill] sm:$0xff] %v7795_v24  ;;  %v9397_v45 = vpack.c.bf16 %v9395_v44, %v9396_v34 }
 0x169   :  { %6395 = vmatprep.subr.bf16.mxu0 %v9352_v19  ;;  %v6250_v40 = vpop.f32.mrf.mxu1 }
 0x16a   :  { %v7799_v33 = vpack.c.bf16 %v6250_v40, %v6249_v22  ;;  %v9401_v22 = vld [vmem:[#allocation20_spill] sm:$0xff]  ;;  %v9403_v40 = vld [vmem:[#allocation17_spill] sm:$0xff] }
 0x16b   :  { %v1142_v20 = vpack.c.bf16 %v9401_v22, %v9400_v41  ;;  %v7896_v8 = vpop.f32.mrf.mxu1 }
 0x16c   :  { %9382 = vst [vmem:[#allocation39_spill] sm:$0xff] %v7799_v33  ;;  %9405 = vst [vmem:[#allocation6_spill] sm:$0xff] %v7896_v8 }
 0x16d   :  { %6392 = vmatmul.mubr.msk.bf16.vlgmr.msra.gmra.mxu1 %vm1192_vm3, %v9383_v29 }
 0x16e   :  { %6402 = vmatpush3.bf16.xpose.msra.mxu1 %v2372_v15  ;;  %6403 = vmatprep.mubr.msk.bf16.mxu1 %vm7005_vm2, %v9352_v19 }
 0x16f   :  { %6386 = vmatmul.mubr.msk.bf16.vlgmr.msra.gmra.mxu0 %vm1192_vm3, %v1134_v3  ;;  %6413 = vmatprep.subr.bf16.mxu1 %v9352_v19  ;;  %v9404_v3 = vpack.c.bf16 %v9402_v27, %v9403_v40 }
 0x170   :  { %6396 = vmatpush3.bf16.xpose.msra.mxu0 %v2325_v56  ;;  %6397 = vmatprep.mubr.msk.bf16.mxu0 %vm7005_vm2, %v9352_v19 }
 0x171   :  { %6407 = vmatprep.subr.bf16.mxu0 %v9352_v19 }
 0x175   :  { %6404 = vmatmul.mubr.msk.bf16.vlgmr.msra.gmra.mxu1 %vm1192_vm3, %v9387_v32 }
 0x176   :  { %6414 = vmatpush3.bf16.xpose.msra.mxu1 %v2466_v61  ;;  %6415 = vmatprep.mubr.msk.bf16.mxu1 %vm7005_vm2, %v9352_v19 }
 0x177   :  { %6398 = vmatmul.mubr.msk.bf16.vlgmr.msra.gmra.mxu0 %vm1192_vm3, %v1136_v5  ;;  %6425 = vmatprep.subr.bf16.mxu1 %v9352_v19 }
 0x178   :  { %6408 = vmatpush3.bf16.xpose.msra.mxu0 %v2419_v37  ;;  %6409 = vmatprep.mubr.msk.bf16.mxu0 %vm7005_vm2, %v9352_v19 }
 0x179   :  { %6419 = vmatprep.subr.bf16.mxu0 %v9352_v19 }
 0x17d   :  { %6416 = vmatmul.mubr.msk.bf16.vlgmr.msra.gmra.mxu1 %vm1192_vm3, %v9392_v52 }
 0x17e   :  { %6426 = vmatpush3.bf16.xpose.msra.mxu1 %v2560_v58  ;;  %6427 = vmatprep.mubr.msk.bf16.mxu1 %vm7005_vm2, %v9352_v19 }
 0x17f   :  { %6410 = vmatmul.mubr.msk.bf16.vlgmr.msra.gmra.mxu0 %vm1192_vm3, %v1138_v35  ;;  %6437 = vmatprep.subr.bf16.mxu1 %v9352_v19 }
 0x180   :  { %6420 = vmatpush3.bf16.xpose.msra.mxu0 %v2513_v47  ;;  %6421 = vmatprep.mubr.msk.bf16.mxu0 %vm7005_vm2, %v9352_v19 }
 0x181   :  { %6431 = vmatprep.subr.bf16.mxu0 %v9352_v19 }
 0x185   :  { %6428 = vmatmul.mubr.msk.bf16.vlgmr.msra.gmra.mxu1 %vm1192_vm3, %v9397_v45 }
 0x186   :  { %6438 = vmatpush3.bf16.xpose.msra.mxu1 %v2654_v4  ;;  %6439 = vmatprep.mubr.msk.bf16.mxu1 %vm7005_vm2, %v9352_v19 }
 0x187   :  { %6422 = vmatmul.mubr.msk.bf16.vlgmr.msra.gmra.mxu0 %vm1192_vm3, %v1140_v54  ;;  %6449 = vmatprep.subr.bf16.mxu1 %v9352_v19 }
 0x188   :  { %6432 = vmatpush3.bf16.xpose.msra.mxu0 %v2607_v57  ;;  %6433 = vmatprep.mubr.msk.bf16.mxu0 %vm7005_vm2, %v9352_v19 }
 0x189   :  { %6443 = vmatprep.subr.bf16.mxu0 %v9352_v19 }
 0x18d   :  { %6440 = vmatmul.mubr.msk.bf16.vlgmr.msra.gmra.mxu1 %vm1192_vm3, %v9404_v3 }
 0x18e   :  { %6450 = vmatpush3.bf16.msra.mxu1 %v7875_v63  ;;  %6451 = vmatprep.mubr.msk.bf16.mxu1 %vm7005_vm2, %v9352_v19 }
 0x18f   :  { %6434 = vmatmul.mubr.msk.bf16.vlgmr.msra.gmra.mxu0 %vm1192_vm3, %v1142_v20  ;;  %6461 = vmatprep.subr.bf16.mxu1 %v9352_v19 }
 0x190   :  { %6444 = vmatpush3.bf16.msra.mxu0 %v7879_v18  ;;  %6445 = vmatprep.mubr.msk.bf16.mxu0 %vm7005_vm2, %v9352_v19 }
 0x191   :  { %6455 = vmatprep.subr.bf16.mxu0 %v9352_v19 }
 0x1d5   :  { %v1280_v38 = vpop.f32.mrf.mxu1 }
 0x1d6   :  { %v7900_v50 = vmul.f32 0.35355338, %v1280_v38 }
 0x1d7   :  { %v1233_v15 = vpop.f32.mrf.mxu0  ;;  %v6261_v29 = vpop.f32.mrf.mxu1 }
 0x1d8   :  { %v7902_v56 = vmul.f32 0.35355338, %v1233_v15  ;;  %v2767_v49 = vsel %vm1192_vm3, %v7900_v50, -inf }
 0x1d9   :  { %2768 = vmax.xlane.f32.xlu1 %v2767_v49  ;;  %v6255_v42 = vpop.f32.mrf.mxu0  ;;  %v1283_v62 = vpop.f32.mrf.mxu1 }
 0x1da   :  { %v7906_v5 = vmul.f32 0.35355338, %v1283_v62  ;;  %v2761_v61 = vsel %vm1192_vm3, %v7902_v56, -inf }
 0x1db   :  { %v6262_v46 = vpop.f32.mrf.mxu1  ;;  %2762 = vmax.xlane.f32.xlu0 %v2761_v61  ;;  %v1236_v11 = vpop.f32.mrf.mxu0 }
 0x1dc   :  { %v7910_v32 = vmul.f32 0.35355338, %v1236_v11  ;;  %v2770_v37 = vsel %vm1192_vm3, %v7906_v5, -inf }
 0x1dd   :  { %2771 = vmax.xlane.f32.xlu1 %v2770_v37  ;;  %v6256_v13 = vpop.f32.mrf.mxu0  ;;  %v1374_v43 = vpop.f32.mrf.mxu1 }
 0x1de   :  { %v7914_v39 = vmul.f32 0.35355338, %v1374_v43  ;;  %v2764_v31 = vsel %vm1192_vm3, %v7910_v32, -inf }
 0x1df   :  { %v6273_v35 = vpop.f32.mrf.mxu1  ;;  %2765 = vmax.xlane.f32.xlu0 %v2764_v31  ;;  %v1327_v58 = vpop.f32.mrf.mxu0 }
 0x1e0   :  { %v7918_v52 = vmul.f32 0.35355338, %v1327_v58  ;;  %v2779_v53 = vsel %vm1192_vm3, %v7914_v39, -inf }
 0x1e1   :  { %v6267_v12 = vpop.f32.mrf.mxu0  ;;  %v1377_v14 = vpop.f32.mrf.mxu1 }
 0x1e2   :  { %v7920_v47 = vmul.f32 0.35355338, %v1377_v14  ;;  %v2773_v45 = vsel %vm1192_vm3, %v7918_v52, -inf }
 0x1e3   :  { %v6274_v25 = vpop.f32.mrf.mxu1  ;;  %2780 = vmax.xlane.f32.xlu0 %v2779_v53  ;;  %v1330_v30 = vpop.f32.mrf.mxu0 }
 0x1e4   :  { %v7924_v21 = vmul.f32 0.35355338, %v1330_v30  ;;  %v2782_v54 = vsel %vm1192_vm3, %v7920_v47, -inf }
 0x1e5   :  { %2783 = vmax.xlane.f32.xlu1 %v2782_v54  ;;  %v6268_v4 = vpop.f32.mrf.mxu0  ;;  %v1468_v44 = vpop.f32.mrf.mxu1 }
 0x1e6   :  { %v7928_v34 = vmul.f32 0.35355338, %v1468_v44  ;;  %v2776_v22 = vsel %vm1192_vm3, %v7924_v21, -inf }
 0x1e7   :  { %v6285_v57 = vpop.f32.mrf.mxu1  ;;  %2774 = vmax.xlane.f32.xlu0 %v2773_v45  ;;  %v1421_v41 = vpop.f32.mrf.mxu0 }
 0x1e8   :  { %v7934_v40 = vmul.f32 0.35355338, %v1421_v41  ;;  %v2791_v38 = vsel %vm1192_vm3, %v7928_v34, -inf }
 0x1e9   :  { %v1471_v20 = vpop.f32.mrf.mxu1  ;;  %2777 = vmax.xlane.f32.xlu1 %v2776_v22  ;;  %v6279_v27 = vpop.f32.mrf.mxu0 }
 0x1ea   :  { %v7936_v3 = vmul.f32 0.35355338, %v1471_v20  ;;  %v2785_v11 = vsel %vm1192_vm3, %v7934_v40, -inf }
 0x1eb   :  { %v6286_v15 = vpop.f32.mrf.mxu1  ;;  %2792 = vmax.xlane.f32.xlu0 %v2791_v38  ;;  %v1424_v29 = vpop.f32.mrf.mxu0 }
 0x1ec   :  { %v7940_v49 = vmul.f32 0.35355338, %v1424_v29  ;;  %v2794_v42 = vsel %vm1192_vm3, %v7936_v3, -inf }
 0x1ed   :  { %v1562_v62 = vpop.f32.mrf.mxu1  ;;  %2795 = vmax.xlane.f32.xlu1 %v2794_v42  ;;  %v6280_v61 = vpop.f32.mrf.mxu0 }
 0x1ee   :  { %v7944_v46 = vmul.f32 0.35355338, %v1562_v62  ;;  %v2788_v43 = vsel %vm1192_vm3, %v7940_v49, -inf }
 0x1ef   :  { %v6297_v37 = vpop.f32.mrf.mxu1  ;;  %2786 = vmax.xlane.f32.xlu0 %v2785_v11  ;;  %v1515_v13 = vpop.f32.mrf.mxu0 }
 0x1f0   :  { %v7950_v58 = vmul.f32 0.35355338, %v1515_v13  ;;  %v2803_v14 = vsel %vm1192_vm3, %v7944_v46, -inf }
 0x1f1   :  { %v1565_v31 = vpop.f32.mrf.mxu1  ;;  %2789 = vmax.xlane.f32.xlu1 %v2788_v43  ;;  %v6291_v35 = vpop.f32.mrf.mxu0 }
 0x1f2   :  { %v7952_v12 = vmul.f32 0.35355338, %v1565_v31  ;;  %v2797_v57 = vsel %vm1192_vm3, %v7950_v58, -inf }
 0x1f3   :  { %v6298_v53 = vpop.f32.mrf.mxu1  ;;  %2804 = vmax.xlane.f32.xlu0 %v2803_v14  ;;  %v1518_v25 = vpop.f32.mrf.mxu0 }
 0x1f4   :  { %v7956_v30 = vmul.f32 0.35355338, %v1518_v25  ;;  %v2806_v54 = vsel %vm1192_vm3, %v7952_v12, -inf }
 0x1f5   :  { %v1656_v4 = vpop.f32.mrf.mxu1  ;;  %2807 = vmax.xlane.f32.xlu1 %v2806_v54  ;;  %v6292_v44 = vpop.f32.mrf.mxu0 }
 0x1f6   :  { %v7960_v45 = vmul.f32 0.35355338, %v1656_v4  ;;  %v2800_v20 = vsel %vm1192_vm3, %v7956_v30, -inf }
 0x1f7   :  { %v6309_v41 = vpop.f32.mrf.mxu1  ;;  %2798 = vmax.xlane.f32.xlu0 %v2797_v57  ;;  %v1609_v22 = vpop.f32.mrf.mxu0 }
 0x1f8   :  { %v7966_v15 = vmul.f32 0.35355338, %v1609_v22  ;;  %v2815_v42 = vsel %vm1192_vm3, %v7960_v45, -inf }
 0x1f9   :  { %v1659_v27 = vpop.f32.mrf.mxu1  ;;  %2801 = vmax.xlane.f32.xlu1 %v2800_v20  ;;  %v6303_v38 = vpop.f32.mrf.mxu0 }
 0x1fa   :  { %v7968_v29 = vmul.f32 0.35355338, %v1659_v27  ;;  %v2809_v35 = vsel %vm1192_vm3, %v7966_v15, -inf }
 0x1fb   :  { %v6310_v62 = vpop.f32.mrf.mxu1  ;;  %2816 = vmax.xlane.f32.xlu0 %v2815_v42  ;;  %v1612_v61 = vpop.f32.mrf.mxu0 }
 0x1fc   :  { %v7972_v11 = vmul.f32 0.35355338, %v1612_v61  ;;  %v2818_v37 = vsel %vm1192_vm3, %v7968_v29, -inf }
 0x1fd   :  { %v1750_v13 = vpop.f32.mrf.mxu1  ;;  %2819 = vmax.xlane.f32.xlu1 %v2818_v37  ;;  %v6304_v43 = vpop.f32.mrf.mxu0 }
 0x1fe   :  { %v7976_v31 = vmul.f32 0.35355338, %v1750_v13  ;;  %v2812_v25 = vsel %vm1192_vm3, %v7972_v11, -inf }
 0x1ff   :  { %v6321_v14 = vpop.f32.mrf.mxu1  ;;  %2810 = vmax.xlane.f32.xlu0 %v2809_v35  ;;  %v1703_v53 = vpop.f32.mrf.mxu0 }
 0x200   :  { %v7982_v44 = vmul.f32 0.35355338, %v1703_v53  ;;  %v2827_v41 = vsel %vm1192_vm3, %v7976_v31, -inf }
 0x201   :  { %v1753_v54 = vpop.f32.mrf.mxu1  ;;  %2813 = vmax.xlane.f32.xlu1 %v2812_v25  ;;  %v6315_v4 = vpop.f32.mrf.mxu0 }
 0x202   :  { %v7984_v57 = vmul.f32 0.35355338, %v1753_v54  ;;  %v2821_v37 = vsel %vm1192_vm3, %v7982_v44, -inf }
 0x203   :  { %v6322_v22 = vpop.f32.mrf.mxu1  ;;  %2828 = vmax.xlane.f32.xlu0 %v2827_v41  ;;  %v1706_v20 = vpop.f32.mrf.mxu0 }
 0x204   :  { %v7988_v27 = vmul.f32 0.35355338, %v1706_v20  ;;  %v2830_v38 = vsel %vm1192_vm3, %v7984_v57, -inf }
 0x205   :  { %v1844_v42 = vpop.f32.mrf.mxu1  ;;  %2831 = vmax.xlane.f32.xlu1 %v2830_v38  ;;  %v6316_v62 = vpop.f32.mrf.mxu0 }
 0x206   :  { %v7992_v61 = vmul.f32 0.35355338, %v1844_v42  ;;  %v2824_v35 = vsel %vm1192_vm3, %v7988_v27, -inf }
 0x207   :  { %v6333_v13 = vpop.f32.mrf.mxu1  ;;  %2822 = vmax.xlane.f32.xlu0 %v2821_v37  ;;  %v1797_v43 = vpop.f32.mrf.mxu0 }
 0x208   :  { %v7998_v25 = vmul.f32 0.35355338, %v1797_v43  ;;  %v2839_v4 = vsel %vm1192_vm3, %v7992_v61, -inf }
 0x209   :  { %v1847_v14 = vpop.f32.mrf.mxu1  ;;  %2825 = vmax.xlane.f32.xlu1 %v2824_v35  ;;  %v6327_v53 = vpop.f32.mrf.mxu0 }
 0x20a   :  { %v8000_v54 = vmul.f32 0.35355338, %v1847_v14  ;;  %v2833_v13 = vsel %vm1192_vm3, %v7998_v25, -inf }
 0x20b   :  { %v6334_v41 = vpop.f32.mrf.mxu1  ;;  %2840 = vmax.xlane.f32.xlu0 %v2839_v4  ;;  %v1800_v22 = vpop.f32.mrf.mxu0 }
 0x20c   :  { %v8004_v20 = vmul.f32 0.35355338, %v1800_v22  ;;  %v2842_v38 = vsel %vm1192_vm3, %v8000_v54, -inf }
 0x20d   :  { %v1938_v42 = vpop.f32.mrf.mxu1  ;;  %2843 = vmax.xlane.f32.xlu1 %v2842_v38  ;;  %v6328_v62 = vpop.f32.mrf.mxu0 }
 0x20e   :  { %v8008_v37 = vmul.f32 0.35355338, %v1938_v42  ;;  %v2836_v14 = vsel %vm1192_vm3, %v8004_v20, -inf }
 0x20f   :  { %v6345_v43 = vpop.f32.mrf.mxu1  ;;  %2834 = vmax.xlane.f32.xlu0 %v2833_v13  ;;  %v1891_v35 = vpop.f32.mrf.mxu0 }
 0x210   :  { %v8014_v41 = vmul.f32 0.35355338, %v1891_v35  ;;  %v2851_v38 = vsel %vm1192_vm3, %v8008_v37, -inf }
 0x211   :  { %v1941_v53 = vpop.f32.mrf.mxu1  ;;  %2837 = vmax.xlane.f32.xlu1 %v2836_v14  ;;  %v6339_v4 = vpop.f32.mrf.mxu0 }
 0x212   :  { %v8016_v22 = vmul.f32 0.35355338, %v1941_v53  ;;  %v2845_v35 = vsel %vm1192_vm3, %v8014_v41, -inf }
 0x213   :  { %v6346_v42 = vpop.f32.mrf.mxu1  ;;  %2852 = vmax.xlane.f32.xlu0 %v2851_v38  ;;  %v1894_v62 = vpop.f32.mrf.mxu0 }
 0x214   :  { %v8020_v18 = vmul.f32 0.35355338, %v1894_v62  ;;  %v2854_v13 = vsel %vm1192_vm3, %v8016_v22, -inf }
 0x215   :  { %v2032_v43 = vpop.f32.mrf.mxu1  ;;  %2855 = vmax.xlane.f32.xlu1 %v2854_v13  ;;  %v6340_v63 = vpop.f32.mrf.mxu0 }
 0x216   :  { %v8024_v14 = vmul.f32 0.35355338, %v2032_v43  ;;  %v2848_v38 = vsel %vm1192_vm3, %v8020_v18, -inf }
 0x217   :  { %v6357_v53 = vpop.f32.mrf.mxu1  ;;  %2846 = vmax.xlane.f32.xlu0 %v2845_v35  ;;  %v1985_v4 = vpop.f32.mrf.mxu0 }
 0x218   :  { %v8030_v8 = vmul.f32 0.35355338, %v1985_v4  ;;  %v2863_v63 = vsel %vm1192_vm3, %v8024_v14, -inf }
 0x219   :  { %v2035_v42 = vpop.f32.mrf.mxu1  ;;  %2849 = vmax.xlane.f32.xlu1 %v2848_v38  ;;  %v6351_v62 = vpop.f32.mrf.mxu0 }
 0x21a   :  { %v8032_v24 = vmul.f32 0.35355338, %v2035_v42  ;;  %v2857_v4 = vsel %vm1192_vm3, %v8030_v8, -inf }
 0x21b   :  { %v6358_v13 = vpop.f32.mrf.mxu1  ;;  %2864 = vmax.xlane.f32.xlu0 %v2863_v63  ;;  %v1988_v43 = vpop.f32.mrf.mxu0 }
 0x21c   :  { %v8036_v33 = vmul.f32 0.35355338, %v1988_v43  ;;  %v2866_v35 = vsel %vm1192_vm3, %v8032_v24, -inf }
 0x21d   :  { %v2126_v53 = vpop.f32.mrf.mxu1  ;;  %2867 = vmax.xlane.f32.xlu1 %v2866_v35  ;;  %v6352_v23 = vpop.f32.mrf.mxu0 }
 0x21e   :  { %v8040_v38 = vmul.f32 0.35355338, %v2126_v53  ;;  %v2860_v63 = vsel %vm1192_vm3, %v8036_v33, -inf }
 0x21f   :  { %v6369_v42 = vpop.f32.mrf.mxu1  ;;  %2858 = vmax.xlane.f32.xlu0 %v2857_v4  ;;  %v2079_v62 = vpop.f32.mrf.mxu0 }
 0x220   :  { %v8046_v17 = vmul.f32 0.35355338, %v2079_v62  ;;  %v2875_v23 = vsel %vm1192_vm3, %v8040_v38, -inf }
 0x221   :  { %v2129_v13 = vpop.f32.mrf.mxu1  ;;  %2861 = vmax.xlane.f32.xlu1 %v2860_v63  ;;  %v6363_v43 = vpop.f32.mrf.mxu0 }
 0x222   :  { %v8048_v2 = vmul.f32 0.35355338, %v2129_v13  ;;  %v2869_v62 = vsel %vm1192_vm3, %v8046_v17, -inf }
 0x223   :  { %v6370_v35 = vpop.f32.mrf.mxu1  ;;  %2876 = vmax.xlane.f32.xlu0 %v2875_v23  ;;  %v2082_v53 = vpop.f32.mrf.mxu0 }
 0x224   :  { %v8052_v26 = vmul.f32 0.35355338, %v2082_v53  ;;  %v2878_v4 = vsel %vm1192_vm3, %v8048_v2, -inf }
 0x225   :  { %v2220_v42 = vpop.f32.mrf.mxu1  ;;  %2879 = vmax.xlane.f32.xlu1 %v2878_v4  ;;  %v6364_v7 = vpop.f32.mrf.mxu0 }
 0x226   :  { %v8056_v63 = vmul.f32 0.35355338, %v2220_v42  ;;  %v2872_v23 = vsel %vm1192_vm3, %v8052_v26, -inf }
 0x227   :  { %v6381_v13 = vpop.f32.mrf.mxu1  ;;  %2870 = vmax.xlane.f32.xlu0 %v2869_v62  ;;  %v2173_v43 = vpop.f32.mrf.mxu0 }
 0x228   :  { %v8062_v16 = vmul.f32 0.35355338, %v2173_v43  ;;  %v2887_v7 = vsel %vm1192_vm3, %v8056_v63, -inf }
 0x229   :  { %v2223_v35 = vpop.f32.mrf.mxu1  ;;  %2873 = vmax.xlane.f32.xlu1 %v2872_v23  ;;  %v6375_v53 = vpop.f32.mrf.mxu0 }
 0x22a   :  { %v8064_v59 = vmul.f32 0.35355338, %v2223_v35  ;;  %v2881_v43 = vsel %vm1192_vm3, %v8062_v16, -inf }
 0x22b   :  { %v6382_v4 = vpop.f32.mrf.mxu1  ;;  %2888 = vmax.xlane.f32.xlu0 %v2887_v7  ;;  %v2176_v42 = vpop.f32.mrf.mxu0 }
 0x22c   :  { %v8068_v9 = vmul.f32 0.35355338, %v2176_v42  ;;  %v2890_v62 = vsel %vm1192_vm3, %v8064_v59, -inf }
 0x22d   :  { %v2314_v13 = vpop.f32.mrf.mxu1  ;;  %2891 = vmax.xlane.f32.xlu1 %v2890_v62  ;;  %v6376_v36 = vpop.f32.mrf.mxu0 }
 0x22e   :  { %v8072_v23 = vmul.f32 0.35355338, %v2314_v13  ;;  %v2884_v7 = vsel %vm1192_vm3, %v8068_v9, -inf }
 0x22f   :  { %v6393_v35 = vpop.f32.mrf.mxu1  ;;  %2882 = vmax.xlane.f32.xlu0 %v2881_v43  ;;  %v2267_v53 = vpop.f32.mrf.mxu0 }
 0x230   :  { %v8078_v55 = vmul.f32 0.35355338, %v2267_v53  ;;  %v2899_v36 = vsel %vm1192_vm3, %v8072_v23, -inf }
 0x231   :  { %v2317_v4 = vpop.f32.mrf.mxu1  ;;  %2885 = vmax.xlane.f32.xlu1 %v2884_v7  ;;  %v6387_v42 = vpop.f32.mrf.mxu0 }
 0x232   :  { %v8080_v10 = vmul.f32 0.35355338, %v2317_v4  ;;  %v2893_v53 = vsel %vm1192_vm3, %v8078_v55, -inf }
 0x233   :  { %v6394_v62 = vpop.f32.mrf.mxu1  ;;  %2900 = vmax.xlane.f32.xlu0 %v2899_v36  ;;  %v2270_v13 = vpop.f32.mrf.mxu0 }
 0x234   :  { %v8084_v48 = vmul.f32 0.35355338, %v2270_v13  ;;  %v2902_v43 = vsel %vm1192_vm3, %v8080_v10, -inf }
 0x235   :  { %v2408_v35 = vpop.f32.mrf.mxu1  ;;  %2903 = vmax.xlane.f32.xlu1 %v2902_v43  ;;  %v6388_v51 = vpop.f32.mrf.mxu0 }
 0x236   :  { %v8088_v7 = vmul.f32 0.35355338, %v2408_v35  ;;  %v2896_v36 = vsel %vm1192_vm3, %v8084_v48, -inf }
 0x237   :  { %v6405_v4 = vpop.f32.mrf.mxu1  ;;  %2894 = vmax.xlane.f32.xlu0 %v2893_v53  ;;  %v2361_v42 = vpop.f32.mrf.mxu0 }
 0x238   :  { %v8094_v0 = vmul.f32 0.35355338, %v2361_v42  ;;  %v2911_v51 = vsel %vm1192_vm3, %v8088_v7, -inf }
 0x239   :  { %v2411_v62 = vpop.f32.mrf.mxu1  ;;  %2897 = vmax.xlane.f32.xlu1 %v2896_v36  ;;  %v6399_v13 = vpop.f32.mrf.mxu0 }
 0x23a   :  { %9407 = vst [vmem:[#allocation12_spill] sm:$0xff] %v8094_v0  ;;  %v8096_v6 = vmul.f32 0.35355338, %v2411_v62  ;;  %v2905_v42 = vsel %vm1192_vm3, %v8094_v0, -inf }
 0x23b   :  { %v6406_v43 = vpop.f32.mrf.mxu1  ;;  %2912 = vmax.xlane.f32.xlu0 %v2911_v51  ;;  %v2364_v35 = vpop.f32.mrf.mxu0 }
 0x23c   :  { %v8100_v28 = vmul.f32 0.35355338, %v2364_v35  ;;  %v2914_v53 = vsel %vm1192_vm3, %v8096_v6, -inf }
 0x23d   :  { %v2502_v4 = vpop.f32.mrf.mxu1  ;;  %2915 = vmax.xlane.f32.xlu1 %v2914_v53  ;;  %v6400_v1 = vpop.f32.mrf.mxu0 }
 0x23e   :  { %9408 = vst [vmem:[#allocation11_spill] sm:$0xff] %v8100_v28  ;;  %v8104_v36 = vmul.f32 0.35355338, %v2502_v4  ;;  %v2908_v51 = vsel %vm1192_vm3, %v8100_v28, -inf }
 0x23f   :  { %v6417_v62 = vpop.f32.mrf.mxu1  ;;  %2906 = vmax.xlane.f32.xlu0 %v2905_v42  ;;  %v2455_v13 = vpop.f32.mrf.mxu0 }
 0x240   :  { %9409 = vst [vmem:[#allocation9_spill] sm:$0xff] %v8104_v36  ;;  %v8110_v19 = vmul.f32 0.35355338, %v2455_v13  ;;  %v2923_v1 = vsel %vm1192_vm3, %v8104_v36, -inf }
 0x241   :  { %v2505_v43 = vpop.f32.mrf.mxu1  ;;  %2909 = vmax.xlane.f32.xlu1 %v2908_v51  ;;  %v6411_v35 = vpop.f32.mrf.mxu0 }
 0x242   :  { %9410 = vst [vmem:[#allocation14_spill] sm:$0xff] %v8110_v19  ;;  %v8112_v60 = vmul.f32 0.35355338, %v2505_v43  ;;  %v2917_v13 = vsel %vm1192_vm3, %v8110_v19, -inf }
 0x243   :  { %v6418_v53 = vpop.f32.mrf.mxu1  ;;  %2924 = vmax.xlane.f32.xlu0 %v2923_v1  ;;  %v2458_v4 = vpop.f32.mrf.mxu0 }
 0x244   :  { %9411 = vst [vmem:[#allocation16_spill] sm:$0xff] %v8112_v60  ;;  %v8116_v0 = vmul.f32 0.35355338, %v2458_v4  ;;  %v2926_v42 = vsel %vm1192_vm3, %v8112_v60, -inf }
 0x245   :  { %v2596_v62 = vpop.f32.mrf.mxu1  ;;  %2927 = vmax.xlane.f32.xlu1 %v2926_v42  ;;  %v6412_v28 = vpop.f32.mrf.mxu0 }
 0x246   :  { %9412 = vst [vmem:[#allocation15_spill] sm:$0xff] %v8116_v0  ;;  %v8120_v51 = vmul.f32 0.35355338, %v2596_v62  ;;  %v2920_v1 = vsel %vm1192_vm3, %v8116_v0, -inf }
 0x247   :  { %v6429_v43 = vpop.f32.mrf.mxu1  ;;  %2918 = vmax.xlane.f32.xlu0 %v2917_v13  ;;  %v2549_v35 = vpop.f32.mrf.mxu0 }
 0x248   :  { %9413 = vst [vmem:[#allocation13_spill] sm:$0xff] %v8120_v51  ;;  %v8126_v36 = vmul.f32 0.35355338, %v2549_v35  ;;  %v2935_v28 = vsel %vm1192_vm3, %v8120_v51, -inf }
 0x249   :  { %v2599_v53 = vpop.f32.mrf.mxu1  ;;  %2921 = vmax.xlane.f32.xlu1 %v2920_v1  ;;  %v6423_v4 = vpop.f32.mrf.mxu0 }
 0x24a   :  { %9414 = vst [vmem:[#allocation18_spill] sm:$0xff] %v8126_v36  ;;  %v8128_v60 = vmul.f32 0.35355338, %v2599_v53  ;;  %v2929_v35 = vsel %vm1192_vm3, %v8126_v36, -inf }
 0x24b   :  { %v6430_v42 = vpop.f32.mrf.mxu1  ;;  %2936 = vmax.xlane.f32.xlu0 %v2935_v28  ;;  %v2552_v62 = vpop.f32.mrf.mxu0 }
 0x24c   :  { %9415 = vst [vmem:[#allocation20_spill] sm:$0xff] %v8128_v60  ;;  %v8132_v19 = vmul.f32 0.35355338, %v2552_v62  ;;  %v2938_v13 = vsel %vm1192_vm3, %v8128_v60, -inf }
 0x24d   :  { %v2690_v43 = vpop.f32.mrf.mxu1  ;;  %2939 = vmax.xlane.f32.xlu1 %v2938_v13  ;;  %v6424_v0 = vpop.f32.mrf.mxu0 }
 0x24e   :  { %v8136_v1 = vmul.f32 0.35355338, %v2690_v43  ;;  %v2932_v28 = vsel %vm1192_vm3, %v8132_v19, -inf }
 0x24f   :  { %v6441_v53 = vpop.f32.mrf.mxu1  ;;  %2930 = vmax.xlane.f32.xlu0 %v2929_v35  ;;  %v2643_v4 = vpop.f32.mrf.mxu0 }
 0x250   :  { %9416 = vst [vmem:[#allocation19_spill] sm:$0xff] %v8136_v1  ;;  %v8142_v51 = vmul.f32 0.35355338, %v2643_v4  ;;  %v2947_v0 = vsel %vm1192_vm3, %v8136_v1, -inf }
 0x251   :  { %v2693_v42 = vpop.f32.mrf.mxu1  ;;  %2933 = vmax.xlane.f32.xlu1 %v2932_v28  ;;  %v6435_v62 = vpop.f32.mrf.mxu0 }
 0x252   :  { %9417 = vst [vmem:[#allocation17_spill] sm:$0xff] %v8142_v51  ;;  %v8144_v60 = vmul.f32 0.35355338, %v2693_v42  ;;  %v2941_v28 = vsel %vm1192_vm3, %v8142_v51, -inf }
 0x253   :  { %v6442_v13 = vpop.f32.mrf.mxu1  ;;  %2948 = vmax.xlane.f32.xlu0 %v2947_v0  ;;  %v2646_v43 = vpop.f32.mrf.mxu0 }
 0x254   :  { %9418 = vst [vmem:[#allocation40_spill] sm:$0xff] %v8144_v60  ;;  %v8148_v36 = vmul.f32 0.35355338, %v2646_v43  ;;  %v2950_v35 = vsel %vm1192_vm3, %v8144_v60, -inf }
 0x255   :  { %2951 = vmax.xlane.f32.xlu1 %v2950_v35  ;;  %v6436_v53 = vpop.f32.mrf.mxu0 }
 0x256   :  { %9419 = vst [vmem:[#allocation41_spill] sm:$0xff] %v8148_v36  ;;  %v2944_v4 = vsel %vm1192_vm3, %v8148_v36, -inf }
 0x257   :  { %2942 = vmax.xlane.f32.xlu0 %v2941_v28 }
 0x259   :  { %2945 = vmax.xlane.f32.xlu1 %v2944_v4 }
 0x262   :  { %v2769_v42 = vpop.xlane.xlu1 %2768 }
 0x263   :  { %v2955_v62 = vsub.f32 %v7900_v50, %v2769_v42 }
 0x264   :  { %v2763_v0 = vpop.xlane.xlu0 %2762 }
 0x265   :  { %v3021_v13 = vmul.f32 1.442695, %v2955_v62  ;;  %v2953_v43 = vsub.f32 %v7902_v56, %v2763_v0 }
 0x266   :  { %v2772_v1 = vpop.xlane.xlu1 %2771 }
 0x267   :  { %6662 = vpow2.f32 %v3021_v13  ;;  %v3017_v60 = vmul.f32 1.442695, %v2953_v43  ;;  %v2956_v35 = vsub.f32 %v7906_v5, %v2772_v1 }
 0x268   :  { %v2766_v53 = vpop.xlane.xlu0 %2765 }
 0x269   :  { %6664 = vpow2.f32 %v3017_v60  ;;  %v3023_v51 = vmul.f32 1.442695, %v2956_v35  ;;  %v2954_v28 = vsub.f32 %v7910_v32, %v2766_v53 }
 0x26b   :  { %6666 = vpow2.f32 %v3023_v51  ;;  %v3019_v36 = vmul.f32 1.442695, %v2954_v28 }
 0x26c   :  { %v2781_v4 = vpop.xlane.xlu0 %2780 }
 0x26d   :  { %6668 = vpow2.f32 %v3019_v36  ;;  %v2959_v50 = vsub.f32 %v7914_v39, %v2781_v4 }
 0x26e   :  { %v2784_v42 = vpop.xlane.xlu1 %2783 }
 0x26f   :  { %v3029_v62 = vmul.f32 1.442695, %v2959_v50  ;;  %v2960_v56 = vsub.f32 %v7920_v47, %v2784_v42 }
 0x270   :  { %v2775_v0 = vpop.xlane.xlu0 %2774 }
 0x271   :  { %6670 = vpow2.f32 %v3029_v62  ;;  %v3031_v13 = vmul.f32 1.442695, %v2960_v56  ;;  %v2957_v5 = vsub.f32 %v7918_v52, %v2775_v0 }
 0x272   :  { %v2778_v1 = vpop.xlane.xlu1 %2777 }
 0x273   :  { %6672 = vpow2.f32 %v3031_v13  ;;  %v3025_v60 = vmul.f32 1.442695, %v2957_v5  ;;  %v2958_v32 = vsub.f32 %v7924_v21, %v2778_v1 }
 0x274   :  { %v8164_v51 = vpop.eup %6662  ;;  %v2793_v43 = vpop.xlane.xlu0 %2792 }
 0x275   :  { %6674 = vpow2.f32 %v3025_v60  ;;  %v3027_v36 = vmul.f32 1.442695, %v2958_v32  ;;  %v2963_v39 = vsub.f32 %v7928_v34, %v2793_v43  ;;  %v3151_v47 = vsel %vm1192_vm3, %v8164_v51, 0.0 }
 0x276   :  { %v8169_v35 = vpop.eup %6664  ;;  %v2796_v53 = vpop.xlane.xlu1 %2795  ;;  %3152 = vadd.xlane.f32.xlu0 %v3151_v47 }
 0x277   :  { %6676 = vpow2.f32 %v3027_v36  ;;  %v3037_v52 = vmul.f32 1.442695, %v2963_v39  ;;  %v2964_v28 = vsub.f32 %v7936_v3, %v2796_v53  ;;  %v3145_v50 = vsel %vm1192_vm3, %v8169_v35, 0.0 }
 0x278   :  { %v8172_v4 = vpop.eup %6666  ;;  %v2787_v21 = vpop.xlane.xlu0 %2786 }
 0x279   :  { %6678 = vpow2.f32 %v3037_v52  ;;  %v3039_v42 = vmul.f32 1.442695, %v2964_v28  ;;  %v2961_v34 = vsub.f32 %v7934_v40, %v2787_v21  ;;  %v3154_v62 = vsel %vm1192_vm3, %v8172_v4, 0.0 }
 0x27a   :  { %v8179_v56 = vpop.eup %6668  ;;  %v2790_v0 = vpop.xlane.xlu1 %2789  ;;  %3146 = vadd.xlane.f32.xlu0 %v3145_v50  ;;  %3155 = vadd.xlane.f32.xlu1 %v3154_v62 }
 0x27b   :  { %6680 = vpow2.f32 %v3039_v42  ;;  %v3033_v3 = vmul.f32 1.442695, %v2961_v34  ;;  %v2962_v13 = vsub.f32 %v7940_v49, %v2790_v0  ;;  %v3148_v40 = vsel %vm1192_vm3, %v8179_v56, 0.0 }
 0x27c   :  { %v2805_v5 = vpop.xlane.xlu0 %2804 }
 0x27d   :  { %6682 = vpow2.f32 %v3033_v3  ;;  %v3035_v1 = vmul.f32 1.442695, %v2962_v13  ;;  %v2967_v60 = vsub.f32 %v7944_v46, %v2805_v5 }
 0x27e   :  { %v8185_v32 = vpop.eup %6670  ;;  %v2808_v43 = vpop.xlane.xlu1 %2807  ;;  %3149 = vadd.xlane.f32.xlu1 %v3148_v40 }
 0x27f   :  { %6684 = vpow2.f32 %v3035_v1  ;;  %v3045_v36 = vmul.f32 1.442695, %v2967_v60  ;;  %v2968_v39 = vsub.f32 %v7952_v12, %v2808_v43  ;;  %v3163_v47 = vsel %vm1192_vm3, %v8185_v32, 0.0 }
 0x280   :  { %v8190_v49 = vpop.eup %6672  ;;  %v2799_v53 = vpop.xlane.xlu0 %2798  ;;  %3164 = vadd.xlane.f32.xlu0 %v3163_v47 }
 0x281   :  { %6686 = vpow2.f32 %v3045_v36  ;;  %v3047_v46 = vmul.f32 1.442695, %v2968_v39  ;;  %v2965_v52 = vsub.f32 %v7950_v58, %v2799_v53  ;;  %v3166_v28 = vsel %vm1192_vm3, %v8190_v49, 0.0 }
 0x282   :  { %v8195_v21 = vpop.eup %6674  ;;  %v2802_v50 = vpop.xlane.xlu1 %2801  ;;  %3167 = vadd.xlane.f32.xlu1 %v3166_v28 }
 0x283   :  { %6688 = vpow2.f32 %v3047_v46  ;;  %v3041_v12 = vmul.f32 1.442695, %v2965_v52  ;;  %v2966_v42 = vsub.f32 %v7956_v30, %v2802_v50  ;;  %v3157_v34 = vsel %vm1192_vm3, %v8195_v21, 0.0 }
 0x284   :  { %v8200_v62 = vpop.eup %6676  ;;  %v2817_v0 = vpop.xlane.xlu0 %2816  ;;  %3158 = vadd.xlane.f32.xlu0 %v3157_v34 }
 0x285   :  { %6690 = vpow2.f32 %v3041_v12  ;;  %v3043_v58 = vmul.f32 1.442695, %v2966_v42  ;;  %v2971_v3 = vsub.f32 %v7960_v45, %v2817_v0  ;;  %v3160_v13 = vsel %vm1192_vm3, %v8200_v62, 0.0 }
 0x286   :  { %v8205_v5 = vpop.eup %6678  ;;  %v2820_v1 = vpop.xlane.xlu1 %2819  ;;  %3161 = vadd.xlane.f32.xlu1 %v3160_v13 }
 0x287   :  { %6692 = vpow2.f32 %v3043_v58  ;;  %v3053_v30 = vmul.f32 1.442695, %v2971_v3  ;;  %v2972_v60 = vsub.f32 %v7968_v29, %v2820_v1  ;;  %v3175_v40 = vsel %vm1192_vm3, %v8205_v5, 0.0 }
 0x288   :  { %v8210_v43 = vpop.eup %6680  ;;  %v2811_v36 = vpop.xlane.xlu0 %2810  ;;  %3176 = vadd.xlane.f32.xlu0 %v3175_v40 }
 0x289   :  { %6694 = vpow2.f32 %v3053_v30  ;;  %v3055_v45 = vmul.f32 1.442695, %v2972_v60  ;;  %v2969_v39 = vsub.f32 %v7966_v15, %v2811_v36  ;;  %v3178_v47 = vsel %vm1192_vm3, %v8210_v43, 0.0 }
 0x28a   :  { %v8215_v53 = vpop.eup %6682  ;;  %v2814_v46 = vpop.xlane.xlu1 %2813  ;;  %3179 = vadd.xlane.f32.xlu1 %v3178_v47 }
 0x28b   :  { %6696 = vpow2.f32 %v3055_v45  ;;  %v3049_v29 = vmul.f32 1.442695, %v2969_v39  ;;  %v2970_v52 = vsub.f32 %v7972_v11, %v2814_v46  ;;  %v3169_v28 = vsel %vm1192_vm3, %v8215_v53, 0.0 }
 0x28c   :  { %v8220_v50 = vpop.eup %6684  ;;  %v2829_v12 = vpop.xlane.xlu0 %2828  ;;  %3170 = vadd.xlane.f32.xlu0 %v3169_v28 }
 0x28d   :  { %6698 = vpow2.f32 %v3049_v29  ;;  %v3051_v15 = vmul.f32 1.442695, %v2970_v52  ;;  %v2975_v42 = vsub.f32 %v7976_v31, %v2829_v12  ;;  %v3172_v34 = vsel %vm1192_vm3, %v8220_v50, 0.0 }
 0x28e   :  { %v8225_v0 = vpop.eup %6686  ;;  %v2832_v58 = vpop.xlane.xlu1 %2831  ;;  %3173 = vadd.xlane.f32.xlu1 %v3172_v34 }
 0x28f   :  { %6700 = vpow2.f32 %v3051_v15  ;;  %v3061_v11 = vmul.f32 1.442695, %v2975_v42  ;;  %v2976_v3 = vsub.f32 %v7984_v57, %v2832_v58  ;;  %v3187_v13 = vsel %vm1192_vm3, %v8225_v0, 0.0 }
 0x290   :  { %v8230_v1 = vpop.eup %6688  ;;  %v2823_v30 = vpop.xlane.xlu0 %2822  ;;  %3188 = vadd.xlane.f32.xlu0 %v3187_v13 }
 0x291   :  { %6702 = vpow2.f32 %v3061_v11  ;;  %v3063_v31 = vmul.f32 1.442695, %v2976_v3  ;;  %v2973_v60 = vsub.f32 %v7982_v44, %v2823_v30  ;;  %v3190_v40 = vsel %vm1192_vm3, %v8230_v1, 0.0 }
 0x292   :  { %v8235_v36 = vpop.eup %6690  ;;  %v2826_v45 = vpop.xlane.xlu1 %2825  ;;  %3191 = vadd.xlane.f32.xlu1 %v3190_v40 }
 0x293   :  { %6704 = vpow2.f32 %v3063_v31  ;;  %v3057_v57 = vmul.f32 1.442695, %v2973_v60  ;;  %v2974_v39 = vsub.f32 %v7988_v27, %v2826_v45  ;;  %v3181_v47 = vsel %vm1192_vm3, %v8235_v36, 0.0 }
 0x294   :  { %v8240_v46 = vpop.eup %6692  ;;  %v2841_v29 = vpop.xlane.xlu0 %2840  ;;  %3182 = vadd.xlane.f32.xlu0 %v3181_v47 }
 0x295   :  { %6706 = vpow2.f32 %v3057_v57  ;;  %v3059_v44 = vmul.f32 1.442695, %v2974_v39  ;;  %v2979_v52 = vsub.f32 %v7992_v61, %v2841_v29  ;;  %v3184_v28 = vsel %vm1192_vm3, %v8240_v46, 0.0 }
 0x296   :  { %v8245_v12 = vpop.eup %6694  ;;  %v2844_v15 = vpop.xlane.xlu1 %2843  ;;  %3185 = vadd.xlane.f32.xlu1 %v3184_v28 }
 0x297   :  { %6708 = vpow2.f32 %v3059_v44  ;;  %v3069_v27 = vmul.f32 1.442695, %v2979_v52  ;;  %v2980_v42 = vsub.f32 %v8000_v54, %v2844_v15  ;;  %v3199_v34 = vsel %vm1192_vm3, %v8245_v12, 0.0 }
 0x298   :  { %v8250_v58 = vpop.eup %6696  ;;  %v2835_v11 = vpop.xlane.xlu0 %2834  ;;  %3200 = vadd.xlane.f32.xlu0 %v3199_v34 }
 0x299   :  { %6710 = vpow2.f32 %v3069_v27  ;;  %v3071_v61 = vmul.f32 1.442695, %v2980_v42  ;;  %v2977_v3 = vsub.f32 %v7998_v25, %v2835_v11  ;;  %v3202_v13 = vsel %vm1192_vm3, %v8250_v58, 0.0 }
 0x29a   :  { %v8255_v30 = vpop.eup %6698  ;;  %v2838_v31 = vpop.xlane.xlu1 %2837  ;;  %3203 = vadd.xlane.f32.xlu1 %v3202_v13 }
 0x29b   :  { %6712 = vpow2.f32 %v3071_v61  ;;  %v3065_v54 = vmul.f32 1.442695, %v2977_v3  ;;  %v2978_v60 = vsub.f32 %v8004_v20, %v2838_v31  ;;  %v3193_v40 = vsel %vm1192_vm3, %v8255_v30, 0.0 }
 0x29c   :  { %v8260_v45 = vpop.eup %6700  ;;  %v2853_v57 = vpop.xlane.xlu0 %2852  ;;  %3194 = vadd.xlane.f32.xlu0 %v3193_v40 }
 0x29d   :  { %6714 = vpow2.f32 %v3065_v54  ;;  %v3067_v25 = vmul.f32 1.442695, %v2978_v60  ;;  %v2983_v39 = vsub.f32 %v8008_v37, %v2853_v57  ;;  %v3196_v47 = vsel %vm1192_vm3, %v8260_v45, 0.0 }
 0x29e   :  { %v8265_v29 = vpop.eup %6702  ;;  %v2856_v44 = vpop.xlane.xlu1 %2855  ;;  %3197 = vadd.xlane.f32.xlu1 %v3196_v47 }
 0x29f   :  { %6716 = vpow2.f32 %v3067_v25  ;;  %v3077_v20 = vmul.f32 1.442695, %v2983_v39  ;;  %v2984_v52 = vsub.f32 %v8016_v22, %v2856_v44  ;;  %v3211_v28 = vsel %vm1192_vm3, %v8265_v29, 0.0 }
 0x2a0   :  { %v8270_v15 = vpop.eup %6704  ;;  %v2847_v27 = vpop.xlane.xlu0 %2846  ;;  %3212 = vadd.xlane.f32.xlu0 %v3211_v28 }
 0x2a1   :  { %6718 = vpow2.f32 %v3077_v20  ;;  %v3079_v37 = vmul.f32 1.442695, %v2984_v52  ;;  %v2981_v42 = vsub.f32 %v8014_v41, %v2847_v27  ;;  %v3214_v34 = vsel %vm1192_vm3, %v8270_v15, 0.0 }
 0x2a2   :  { %v8275_v11 = vpop.eup %6706  ;;  %v2850_v61 = vpop.xlane.xlu1 %2849  ;;  %3215 = vadd.xlane.f32.xlu1 %v3214_v34 }
 0x2a3   :  { %6720 = vpow2.f32 %v3079_v37  ;;  %v3073_v22 = vmul.f32 1.442695, %v2981_v42  ;;  %v2982_v3 = vsub.f32 %v8020_v18, %v2850_v61  ;;  %v3205_v13 = vsel %vm1192_vm3, %v8275_v11, 0.0 }
 0x2a4   :  { %v8280_v31 = vpop.eup %6708  ;;  %v2865_v54 = vpop.xlane.xlu0 %2864  ;;  %3206 = vadd.xlane.f32.xlu0 %v3205_v13 }
 0x2a5   :  { %6722 = vpow2.f32 %v3073_v22  ;;  %v3075_v41 = vmul.f32 1.442695, %v2982_v3  ;;  %v2987_v60 = vsub.f32 %v8024_v14, %v2865_v54  ;;  %v3208_v40 = vsel %vm1192_vm3, %v8280_v31, 0.0 }
 0x2a6   :  { %v8285_v57 = vpop.eup %6710  ;;  %v2868_v25 = vpop.xlane.xlu1 %2867  ;;  %3209 = vadd.xlane.f32.xlu1 %v3208_v40 }
 0x2a7   :  { %6724 = vpow2.f32 %v3075_v41  ;;  %v3085_v18 = vmul.f32 1.442695, %v2987_v60  ;;  %v2988_v39 = vsub.f32 %v8032_v24, %v2868_v25  ;;  %v3223_v47 = vsel %vm1192_vm3, %v8285_v57, 0.0 }
 0x2a8   :  { %v8290_v44 = vpop.eup %6712  ;;  %v2859_v20 = vpop.xlane.xlu0 %2858  ;;  %3224 = vadd.xlane.f32.xlu0 %v3223_v47 }
 0x2a9   :  { %6726 = vpow2.f32 %v3085_v18  ;;  %v3087_v14 = vmul.f32 1.442695, %v2988_v39  ;;  %v2985_v52 = vsub.f32 %v8030_v8, %v2859_v20  ;;  %v3226_v28 = vsel %vm1192_vm3, %v8290_v44, 0.0 }
 0x2aa   :  { %v8295_v27 = vpop.eup %6714  ;;  %v2862_v37 = vpop.xlane.xlu1 %2861  ;;  %3227 = vadd.xlane.f32.xlu1 %v3226_v28 }
 0x2ab   :  { %6728 = vpow2.f32 %v3087_v14  ;;  %v3081_v24 = vmul.f32 1.442695, %v2985_v52  ;;  %v2986_v42 = vsub.f32 %v8036_v33, %v2862_v37  ;;  %v3217_v34 = vsel %vm1192_vm3, %v8295_v27, 0.0 }
 0x2ac   :  { %v8300_v61 = vpop.eup %6716  ;;  %v2877_v22 = vpop.xlane.xlu0 %2876  ;;  %3218 = vadd.xlane.f32.xlu0 %v3217_v34 }
 0x2ad   :  { %6730 = vpow2.f32 %v3081_v24  ;;  %v3083_v8 = vmul.f32 1.442695, %v2986_v42  ;;  %v2991_v3 = vsub.f32 %v8040_v38, %v2877_v22  ;;  %v3220_v13 = vsel %vm1192_vm3, %v8300_v61, 0.0 }
 0x2ae   :  { %v8305_v54 = vpop.eup %6718  ;;  %v2880_v41 = vpop.xlane.xlu1 %2879  ;;  %3221 = vadd.xlane.f32.xlu1 %v3220_v13 }
 0x2af   :  { %6732 = vpow2.f32 %v3083_v8  ;;  %v3093_v33 = vmul.f32 1.442695, %v2991_v3  ;;  %v2992_v60 = vsub.f32 %v8048_v2, %v2880_v41  ;;  %v3235_v40 = vsel %vm1192_vm3, %v8305_v54, 0.0 }
 0x2b0   :  { %v8310_v25 = vpop.eup %6720  ;;  %v2871_v18 = vpop.xlane.xlu0 %2870  ;;  %3236 = vadd.xlane.f32.xlu0 %v3235_v40 }
 0x2b1   :  { %6734 = vpow2.f32 %v3093_v33  ;;  %v3095_v38 = vmul.f32 1.442695, %v2992_v60  ;;  %v2989_v39 = vsub.f32 %v8046_v17, %v2871_v18  ;;  %v3238_v47 = vsel %vm1192_vm3, %v8310_v25, 0.0 }
 0x2b2   :  { %v8315_v20 = vpop.eup %6722  ;;  %v2874_v14 = vpop.xlane.xlu1 %2873  ;;  %3239 = vadd.xlane.f32.xlu1 %v3238_v47 }
 0x2b3   :  { %6736 = vpow2.f32 %v3095_v38  ;;  %v3089_v2 = vmul.f32 1.442695, %v2989_v39  ;;  %v2990_v52 = vsub.f32 %v8052_v26, %v2874_v14  ;;  %v3229_v28 = vsel %vm1192_vm3, %v8315_v20, 0.0 }
 0x2b4   :  { %v8320_v37 = vpop.eup %6724  ;;  %v2889_v24 = vpop.xlane.xlu0 %2888  ;;  %3230 = vadd.xlane.f32.xlu0 %v3229_v28 }
 0x2b5   :  { %6738 = vpow2.f32 %v3089_v2  ;;  %v3091_v17 = vmul.f32 1.442695, %v2990_v52  ;;  %v2995_v42 = vsub.f32 %v8056_v63, %v2889_v24  ;;  %v3232_v34 = vsel %vm1192_vm3, %v8320_v37, 0.0 }
 0x2b6   :  { %v8325_v22 = vpop.eup %6726  ;;  %v2892_v8 = vpop.xlane.xlu1 %2891  ;;  %3233 = vadd.xlane.f32.xlu1 %v3232_v34 }
 0x2b7   :  { %6740 = vpow2.f32 %v3091_v17  ;;  %v3101_v26 = vmul.f32 1.442695, %v2995_v42  ;;  %v2996_v3 = vsub.f32 %v8064_v59, %v2892_v8  ;;  %v3247_v13 = vsel %vm1192_vm3, %v8325_v22, 0.0 }
 0x2b8   :  { %v8330_v41 = vpop.eup %6728  ;;  %v2883_v33 = vpop.xlane.xlu0 %2882  ;;  %3248 = vadd.xlane.f32.xlu0 %v3247_v13 }
 0x2b9   :  { %6742 = vpow2.f32 %v3101_v26  ;;  %v3103_v63 = vmul.f32 1.442695, %v2996_v3  ;;  %v2993_v60 = vsub.f32 %v8062_v16, %v2883_v33  ;;  %v3250_v40 = vsel %vm1192_vm3, %v8330_v41, 0.0 }
 0x2ba   :  { %v8335_v18 = vpop.eup %6730  ;;  %v2886_v38 = vpop.xlane.xlu1 %2885  ;;  %3251 = vadd.xlane.f32.xlu1 %v3250_v40 }
 0x2bb   :  { %6744 = vpow2.f32 %v3103_v63  ;;  %v3097_v59 = vmul.f32 1.442695, %v2993_v60  ;;  %v2994_v39 = vsub.f32 %v8068_v9, %v2886_v38  ;;  %v3241_v47 = vsel %vm1192_vm3, %v8335_v18, 0.0 }
 0x2bc   :  { %v8340_v14 = vpop.eup %6732  ;;  %v2901_v2 = vpop.xlane.xlu0 %2900  ;;  %3242 = vadd.xlane.f32.xlu0 %v3241_v47 }
 0x2bd   :  { %6746 = vpow2.f32 %v3097_v59  ;;  %v3099_v16 = vmul.f32 1.442695, %v2994_v39  ;;  %v2999_v52 = vsub.f32 %v8072_v23, %v2901_v2  ;;  %v3244_v28 = vsel %vm1192_vm3, %v8340_v14, 0.0 }
 0x2be   :  { %v8345_v24 = vpop.eup %6734  ;;  %v2904_v17 = vpop.xlane.xlu1 %2903  ;;  %3245 = vadd.xlane.f32.xlu1 %v3244_v28 }
 0x2bf   :  { %6748 = vpow2.f32 %v3099_v16  ;;  %v3109_v9 = vmul.f32 1.442695, %v2999_v52  ;;  %v3000_v42 = vsub.f32 %v8080_v10, %v2904_v17  ;;  %v3259_v34 = vsel %vm1192_vm3, %v8345_v24, 0.0 }
 0x2c0   :  { %v8350_v8 = vpop.eup %6736  ;;  %v2895_v26 = vpop.xlane.xlu0 %2894  ;;  %3260 = vadd.xlane.f32.xlu0 %v3259_v34 }
 0x2c1   :  { %6750 = vpow2.f32 %v3109_v9  ;;  %v3111_v23 = vmul.f32 1.442695, %v3000_v42  ;;  %v2997_v3 = vsub.f32 %v8078_v55, %v2895_v26  ;;  %v3262_v13 = vsel %vm1192_vm3, %v8350_v8, 0.0  ;;  %v9420_v42 = vld [vmem:[#allocation12_spill] sm:$0xff] }
 0x2c2   :  { %v8355_v33 = vpop.eup %6738  ;;  %v2898_v63 = vpop.xlane.xlu1 %2897  ;;  %3263 = vadd.xlane.f32.xlu1 %v3262_v13  ;;  %v9421_v13 = vld [vmem:[#allocation11_spill] sm:$0xff] }
 0x2c3   :  { %6752 = vpow2.f32 %v3111_v23  ;;  %v3105_v10 = vmul.f32 1.442695, %v2997_v3  ;;  %v2998_v60 = vsub.f32 %v8084_v48, %v2898_v63  ;;  %v3253_v40 = vsel %vm1192_vm3, %v8355_v33, 0.0 }
 0x2c4   :  { %v8360_v38 = vpop.eup %6740  ;;  %v2913_v59 = vpop.xlane.xlu0 %2912  ;;  %3254 = vadd.xlane.f32.xlu0 %v3253_v40 }
 0x2c5   :  { %6754 = vpow2.f32 %v3105_v10  ;;  %v3107_v55 = vmul.f32 1.442695, %v2998_v60  ;;  %v3003_v39 = vsub.f32 %v8088_v7, %v2913_v59  ;;  %v3256_v47 = vsel %vm1192_vm3, %v8360_v38, 0.0 }
 0x2c6   :  { %v8365_v2 = vpop.eup %6742  ;;  %v2916_v16 = vpop.xlane.xlu1 %2915  ;;  %3257 = vadd.xlane.f32.xlu1 %v3256_v47 }
 0x2c7   :  { %6756 = vpow2.f32 %v3107_v55  ;;  %v3117_v48 = vmul.f32 1.442695, %v3003_v39  ;;  %v3004_v52 = vsub.f32 %v8096_v6, %v2916_v16  ;;  %v3271_v28 = vsel %vm1192_vm3, %v8365_v2, 0.0  ;;  %v9422_v55 = vld [vmem:[#allocation9_spill] sm:$0xff] }
 0x2c8   :  { %v8370_v17 = vpop.eup %6744  ;;  %v2907_v9 = vpop.xlane.xlu0 %2906  ;;  %3272 = vadd.xlane.f32.xlu0 %v3271_v28  ;;  %v9423_v28 = vld [vmem:[#allocation16_spill] sm:$0xff] }
 0x2c9   :  { %6758 = vpow2.f32 %v3117_v48  ;;  %v3119_v7 = vmul.f32 1.442695, %v3004_v52  ;;  %v3001_v34 = vsub.f32 %v9420_v42, %v2907_v9  ;;  %v3274_v26 = vsel %vm1192_vm3, %v8370_v17, 0.0 }
 0x2ca   :  { %v8375_v23 = vpop.eup %6746  ;;  %v2910_v3 = vpop.xlane.xlu1 %2909  ;;  %3275 = vadd.xlane.f32.xlu1 %v3274_v26 }
 0x2cb   :  { %6760 = vpow2.f32 %v3119_v7  ;;  %v3113_v6 = vmul.f32 1.442695, %v3001_v34  ;;  %v3002_v63 = vsub.f32 %v9421_v13, %v2910_v3  ;;  %v3265_v10 = vsel %vm1192_vm3, %v8375_v23, 0.0  ;;  %v9424_v3 = vld [vmem:[#allocation14_spill] sm:$0xff] }
 0x2cc   :  { %v8380_v60 = vpop.eup %6748  ;;  %v2925_v40 = vpop.xlane.xlu0 %2924  ;;  %3266 = vadd.xlane.f32.xlu0 %v3265_v10 }
 0x2cd   :  { %6762 = vpow2.f32 %v3113_v6  ;;  %v3115_v59 = vmul.f32 1.442695, %v3002_v63  ;;  %v3007_v39 = vsub.f32 %v9422_v55, %v2925_v40  ;;  %v3268_v47 = vsel %vm1192_vm3, %v8380_v60, 0.0 }
 0x2ce   :  { %v8385_v16 = vpop.eup %6750  ;;  %v2928_v48 = vpop.xlane.xlu1 %2927  ;;  %3269 = vadd.xlane.f32.xlu1 %v3268_v47 }
 0x2cf   :  { %6764 = vpow2.f32 %v3115_v59  ;;  %v3125_v52 = vmul.f32 1.442695, %v3007_v39  ;;  %v3008_v9 = vsub.f32 %v9423_v28, %v2928_v48  ;;  %v3283_v7 = vsel %vm1192_vm3, %v8385_v16, 0.0  ;;  %v9425_v59 = vld [vmem:[#allocation15_spill] sm:$0xff]  ;;  %v9427_v28 = vld [vmem:[#allocation13_spill] sm:$0xff] }
 0x2d0   :  { %v8390_v42 = vpop.eup %6752  ;;  %v2919_v34 = vpop.xlane.xlu0 %2918  ;;  %3284 = vadd.xlane.f32.xlu0 %v3283_v7 }
 0x2d1   :  { %6766 = vpow2.f32 %v3125_v52  ;;  %v3127_v26 = vmul.f32 1.442695, %v3008_v9  ;;  %v3005_v6 = vsub.f32 %v9424_v3, %v2919_v34  ;;  %v3286_v13 = vsel %vm1192_vm3, %v8390_v42, 0.0 }
 0x2d2   :  { %v8395_v63 = vpop.eup %6754  ;;  %v2922_v10 = vpop.xlane.xlu1 %2921  ;;  %3287 = vadd.xlane.f32.xlu1 %v3286_v13 }
 0x2d3   :  { %6768 = vpow2.f32 %v3127_v26  ;;  %v3121_v40 = vmul.f32 1.442695, %v3005_v6  ;;  %v3006_v55 = vsub.f32 %v9425_v59, %v2922_v10  ;;  %v3277_v39 = vsel %vm1192_vm3, %v8395_v63, 0.0  ;;  %v9429_v6 = vld [vmem:[#allocation20_spill] sm:$0xff] }
 0x2d4   :  { %v8400_v47 = vpop.eup %6756  ;;  %v2937_v48 = vpop.xlane.xlu0 %2936  ;;  %3278 = vadd.xlane.f32.xlu0 %v3277_v39  ;;  %v9431_v39 = vld [vmem:[#allocation18_spill] sm:$0xff] }
 0x2d5   :  { %9426 = vst [vmem:[#allocation12_spill] sm:$0xff] %v8400_v47  ;;  %6770 = vpow2.f32 %v3121_v40  ;;  %v3123_v52 = vmul.f32 1.442695, %v3006_v55  ;;  %v3011_v9 = vsub.f32 %v9427_v28, %v2937_v48  ;;  %v3280_v7 = vsel %vm1192_vm3, %v8400_v47, 0.0 }
 0x2d6   :  { %v8405_v34 = vpop.eup %6758  ;;  %v2940_v26 = vpop.xlane.xlu1 %2939  ;;  %3281 = vadd.xlane.f32.xlu1 %v3280_v7 }
 0x2d7   :  { %9428 = vst [vmem:[#allocation11_spill] sm:$0xff] %v8405_v34  ;;  %6772 = vpow2.f32 %v3123_v52  ;;  %v3133_v3 = vmul.f32 1.442695, %v3011_v9  ;;  %v3012_v13 = vsub.f32 %v9429_v6, %v2940_v26  ;;  %v3295_v10 = vsel %vm1192_vm3, %v8405_v34, 0.0 }
 0x2d8   :  { %v8410_v59 = vpop.eup %6760  ;;  %v2931_v40 = vpop.xlane.xlu0 %2930  ;;  %3296 = vadd.xlane.f32.xlu0 %v3295_v10 }
 0x2d9   :  { %9430 = vst [vmem:[#allocation9_spill] sm:$0xff] %v8410_v59  ;;  %6774 = vpow2.f32 %v3133_v3  ;;  %v3135_v55 = vmul.f32 1.442695, %v3012_v13  ;;  %v3009_v48 = vsub.f32 %v9431_v39, %v2931_v40  ;;  %v3298_v28 = vsel %vm1192_vm3, %v8410_v59, 0.0  ;;  %v9435_v39 = vld [vmem:[#allocation19_spill] sm:$0xff] }
 0x2da   :  { %v8415_v47 = vpop.eup %6762  ;;  %v2934_v52 = vpop.xlane.xlu1 %2933  ;;  %3299 = vadd.xlane.f32.xlu1 %v3298_v28 }
 0x2db   :  { %9432 = vst [vmem:[#allocation16_spill] sm:$0xff] %v8415_v47  ;;  %6776 = vpow2.f32 %v3135_v55  ;;  %v3129_v9 = vmul.f32 1.442695, %v3009_v48  ;;  %v3010_v7 = vsub.f32 %v8132_v19, %v2934_v52  ;;  %v3289_v26 = vsel %vm1192_vm3, %v8415_v47, 0.0 }
 0x2dc   :  { %v8420_v6 = vpop.eup %6764  ;;  %v2949_v3 = vpop.xlane.xlu0 %2948  ;;  %3290 = vadd.xlane.f32.xlu0 %v3289_v26  ;;  %v9436_v26 = vld [vmem:[#allocation40_spill] sm:$0xff] }
 0x2dd   :  { %9433 = vst [vmem:[#allocation14_spill] sm:$0xff] %v8420_v6  ;;  %6778 = vpow2.f32 %v3129_v9  ;;  %v3131_v13 = vmul.f32 1.442695, %v3010_v7  ;;  %v3292_v10 = vsel %vm1192_vm3, %v8420_v6, 0.0  ;;  %v3015_v28 = vsub.f32 %v9435_v39, %v2949_v3  ;;  %v9437_v7 = vld [vmem:[#allocation17_spill] sm:$0xff] }
 0x2de   :  { %v8424_v40 = vpop.eup %6766  ;;  %v2952_v55 = vpop.xlane.xlu1 %2951  ;;  %3293 = vadd.xlane.f32.xlu1 %v3292_v10  ;;  %v9438_v39 = vld [vmem:[#allocation41_spill] sm:$0xff] }
 0x2df   :  { %9434 = vst [vmem:[#allocation15_spill] sm:$0xff] %v8424_v40  ;;  %6780 = vpow2.f32 %v3131_v13  ;;  %v3307_v19 = vsel %vm1192_vm3, %v8424_v40, 0.0  ;;  %v3016_v9 = vsub.f32 %v9436_v26, %v2952_v55  ;;  %v3141_v3 = vmul.f32 1.442695, %v3015_v28 }
 0x2e0   :  { %v8429_v48 = vpop.eup %6768  ;;  %3308 = vadd.xlane.f32.xlu0 %v3307_v19  ;;  %v2943_v52 = vpop.xlane.xlu0 %2942 }
 0x2e1   :  { %v3013_v47 = vsub.f32 %v9437_v7, %v2943_v52  ;;  %v3310_v6 = vsel %vm1192_vm3, %v8429_v48, 0.0  ;;  %v3143_v55 = vmul.f32 1.442695, %v3016_v9 }
 0x2e2   :  { %v8435_v59 = vpop.eup %6770  ;;  %3311 = vadd.xlane.f32.xlu1 %v3310_v6  ;;  %v2946_v10 = vpop.xlane.xlu1 %2945 }
 0x2e3   :  { %v3137_v13 = vmul.f32 1.442695, %v3013_v47  ;;  %v3014_v34 = vsub.f32 %v9438_v39, %v2946_v10  ;;  %v3301_v40 = vsel %vm1192_vm3, %v8435_v59, 0.0 }
 0x2e4   :  { %v8440_v19 = vpop.eup %6772  ;;  %3302 = vadd.xlane.f32.xlu0 %v3301_v40 }
 0x2e5   :  { %6782 = vpow2.f32 %v3137_v13  ;;  %v3139_v52 = vmul.f32 1.442695, %v3014_v34  ;;  %v3304_v26 = vsel %vm1192_vm3, %v8440_v19, 0.0 }
 0x2e6   :  { %v8444_v7 = vpop.eup %6774  ;;  %6784 = vpow2.f32 %v3141_v3  ;;  %3305 = vadd.xlane.f32.xlu1 %v3304_v26 }
 0x2e7   :  { %9439 = vst [vmem:[#allocation13_spill] sm:$0xff] %v8444_v7  ;;  %6786 = vpow2.f32 %v3139_v52  ;;  %v3319_v47 = vsel %vm1192_vm3, %v8444_v7, 0.0 }
 0x2e8   :  { %v8448_v6 = vpop.eup %6776  ;;  %3320 = vadd.xlane.f32.xlu0 %v3319_v47  ;;  %6788 = vpow2.f32 %v3143_v55 }
 0x2e9   :  { %9440 = vst [vmem:[#allocation20_spill] sm:$0xff] %v8448_v6  ;;  %v3322_v40 = vsel %vm1192_vm3, %v8448_v6, 0.0 }
 0x2ea   :  { %v8452_v28 = vpop.eup %6778  ;;  %3323 = vadd.xlane.f32.xlu1 %v3322_v40 }
 0x2eb   :  { %9441 = vst [vmem:[#allocation18_spill] sm:$0xff] %v8452_v28  ;;  %v3313_v34 = vsel %vm1192_vm3, %v8452_v28, 0.0 }
 0x2ec   :  { %v8456_v9 = vpop.eup %6780  ;;  %3314 = vadd.xlane.f32.xlu0 %v3313_v34 }
 0x2ed   :  { %9442 = vst [vmem:[#allocation19_spill] sm:$0xff] %v8456_v9  ;;  %v3316_v3 = vsel %vm1192_vm3, %v8456_v9, 0.0 }
 0x2ee   :  { %3317 = vadd.xlane.f32.xlu1 %v3316_v3 }
 0x2f2   :  { %v8460_v10 = vpop.eup %6782 }
 0x2f3   :  { %9443 = vst [vmem:[#allocation40_spill] sm:$0xff] %v8460_v10  ;;  %v8462_v13 = vpop.eup %6784  ;;  %v3325_v39 = vsel %vm1192_vm3, %v8460_v10, 0.0 }
 0x2f4   :  { %9444 = vst [vmem:[#allocation17_spill] sm:$0xff] %v8462_v13  ;;  %v8466_v55 = vpop.eup %6786  ;;  %3326 = vadd.xlane.f32.xlu0 %v3325_v39  ;;  %v3331_v47 = vsel %vm1192_vm3, %v8462_v13, 0.0 }
 0x2f5   :  { %9445 = vst [vmem:[#allocation41_spill] sm:$0xff] %v8466_v55  ;;  %v3328_v52 = vsel %vm1192_vm3, %v8466_v55, 0.0  ;;  %v8470_v26 = vpop.eup %6788 }
 0x2f6   :  { %9446 = vst [vmem:[#allocation42_spill] sm:$0xff] %v8470_v26  ;;  %3329 = vadd.xlane.f32.xlu1 %v3328_v52  ;;  %v3334_v40 = vsel %vm1192_vm3, %v8470_v26, 0.0 }
 0x2f8   :  { %3332 = vadd.xlane.f32.xlu0 %v3331_v47 }
 0x2fa   :  { %3335 = vadd.xlane.f32.xlu1 %v3334_v40 }
 0x2ff   :  { %v3153_v34 = vpop.xlane.xlu0 %3152 }
 0x300   :  { %6790 = vrcp.f32 %v3153_v34 }
 0x303   :  { %v3147_v3 = vpop.xlane.xlu0 %3146  ;;  %v3156_v10 = vpop.xlane.xlu1 %3155 }
 0x304   :  { %6792 = vrcp.f32 %v3156_v10 }
 0x305   :  { %6794 = vrcp.f32 %v3147_v3 }
 0x307   :  { %v3150_v39 = vpop.xlane.xlu1 %3149 }
 0x308   :  { %6796 = vrcp.f32 %v3150_v39 }
 0x309   :  { %v3165_v55 = vpop.xlane.xlu0 %3164 }
 0x30a   :  { %6798 = vrcp.f32 %v3165_v55 }
 0x30b   :  { %v3168_v9 = vpop.xlane.xlu1 %3167 }
 0x30c   :  { %6800 = vrcp.f32 %v3168_v9 }
 0x30d   :  { %v3159_v52 = vpop.xlane.xlu0 %3158  ;;  %v6791_v47 = vpop.eup %6790 }
 0x30e   :  { %6802 = vrcp.f32 %v3159_v52  ;;  %v3403_v34 = vmul.f32 %v6791_v47, %v8164_v51  ;;  %v9448_v47 = vmov 0.0  }
 0x30f   :  { %v3162_v13 = vpop.xlane.xlu1 %3161 }
 0x310   :  { %6804 = vrcp.f32 %v3162_v13 }
 0x311   :  { %v3177_v28 = vpop.xlane.xlu0 %3176  ;;  %v6793_v26 = vpop.eup %6792 }
 0x312   :  { %6806 = vrcp.f32 %v3177_v28  ;;  %v6795_v40 = vpop.eup %6794  ;;  %v3404_v10 = vmul.f32 %v6793_v26, %v8172_v4  ;;  %v9447_v28 = vld [vmem:[#allocation23_spill] sm:$0xff]  ;;  %v9449_v26 = vld [vmem:[#allocation21_spill] sm:$0xff] }
 0x313   :  { %v3180_v3 = vpop.xlane.xlu1 %3179  ;;  %v3401_v9 = vmul.f32 %v6795_v40, %v8169_v35 }
 0x314   :  { %6808 = vrcp.f32 %v3180_v3  ;;  %v3467_v55 = vpack.c.bf16 %v3404_v10, %v3403_v34  ;;  %v9450_v3 = vld [vmem:[#allocation25_spill] sm:$0xff] }
 0x315   :  { %v6797_v39 = vpop.eup %6796  ;;  %v3171_v6 = vpop.xlane.xlu0 %3170  ;;  %v8486_v34 = vpack.c.bf16 %v9450_v3, %v9449_v26  ;;  %v9452_v26 = vld [vmem:[#allocation27_spill] sm:$0xff] }
 0x316   :  { %v3402_v52 = vmul.f32 %v6797_v39, %v8179_v56  ;;  %6810 = vrcp.f32 %v3171_v6  ;;  %6452 = vmatmul.mubr.msk.bf16.vlgmr.msra.gmra.mxu1 %vm1192_vm3, %v3467_v55  ;;  %v9453_v3 = vld [vmem:[#allocation31_spill] sm:$0xff] }
 0x317   :  { %v6799_v7 = vpop.eup %6798  ;;  %v3174_v13 = vpop.xlane.xlu1 %3173  ;;  %6462 = vmatpush3.bf16.msra.mxu1 %v9447_v28  ;;  %6463 = vmatprep.mubr.msk.bf16.mxu1 %vm7005_vm2, %v9448_v47 }
 0x318   :  { %6812 = vrcp.f32 %v3174_v13  ;;  %v3466_v51 = vpack.c.bf16 %v3402_v52, %v3401_v9  ;;  %6473 = vmatprep.subr.bf16.mxu1 %v9448_v47  ;;  %v3407_v56 = vmul.f32 %v6799_v7, %v8185_v32  ;;  %v9451_v13 = vld [vmem:[#allocation29_spill] sm:$0xff] }
 0x319   :  { %v6801_v4 = vpop.eup %6800  ;;  %v3189_v35 = vpop.xlane.xlu0 %3188 }
 0x31a   :  { %v3408_v6 = vmul.f32 %v6801_v4, %v8190_v49  ;;  %6814 = vrcp.f32 %v3189_v35  ;;  %6446 = vmatmul.mubr.msk.bf16.vlgmr.msra.gmra.mxu0 %vm1192_vm3, %v3466_v51  ;;  %v8504_v35 = vpack.c.bf16 %v9453_v3, %v9452_v26 }
 0x31b   :  { %v6803_v40 = vpop.eup %6802  ;;  %6456 = vmatpush3.bf16.msra.mxu0 %v8486_v34  ;;  %v3192_v10 = vpop.xlane.xlu1 %3191  ;;  %6457 = vmatprep.mubr.msk.bf16.mxu0 %vm7005_vm2, %v9448_v47 }
 0x31c   :  { %6816 = vrcp.f32 %v3192_v10  ;;  %v3469_v39 = vpack.c.bf16 %v3408_v6, %v3407_v56  ;;  %6467 = vmatprep.subr.bf16.mxu0 %v9448_v47  ;;  %v3405_v32 = vmul.f32 %v6803_v40, %v8195_v21 }
 0x31d   :  { %v6805_v55 = vpop.eup %6804  ;;  %v3183_v9 = vpop.xlane.xlu0 %3182 }
 0x31e   :  { %v3406_v49 = vmul.f32 %v6805_v55, %v8200_v62  ;;  %6818 = vrcp.f32 %v3183_v9  ;;  %6464 = vmatmul.mubr.msk.bf16.vlgmr.msra.gmra.mxu1 %vm1192_vm3, %v3469_v39 }
 0x31f   :  { %v6807_v7 = vpop.eup %6806  ;;  %v3186_v52 = vpop.xlane.xlu1 %3185  ;;  %6474 = vmatpush3.bf16.msra.mxu1 %v9451_v13  ;;  %6475 = vmatprep.mubr.msk.bf16.mxu1 %vm7005_vm2, %v9448_v47 }
 0x320   :  { %6820 = vrcp.f32 %v3186_v52  ;;  %v3468_v51 = vpack.c.bf16 %v3406_v49, %v3405_v32  ;;  %6485 = vmatprep.subr.bf16.mxu1 %v9448_v47  ;;  %v3411_v62 = vmul.f32 %v6807_v7, %v8205_v5  ;;  %v9454_v49 = vld [vmem:[#allocation35_spill] sm:$0xff] }
 0x321   :  { %v6809_v4 = vpop.eup %6808  ;;  %v3201_v21 = vpop.xlane.xlu0 %3200 }
 0x322   :  { %v3412_v56 = vmul.f32 %v6809_v4, %v8210_v43  ;;  %6822 = vrcp.f32 %v3201_v21  ;;  %6458 = vmatmul.mubr.msk.bf16.vlgmr.msra.gmra.mxu0 %vm1192_vm3, %v3468_v51  ;;  %v9455_v51 = vld [vmem:[#allocation33_spill] sm:$0xff]  ;;  %v9456_v4 = vld [vmem:[#allocation10_spill] sm:$0xff] }
 0x323   :  { %v6811_v6 = vpop.eup %6810  ;;  %6468 = vmatpush3.bf16.msra.mxu0 %v8504_v35  ;;  %v3204_v40 = vpop.xlane.xlu1 %3203  ;;  %6469 = vmatprep.mubr.msk.bf16.mxu0 %vm7005_vm2, %v9448_v47  ;;  %v8522_v26 = vpack.c.bf16 %v9456_v4, %v9455_v51 }
 0x324   :  { %6824 = vrcp.f32 %v3204_v40  ;;  %v3471_v10 = vpack.c.bf16 %v3412_v56, %v3411_v62  ;;  %6479 = vmatprep.subr.bf16.mxu0 %v9448_v47  ;;  %v3409_v5 = vmul.f32 %v6811_v6, %v8215_v53 }
 0x325   :  { %v6813_v39 = vpop.eup %6812  ;;  %v3195_v55 = vpop.xlane.xlu0 %3194 }
 0x326   :  { %v3410_v43 = vmul.f32 %v6813_v39, %v8220_v50  ;;  %6826 = vrcp.f32 %v3195_v55  ;;  %6476 = vmatmul.mubr.msk.bf16.vlgmr.msra.gmra.mxu1 %vm1192_vm3, %v3471_v10  ;;  %v9457_v55 = vld [vmem:[#allocation24_spill] sm:$0xff] }
 0x327   :  { %v6815_v9 = vpop.eup %6814  ;;  %v3198_v32 = vpop.xlane.xlu1 %3197  ;;  %6486 = vmatpush3.bf16.msra.mxu1 %v9454_v49  ;;  %6487 = vmatprep.mubr.msk.bf16.mxu1 %vm7005_vm2, %v9448_v47 }
 0x328   :  { %6828 = vrcp.f32 %v3198_v32  ;;  %v3470_v7 = vpack.c.bf16 %v3410_v43, %v3409_v5  ;;  %6497 = vmatprep.subr.bf16.mxu1 %v9448_v47  ;;  %v3415_v50 = vmul.f32 %v6815_v9, %v8225_v0  ;;  %v9458_v9 = vld [vmem:[#allocation22_spill] sm:$0xff] }
 0x329   :  { %v6817_v52 = vpop.eup %6816  ;;  %v3213_v53 = vpop.xlane.xlu0 %3212  ;;  %v9459_v32 = vld [vmem:[#allocation26_spill] sm:$0xff] }
 0x32a   :  { %v3416_v3 = vmul.f32 %v6817_v52, %v8230_v1  ;;  %6830 = vrcp.f32 %v3213_v53  ;;  %6470 = vmatmul.mubr.msk.bf16.vlgmr.msra.gmra.mxu0 %vm1192_vm3, %v3470_v7  ;;  %v8540_v7 = vpack.c.bf16 %v9459_v32, %v9458_v9 }
 0x32b   :  { %v6819_v21 = vpop.eup %6818  ;;  %6480 = vmatpush3.bf16.msra.mxu0 %v8522_v26  ;;  %v3216_v62 = vpop.xlane.xlu1 %3215  ;;  %6481 = vmatprep.mubr.msk.bf16.mxu0 %vm7005_vm2, %v9448_v47 }
 0x32c   :  { %6832 = vrcp.f32 %v3216_v62  ;;  %v3473_v56 = vpack.c.bf16 %v3416_v3, %v3415_v50  ;;  %6491 = vmatprep.subr.bf16.mxu0 %v9448_v47  ;;  %v3413_v0 = vmul.f32 %v6819_v21, %v8235_v36 }
 0x32d   :  { %v6821_v6 = vpop.eup %6820  ;;  %v3207_v40 = vpop.xlane.xlu0 %3206 }
 0x32e   :  { %v3414_v1 = vmul.f32 %v6821_v6, %v8240_v46  ;;  %6834 = vrcp.f32 %v3207_v40  ;;  %6488 = vmatmul.mubr.msk.bf16.vlgmr.msra.gmra.mxu1 %vm1192_vm3, %v3473_v56  ;;  %v9460_v56 = vld [vmem:[#allocation30_spill] sm:$0xff] }
 0x32f   :  { %v6823_v10 = vpop.eup %6822  ;;  %v3210_v39 = vpop.xlane.xlu1 %3209  ;;  %6498 = vmatpush3.bf16.msra.mxu1 %v9457_v55  ;;  %6499 = vmatprep.mubr.msk.bf16.mxu1 %vm7005_vm2, %v9448_v47 }
 0x330   :  { %6836 = vrcp.f32 %v3210_v39  ;;  %v3472_v5 = vpack.c.bf16 %v3414_v1, %v3413_v0  ;;  %6509 = vmatprep.subr.bf16.mxu1 %v9448_v47  ;;  %v3419_v46 = vmul.f32 %v6823_v10, %v8245_v12  ;;  %v9461_v0 = vld [vmem:[#allocation28_spill] sm:$0xff] }
 0x331   :  { %v6825_v43 = vpop.eup %6824  ;;  %v3225_v36 = vpop.xlane.xlu0 %3224  ;;  %v9462_v1 = vld [vmem:[#allocation32_spill] sm:$0xff] }
 0x332   :  { %v3420_v52 = vmul.f32 %v6825_v43, %v8250_v58  ;;  %6838 = vrcp.f32 %v3225_v36  ;;  %6482 = vmatmul.mubr.msk.bf16.vlgmr.msra.gmra.mxu0 %vm1192_vm3, %v3472_v5  ;;  %v8558_v10 = vpack.c.bf16 %v9462_v1, %v9461_v0 }
 0x333   :  { %v6827_v51 = vpop.eup %6826  ;;  %6492 = vmatpush3.bf16.msra.mxu0 %v8540_v7  ;;  %v3228_v4 = vpop.xlane.xlu1 %3227  ;;  %6493 = vmatprep.mubr.msk.bf16.mxu0 %vm7005_vm2, %v9448_v47 }
 0x334   :  { %6840 = vrcp.f32 %v3228_v4  ;;  %v3475_v53 = vpack.c.bf16 %v3420_v52, %v3419_v46  ;;  %6503 = vmatprep.subr.bf16.mxu0 %v9448_v47  ;;  %v3417_v12 = vmul.f32 %v6827_v51, %v8255_v30  ;;  %v9463_v51 = vld [vmem:[#allocation36_spill] sm:$0xff] }
 0x335   :  { %v6829_v50 = vpop.eup %6828  ;;  %v3219_v3 = vpop.xlane.xlu0 %3218 }
 0x336   :  { %v3418_v58 = vmul.f32 %v6829_v50, %v8260_v45  ;;  %6842 = vrcp.f32 %v3219_v3  ;;  %6500 = vmatmul.mubr.msk.bf16.vlgmr.msra.gmra.mxu1 %vm1192_vm3, %v3475_v53  ;;  %v9464_v50 = vld [vmem:[#allocation34_spill] sm:$0xff]  ;;  %v9465_v3 = vld [vmem:[#allocation37_spill] sm:$0xff] }
 0x337   :  { %v6831_v21 = vpop.eup %6830  ;;  %v3222_v62 = vpop.xlane.xlu1 %3221  ;;  %6510 = vmatpush3.bf16.msra.mxu1 %v9460_v56  ;;  %6511 = vmatprep.mubr.msk.bf16.mxu1 %vm7005_vm2, %v9448_v47 }
 0x338   :  { %6844 = vrcp.f32 %v3222_v62  ;;  %v3474_v6 = vpack.c.bf16 %v3418_v58, %v3417_v12  ;;  %6521 = vmatprep.subr.bf16.mxu1 %v9448_v47  ;;  %v3423_v45 = vmul.f32 %v6831_v21, %v8265_v29  ;;  %v8576_v12 = vpack.c.bf16 %v9465_v3, %v9464_v50 }
 0x339   :  { %v6833_v40 = vpop.eup %6832  ;;  %v3237_v30 = vpop.xlane.xlu0 %3236 }
 0x33a   :  { %v3424_v39 = vmul.f32 %v6833_v40, %v8270_v15  ;;  %6846 = vrcp.f32 %v3237_v30  ;;  %6494 = vmatmul.mubr.msk.bf16.vlgmr.msra.gmra.mxu0 %vm1192_vm3, %v3474_v6 }
 0x33b   :  { %v6835_v5 = vpop.eup %6834  ;;  %6504 = vmatpush3.bf16.msra.mxu0 %v8558_v10  ;;  %v3240_v43 = vpop.xlane.xlu1 %3239  ;;  %6505 = vmatprep.mubr.msk.bf16.mxu0 %vm7005_vm2, %v9448_v47 }
 0x33c   :  { %6848 = vrcp.f32 %v3240_v43  ;;  %v3477_v9 = vpack.c.bf16 %v3424_v39, %v3423_v45  ;;  %6515 = vmatprep.subr.bf16.mxu0 %v9448_v47  ;;  %v3421_v29 = vmul.f32 %v6835_v5, %v8275_v11  ;;  %v9466_v45 = vld [vmem:[#allocation39_spill] sm:$0xff]  ;;  %v9467_v43 = vld [vmem:[#allocation38_spill] sm:$0xff] }
 0x33d   :  { %v6837_v32 = vpop.eup %6836  ;;  %v3231_v36 = vpop.xlane.xlu0 %3230 }
 0x33e   :  { %v3422_v15 = vmul.f32 %v6837_v32, %v8280_v31  ;;  %6850 = vrcp.f32 %v3231_v36  ;;  %6512 = vmatmul.mubr.msk.bf16.vlgmr.msra.gmra.mxu1 %vm1192_vm3, %v3477_v9  ;;  %v9468_v9 = vld [vmem:[#allocation6_spill] sm:$0xff] }
 0x33f   :  { %v6839_v46 = vpop.eup %6838  ;;  %v3234_v52 = vpop.xlane.xlu1 %3233  ;;  %6522 = vmatpush3.bf16.msra.mxu1 %v9463_v51  ;;  %6523 = vmatprep.mubr.msk.bf16.mxu1 %vm7005_vm2, %v9448_v47  ;;  %v8594_v32 = vpack.c.bf16 %v9468_v9, %v9467_v43 }
 0x340   :  { %6852 = vrcp.f32 %v3234_v52  ;;  %v3476_v4 = vpack.c.bf16 %v3422_v15, %v3421_v29  ;;  %6533 = vmatprep.subr.bf16.mxu1 %v9448_v47  ;;  %v3427_v31 = vmul.f32 %v6839_v46, %v8285_v57 }
 0x341   :  { %v6841_v53 = vpop.eup %6840  ;;  %v3249_v11 = vpop.xlane.xlu0 %3248 }
 0x342   :  { %v3428_v58 = vmul.f32 %v6841_v53, %v8290_v44  ;;  %6854 = vrcp.f32 %v3249_v11  ;;  %6506 = vmatmul.mubr.msk.bf16.vlgmr.msra.gmra.mxu0 %vm1192_vm3, %v3476_v4  ;;  %v9469_v11 = vld [vmem:[#allocation8_spill] sm:$0xff] }
 0x343   :  { %v6843_v21 = vpop.eup %6842  ;;  %6516 = vmatpush3.bf16.msra.mxu0 %v8576_v12  ;;  %v3252_v62 = vpop.xlane.xlu1 %3251  ;;  %6517 = vmatprep.mubr.msk.bf16.mxu0 %vm7005_vm2, %v9448_v47 }
 0x344   :  { %6856 = vrcp.f32 %v3252_v62  ;;  %v3479_v6 = vpack.c.bf16 %v3428_v58, %v3427_v31  ;;  %6527 = vmatprep.subr.bf16.mxu0 %v9448_v47  ;;  %v3425_v57 = vmul.f32 %v6843_v21, %v8295_v27  ;;  %v9470_v62 = vld [vmem:[#allocation7_spill] sm:$0xff] }
 0x345   :  { %v6845_v40 = vpop.eup %6844  ;;  %v3243_v0 = vpop.xlane.xlu0 %3242 }
 0x346   :  { %v3426_v44 = vmul.f32 %v6845_v40, %v8300_v61  ;;  %6858 = vrcp.f32 %v3243_v0  ;;  %6524 = vmatmul.mubr.msk.bf16.vlgmr.msra.gmra.mxu1 %vm1192_vm3, %v3479_v6 }
 0x347   :  { %v6847_v1 = vpop.eup %6846  ;;  %v3246_v30 = vpop.xlane.xlu1 %3245  ;;  %6534 = vmatpush3.bf16.msra.mxu1 %v9466_v45  ;;  %6535 = vmatprep.mubr.msk.bf16.mxu1 %vm7005_vm2, %v9448_v47 }
 0x348   :  { %6860 = vrcp.f32 %v3246_v30  ;;  %v3478_v39 = vpack.c.bf16 %v3426_v44, %v3425_v57  ;;  %6545 = vmatprep.subr.bf16.mxu1 %v9448_v47  ;;  %v3431_v61 = vmul.f32 %v6847_v1, %v8305_v54 }
 0x349   :  { %v6849_v5 = vpop.eup %6848  ;;  %v3261_v27 = vpop.xlane.xlu0 %3260 }
 0x34a   :  { %v3432_v36 = vmul.f32 %v6849_v5, %v8310_v25  ;;  %6862 = vrcp.f32 %v3261_v27  ;;  %6518 = vmatmul.mubr.msk.bf16.vlgmr.msra.gmra.mxu0 %vm1192_vm3, %v3478_v39 }
 0x34b   :  { %v6851_v29 = vpop.eup %6850  ;;  %6528 = vmatpush3.bf16.msra.mxu0 %v8594_v32  ;;  %v3264_v15 = vpop.xlane.xlu1 %3263  ;;  %6529 = vmatprep.mubr.msk.bf16.mxu0 %vm7005_vm2, %v9448_v47 }
 0x34c   :  { %v3481_v46 = vpack.c.bf16 %v3432_v36, %v3431_v61  ;;  %6864 = vrcp.f32 %v3264_v15  ;;  %6539 = vmatprep.subr.bf16.mxu0 %v9448_v47  ;;  %v3429_v54 = vmul.f32 %v6851_v29, %v8315_v20 }
 0x34d   :  { %v6853_v52 = vpop.eup %6852  ;;  %v3255_v4 = vpop.xlane.xlu0 %3254 }
 0x34e   :  { %v3430_v25 = vmul.f32 %v6853_v52, %v8320_v37  ;;  %6866 = vrcp.f32 %v3255_v4  ;;  %6536 = vmatmul.mubr.msk.bf16.vlgmr.msra.gmra.mxu1 %vm1192_vm3, %v3481_v46 }
 0x34f   :  { %v6855_v53 = vpop.eup %6854  ;;  %v3258_v50 = vpop.xlane.xlu1 %3257  ;;  %6546 = vmatpush3.bf16.msra.mxu1 %v9469_v11  ;;  %6547 = vmatprep.mubr.msk.bf16.mxu1 %vm7005_vm2, %v9448_v47 }
 0x350   :  { %v3480_v3 = vpack.c.bf16 %v3430_v25, %v3429_v54  ;;  %6868 = vrcp.f32 %v3258_v50  ;;  %6557 = vmatprep.subr.bf16.mxu1 %v9448_v47  ;;  %v3435_v20 = vmul.f32 %v6855_v53, %v8325_v22 }
 0x351   :  { %v6857_v31 = vpop.eup %6856  ;;  %v3273_v58 = vpop.xlane.xlu0 %3272 }
 0x352   :  { %v3436_v37 = vmul.f32 %v6857_v31, %v8330_v41  ;;  %6870 = vrcp.f32 %v3273_v58  ;;  %6530 = vmatmul.mubr.msk.bf16.vlgmr.msra.gmra.mxu0 %vm1192_vm3, %v3480_v3 }
 0x353   :  { %v6859_v21 = vpop.eup %6858  ;;  %6540 = vmatpush3.bf16.msra.mxu0 %v9470_v62  ;;  %v3276_v6 = vpop.xlane.xlu1 %3275  ;;  %6541 = vmatprep.mubr.msk.bf16.mxu0 %vm7005_vm2, %v9448_v47 }
 0x354   :  { %v3483_v40 = vpack.c.bf16 %v3436_v37, %v3435_v20  ;;  %6872 = vrcp.f32 %v3276_v6  ;;  %6551 = vmatprep.subr.bf16.mxu0 %v9448_v47  ;;  %v3433_v22 = vmul.f32 %v6859_v21, %v8335_v18  ;;  %v9471_v21 = vld [vmem:[#allocation12_spill] sm:$0xff] }
 0x355   :  { %v6861_v0 = vpop.eup %6860  ;;  %v3267_v57 = vpop.xlane.xlu0 %3266 }
 0x356   :  { %v3434_v41 = vmul.f32 %v6861_v0, %v8340_v14  ;;  %6874 = vrcp.f32 %v3267_v57  ;;  %6548 = vmatmul.mubr.msk.bf16.vlgmr.msra.gmra.mxu1 %vm1192_vm3, %v3483_v40  ;;  %v9472_v57 = vld [vmem:[#allocation11_spill] sm:$0xff] }
 0x357   :  { %v6863_v44 = vpop.eup %6862  ;;  %v3270_v1 = vpop.xlane.xlu1 %3269  ;;  %6558 = vmatpush3.bf16.msra.mxu1 %v9447_v28  ;;  %6559 = vmatprep.mubr.msk.bf16.mxu1 %vm7005_vm2, %v9448_v47 }
 0x358   :  { %v3482_v30 = vpack.c.bf16 %v3434_v41, %v3433_v22  ;;  %6876 = vrcp.f32 %v3270_v1  ;;  %6569 = vmatprep.subr.bf16.mxu1 %v9448_v47  ;;  %v3439_v18 = vmul.f32 %v6863_v44, %v8345_v24  ;;  %v9473_v22 = vld [vmem:[#allocation9_spill] sm:$0xff] }
 0x359   :  { %v6865_v39 = vpop.eup %6864  ;;  %v3285_v5 = vpop.xlane.xlu0 %3284 }
 0x35a   :  { %v3440_v14 = vmul.f32 %v6865_v39, %v8350_v8  ;;  %6878 = vrcp.f32 %v3285_v5  ;;  %6542 = vmatmul.mubr.msk.bf16.vlgmr.msra.gmra.mxu0 %vm1192_vm3, %v3482_v30  ;;  %v9474_v5 = vld [vmem:[#allocation16_spill] sm:$0xff] }
 0x35b   :  { %v6867_v43 = vpop.eup %6866  ;;  %6552 = vmatpush3.bf16.msra.mxu0 %v8486_v34  ;;  %v3288_v9 = vpop.xlane.xlu1 %3287  ;;  %6553 = vmatprep.mubr.msk.bf16.mxu0 %vm7005_vm2, %v9448_v47 }
 0x35c   :  { %v3485_v28 = vpack.c.bf16 %v3440_v14, %v3439_v18  ;;  %6880 = vrcp.f32 %v3288_v9  ;;  %6563 = vmatprep.subr.bf16.mxu0 %v9448_v47  ;;  %v3437_v24 = vmul.f32 %v6867_v43, %v8355_v33  ;;  %v9475_v14 = vld [vmem:[#allocation14_spill] sm:$0xff] }
 0x35d   :  { %v6869_v27 = vpop.eup %6868  ;;  %v3279_v61 = vpop.xlane.xlu0 %3278 }
 0x35e   :  { %v3438_v8 = vmul.f32 %v6869_v27, %v8360_v38  ;;  %6882 = vrcp.f32 %v3279_v61  ;;  %6560 = vmatmul.mubr.msk.bf16.vlgmr.msra.gmra.mxu1 %vm1192_vm3, %v3485_v28  ;;  %v9476_v61 = vld [vmem:[#allocation15_spill] sm:$0xff] }
 0x35f   :  { %v6871_v36 = vpop.eup %6870  ;;  %v3282_v29 = vpop.xlane.xlu1 %3281  ;;  %6570 = vmatpush3.bf16.msra.mxu1 %v9451_v13  ;;  %6571 = vmatprep.mubr.msk.bf16.mxu1 %vm7005_vm2, %v9448_v47 }
 0x360   :  { %v3484_v34 = vpack.c.bf16 %v3438_v8, %v3437_v24  ;;  %6884 = vrcp.f32 %v3282_v29  ;;  %6581 = vmatprep.subr.bf16.mxu1 %v9448_v47  ;;  %v3443_v33 = vmul.f32 %v6871_v36, %v8365_v2 }
 0x361   :  { %v6873_v15 = vpop.eup %6872  ;;  %v3297_v46 = vpop.xlane.xlu0 %3296 }
 0x362   :  { %v3444_v38 = vmul.f32 %v6873_v15, %v8370_v17  ;;  %6886 = vrcp.f32 %v3297_v46  ;;  %6554 = vmatmul.mubr.msk.bf16.vlgmr.msra.gmra.mxu0 %vm1192_vm3, %v3484_v34 }
 0x363   :  { %v6875_v52 = vpop.eup %6874  ;;  %6564 = vmatpush3.bf16.msra.mxu0 %v8504_v35  ;;  %v3300_v4 = vpop.xlane.xlu1 %3299  ;;  %6565 = vmatprep.mubr.msk.bf16.mxu0 %vm7005_vm2, %v9448_v47 }
 0x364   :  { %v3487_v13 = vpack.c.bf16 %v3444_v38, %v3443_v33  ;;  %6888 = vrcp.f32 %v3300_v4  ;;  %6575 = vmatprep.subr.bf16.mxu0 %v9448_v47  ;;  %v3441_v2 = vmul.f32 %v6875_v52, %v8375_v23  ;;  %v9477_v4 = vld [vmem:[#allocation13_spill] sm:$0xff] }
 0x365   :  { %v6877_v54 = vpop.eup %6876  ;;  %v3291_v25 = vpop.xlane.xlu0 %3290 }
 0x366   :  { %v3442_v17 = vmul.f32 %v6877_v54, %v8380_v60  ;;  %6890 = vrcp.f32 %v3291_v25  ;;  %6572 = vmatmul.mubr.msk.bf16.vlgmr.msra.gmra.mxu1 %vm1192_vm3, %v3487_v13  ;;  %v9478_v13 = vld [vmem:[#allocation20_spill] sm:$0xff] }
 0x367   :  { %v6879_v53 = vpop.eup %6878  ;;  %v3294_v50 = vpop.xlane.xlu1 %3293  ;;  %6582 = vmatpush3.bf16.msra.mxu1 %v9454_v49  ;;  %6583 = vmatprep.mubr.msk.bf16.mxu1 %vm7005_vm2, %v9448_v47 }
 0x368   :  { %v3486_v35 = vpack.c.bf16 %v3442_v17, %v3441_v2  ;;  %6892 = vrcp.f32 %v3294_v50  ;;  %6593 = vmatprep.subr.bf16.mxu1 %v9448_v47  ;;  %v3447_v23 = vmul.f32 %v6879_v53, %v8385_v16  ;;  %v9479_v17 = vld [vmem:[#allocation18_spill] sm:$0xff]  ;;  %v9480_v50 = vld [vmem:[#allocation19_spill] sm:$0xff] }
 0x369   :  { %v6881_v3 = vpop.eup %6880  ;;  %v3309_v11 = vpop.xlane.xlu0 %3308 }
 0x36a   :  { %v3448_v60 = vmul.f32 %v6881_v3, %v8390_v42  ;;  %6894 = vrcp.f32 %v3309_v11  ;;  %6566 = vmatmul.mubr.msk.bf16.vlgmr.msra.gmra.mxu0 %vm1192_vm3, %v3486_v35 }
 0x36b   :  { %v6883_v31 = vpop.eup %6882  ;;  %6576 = vmatpush3.bf16.msra.mxu0 %v8522_v26  ;;  %v3312_v58 = vpop.xlane.xlu1 %3311  ;;  %6577 = vmatprep.mubr.msk.bf16.mxu0 %vm7005_vm2, %v9448_v47 }
 0x36c   :  { %v3489_v49 = vpack.c.bf16 %v3448_v60, %v3447_v23  ;;  %6896 = vrcp.f32 %v3312_v58  ;;  %6587 = vmatprep.subr.bf16.mxu0 %v9448_v47  ;;  %v3445_v16 = vmul.f32 %v6883_v31, %v8395_v63  ;;  %v9481_v23 = vld [vmem:[#allocation40_spill] sm:$0xff]  ;;  %v9482_v31 = vld [vmem:[#allocation41_spill] sm:$0xff] }
 0x36d   :  { %v6885_v20 = vpop.eup %6884  ;;  %v3303_v37 = vpop.xlane.xlu0 %3302 }
 0x36e   :  { %v3446_v42 = vmul.f32 %v6885_v20, %v9471_v21  ;;  %6898 = vrcp.f32 %v3303_v37  ;;  %6584 = vmatmul.mubr.msk.bf16.vlgmr.msra.gmra.mxu1 %vm1192_vm3, %v3489_v49  ;;  %v9484_v21 = vld [vmem:[#allocation42_spill] sm:$0xff] }
 0x36f   :  { %v6887_v62 = vpop.eup %6886  ;;  %v3306_v6 = vpop.xlane.xlu1 %3305  ;;  %6594 = vmatpush3.bf16.msra.mxu1 %v9457_v55  ;;  %6595 = vmatprep.mubr.msk.bf16.mxu1 %vm7005_vm2, %v9448_v47 }
 0x370   :  { %v3488_v26 = vpack.c.bf16 %v3446_v42, %v3445_v16  ;;  %6900 = vrcp.f32 %v3306_v6  ;;  %6605 = vmatprep.subr.bf16.mxu1 %v9448_v47  ;;  %v3451_v63 = vmul.f32 %v6887_v62, %v9472_v57 }
 0x371   :  { %v6889_v40 = vpop.eup %6888  ;;  %v3321_v0 = vpop.xlane.xlu0 %3320 }
 0x372   :  { %v3452_v41 = vmul.f32 %v6889_v40, %v9473_v22  ;;  %6902 = vrcp.f32 %v3321_v0  ;;  %6578 = vmatmul.mubr.msk.bf16.vlgmr.msra.gmra.mxu0 %vm1192_vm3, %v3488_v26 }
 0x373   :  { %v6891_v44 = vpop.eup %6890  ;;  %6588 = vmatpush3.bf16.msra.mxu0 %v8540_v7  ;;  %v3324_v1 = vpop.xlane.xlu1 %3323  ;;  %6589 = vmatprep.mubr.msk.bf16.mxu0 %vm7005_vm2, %v9448_v47 }
 0x374   :  { %v3491_v55 = vpack.c.bf16 %v3452_v41, %v3451_v63  ;;  %6904 = vrcp.f32 %v3324_v1  ;;  %6599 = vmatprep.subr.bf16.mxu0 %v9448_v47  ;;  %v3449_v18 = vmul.f32 %v6891_v44, %v9474_v5 }
 0x375   :  { %v6893_v30 = vpop.eup %6892  ;;  %v3315_v39 = vpop.xlane.xlu0 %3314 }
 0x376   :  { %v3450_v43 = vmul.f32 %v6893_v30, %v9475_v14  ;;  %6906 = vrcp.f32 %v3315_v39  ;;  %6596 = vmatmul.mubr.msk.bf16.vlgmr.msra.gmra.mxu1 %vm1192_vm3, %v3491_v55 }
 0x377   :  { %v6895_v9 = vpop.eup %6894  ;;  %v3318_v28 = vpop.xlane.xlu1 %3317  ;;  %6606 = vmatpush3.bf16.msra.mxu1 %v9460_v56  ;;  %6607 = vmatprep.mubr.msk.bf16.mxu1 %vm7005_vm2, %v9448_v47 }
 0x378   :  { %v3490_v7 = vpack.c.bf16 %v3450_v43, %v3449_v18  ;;  %6908 = vrcp.f32 %v3318_v28  ;;  %6617 = vmatprep.subr.bf16.mxu1 %v9448_v47  ;;  %v3455_v24 = vmul.f32 %v6895_v9, %v9476_v61 }
 0x379   :  { %v6897_v27 = vpop.eup %6896 }
 0x37a   :  { %v3456_v8 = vmul.f32 %v6897_v27, %v8429_v48  ;;  %6590 = vmatmul.mubr.msk.bf16.vlgmr.msra.gmra.mxu0 %vm1192_vm3, %v3490_v7 }
 0x37b   :  { %v6899_v36 = vpop.eup %6898  ;;  %6600 = vmatpush3.bf16.msra.mxu0 %v8558_v10  ;;  %6601 = vmatprep.mubr.msk.bf16.mxu0 %vm7005_vm2, %v9448_v47 }
 0x37c   :  { %v3493_v56 = vpack.c.bf16 %v3456_v8, %v3455_v24  ;;  %6611 = vmatprep.subr.bf16.mxu0 %v9448_v47  ;;  %v3453_v15 = vmul.f32 %v6899_v36, %v8435_v59 }
 0x37d   :  { %v6901_v29 = vpop.eup %6900  ;;  %v3327_v34 = vpop.xlane.xlu0 %3326 }
 0x37e   :  { %v3454_v46 = vmul.f32 %v6901_v29, %v8440_v19  ;;  %6910 = vrcp.f32 %v3327_v34  ;;  %6608 = vmatmul.mubr.msk.bf16.vlgmr.msra.gmra.mxu1 %vm1192_vm3, %v3493_v56 }
 0x37f   :  { %v6903_v33 = vpop.eup %6902  ;;  %v3330_v48 = vpop.xlane.xlu1 %3329  ;;  %6618 = vmatpush3.bf16.msra.mxu1 %v9463_v51  ;;  %6619 = vmatprep.mubr.msk.bf16.mxu1 %vm7005_vm2, %v9448_v47 }
 0x380   :  { %v3492_v38 = vpack.c.bf16 %v3454_v46, %v3453_v15  ;;  %6912 = vrcp.f32 %v3330_v48  ;;  %6629 = vmatprep.subr.bf16.mxu1 %v9448_v47  ;;  %v3459_v59 = vmul.f32 %v6903_v33, %v9477_v4 }
 0x381   :  { %v6905_v10 = vpop.eup %6904  ;;  %v3333_v52 = vpop.xlane.xlu0 %3332 }
 0x382   :  { %v3460_v19 = vmul.f32 %v6905_v10, %v9478_v13  ;;  %6914 = vrcp.f32 %v3333_v52  ;;  %6602 = vmatmul.mubr.msk.bf16.vlgmr.msra.gmra.mxu0 %vm1192_vm3, %v3492_v38 }
 0x383   :  { %v6907_v54 = vpop.eup %6906  ;;  %6612 = vmatpush3.bf16.msra.mxu0 %v8576_v12  ;;  %v3336_v25 = vpop.xlane.xlu1 %3335  ;;  %6613 = vmatprep.mubr.msk.bf16.mxu0 %vm7005_vm2, %v9448_v47 }
 0x384   :  { %v3495_v51 = vpack.c.bf16 %v3460_v19, %v3459_v59  ;;  %6916 = vrcp.f32 %v3336_v25  ;;  %6623 = vmatprep.subr.bf16.mxu0 %v9448_v47  ;;  %v3457_v53 = vmul.f32 %v6907_v54, %v9479_v17 }
 0x385   :  { %v6909_v2 = vpop.eup %6908 }
 0x386   :  { %v3458_v35 = vmul.f32 %v6909_v2, %v9480_v50  ;;  %6620 = vmatmul.mubr.msk.bf16.vlgmr.msra.gmra.mxu1 %vm1192_vm3, %v3495_v51 }
 0x387   :  { %6630 = vmatpush3.bf16.msra.mxu1 %v9466_v45  ;;  %6631 = vmatprep.mubr.msk.bf16.mxu1 %vm7005_vm2, %v9448_v47  ;;  %v9483_v45 = vld [vmem:[#allocation17_spill] sm:$0xff] }
 0x388   :  { %v3494_v3 = vpack.c.bf16 %v3458_v35, %v3457_v53 }
 0x38a   :  { %6614 = vmatmul.mubr.msk.bf16.vlgmr.msra.gmra.mxu0 %vm1192_vm3, %v3494_v3 }
 0x38b   :  { %v6911_v12 = vpop.eup %6910  ;;  %6624 = vmatpush3.bf16.msra.mxu0 %v8594_v32  ;;  %6625 = vmatprep.mubr.msk.bf16.mxu0 %vm7005_vm2, %v9448_v47 }
 0x38c   :  { %v3461_v60 = vmul.f32 %v6911_v12, %v9481_v23 }
 0x38d   :  { %v6913_v11 = vpop.eup %6912 }
 0x38e   :  { %v3462_v58 = vmul.f32 %v6913_v11, %v9482_v31 }
 0x38f   :  { %v6915_v49 = vpop.eup %6914 }
 0x390   :  { %v3496_v20 = vpack.c.bf16 %v3462_v58, %v3461_v60  ;;  %v3463_v16 = vmul.f32 %v6915_v49, %v9483_v45 }
 0x391   :  { %v6917_v37 = vpop.eup %6916 }
 0x392   :  { %v3464_v42 = vmul.f32 %v6917_v37, %v9484_v21  ;;  %6626 = vmatmul.mubr.msk.bf16.vlgmr.msra.gmra.mxu0 %vm1192_vm3, %v3496_v20 }
 0x394   :  { %v3497_v62 = vpack.c.bf16 %v3464_v42, %v3463_v16 }
 0x396   :  { %6632 = vmatmul.mubr.msk.bf16.vlgmr.msra.gmra.mxu1 %vm1192_vm3, %v3497_v62 }
 0x3d6   :  { %v8718_v32 = vpop.f32.mrf.mxu1 }
 0x3d8   :  { %v6453_v47 = vpop.f32.mrf.mxu1 }
 0x3da   :  { %v8720_v6 = vpop.f32.mrf.mxu0  ;;  %v8722_v26 = vpop.f32.mrf.mxu1 }
 0x3dc   :  { %v6447_v40 = vpop.f32.mrf.mxu0  ;;  %v6454_v0 = vpop.f32.mrf.mxu1 }
 0x3de   :  { %v8724_v57 = vpop.f32.mrf.mxu0  ;;  %v8726_v63 = vpop.f32.mrf.mxu1 }
 0x3e0   :  { %v6448_v22 = vpop.f32.mrf.mxu0  ;;  %v6465_v41 = vpop.f32.mrf.mxu1 }
 0x3e2   :  { %v8728_v44 = vpop.f32.mrf.mxu0  ;;  %v8730_v1 = vpop.f32.mrf.mxu1 }
 0x3e4   :  { %v6459_v55 = vpop.f32.mrf.mxu0  ;;  %v6466_v30 = vpop.f32.mrf.mxu1 }
 0x3e6   :  { %v8732_v39 = vpop.f32.mrf.mxu0  ;;  %v8734_v5 = vpop.f32.mrf.mxu1 }
 0x3e8   :  { %v6460_v18 = vpop.f32.mrf.mxu0  ;;  %v6477_v14 = vpop.f32.mrf.mxu1 }
 0x3ea   :  { %v8736_v43 = vpop.f32.mrf.mxu0  ;;  %v8738_v9 = vpop.f32.mrf.mxu1 }
 0x3ec   :  { %v6471_v28 = vpop.f32.mrf.mxu0  ;;  %v6478_v7 = vpop.f32.mrf.mxu1 }
 0x3ee   :  { %v8740_v27 = vpop.f32.mrf.mxu0  ;;  %v8742_v61 = vpop.f32.mrf.mxu1 }
 0x3f0   :  { %v6472_v24 = vpop.f32.mrf.mxu0  ;;  %v6489_v8 = vpop.f32.mrf.mxu1 }
 0x3f2   :  { %v8744_v36 = vpop.f32.mrf.mxu0  ;;  %v8746_v56 = vpop.f32.mrf.mxu1 }
 0x3f4   :  { %v6483_v29 = vpop.f32.mrf.mxu0  ;;  %v6490_v34 = vpop.f32.mrf.mxu1 }
 0x3f6   :  { %v8748_v15 = vpop.f32.mrf.mxu0  ;;  %v8750_v46 = vpop.f32.mrf.mxu1 }
 0x3f8   :  { %v6484_v33 = vpop.f32.mrf.mxu0  ;;  %v6501_v48 = vpop.f32.mrf.mxu1 }
 0x3fa   :  { %v8752_v38 = vpop.f32.mrf.mxu0  ;;  %v8754_v10 = vpop.f32.mrf.mxu1 }
 0x3fc   :  { %v6495_v52 = vpop.f32.mrf.mxu0  ;;  %v6502_v4 = vpop.f32.mrf.mxu1 }
 0x3fe   :  { %v8756_v59 = vpop.f32.mrf.mxu0  ;;  %v8758_v13 = vpop.f32.mrf.mxu1 }
 0x400   :  { %v6496_v19 = vpop.f32.mrf.mxu0  ;;  %v6513_v54 = vpop.f32.mrf.mxu1 }
 0x402   :  { %v8760_v25 = vpop.f32.mrf.mxu0  ;;  %v8762_v51 = vpop.f32.mrf.mxu1 }
 0x404   :  { %v6507_v2 = vpop.f32.mrf.mxu0  ;;  %v6514_v17 = vpop.f32.mrf.mxu1 }
 0x406   :  { %v8764_v53 = vpop.f32.mrf.mxu0  ;;  %v8766_v50 = vpop.f32.mrf.mxu1 }
 0x408   :  { %v6508_v35 = vpop.f32.mrf.mxu0  ;;  %v6525_v3 = vpop.f32.mrf.mxu1 }
 0x40a   :  { %v8768_v12 = vpop.f32.mrf.mxu0  ;;  %v8770_v11 = vpop.f32.mrf.mxu1 }
 0x40c   :  { %v6519_v23 = vpop.f32.mrf.mxu0  ;;  %v6526_v60 = vpop.f32.mrf.mxu1 }
 0x40e   :  { %v8772_v31 = vpop.f32.mrf.mxu0  ;;  %v8774_v58 = vpop.f32.mrf.mxu1 }
 0x410   :  { %v6520_v49 = vpop.f32.mrf.mxu0  ;;  %v6537_v20 = vpop.f32.mrf.mxu1 }
 0x411   :  { %v8813_v49 = vstv %s9288_s3 }
 0x412   :  { %v8776_v37 = vpop.f32.mrf.mxu0  ;;  %v8778_v45 = vpop.f32.mrf.mxu1 }
 0x414   :  { %v6531_v16 = vpop.f32.mrf.mxu0  ;;  %v6538_v21 = vpop.f32.mrf.mxu1 }
 0x416   :  { %v8780_v42 = vpop.f32.mrf.mxu0  ;;  %v8782_v62 = vpop.f32.mrf.mxu1 }
 0x418   :  { %v6532_v47 = vpop.f32.mrf.mxu0  ;;  %v6549_v40 = vpop.f32.mrf.mxu1 }
 0x41a   :  { %v8784_v0 = vpop.f32.mrf.mxu0  ;;  %v8786_v22 = vpop.f32.mrf.mxu1 }
 0x41c   :  { %v6543_v41 = vpop.f32.mrf.mxu0  ;;  %v6550_v55 = vpop.f32.mrf.mxu1 }
 0x41e   :  { %v8788_v30 = vpop.f32.mrf.mxu0  ;;  %v8790_v18 = vpop.f32.mrf.mxu1 }
 0x420   :  { %v6544_v14 = vpop.f32.mrf.mxu0  ;;  %v6561_v28 = vpop.f32.mrf.mxu1 }
 0x422   :  { %v8792_v7 = vpop.f32.mrf.mxu0  ;;  %v8794_v24 = vpop.f32.mrf.mxu1 }
 0x424   :  { %v6555_v8 = vpop.f32.mrf.mxu0  ;;  %v6562_v29 = vpop.f32.mrf.mxu1 }
 0x426   :  { %v8796_v34 = vpop.f32.mrf.mxu0  ;;  %v8798_v33 = vpop.f32.mrf.mxu1 }
 0x428   :  { %v6556_v48 = vpop.f32.mrf.mxu0  ;;  %v6573_v52 = vpop.f32.mrf.mxu1 }
 0x42a   :  { %v8800_v4 = vpop.f32.mrf.mxu0  ;;  %v8802_v19 = vpop.f32.mrf.mxu1 }
 0x42c   :  { %v6567_v54 = vpop.f32.mrf.mxu0  ;;  %v6574_v2 = vpop.f32.mrf.mxu1 }
 0x42e   :  { %v8804_v17 = vpop.f32.mrf.mxu0  ;;  %v8806_v35 = vpop.f32.mrf.mxu1 }
 0x430   :  { %v6568_v3 = vpop.f32.mrf.mxu0  ;;  %v6585_v23 = vpop.f32.mrf.mxu1 }
 0x432   :  { %v8808_v60 = vpop.f32.mrf.mxu0  ;;  %v4550_v20 = vpop.f32.mrf.mxu1 }
 0x433   :  { %v8816_v16 = vmul.f32 %v8813_v49, %v4550_v20 }
 0x434   :  { %v6579_v21 = vpop.f32.mrf.mxu0  ;;  %v6586_v47 = vpop.f32.mrf.mxu1 }
 0x436   :  { %v8818_v40 = vpop.f32.mrf.mxu0  ;;  %v4635_v41 = vpop.f32.mrf.mxu1 }
 0x437   :  { %v4925_v55 = vmul.f32 %v8813_v49, %v4635_v41 }
 0x438   :  { %v6580_v14 = vpop.f32.mrf.mxu0  ;;  %v6597_v28 = vpop.f32.mrf.mxu1 }
 0x439   :  { %v8822_v8 = vsub.f32 %v8750_v46, %v4925_v55 }
 0x43a   :  { %v4591_v29 = vpop.f32.mrf.mxu0  ;;  %v4638_v52 = vpop.f32.mrf.mxu1 }
 0x43b   :  { %v4923_v48 = vmul.f32 %v8813_v49, %v4591_v29  ;;  %v4926_v54 = vmul.f32 %v8813_v49, %v4638_v52  ;;  %v4989_v3 = vmul.f32 %v8822_v8, %v8822_v8 }
 0x43c   :  { %v6591_v2 = vpop.f32.mrf.mxu0  ;;  %v6598_v20 = vpop.f32.mrf.mxu1 }
 0x43d   :  { %v8829_v23 = vsub.f32 %v8752_v38, %v4923_v48  ;;  %v8832_v21 = vsub.f32 %v8754_v10, %v4926_v54  ;;  %v5057_v46 = vsel %vm1192_vm3, %v4989_v3, 0.0 }
 0x43e   :  { %v4594_v47 = vpop.f32.mrf.mxu0  ;;  %5058 = vadd.xlane.f32.xlu0 %v5057_v46  ;;  %v4723_v55 = vpop.f32.mrf.mxu1 }
 0x43f   :  { %v4924_v41 = vmul.f32 %v8813_v49, %v4594_v47  ;;  %v4987_v14 = vmul.f32 %v8829_v23, %v8829_v23  ;;  %v4929_v28 = vmul.f32 %v8813_v49, %v4723_v55  ;;  %v4990_v38 = vmul.f32 %v8832_v21, %v8832_v21 }
 0x440   :  { %v6592_v29 = vpop.f32.mrf.mxu0  ;;  %v6609_v10 = vpop.f32.mrf.mxu1 }
 0x441   :  { %v8842_v48 = vsub.f32 %v8756_v59, %v4924_v41  ;;  %v5051_v52 = vsel %vm1192_vm3, %v4987_v14, 0.0  ;;  %v8846_v54 = vsub.f32 %v8758_v13, %v4929_v28  ;;  %v5060_v2 = vsel %vm1192_vm3, %v4990_v38, 0.0 }
 0x442   :  { %v4679_v3 = vpop.f32.mrf.mxu0  ;;  %5061 = vadd.xlane.f32.xlu1 %v5060_v2  ;;  %v4726_v20 = vpop.f32.mrf.mxu1  ;;  %5052 = vadd.xlane.f32.xlu0 %v5051_v52 }
 0x443   :  { %v4927_v46 = vmul.f32 %v8813_v49, %v4679_v3  ;;  %v4988_v47 = vmul.f32 %v8842_v48, %v8842_v48  ;;  %v4930_v59 = vmul.f32 %v8813_v49, %v4726_v20  ;;  %v4993_v55 = vmul.f32 %v8846_v54, %v8846_v54 }
 0x444   :  { %v6603_v41 = vpop.f32.mrf.mxu0  ;;  %v6610_v14 = vpop.f32.mrf.mxu1 }
 0x445   :  { %v8856_v13 = vsub.f32 %v8760_v25, %v4927_v46  ;;  %v5054_v28 = vsel %vm1192_vm3, %v4988_v47, 0.0  ;;  %v8860_v29 = vsub.f32 %v8762_v51, %v4930_v59  ;;  %v5069_v38 = vsel %vm1192_vm3, %v4993_v55, 0.0 }
 0x446   :  { %v4682_v10 = vpop.f32.mrf.mxu0  ;;  %v4811_v52 = vpop.f32.mrf.mxu1  ;;  %5070 = vadd.xlane.f32.xlu0 %v5069_v38  ;;  %5055 = vadd.xlane.f32.xlu1 %v5054_v28 }
 0x447   :  { %v4928_v2 = vmul.f32 %v8813_v49, %v4682_v10  ;;  %v4991_v3 = vmul.f32 %v8856_v13, %v8856_v13  ;;  %v4933_v25 = vmul.f32 %v8813_v49, %v4811_v52  ;;  %v4994_v46 = vmul.f32 %v8860_v29, %v8860_v29 }
 0x448   :  { %v6604_v20 = vpop.f32.mrf.mxu0  ;;  %v6621_v47 = vpop.f32.mrf.mxu1 }
 0x449   :  { %v8870_v51 = vsub.f32 %v8764_v53, %v4928_v2  ;;  %v5063_v59 = vsel %vm1192_vm3, %v4991_v3, 0.0  ;;  %v8874_v41 = vsub.f32 %v8766_v50, %v4933_v25  ;;  %v5072_v55 = vsel %vm1192_vm3, %v4994_v46, 0.0 }
 0x44a   :  { %v4767_v14 = vpop.f32.mrf.mxu0  ;;  %v4814_v28 = vpop.f32.mrf.mxu1  ;;  %5073 = vadd.xlane.f32.xlu1 %v5072_v55  ;;  %5064 = vadd.xlane.f32.xlu0 %v5063_v59  ;;  %v4908_v20 = vmul.f32 %v8813_v49, %v8788_v30  ;;  %v4910_v30 = vmul.f32 %v8813_v49, %v8786_v22 }
 0x44b   :  { %v4931_v38 = vmul.f32 %v8813_v49, %v4767_v14  ;;  %v4992_v10 = vmul.f32 %v8870_v51, %v8870_v51  ;;  %v4934_v53 = vmul.f32 %v8813_v49, %v4814_v28  ;;  %v4997_v2 = vmul.f32 %v8874_v41, %v8874_v41 }
 0x44c   :  { %v6615_v52 = vpop.f32.mrf.mxu0  ;;  %v6622_v3 = vpop.f32.mrf.mxu1  ;;  %v8918_v22 = vsub.f32 %v8722_v26, %v4910_v30 }
 0x44d   :  { %v8884_v50 = vsub.f32 %v8768_v12, %v4931_v38  ;;  %v5066_v25 = vsel %vm1192_vm3, %v4992_v10, 0.0  ;;  %v8890_v46 = vsub.f32 %v8770_v11, %v4934_v53  ;;  %v5081_v47 = vsel %vm1192_vm3, %v4997_v2, 0.0 }
 0x44e   :  { %v4770_v59 = vpop.f32.mrf.mxu0  ;;  %5082 = vadd.xlane.f32.xlu0 %v5081_v47  ;;  %5067 = vadd.xlane.f32.xlu1 %v5066_v25  ;;  %v8905_v10 = vsub.f32 %v8724_v57, %v4908_v20  ;;  %v4907_v25 = vmul.f32 %v8813_v49, %v8784_v0 }
 0x44f   :  { %v4932_v55 = vmul.f32 %v8813_v49, %v4770_v59  ;;  %v4995_v12 = vmul.f32 %v8884_v50, %v8884_v50  ;;  %v4998_v28 = vmul.f32 %v8890_v46, %v8890_v46 }
 0x450   :  { %v6616_v14 = vpop.f32.mrf.mxu0 }
 0x451   :  { %v8899_v38 = vsub.f32 %v8772_v31, %v4932_v55  ;;  %v5075_v11 = vsel %vm1192_vm3, %v4995_v12, 0.0  ;;  %v5084_v53 = vsel %vm1192_vm3, %v4998_v28, 0.0  ;;  %v4972_v55 = vmul.f32 %v8905_v10, %v8905_v10 }
 0x452   :  { %v4855_v52 = vpop.f32.mrf.mxu0  ;;  %5085 = vadd.xlane.f32.xlu1 %v5084_v53  ;;  %5076 = vadd.xlane.f32.xlu0 %v5075_v11  ;;  %v8928_v11 = vsub.f32 %v8720_v6, %v4907_v25  ;;  %v4911_v25 = vmul.f32 %v8813_v49, %v8792_v7 }
 0x453   :  { %v4935_v2 = vmul.f32 %v8813_v49, %v4855_v52  ;;  %v4996_v3 = vmul.f32 %v8899_v38, %v8899_v38 }
 0x454   :  { %v6627_v31 = vpop.f32.mrf.mxu0 }
 0x455   :  { %v8914_v47 = vsub.f32 %v8776_v37, %v4935_v2  ;;  %v5078_v57 = vsel %vm1192_vm3, %v4996_v3, 0.0  ;;  %v4909_v37 = vmul.f32 %v8813_v49, %v8782_v62  ;;  %v5006_v2 = vsel %vm1192_vm3, %v4972_v55, 0.0 }
 0x456   :  { %v4899_v20 = vpop.f32.mrf.mxu1  ;;  %v4858_v59 = vpop.f32.mrf.mxu0  ;;  %5079 = vadd.xlane.f32.xlu1 %v5078_v57  ;;  %v4974_v3 = vmul.f32 %v8918_v22, %v8918_v22  ;;  %v4912_v55 = vmul.f32 %v8813_v49, %v8796_v34 }
 0x457   :  { %v4937_v12 = vmul.f32 %v8813_v49, %v4899_v20  ;;  %v4999_v14 = vmul.f32 %v8914_v47, %v8914_v47  ;;  %v4936_v53 = vmul.f32 %v8813_v49, %v4858_v59  ;;  %v4971_v59 = vmul.f32 %v8928_v11, %v8928_v11 }
 0x458   :  { %v6628_v0 = vpop.f32.mrf.mxu0  ;;  %v6633_v28 = vpop.f32.mrf.mxu1 }
 0x459   :  { %v8931_v26 = vsub.f32 %v8774_v58, %v4937_v12  ;;  %v5087_v30 = vsel %vm1192_vm3, %v4999_v14, 0.0  ;;  %v8942_v58 = vsub.f32 %v8718_v32, %v4909_v37  ;;  %v8955_v12 = vsub.f32 %v8780_v42, %v4936_v53 }
 0x45a   :  { %v4902_v52 = vpop.f32.mrf.mxu1  ;;  %5088 = vadd.xlane.f32.xlu0 %v5087_v30  ;;  %5007 = vadd.xlane.f32.xlu1 %v5006_v2  ;;  %v5012_v32 = vsel %vm1192_vm3, %v4974_v3, 0.0  ;;  %v4913_v14 = vmul.f32 %v8813_v49, %v8790_v18  ;;  %v8965_v37 = vsub.f32 %v8728_v44, %v4911_v25  ;;  %v5003_v42 = vsel %vm1192_vm3, %v4971_v59, 0.0 }
 0x45b   :  { %v4938_v62 = vmul.f32 %v8813_v49, %v4902_v52  ;;  %v5001_v6 = vmul.f32 %v8931_v26, %v8931_v26  ;;  %v4914_v0 = vmul.f32 %v8813_v49, %v8794_v24  ;;  %v8972_v28 = vsub.f32 %v8732_v39, %v4912_v55 }
 0x45c   :  { %v6634_v31 = vpop.f32.mrf.mxu1  ;;  %v5000_v30 = vmul.f32 %v8955_v12, %v8955_v12  ;;  %v8977_v18 = vsub.f32 %v8726_v63, %v4913_v14  ;;  %v4915_v44 = vmul.f32 %v8813_v49, %v8800_v4  ;;  %v4975_v52 = vmul.f32 %v8965_v37, %v8965_v37 }
 0x45d   :  { %v8947_v57 = vsub.f32 %v8778_v45, %v4938_v62  ;;  %v5093_v20 = vsel %vm1192_vm3, %v5001_v6, 0.0  ;;  %v4973_v45 = vmul.f32 %v8942_v58, %v8942_v58  ;;  %v8985_v24 = vsub.f32 %v8730_v1, %v4914_v0 }
 0x45e   :  { %5094 = vadd.xlane.f32.xlu0 %v5093_v20  ;;  %5013 = vadd.xlane.f32.xlu1 %v5012_v32  ;;  %v4916_v39 = vmul.f32 %v8813_v49, %v8804_v17  ;;  %v5090_v2 = vsel %vm1192_vm3, %v5000_v30, 0.0  ;;  %v4976_v63 = vmul.f32 %v8972_v28, %v8972_v28  ;;  %v4917_v4 = vmul.f32 %v8813_v49, %v8798_v33 }
 0x45f   :  { %v5002_v7 = vmul.f32 %v8947_v57, %v8947_v57  ;;  %v5009_v53 = vsel %vm1192_vm3, %v4973_v45, 0.0  ;;  %v8995_v3 = vsub.f32 %v8736_v43, %v4915_v44  ;;  %v5015_v62 = vsel %vm1192_vm3, %v4975_v52, 0.0 }
 0x460   :  { %v4977_v1 = vmul.f32 %v8977_v18, %v8977_v18  ;;  %v4918_v17 = vmul.f32 %v8813_v49, %v8802_v19  ;;  %v9003_v6 = vsub.f32 %v8740_v27, %v4916_v39  ;;  %v5018_v31 = vsel %vm1192_vm3, %v4976_v63, 0.0 }
 0x461   :  { %v5096_v34 = vsel %vm1192_vm3, %v5002_v7, 0.0  ;;  %v4978_v33 = vmul.f32 %v8985_v24, %v8985_v24  ;;  %v9009_v43 = vsub.f32 %v8734_v5, %v4917_v4  ;;  %v4919_v25 = vmul.f32 %v8813_v49, %v8808_v60 }
 0x462   :  { %5004 = vadd.xlane.f32.xlu0 %v5003_v42  ;;  %5097 = vadd.xlane.f32.xlu1 %v5096_v34  ;;  %v5021_v20 = vsel %vm1192_vm3, %v4977_v1, 0.0  ;;  %v4979_v19 = vmul.f32 %v8995_v3, %v8995_v3  ;;  %v9017_v27 = vsub.f32 %v8738_v9, %v4918_v17  ;;  %v4920_v59 = vmul.f32 %v8813_v49, %v8818_v40 }
 0x463   :  { %v5024_v55 = vsel %vm1192_vm3, %v4978_v33, 0.0  ;;  %v4980_v5 = vmul.f32 %v9003_v6, %v9003_v6  ;;  %v4921_v60 = vmul.f32 %v8813_v49, %v8806_v35  ;;  %v9027_v32 = vsub.f32 %v8744_v36, %v4919_v25 }
 0x464   :  { %v5027_v7 = vsel %vm1192_vm3, %v4979_v19, 0.0  ;;  %v4981_v9 = vmul.f32 %v9009_v43, %v9009_v43  ;;  %v9033_v40 = vsub.f32 %v8748_v15, %v4920_v59  ;;  %v4982_v14 = vmul.f32 %v9017_v27, %v9017_v27 }
 0x465   :  { %v5030_v45 = vsel %vm1192_vm3, %v4980_v5, 0.0  ;;  %v9039_v35 = vsub.f32 %v8742_v61, %v4921_v60  ;;  %v4983_v49 = vmul.f32 %v9027_v32, %v9027_v32  ;;  %v9046_v34 = vsub.f32 %v8746_v56, %v8816_v16 }
 0x466   :  { %5010 = vadd.xlane.f32.xlu0 %v5009_v53  ;;  %5091 = vadd.xlane.f32.xlu1 %v5090_v2  ;;  %v5033_v36 = vsel %vm1192_vm3, %v4981_v9, 0.0  ;;  %v5036_v15 = vsel %vm1192_vm3, %v4982_v14, 0.0  ;;  %v4984_v42 = vmul.f32 %v9033_v40, %v9033_v40 }
 0x467   :  { %v5039_v0 = vsel %vm1192_vm3, %v4983_v49, 0.0  ;;  %v4985_v61 = vmul.f32 %v9039_v35, %v9039_v35  ;;  %v4986_v44 = vmul.f32 %v9046_v34, %v9046_v34 }
 0x468   :  { %v5042_v30 = vsel %vm1192_vm3, %v4984_v42, 0.0 }
 0x469   :  { %v5045_v56 = vsel %vm1192_vm3, %v4985_v61, 0.0  ;;  %v5048_v16 = vsel %vm1192_vm3, %v4986_v44, 0.0 }
 0x46a   :  { %5016 = vadd.xlane.f32.xlu0 %v5015_v62  ;;  %5019 = vadd.xlane.f32.xlu1 %v5018_v31 }
 0x46e   :  { %5022 = vadd.xlane.f32.xlu0 %v5021_v20  ;;  %5025 = vadd.xlane.f32.xlu1 %v5024_v55 }
 0x472   :  { %5028 = vadd.xlane.f32.xlu0 %v5027_v7  ;;  %5031 = vadd.xlane.f32.xlu1 %v5030_v45 }
 0x476   :  { %5034 = vadd.xlane.f32.xlu0 %v5033_v36  ;;  %5037 = vadd.xlane.f32.xlu1 %v5036_v15 }
 0x47a   :  { %5040 = vadd.xlane.f32.xlu0 %v5039_v0  ;;  %5043 = vadd.xlane.f32.xlu1 %v5042_v30  ;;  %v9062_v0 = vld [vmem:[%s9287_s2] ss:$0 sm:$0xff]  ;;  %s7009_s2 = smov 32  }
 0x47e   :  { %5046 = vadd.xlane.f32.xlu0 %v5045_v56  ;;  %5049 = vadd.xlane.f32.xlu1 %v5048_v16 }
 0x4c7   :  { %v5059_v53 = vpop.xlane.xlu0 %5058 }
 0x4c8   :  { %v5118_v52 = vmul.f32 0.0625, %v5059_v53 }
 0x4ca   :  { %v5150_v39 = vadd.f32 1e-05, %v5118_v52 }
 0x4cb   :  { %v5062_v2 = vpop.xlane.xlu1 %5061  ;;  %v5053_v63 = vpop.xlane.xlu0 %5052 }
 0x4cc   :  { %6918 = vrsqrt.f32 %v5150_v39  ;;  %v5119_v4 = vmul.f32 0.0625, %v5062_v2  ;;  %v5116_v62 = vmul.f32 0.0625, %v5053_v63 }
 0x4ce   :  { %v5151_v1 = vadd.f32 1e-05, %v5119_v4  ;;  %v5148_v17 = vadd.f32 1e-05, %v5116_v62 }
 0x4cf   :  { %v5071_v31 = vpop.xlane.xlu0 %5070  ;;  %v5056_v33 = vpop.xlane.xlu1 %5055 }
 0x4d0   :  { %6920 = vrsqrt.f32 %v5151_v1  ;;  %v5122_v25 = vmul.f32 0.0625, %v5071_v31  ;;  %v5117_v20 = vmul.f32 0.0625, %v5056_v33 }
 0x4d1   :  { %6922 = vrsqrt.f32 %v5148_v17 }
 0x4d2   :  { %v5154_v19 = vadd.f32 1e-05, %v5122_v25  ;;  %v5149_v59 = vadd.f32 1e-05, %v5117_v20 }
 0x4d3   :  { %v5074_v55 = vpop.xlane.xlu1 %5073  ;;  %v5065_v5 = vpop.xlane.xlu0 %5064 }
 0x4d4   :  { %6924 = vrsqrt.f32 %v5154_v19  ;;  %v5123_v60 = vmul.f32 0.0625, %v5074_v55  ;;  %v5120_v7 = vmul.f32 0.0625, %v5065_v5 }
 0x4d5   :  { %6926 = vrsqrt.f32 %v5149_v59 }
 0x4d6   :  { %v5155_v9 = vadd.f32 1e-05, %v5123_v60  ;;  %v5152_v45 = vadd.f32 1e-05, %v5120_v7 }
 0x4d7   :  { %v5083_v14 = vpop.xlane.xlu0 %5082  ;;  %v5068_v36 = vpop.xlane.xlu1 %5067 }
 0x4d8   :  { %6928 = vrsqrt.f32 %v5155_v9  ;;  %v5126_v49 = vmul.f32 0.0625, %v5083_v14  ;;  %v5121_v15 = vmul.f32 0.0625, %v5068_v36 }
 0x4d9   :  { %v6919_v42 = vpop.eup %6918  ;;  %6930 = vrsqrt.f32 %v5152_v45 }
 0x4da   :  { %v5158_v61 = vadd.f32 1e-05, %v5126_v49  ;;  %v5153_v30 = vadd.f32 1e-05, %v5121_v15  ;;  %v5214_v44 = vmul.f32 %v6919_v42, %v8822_v8 }
 0x4db   :  { %v5086_v56 = vpop.xlane.xlu1 %5085  ;;  %v5077_v16 = vpop.xlane.xlu0 %5076 }
 0x4dc   :  { %6932 = vrsqrt.f32 %v5158_v61  ;;  %v5127_v53 = vmul.f32 0.0625, %v5086_v56  ;;  %v5124_v52 = vmul.f32 0.0625, %v5077_v16  ;;  %v5253_v39 = vmul.f32 %v9062_v0, %v5214_v44 }
 0x4dd   :  { %v6921_v2 = vpop.eup %6920  ;;  %6934 = vrsqrt.f32 %v5153_v30 }
 0x4de   :  { %v6923_v63 = vpop.eup %6922  ;;  %v5159_v4 = vadd.f32 1e-05, %v5127_v53  ;;  %v5156_v62 = vadd.f32 1e-05, %v5124_v52  ;;  %5287 = vrot.lane.b32.xlu1 %v5253_v39, %s7006_s26  ;;  %v5215_v1 = vmul.f32 %v6921_v2, %v8832_v21 }
 0x4df   :  { %v5080_v17 = vpop.xlane.xlu1 %5079  ;;  %v5212_v8 = vmul.f32 %v6923_v63, %v8829_v23 }
 0x4e0   :  { %6936 = vrsqrt.f32 %v5159_v4  ;;  %v5125_v31 = vmul.f32 0.0625, %v5080_v17  ;;  %v5254_v33 = vmul.f32 %v9062_v0, %v5215_v1 }
 0x4e1   :  { %v6925_v25 = vpop.eup %6924  ;;  %6938 = vrsqrt.f32 %v5156_v62  ;;  %v5251_v20 = vmul.f32 %v9062_v0, %v5212_v8 }
 0x4e2   :  { %v6927_v19 = vpop.eup %6926  ;;  %v5157_v59 = vadd.f32 1e-05, %v5125_v31  ;;  %5289 = vrot.lane.b32.xlu1 %v5254_v33, %s7006_s26  ;;  %v5218_v5 = vmul.f32 %v6925_v25, %v8846_v54 }
 0x4e3   :  { %v5089_v55 = vpop.xlane.xlu0 %5088  ;;  %5283 = vrot.lane.b32.xlu0 %v5251_v20, %s7006_s26  ;;  %v5008_v21 = vpop.xlane.xlu1 %5007  ;;  %v5213_v23 = vmul.f32 %v6927_v19, %v8842_v48 }
 0x4e4   :  { %v5128_v60 = vmul.f32 0.0625, %v5089_v55  ;;  %6940 = vrsqrt.f32 %v5157_v59  ;;  %v5101_v7 = vmul.f32 0.0625, %v5008_v21  ;;  %v5257_v9 = vmul.f32 %v9062_v0, %v5218_v5 }
 0x4e5   :  { %v6929_v45 = vpop.eup %6928  ;;  %v5252_v36 = vmul.f32 %v9062_v0, %v5213_v23 }
 0x4e6   :  { %v5160_v14 = vadd.f32 1e-05, %v5128_v60  ;;  %v6931_v49 = vpop.eup %6930  ;;  %v5133_v15 = vadd.f32 1e-05, %v5101_v7  ;;  %v5219_v61 = vmul.f32 %v6929_v45, %v8860_v29 }
 0x4e7   :  { %v5095_v42 = vpop.xlane.xlu0 %5094  ;;  %5295 = vrot.lane.b32.xlu0 %v5257_v9, %s7006_s26  ;;  %5285 = vrot.lane.b32.xlu1 %v5252_v36, %s7006_s26  ;;  %v5014_v54 = vpop.xlane.xlu1 %5013  ;;  %v5216_v30 = vmul.f32 %v6931_v49, %v8856_v13 }
 0x4e8   :  { %6942 = vrsqrt.f32 %v5160_v14  ;;  %v5130_v48 = vmul.f32 0.0625, %v5095_v42  ;;  %v5103_v44 = vmul.f32 0.0625, %v5014_v54  ;;  %v5258_v56 = vmul.f32 %v9062_v0, %v5219_v61 }
 0x4e9   :  { %6944 = vrsqrt.f32 %v5133_v15  ;;  %v6933_v16 = vpop.eup %6932  ;;  %v5255_v52 = vmul.f32 %v9062_v0, %v5216_v30 }
 0x4ea   :  { %v5162_v53 = vadd.f32 1e-05, %v5130_v48  ;;  %v6935_v39 = vpop.eup %6934  ;;  %v5135_v2 = vadd.f32 1e-05, %v5103_v44  ;;  %v5222_v29 = vmul.f32 %v6933_v16, %v8874_v41 }
 0x4eb   :  { %5291 = vrot.lane.b32.xlu0 %v5255_v52, %s7006_s26  ;;  %5297 = vrot.lane.b32.xlu1 %v5258_v56, %s7006_s26  ;;  %v5098_v63 = vpop.xlane.xlu1 %5097  ;;  %v5217_v13 = vmul.f32 %v6935_v39, %v8870_v51 }
 0x4ec   :  { %6946 = vrsqrt.f32 %v5162_v53  ;;  %v5131_v4 = vmul.f32 0.0625, %v5098_v63  ;;  %v5261_v62 = vmul.f32 %v9062_v0, %v5222_v29 }
 0x4ed   :  { %6948 = vrsqrt.f32 %v5135_v2  ;;  %v6937_v1 = vpop.eup %6936  ;;  %v5256_v17 = vmul.f32 %v9062_v0, %v5217_v13 }
 0x4ee   :  { %v6939_v8 = vpop.eup %6938  ;;  %v5223_v31 = vmul.f32 %v6937_v1, %v8890_v46  ;;  %v5163_v33 = vadd.f32 1e-05, %v5131_v4 }
 0x4ef   :  { %5303 = vrot.lane.b32.xlu0 %v5261_v62, %s7006_s26  ;;  %5293 = vrot.lane.b32.xlu1 %v5256_v17, %s7006_s26  ;;  %v5092_v41 = vpop.xlane.xlu1 %5091  ;;  %v5220_v25 = vmul.f32 %v6939_v8, %v8884_v50 }
 0x4f0   :  { %v5129_v20 = vmul.f32 0.0625, %v5092_v41  ;;  %v5262_v51 = vmul.f32 %v9062_v0, %v5223_v31  ;;  %6950 = vrsqrt.f32 %v5163_v33 }
 0x4f1   :  { %v6941_v19 = vpop.eup %6940  ;;  %v5259_v59 = vmul.f32 %v9062_v0, %v5220_v25 }
 0x4f2   :  { %v5161_v55 = vadd.f32 1e-05, %v5129_v20  ;;  %v5221_v5 = vmul.f32 %v6941_v19, %v8899_v38 }
 0x4f3   :  { %5299 = vrot.lane.b32.xlu0 %v5259_v59, %s7006_s26  ;;  %5305 = vrot.lane.b32.xlu1 %v5262_v51, %s7006_s26  ;;  %v5020_v30 = vpop.xlane.xlu1 %5019 }
 0x4f4   :  { %6952 = vrsqrt.f32 %v5161_v55  ;;  %v5260_v21 = vmul.f32 %v9062_v0, %v5221_v5  ;;  %v5105_v29 = vmul.f32 0.0625, %v5020_v30 }
 0x4f5   :  { %v6943_v46 = vpop.eup %6942 }
 0x4f6   :  { %v6945_v60 = vpop.eup %6944  ;;  %v5224_v50 = vmul.f32 %v6943_v46, %v8914_v47  ;;  %v5137_v13 = vadd.f32 1e-05, %v5105_v29 }
 0x4f7   :  { %v5197_v23 = vmul.f32 %v6945_v60, %v8905_v10  ;;  %5301 = vrot.lane.b32.xlu1 %v5260_v21, %s7006_s26  ;;  %v5026_v56 = vpop.xlane.xlu1 %5025 }
 0x4f8   :  { %v5263_v7 = vmul.f32 %v9062_v0, %v5224_v50  ;;  %v5107_v39 = vmul.f32 0.0625, %v5026_v56 }
 0x4f9   :  { %v6947_v9 = vpop.eup %6946  ;;  %v9104_v38 = vmul.f32 %v9062_v0, %v5197_v23 }
 0x4fa   :  { %v6949_v45 = vpop.eup %6948  ;;  %5307 = vrot.lane.b32.xlu0 %v5263_v7, %s7006_s26  ;;  %v5226_v14 = vmul.f32 %v6947_v9, %v8931_v26  ;;  %v5139_v63 = vadd.f32 1e-05, %v5107_v39 }
 0x4fb   :  { %v5199_v36 = vmul.f32 %v6949_v45, %v8918_v22  ;;  %v5005_v22 = vpop.xlane.xlu0 %5004  ;;  %v5032_v53 = vpop.xlane.xlu1 %5031 }
 0x4fc   :  { %v5265_v49 = vmul.f32 %v9062_v0, %v5226_v14  ;;  %6954 = vrsqrt.f32 %v5139_v63  ;;  %v5100_v1 = vmul.f32 0.0625, %v5005_v22 }
 0x4fd   :  { %v9111_v47 = vmul.f32 %v9062_v0, %v5199_v36  ;;  %v6951_v10 = vpop.eup %6950  ;;  %6956 = vrsqrt.f32 %v5137_v13 }
 0x4fe   :  { %5311 = vrot.lane.b32.xlu0 %v5265_v49, %s7006_s26  ;;  %v5227_v54 = vmul.f32 %v6951_v10, %v8947_v57  ;;  %v5132_v25 = vadd.f32 1e-05, %v5100_v1  ;;  %v5352_v49 = vlaneseq }
 0x4ff   :  { %v5011_v48 = vpop.xlane.xlu0 %5010 }
 0x500   :  { %v5266_v26 = vmul.f32 %v9062_v0, %v5227_v54  ;;  %v5102_v8 = vmul.f32 0.0625, %v5011_v48  ;;  %v9129_v56 = vshrl.u32 %v5352_v49, 7 }
 0x501   :  { %v6953_v15 = vpop.eup %6952 }
 0x502   :  { %v5225_v42 = vmul.f32 %v6953_v15, %v8955_v12  ;;  %v5038_v12 = vpop.xlane.xlu1 %5037  ;;  %v5134_v59 = vadd.f32 1e-05, %v5102_v8 }
 0x503   :  { %v5017_v44 = vpop.xlane.xlu0 %5016  ;;  %v5111_v22 = vmul.f32 0.0625, %v5038_v12 }
 0x504   :  { %v5264_v61 = vmul.f32 %v9062_v0, %v5225_v42  ;;  %v5104_v4 = vmul.f32 0.0625, %v5017_v44 }
 0x506   :  { %5309 = vrot.lane.b32.xlu1 %v5264_v61, %s7006_s26  ;;  %v5044_v57 = vpop.xlane.xlu1 %5043  ;;  %v5136_v33 = vadd.f32 1e-05, %v5104_v4  ;;  %v7007_v61 = vmov 1983009808  }
 0x507   :  { %v5023_v16 = vpop.xlane.xlu0 %5022  ;;  %v5113_v42 = vmul.f32 0.0625, %v5044_v57  ;;  %v5350_v54 = vunpack.c.l.s4 %v7007_v61 }
 0x508   :  { %v5106_v17 = vmul.f32 0.0625, %v5023_v16  ;;  %6958 = vrsqrt.f32 %v5136_v33 }
 0x509   :  { %6960 = vrsqrt.f32 %v5132_v25  ;;  %v6955_v23 = vpop.eup %6954  ;;  %v5145_v39 = vadd.f32 1e-05, %v5113_v42  ;;  %v5351_v29 = vunpack.c.0.s8 %v5350_v54 }
 0x50a   :  { %5313 = vrot.lane.b32.xlu1 %v5266_v26, %s7006_s26  ;;  %v5050_v31 = vpop.xlane.xlu1 %5049  ;;  %v5138_v20 = vadd.f32 1e-05, %v5106_v17  ;;  %v5203_v14 = vmul.f32 %v6955_v23, %v8985_v24  ;;  %v6957_v36 = vpop.eup %6956  ;;  %v5109_v26 = vmul.f32 0.0625, %v5032_v53 }
 0x50b   :  { %v5029_v52 = vpop.xlane.xlu0 %5028  ;;  %v5201_v30 = vmul.f32 %v6957_v36, %v8972_v28  ;;  %v5115_v44 = vmul.f32 0.0625, %v5050_v31 }
 0x50c   :  { %v5108_v51 = vmul.f32 0.0625, %v5029_v52  ;;  %6962 = vrsqrt.f32 %v5138_v20  ;;  %v5242_v48 = vmul.f32 %v9062_v0, %v5203_v14  ;;  %v5141_v53 = vadd.f32 1e-05, %v5109_v26 }
 0x50d   :  { %6964 = vrsqrt.f32 %v5134_v59  ;;  %v5240_v28 = vmul.f32 %v9062_v0, %v5201_v30  ;;  %v5147_v17 = vadd.f32 1e-05, %v5115_v44 }
 0x50e   :  { %v5140_v60 = vadd.f32 1e-05, %v5108_v51 }
 0x50f   :  { %v5035_v2 = vpop.xlane.xlu0 %5034 }
 0x510   :  { %v5110_v5 = vmul.f32 0.0625, %v5035_v2 }
 0x512   :  { %v5142_v7 = vadd.f32 1e-05, %v5110_v5 }
 0x513   :  { %v5041_v62 = vpop.xlane.xlu0 %5040 }
 0x514   :  { %v5112_v41 = vmul.f32 0.0625, %v5041_v62  ;;  %v5143_v62 = vadd.f32 1e-05, %v5111_v22 }
 0x515   :  { %v6959_v52 = vpop.eup %6958 }
 0x516   :  { %v5144_v46 = vadd.f32 1e-05, %v5112_v41  ;;  %v6961_v57 = vpop.eup %6960  ;;  %v5200_v8 = vmul.f32 %v6959_v52, %v8965_v37  ;;  %v7008_v37 = vmov 1934713408  }
 0x517   :  { %v5047_v19 = vpop.xlane.xlu0 %5046  ;;  %v5196_v20 = vmul.f32 %v6961_v57, %v8928_v11  ;;  %v5414_v5 = vunpack.c.l.s4 %v7008_v37 }
 0x518   :  { %v5114_v21 = vmul.f32 0.0625, %v5047_v19  ;;  %6966 = vrsqrt.f32 %v5144_v46 }
 0x519   :  { %6968 = vrsqrt.f32 %v5140_v60  ;;  %v6963_v4 = vpop.eup %6962 }
 0x51a   :  { %v5146_v45 = vadd.f32 1e-05, %v5114_v21  ;;  %6970 = vrsqrt.f32 %v5142_v7  ;;  %v6965_v1 = vpop.eup %6964  ;;  %v5202_v51 = vmul.f32 %v6963_v4, %v8977_v18 }
 0x51b   :  { %v5198_v60 = vmul.f32 %v6965_v1, %v8942_v58  ;;  %v5235_v58 = vmul.f32 %v9062_v0, %v5196_v20 }
 0x51c   :  { %6972 = vrsqrt.f32 %v5146_v45  ;;  %v5241_v36 = vmul.f32 %v9062_v0, %v5202_v51 }
 0x51d   :  { %6974 = vrsqrt.f32 %v5145_v39  ;;  %v5237_v22 = vmul.f32 %v9062_v0, %v5198_v60 }
 0x51e   :  { %6976 = vrsqrt.f32 %v5141_v53  ;;  %v5415_v53 = vunpack.c.0.s8 %v5414_v5 }
 0x51f   :  { %6978 = vrsqrt.f32 %v5143_v62 }
 0x520   :  { %6980 = vrsqrt.f32 %v5147_v17  ;;  %v9196_v37 = vsub.s32 %v5415_v53, %v9129_v56 }
 0x525   :  { %v6967_v41 = vpop.eup %6966 }
 0x526   :  { %v6969_v59 = vpop.eup %6968  ;;  %v5208_v23 = vmul.f32 %v6967_v41, %v9027_v32 }
 0x527   :  { %v6971_v7 = vpop.eup %6970  ;;  %v5204_v49 = vmul.f32 %v6969_v59, %v8995_v3 }
 0x528   :  { %v5206_v30 = vmul.f32 %v6971_v7, %v9009_v43 }
 0x529   :  { %v6973_v14 = vpop.eup %6972  ;;  %v5243_v57 = vmul.f32 %v9062_v0, %v5204_v49 }
 0x52a   :  { %v5210_v52 = vmul.f32 %v6973_v14, %v9039_v35 }
 0x52c   :  { %v5249_v4 = vmul.f32 %v9062_v0, %v5210_v52 }
 0x550   :  { %v9120_v55 = vpop.permute.xlu1 %5287 }
 0x551   :  { %v5333_v39 = vsel %vm1192_vm3, %v5237_v22, %v9120_v55  ;;  %v6975_v55 = vpop.eup %6974 }
 0x552   :  { %v6977_v17 = vpop.eup %6976 }
 0x553   :  { %v6979_v20 = vpop.eup %6978  ;;  %v5205_v14 = vmul.f32 %v6977_v17, %v9003_v6 }
 0x554   :  { %v5290_v50 = vpop.permute.xlu1 %5289  ;;  %v6981_v59 = vpop.eup %6980  ;;  %v5207_v7 = vmul.f32 %v6979_v20, %v9017_v27 }
 0x555   :  { %v9122_v9 = vpop.permute.xlu0 %5283  ;;  %v5334_v2 = vsel %vm1192_vm3, %v9111_v47, %v5290_v50  ;;  %v9139_v47 = vsub.s32 %v5351_v29, %v9129_v56  ;;  %v5239_v50 = vmul.f32 %v9062_v0, %v5200_v8 }
 0x559   :  { %v9125_v10 = vpop.permute.xlu0 %5295  ;;  %v5286_v15 = vpop.permute.xlu1 %5285 }
 0x55a   :  { %v5332_v19 = vsel %vm1192_vm3, %v9104_v38, %v5286_v15  ;;  %v5337_v3 = vsel %vm1192_vm3, %v5241_v36, %v9125_v10  ;;  %v5245_v10 = vmul.f32 %v9062_v0, %v5206_v30 }
 0x55b   :  { %v5363_v29 = vcombine.low %v5333_v39, %v5337_v3 }
 0x55d   :  { %v5292_v24 = vpop.permute.xlu0 %5291  ;;  %v5298_v16 = vpop.permute.xlu1 %5297  ;;  %v5371_v8 = vrot.slane %v5363_v29, %v9139_v47 }
 0x55e   :  { %v5338_v63 = vsel %vm1192_vm3, %v5242_v48, %v5298_v16  ;;  %v5335_v32 = vsel %vm1192_vm3, %v5239_v50, %v5292_v24  ;;  %v5331_v48 = vsel %vm1192_vm3, %v5235_v58, %v9122_v9  ;;  %v5247_v16 = vmul.f32 %v9062_v0, %v5208_v23 }
 0x55f   :  { %v5499_v12 = vcombine.low %v5334_v2, %v5338_v63  ;;  %v5500_v13 = vcombine.high %v5334_v2, %v5338_v63  ;;  %v5347_v44 = vcombine.low %v5331_v48, %v5335_v32  ;;  %v5348_v24 = vcombine.high %v5331_v48, %v5335_v32 }
 0x560   :  { %v5364_v63 = vcombine.high %v5333_v39, %v5337_v3  ;;  %v5211_v48 = vmul.f32 %v6981_v59, %v9046_v34 }
 0x561   :  { %v9136_v31 = vpop.permute.xlu0 %5303  ;;  %v5294_v33 = vpop.permute.xlu1 %5293  ;;  %v9150_v11 = vrot.slane %v5499_v12, %v9139_v47  ;;  %v9153_v18 = vrot.slane %v5500_v13, %v9139_v47  ;;  %v5355_v43 = vrot.slane %v5347_v44, %v9139_v47  ;;  %v5362_v12 = vrot.slane %v5348_v24, %v9139_v47 }
 0x562   :  { %v5336_v25 = vsel %vm1192_vm3, %v5240_v28, %v5294_v33  ;;  %v5378_v33 = vrot.slane %v5364_v63, %v9139_v47  ;;  %v5341_v41 = vsel %vm1192_vm3, %v5245_v10, %v9136_v31  ;;  %v5244_v44 = vmul.f32 %v9062_v0, %v5205_v14 }
 0x563   :  { %v5483_v46 = vcombine.low %v5332_v19, %v5336_v25  ;;  %v5484_v21 = vcombine.high %v5332_v19, %v5336_v25  ;;  %v5411_v5 = vcombine.low %v5355_v43, %v5371_v8 }
 0x564   :  { %v5428_v22 = vcombine.high %v5362_v12, %v5378_v33 }
 0x565   :  { %v9156_v38 = vrot.slane %v5483_v46, %v9139_v47  ;;  %v9159_v45 = vrot.slane %v5484_v21, %v9139_v47  ;;  %v5300_v15 = vpop.permute.xlu0 %5299  ;;  %v5306_v35 = vpop.permute.xlu1 %5305  ;;  %v5427_v46 = vcombine.low %v5362_v12, %v5378_v33  ;;  %v5209_v21 = vmul.f32 %v6975_v55, %v9033_v40 }
 0x566   :  { %v5339_v13 = vsel %vm1192_vm3, %v5243_v57, %v5300_v15  ;;  %v5412_v15 = vcombine.high %v5355_v43, %v5371_v8  ;;  %v9208_v3 = vrot.slane %v5411_v5, %v9196_v37  ;;  %v5442_v63 = vrot.slane %v5428_v22, %v9196_v37 }
 0x567   :  { %v5547_v42 = vcombine.low %v9156_v38, %v9150_v11  ;;  %v5548_v61 = vcombine.high %v9156_v38, %v9150_v11  ;;  %v5563_v54 = vcombine.low %v9159_v45, %v9153_v18  ;;  %v5564_v26 = vcombine.high %v9159_v45, %v9153_v18 }
 0x568   :  { %v5248_v40 = vmul.f32 %v9062_v0, %v5209_v21  ;;  %v9211_v30 = vrot.slane %v5427_v46, %v9196_v37  ;;  %v5426_v29 = vrot.slane %v5412_v15, %v9196_v37  ;;  %v5246_v57 = vmul.f32 %v9062_v0, %v5207_v7 }
 0x569   :  { %v5302_v58 = vpop.permute.xlu1 %5301  ;;  %v5562_v21 = vrot.slane %v5548_v61, %v9196_v37 }
 0x56a   :  { %v5340_v53 = vsel %vm1192_vm3, %v5244_v44, %v5302_v58  ;;  %v5342_v55 = vsel %vm1192_vm3, %v5246_v57, %v5306_v35  ;;  %v5555_v35 = vrot.slane %v5547_v42, %v9196_v37  ;;  %v5578_v42 = vrot.slane %v5564_v26, %v9196_v37 }
 0x56c   :  { %v5308_v2 = vpop.permute.xlu0 %5307 }
 0x56d   :  { %v5343_v9 = vsel %vm1192_vm3, %v5247_v16, %v5308_v2 }
 0x56e   :  { %v5379_v62 = vcombine.low %v5339_v13, %v5343_v9  ;;  %v5380_v28 = vcombine.high %v5339_v13, %v5343_v9  ;;  %v5250_v9 = vmul.f32 %v9062_v0, %v5211_v48 }
 0x570   :  { %v5312_v1 = vpop.permute.xlu0 %5311  ;;  %v5387_v60 = vrot.slane %v5379_v62, %v9139_v47  ;;  %v5394_v50 = vrot.slane %v5380_v28, %v9139_v47 }
 0x571   :  { %v5345_v25 = vsel %vm1192_vm3, %v5249_v4, %v5312_v1 }
 0x572   :  { %v5395_v51 = vcombine.low %v5341_v41, %v5345_v25  ;;  %v5396_v19 = vcombine.high %v5341_v41, %v5345_v25 }
 0x574   :  { %v5403_v23 = vrot.slane %v5395_v51, %v9139_v47  ;;  %v5410_v31 = vrot.slane %v5396_v19, %v9139_v47 }
 0x576   :  { %v5443_v36 = vcombine.low %v5387_v60, %v5403_v23  ;;  %v5444_v56 = vcombine.high %v5387_v60, %v5403_v23  ;;  %v5459_v32 = vcombine.low %v5394_v50, %v5410_v31  ;;  %v5460_v49 = vcombine.high %v5394_v50, %v5410_v31 }
 0x578   :  { %v9214_v27 = vrot.slane %v5443_v36, %v9196_v37  ;;  %v9217_v6 = vrot.slane %v5459_v32, %v9196_v37  ;;  %v5458_v24 = vrot.slane %v5444_v56, %v9196_v37  ;;  %v5310_v16 = vpop.permute.xlu1 %5309  ;;  %v5474_v52 = vrot.slane %v5460_v49, %v9196_v37 }
 0x579   :  { %v5344_v34 = vsel %vm1192_vm3, %v5248_v40, %v5310_v16 }
 0x57a   :  { %v5480_v39 = vcombine.high %v9211_v30, %v9217_v6  ;;  %v5476_v2 = vcombine.high %v9208_v3, %v9214_v27  ;;  %v5475_v10 = vcombine.low %v9208_v3, %v9214_v27  ;;  %v5479_v43 = vcombine.low %v9211_v30, %v9217_v6 }
 0x57b   :  { %v5515_v12 = vcombine.low %v5340_v53, %v5344_v34  ;;  %v5516_v13 = vcombine.high %v5340_v53, %v5344_v34  ;;  %v5481_v62 = vcombine.low %v5442_v63, %v5474_v52  ;;  %v5477_v28 = vcombine.low %v5426_v29, %v5458_v24 }
 0x57c   :  { %5632 = vrot.lane.b32.xlu1 %v5480_v39, %s7009_s2  ;;  %5620 = vrot.lane.b32.xlu0 %v5476_v2, %s7009_s2  ;;  %v5314_v4 = vpop.permute.xlu1 %5313  ;;  %v5482_v20 = vcombine.high %v5442_v63, %v5474_v52  ;;  %v5478_v51 = vcombine.high %v5426_v29, %v5458_v24 }
 0x57d   :  { %v5346_v0 = vsel %vm1192_vm3, %v5250_v9, %v5314_v4  ;;  %v5523_v8 = vrot.slane %v5515_v12, %v9139_v47  ;;  %v5530_v33 = vrot.slane %v5516_v13, %v9139_v47 }
 0x57e   :  { %v5531_v1 = vcombine.low %v5342_v55, %v5346_v0  ;;  %v5532_v17 = vcombine.high %v5342_v55, %v5346_v0 }
 0x580   :  { %5636 = vrot.lane.b32.xlu1 %v5481_v62, %s7010_s27  ;;  %5624 = vrot.lane.b32.xlu0 %v5477_v28, %s7010_s27  ;;  %v5539_v41 = vrot.slane %v5531_v1, %v9139_v47  ;;  %v5546_v25 = vrot.slane %v5532_v17, %v9139_v47  ;;  %v5571_v47 = vrot.slane %v5563_v54, %v9196_v37 }
 0x582   :  { %v5579_v19 = vcombine.low %v5523_v8, %v5539_v41  ;;  %v5580_v59 = vcombine.high %v5523_v8, %v5539_v41  ;;  %v5595_v5 = vcombine.low %v5530_v33, %v5546_v25  ;;  %v5596_v46 = vcombine.high %v5530_v33, %v5546_v25 }
 0x584   :  { %5640 = vrot.lane.b32.xlu1 %v5482_v20, %s7011_s28  ;;  %5628 = vrot.lane.b32.xlu0 %v5478_v51, %s7011_s28  ;;  %v5587_v60 = vrot.slane %v5579_v19, %v9196_v37  ;;  %v5594_v50 = vrot.slane %v5580_v59, %v9196_v37  ;;  %v5603_v11 = vrot.slane %v5595_v5, %v9196_v37 }
 0x585   :  { %v5610_v38 = vrot.slane %v5596_v46, %v9196_v37 }
 0x586   :  { %v5616_v61 = vcombine.high %v5571_v47, %v5603_v11  ;;  %v5612_v23 = vcombine.high %v5555_v35, %v5587_v60  ;;  %v5613_v54 = vcombine.low %v5562_v21, %v5594_v50  ;;  %v5614_v14 = vcombine.high %v5562_v21, %v5594_v50 }
 0x587   :  { %v5617_v31 = vcombine.low %v5578_v42, %v5610_v38  ;;  %v5618_v7 = vcombine.high %v5578_v42, %v5610_v38  ;;  %v5611_v58 = vcombine.low %v5555_v35, %v5587_v60  ;;  %v5615_v18 = vcombine.low %v5571_v47, %v5603_v11 }
 0x588   :  { %5656 = vrot.lane.b32.xlu1 %v5616_v61, %s7009_s2  ;;  %5644 = vrot.lane.b32.xlu0 %v5612_v23, %s7009_s2 }
 0x58c   :  { %5660 = vrot.lane.b32.xlu1 %v5617_v31, %s7010_s27  ;;  %5648 = vrot.lane.b32.xlu0 %v5613_v54, %s7010_s27 }
 0x590   :  { %5664 = vrot.lane.b32.xlu1 %v5618_v7, %s7011_s28  ;;  %5652 = vrot.lane.b32.xlu0 %v5614_v14, %s7011_s28 }
 0x5ee   :  { %v5621_v45 = vpop.permute.xlu0 %5620  ;;  %v5633_v26 = vpop.permute.xlu1 %5632 }
 0x5ef   :  { %v5668_v56 = vsel %vm5667_vm4, %v5475_v10, %v5621_v45  ;;  %v5673_v32 = vsel %vm5667_vm4, %v5479_v43, %v5633_v26 }
 0x5f2   :  { %v5625_v37 = vpop.permute.xlu0 %5624  ;;  %v5637_v36 = vpop.permute.xlu1 %5636 }
 0x5f3   :  { %v5670_v49 = vsel %vm5669_vm5, %v5668_v56, %v5625_v37  ;;  %v5674_v15 = vsel %vm5669_vm5, %v5673_v32, %v5637_v36 }
 0x5f6   :  { %v5629_v22 = vpop.permute.xlu0 %5628  ;;  %v5641_v40 = vpop.permute.xlu1 %5640 }
 0x5f7   :  { %v5672_v48 = vsel %vm5671_vm6, %v5670_v49, %v5629_v22  ;;  %v5675_v3 = vsel %vm5671_vm6, %v5674_v15, %v5641_v40 }
 0x5f8   :  { %5682 = vst [vmem:[#allocation3] sm:$0xff] %v5672_v48  ;;  %5683 = vst [vmem:[#allocation3 + $0x8] sm:$0xff] %v5675_v3 }
 0x5fa   :  { %v5645_v30 = vpop.permute.xlu0 %5644  ;;  %v5657_v27 = vpop.permute.xlu1 %5656 }
 0x5fb   :  { %v5676_v24 = vsel %vm5667_vm4, %v5611_v58, %v5645_v30  ;;  %v5679_v16 = vsel %vm5667_vm4, %v5615_v18, %v5657_v27 }
 0x5fe   :  { %v5649_v6 = vpop.permute.xlu0 %5648  ;;  %v5661_v44 = vpop.permute.xlu1 %5660 }
 0x5ff   :  { %v5677_v52 = vsel %vm5669_vm5, %v5676_v24, %v5649_v6  ;;  %v5680_v34 = vsel %vm5669_vm5, %v5679_v16, %v5661_v44 }
 0x602   :  { %v5653_v39 = vpop.permute.xlu0 %5652  ;;  %v5665_v2 = vpop.permute.xlu1 %5664 }
 0x603   :  { %v5678_v29 = vsel %vm5671_vm6, %v5677_v52, %v5653_v39  ;;  %v5681_v63 = vsel %vm5671_vm6, %v5680_v34, %v5665_v2 }
 0x604   :  { %5684 = vst [vmem:[#allocation3 + $0x10] sm:$0xff] %v5678_v29  ;;  %5685 = vst [vmem:[#allocation3 + $0x18] sm:$0xff] %v5681_v63 }
 0x605   :  { %6993 = shalt.err (!%p6990_p4)
}
 0x606   :  { %5695 = dma.vmem_to_hbm [thread:$0]  %s5693_s30, 512, %s9289_s4, [#allocation4]  }
 0x607   :  { %7002 = dma.done.wait [#allocation4], 512  }
 0x608   :  { %7003 = vsyncadd [#allocation4], 4294966784 }
 0x609   :  { %5699 = vsyncpa [#allocation4], 1 }

// kernel: tpu_custom_call.1
= control target key start
LH: loop header
LB: loop body
LE: loop exit
PB: predicated region body
PF: predicated region fallthrough
CT: control target
= control target key end

     0   :  { %vm111_vm0 = vcmask 1043456   ;;  %vm86_vm1 = vcmask 64512   ;;  %s8859_s0 = inlined_call_operand.vmem [shape: bf16[8,16,8], index: 0, kind: input, shape index: {}]   ;;  %s8860_s1 = inlined_call_operand.vmem [shape: bf16[10,8,16], index: 1, kind: input, shape index: {}]   ;;  %s8861_s2 = inlined_call_operand.vmem [shape: f32[1,16], index: 2, kind: input, shape index: {}]   ;;  %s8862_s3 = inlined_call_operand.<no memory space> [shape: f32[1], index: 3, kind: input, shape index: {}]   ;;  %s8863_s4 = inlined_call_operand.hbm [shape: f32[8,16,32], index: 4, kind: output, shape index: {}]  }
   0x1   :  { %v36_v0 = vld [vmem:[%s8860_s1] sm:$0xf]  ;;  %v6727_v3 = vld [vmem:[%s8859_s0 + $0x8] sm:$0xff]   ;;  %v6732_v4 = vld [vmem:[%s8859_s0 + $0x10] sm:$0xff]  }
   0x2   :  { %v6718_v1 = vld [vmem:[%s8859_s0] sm:$0xff]   ;;  %6315 = vmatprep.subr.msk.bf16.mxu0 %vm111_vm0, %v36_v0  ;;  %v113_v2 = vsel %vm111_vm0, %v36_v0, 0  ;;  %v38_v5 = vld [vmem:[%s8860_s1 + $0x8] sm:$0xf]  ;;  %v6746_v6 = vld [vmem:[%s8859_s0 + $0x18] sm:$0xff]  }
   0x3   :  { %5752 = vmatpush3.bf16.msra.mxu0 %v113_v2  ;;  %5753 = vmatprep.mubr.msk.bf16.mxu0 %vm86_vm1, %v6718_v1  ;;  %v313_v7 = vsel %vm111_vm0, %v38_v5, 0  ;;  %v37_v8 = vld [vmem:[%s8860_s1 + $0x4] sm:$0xf]  ;;  %v39_v9 = vld [vmem:[%s8860_s1 + $0xc] sm:$0xf] }
   0x4   :  { %5771 = vmatprep.mubr.msk.bf16.mxu1 %vm86_vm1, %v6718_v1  ;;  %6317 = vmatprep.subr.msk.bf16.mxu0 %vm111_vm0, %v38_v5  ;;  %v6759_v10 = vld [vmem:[%s8859_s0 + $0x20] sm:$0xff]   ;;  %v213_v11 = vsel %vm111_vm0, %v37_v8, 0  ;;  %v40_v12 = vld [vmem:[%s8860_s1 + $0x10] sm:$0xf]  ;;  %v413_v13 = vsel %vm111_vm0, %v39_v9, 0 }
   0x5   :  { %6316 = vmatprep.subr.msk.bf16.mxu1 %vm111_vm0, %v37_v8 }
   0x6   :  { %5754 = vmatmul.mubr.msk.bf16.vlgmr.msra.gmra.mxu0 %vm86_vm1, %v6727_v3  ;;  %5770 = vmatpush3.bf16.msra.mxu1 %v213_v11 }
   0x7   :  { %5757 = vmatprep.mubr.msk.bf16.mxu0 %vm86_vm1, %v6732_v4  ;;  %5788 = vmatpush3.bf16.msra.mxu0 %v313_v7 }
   0x8   :  { %6319 = vmatprep.subr.msk.bf16.mxu0 %vm111_vm0, %v40_v12  ;;  %6318 = vmatprep.subr.msk.bf16.mxu1 %vm111_vm0, %v39_v9 }
   0x9   :  { %10 = vsyncpa [#allocation4], 0  ;;  %v41_v14 = vld [vmem:[%s8860_s1 + $0x14] sm:$0xf]  ;;  %5772 = vmatmul.mubr.msk.bf16.vlgmr.msra.gmra.mxu1 %vm86_vm1, %v6727_v3  ;;  %v6784_v15 = vld [vmem:[%s8859_s0 + $0x28] sm:$0xff]   ;;  %v513_v18 = vsel %vm111_vm0, %v40_v12, 0 }
   0xa   :  { %5775 = vmatprep.mubr.msk.bf16.mxu1 %vm86_vm1, %v6732_v4  ;;  %5806 = vmatpush3.bf16.msra.mxu1 %v413_v13  ;;  %v6789_v16 = vld [vmem:[%s8859_s0 + $0x30] sm:$0xff]   ;;  %v6802_v17 = vld [vmem:[%s8859_s0 + $0x38] sm:$0xff]   ;;  %v613_v20 = vsel %vm111_vm0, %v41_v14, 0  ;;  %v45_v24 = vld [vmem:[%s8860_s1 + $0x24] sm:$0xf]  ;;  %v8864_v28 = vmov 0.0  }
   0xb   :  { %6320 = vmatprep.subr.msk.bf16.mxu1 %vm111_vm0, %v41_v14  ;;  %v42_v19 = vld [vmem:[%s8860_s1 + $0x18] sm:$0xf]  ;;  %v43_v21 = vld [vmem:[%s8860_s1 + $0x1c] sm:$0xf]  ;;  %v1013_v25 = vsel %vm111_vm0, %v45_v24, 0  ;;  %vm6682_vm2 = vmmov 0  }
   0xc   :  { %v713_v22 = vsel %vm111_vm0, %v42_v19, 0  ;;  %v813_v23 = vsel %vm111_vm0, %v43_v21, 0  ;;  %v44_v26 = vld [vmem:[%s8860_s1 + $0x20] sm:$0xf]  ;;  %vm1192_vm3 = vcmask 130048   ;;  %s6683_s26 = smov 16  }
   0xd   :  { %v913_v27 = vsel %vm111_vm0, %v44_v26, 0  ;;  %vm5347_vm4 = vcmask 261120  }
   0xe   :  { %5758 = vmatmul.mubr.msk.bf16.gmra.mxu0 %vm86_vm1, %v6746_v6 }
   0xf   :  { %5761 = vmatprep.mubr.msk.bf16.mxu0 %vm86_vm1, %v6759_v10 }
  0x11   :  { %5776 = vmatmul.mubr.msk.bf16.gmra.mxu1 %vm86_vm1, %v6746_v6 }
  0x12   :  { %5779 = vmatprep.mubr.msk.bf16.mxu1 %vm86_vm1, %v6759_v10 }
  0x16   :  { %5762 = vmatmul.mubr.msk.bf16.gmra.mxu0 %vm86_vm1, %v6784_v15 }
  0x17   :  { %5765 = vmatprep.mubr.msk.bf16.mxu0 %vm86_vm1, %v6789_v16 }
  0x19   :  { %5780 = vmatmul.mubr.msk.bf16.gmra.mxu1 %vm86_vm1, %v6784_v15 }
  0x1a   :  { %5783 = vmatprep.mubr.msk.bf16.mxu1 %vm86_vm1, %v6789_v16 }
  0x1e   :  { %5766 = vmatmul.mubr.msk.bf16.gmra.mxu0 %vm86_vm1, %v6802_v17 }
  0x1f   :  { %5789 = vmatprep.mubr.msk.bf16.mxu0 %vm86_vm1, %v6718_v1 }
  0x21   :  { %5784 = vmatmul.mubr.msk.bf16.gmra.mxu1 %vm86_vm1, %v6802_v17 }
  0x22   :  { %5807 = vmatprep.mubr.msk.bf16.mxu1 %vm86_vm1, %v6718_v1 }
  0x26   :  { %5790 = vmatmul.mubr.msk.bf16.vlgmr.msra.gmra.mxu0 %vm86_vm1, %v6727_v3 }
  0x27   :  { %5793 = vmatprep.mubr.msk.bf16.mxu0 %vm86_vm1, %v6732_v4  ;;  %5824 = vmatpush3.bf16.msra.mxu0 %v513_v18 }
  0x28   :  { %6321 = vmatprep.subr.msk.bf16.mxu0 %vm111_vm0, %v42_v19 }
  0x29   :  { %5808 = vmatmul.mubr.msk.bf16.vlgmr.msra.gmra.mxu1 %vm86_vm1, %v6727_v3 }
  0x2a   :  { %5811 = vmatprep.mubr.msk.bf16.mxu1 %vm86_vm1, %v6732_v4  ;;  %5842 = vmatpush3.bf16.msra.mxu1 %v613_v20 }
  0x2b   :  { %6322 = vmatprep.subr.msk.bf16.mxu1 %vm111_vm0, %v43_v21 }
  0x2e   :  { %5794 = vmatmul.mubr.msk.bf16.gmra.mxu0 %vm86_vm1, %v6746_v6 }
  0x2f   :  { %5797 = vmatprep.mubr.msk.bf16.mxu0 %vm86_vm1, %v6759_v10 }
  0x31   :  { %5812 = vmatmul.mubr.msk.bf16.gmra.mxu1 %vm86_vm1, %v6746_v6 }
  0x32   :  { %5815 = vmatprep.mubr.msk.bf16.mxu1 %vm86_vm1, %v6759_v10 }
  0x36   :  { %5798 = vmatmul.mubr.msk.bf16.gmra.mxu0 %vm86_vm1, %v6784_v15 }
  0x37   :  { %5801 = vmatprep.mubr.msk.bf16.mxu0 %vm86_vm1, %v6789_v16 }
  0x39   :  { %5816 = vmatmul.mubr.msk.bf16.gmra.mxu1 %vm86_vm1, %v6784_v15 }
  0x3a   :  { %5819 = vmatprep.mubr.msk.bf16.mxu1 %vm86_vm1, %v6789_v16 }
  0x3e   :  { %5802 = vmatmul.mubr.msk.bf16.gmra.mxu0 %vm86_vm1, %v6802_v17 }
  0x3f   :  { %5825 = vmatprep.mubr.msk.bf16.mxu0 %vm86_vm1, %v6718_v1 }
  0x41   :  { %5820 = vmatmul.mubr.msk.bf16.gmra.mxu1 %vm86_vm1, %v6802_v17 }
  0x42   :  { %5843 = vmatprep.mubr.msk.bf16.mxu1 %vm86_vm1, %v6718_v1 }
  0x46   :  { %5826 = vmatmul.mubr.msk.bf16.vlgmr.msra.gmra.mxu0 %vm86_vm1, %v6727_v3 }
  0x47   :  { %5829 = vmatprep.mubr.msk.bf16.mxu0 %vm86_vm1, %v6732_v4  ;;  %5860 = vmatpush3.bf16.msra.mxu0 %v713_v22 }
  0x48   :  { %6323 = vmatprep.subr.msk.bf16.mxu0 %vm111_vm0, %v44_v26 }
  0x49   :  { %5844 = vmatmul.mubr.msk.bf16.vlgmr.msra.gmra.mxu1 %vm86_vm1, %v6727_v3 }
  0x4a   :  { %5847 = vmatprep.mubr.msk.bf16.mxu1 %vm86_vm1, %v6732_v4  ;;  %5878 = vmatpush3.bf16.msra.mxu1 %v813_v23 }
  0x4b   :  { %6324 = vmatprep.subr.msk.bf16.mxu1 %vm111_vm0, %v45_v24 }
  0x4e   :  { %5830 = vmatmul.mubr.msk.bf16.gmra.mxu0 %vm86_vm1, %v6746_v6 }
  0x4f   :  { %5833 = vmatprep.mubr.msk.bf16.mxu0 %vm86_vm1, %v6759_v10 }
  0x51   :  { %5848 = vmatmul.mubr.msk.bf16.gmra.mxu1 %vm86_vm1, %v6746_v6 }
  0x52   :  { %5851 = vmatprep.mubr.msk.bf16.mxu1 %vm86_vm1, %v6759_v10 }
  0x56   :  { %5834 = vmatmul.mubr.msk.bf16.gmra.mxu0 %vm86_vm1, %v6784_v15 }
  0x57   :  { %5837 = vmatprep.mubr.msk.bf16.mxu0 %vm86_vm1, %v6789_v16 }
  0x59   :  { %5852 = vmatmul.mubr.msk.bf16.gmra.mxu1 %vm86_vm1, %v6784_v15 }
  0x5a   :  { %5855 = vmatprep.mubr.msk.bf16.mxu1 %vm86_vm1, %v6789_v16 }
  0x5e   :  { %5838 = vmatmul.mubr.msk.bf16.gmra.mxu0 %vm86_vm1, %v6802_v17 }
  0x5f   :  { %5861 = vmatprep.mubr.msk.bf16.mxu0 %vm86_vm1, %v6718_v1 }
  0x61   :  { %5856 = vmatmul.mubr.msk.bf16.gmra.mxu1 %vm86_vm1, %v6802_v17 }
  0x62   :  { %5879 = vmatprep.mubr.msk.bf16.mxu1 %vm86_vm1, %v6718_v1 }
  0x66   :  { %5862 = vmatmul.mubr.msk.bf16.vlgmr.msra.gmra.mxu0 %vm86_vm1, %v6727_v3 }
  0x67   :  { %5865 = vmatprep.mubr.msk.bf16.mxu0 %vm86_vm1, %v6732_v4  ;;  %5896 = vmatpush3.bf16.msra.mxu0 %v913_v27 }
  0x68   :  { %5931 = vmatprep.subr.bf16.mxu0 %v8864_v28 }
  0x69   :  { %5880 = vmatmul.mubr.msk.bf16.vlgmr.msra.gmra.mxu1 %vm86_vm1, %v6727_v3 }
  0x6a   :  { %5883 = vmatprep.mubr.msk.bf16.mxu1 %vm86_vm1, %v6732_v4  ;;  %5914 = vmatpush3.bf16.msra.mxu1 %v1013_v25 }
  0x6b   :  { %5937 = vmatprep.subr.bf16.mxu1 %v8864_v28 }
  0x6e   :  { %5866 = vmatmul.mubr.msk.bf16.gmra.mxu0 %vm86_vm1, %v6746_v6 }
  0x6f   :  { %5869 = vmatprep.mubr.msk.bf16.mxu0 %vm86_vm1, %v6759_v10 }
  0x71   :  { %5884 = vmatmul.mubr.msk.bf16.gmra.mxu1 %vm86_vm1, %v6746_v6 }
  0x72   :  { %5887 = vmatprep.mubr.msk.bf16.mxu1 %vm86_vm1, %v6759_v10 }
  0x76   :  { %5870 = vmatmul.mubr.msk.bf16.gmra.mxu0 %vm86_vm1, %v6784_v15 }
  0x77   :  { %5873 = vmatprep.mubr.msk.bf16.mxu0 %vm86_vm1, %v6789_v16 }
  0x79   :  { %5888 = vmatmul.mubr.msk.bf16.gmra.mxu1 %vm86_vm1, %v6784_v15 }
  0x7a   :  { %5891 = vmatprep.mubr.msk.bf16.mxu1 %vm86_vm1, %v6789_v16 }
  0x7e   :  { %5874 = vmatmul.mubr.msk.bf16.gmra.mxu0 %vm86_vm1, %v6802_v17 }
  0x7f   :  { %5897 = vmatprep.mubr.msk.bf16.mxu0 %vm86_vm1, %v6718_v1 }
  0x81   :  { %5892 = vmatmul.mubr.msk.bf16.gmra.mxu1 %vm86_vm1, %v6802_v17 }
  0x82   :  { %5915 = vmatprep.mubr.msk.bf16.mxu1 %vm86_vm1, %v6718_v1 }
  0x86   :  { %5898 = vmatmul.mubr.msk.bf16.vlgmr.msra.gmra.mxu0 %vm86_vm1, %v6727_v3 }
  0x87   :  { %5901 = vmatprep.mubr.msk.bf16.mxu0 %vm86_vm1, %v6732_v4 }
  0x89   :  { %5916 = vmatmul.mubr.msk.bf16.vlgmr.msra.gmra.mxu1 %vm86_vm1, %v6727_v3 }
  0x8a   :  { %5919 = vmatprep.mubr.msk.bf16.mxu1 %vm86_vm1, %v6732_v4 }
  0x8e   :  { %5902 = vmatmul.mubr.msk.bf16.gmra.mxu0 %vm86_vm1, %v6746_v6 }
  0x8f   :  { %5905 = vmatprep.mubr.msk.bf16.mxu0 %vm86_vm1, %v6759_v10 }
  0x91   :  { %5920 = vmatmul.mubr.msk.bf16.gmra.mxu1 %vm86_vm1, %v6746_v6 }
  0x92   :  { %5923 = vmatprep.mubr.msk.bf16.mxu1 %vm86_vm1, %v6759_v10 }
  0x96   :  { %5906 = vmatmul.mubr.msk.bf16.gmra.mxu0 %vm86_vm1, %v6784_v15 }
  0x97   :  { %5909 = vmatprep.mubr.msk.bf16.mxu0 %vm86_vm1, %v6789_v16 }
  0x99   :  { %5924 = vmatmul.mubr.msk.bf16.gmra.mxu1 %vm86_vm1, %v6784_v15 }
  0x9a   :  { %5927 = vmatprep.mubr.msk.bf16.mxu1 %vm86_vm1, %v6789_v16 }
  0x9e   :  { %5910 = vmatmul.mubr.msk.bf16.gmra.mxu0 %vm86_vm1, %v6802_v17 }
  0x9f   :  { %5933 = vmatprep.mubr.msk.bf16.mxu0 %vm6682_vm2, %v8864_v28 }
  0xa1   :  { %5928 = vmatmul.mubr.msk.bf16.gmra.mxu1 %vm86_vm1, %v6802_v17 }
  0xa2   :  { %5939 = vmatprep.mubr.msk.bf16.mxu1 %vm6682_vm2, %v8864_v28 }
  0xc6   :  { %v6968_v29 = vpop.f32.mrf.mxu0 }
  0xc8   :  { %v6970_v30 = vpop.f32.mrf.mxu0 }
  0xc9   :  { %v6980_v35 = vpop.f32.mrf.mxu1 }
  0xca   :  { %v6972_v31 = vpop.f32.mrf.mxu0 }
  0xcb   :  { %v6984_v37 = vpop.f32.mrf.mxu1 }
  0xcc   :  { %v6976_v33 = vpop.f32.mrf.mxu0 }
  0xcd   :  { %v6990_v40 = vpop.f32.mrf.mxu1 }
  0xce   :  { %v6978_v34 = vpop.f32.mrf.mxu0 }
  0xcf   :  { %v6996_v43 = vpop.f32.mrf.mxu1 }
  0xd0   :  { %v6982_v36 = vpop.f32.mrf.mxu0 }
  0xd1   :  { %v7000_v45 = vpop.f32.mrf.mxu1 }
  0xd2   :  { %v6986_v38 = vpop.f32.mrf.mxu0 }
  0xd3   :  { %v7004_v47 = vpop.f32.mrf.mxu1 }
  0xd4   :  { %v6992_v41 = vpop.f32.mrf.mxu0 }
  0xd5   :  { %v7010_v50 = vpop.f32.mrf.mxu1 }
  0xd6   :  { %v6998_v44 = vpop.f32.mrf.mxu0 }
  0xd7   :  { %v7016_v53 = vpop.f32.mrf.mxu1 }
  0xd8   :  { %v7002_v46 = vpop.f32.mrf.mxu0 }
  0xd9   :  { %v7020_v55 = vpop.f32.mrf.mxu1 }
  0xda   :  { %v7006_v48 = vpop.f32.mrf.mxu0 }
  0xdb   :  { %v7024_v57 = vpop.f32.mrf.mxu1 }
  0xdc   :  { %v7012_v51 = vpop.f32.mrf.mxu0 }
  0xdd   :  { %v7030_v60 = vpop.f32.mrf.mxu1 }
  0xde   :  { %v7018_v54 = vpop.f32.mrf.mxu0 }
  0xdf   :  { %v7036_v63 = vpop.f32.mrf.mxu1 }
  0xe0   :  { %v7022_v56 = vpop.f32.mrf.mxu0 }
  0xe1   :  { %v7040_v1 = vpop.f32.mrf.mxu1 }
  0xe2   :  { %v7026_v58 = vpop.f32.mrf.mxu0 }
  0xe3   :  { %v7044_v3 = vpop.f32.mrf.mxu1 }
  0xe4   :  { %v7032_v61 = vpop.f32.mrf.mxu0 }
  0xe5   :  { %v7050_v6 = vpop.f32.mrf.mxu1 }
  0xe6   :  { %v7038_v0 = vpop.f32.mrf.mxu0 }
  0xe7   :  { %v7056_v9 = vpop.f32.mrf.mxu1 }
  0xe8   :  { %v7042_v2 = vpop.f32.mrf.mxu0 }
  0xe9   :  { %v7060_v11 = vpop.f32.mrf.mxu1 }
  0xea   :  { %v7046_v4 = vpop.f32.mrf.mxu0  ;;  %8911 = vst [vmem:[#allocation6_spill] sm:$0xff] %v7060_v11 }
  0xeb   :  { %v7064_v13 = vpop.f32.mrf.mxu1 }
  0xec   :  { %v7052_v7 = vpop.f32.mrf.mxu0 }
  0xed   :  { %v7070_v16 = vpop.f32.mrf.mxu1 }
  0xee   :  { %v7058_v10 = vpop.f32.mrf.mxu0  ;;  %8912 = vst [vmem:[#allocation7_spill] sm:$0xff] %v7070_v16 }
  0xef   :  { %v7076_v19 = vpop.f32.mrf.mxu1 }
  0xf0   :  { %v7062_v12 = vpop.f32.mrf.mxu0  ;;  %8913 = vst [vmem:[#allocation8_spill] sm:$0xff] %v7076_v19  ;;  %v8926_v19 = vmov 0.0  }
  0xf1   :  { %v7080_v21 = vpop.f32.mrf.mxu1 }
  0xf2   :  { %v7066_v14 = vpop.f32.mrf.mxu0  ;;  %8914 = vst [vmem:[#allocation9_spill] sm:$0xff] %v7080_v21 }
  0xf3   :  { %v7084_v23 = vpop.f32.mrf.mxu1 }
  0xf4   :  { %v7072_v17 = vpop.f32.mrf.mxu0  ;;  %8915 = vst [vmem:[#allocation10_spill] sm:$0xff] %v7084_v23 }
  0xf5   :  { %v7090_v26 = vpop.f32.mrf.mxu1 }
  0xf6   :  { %v7078_v20 = vpop.f32.mrf.mxu0  ;;  %8916 = vst [vmem:[#allocation11_spill] sm:$0xff] %v7090_v26 }
  0xf7   :  { %v7096_v15 = vpop.f32.mrf.mxu1 }
  0xf8   :  { %v7082_v22 = vpop.f32.mrf.mxu0  ;;  %8917 = vst [vmem:[#allocation12_spill] sm:$0xff] %v7096_v15 }
  0xf9   :  { %v7100_v8 = vpop.f32.mrf.mxu1 }
  0xfa   :  { %v7086_v24 = vpop.f32.mrf.mxu0  ;;  %8918 = vst [vmem:[#allocation13_spill] sm:$0xff] %v7100_v8 }
  0xfb   :  { %v7104_v52 = vpop.f32.mrf.mxu1 }
  0xfc   :  { %v7092_v27 = vpop.f32.mrf.mxu0  ;;  %8919 = vst [vmem:[#allocation14_spill] sm:$0xff] %v7104_v52 }
  0xfd   :  { %v7110_v59 = vpop.f32.mrf.mxu1 }
  0xfe   :  { %v7098_v5 = vpop.f32.mrf.mxu0  ;;  %8920 = vst [vmem:[#allocation15_spill] sm:$0xff] %v7110_v59 }
  0xff   :  { %v7116_v39 = vpop.f32.mrf.mxu1 }
 0x100   :  { %v7102_v62 = vpop.f32.mrf.mxu0  ;;  %8921 = vst [vmem:[#allocation16_spill] sm:$0xff] %v7116_v39 }
 0x101   :  { %v7118_v28 = vpop.f32.mrf.mxu1 }
 0x102   :  { %v7106_v42 = vpop.f32.mrf.mxu0  ;;  %8922 = vst [vmem:[#allocation17_spill] sm:$0xff] %v7118_v28 }
 0x103   :  { %v7120_v26 = vpop.f32.mrf.mxu1 }
 0x104   :  { %v7112_v49 = vpop.f32.mrf.mxu0  ;;  %8923 = vst [vmem:[#allocation18_spill] sm:$0xff] %v7120_v26 }
 0x105   :  { %v7122_v23 = vpop.f32.mrf.mxu1 }
 0x106   :  { %v5827_v32 = vpop.f32.mrf.mxu0  ;;  %8924 = vst [vmem:[#allocation19_spill] sm:$0xff] %v7122_v23  ;;  %v8927_v23 = vpack.c.bf16 %v6972_v31, %v6968_v29 }
 0x107   :  { %v7127_v8 = vpop.f32.mrf.mxu1 }
 0x108   :  { %v549_v21 = vpop.f32.mrf.mxu0  ;;  %8925 = vst [vmem:[#allocation20_spill] sm:$0xff] %v7127_v8 }
 0x109   :  { %v7131_v26 = vpop.f32.mrf.mxu1 }
 0x10a   :  { %v5828_v52 = vpop.f32.mrf.mxu0 }
 0x10b   :  { %v1145_v15 = vpack.c.bf16 %v5828_v52, %v5827_v32  ;;  %v7134_v52 = vpop.f32.mrf.mxu1 }
 0x10c   :  { %v552_v25 = vpop.f32.mrf.mxu0 }
 0x10d   :  { %v1244_v16 = vsel %vm1192_vm3, %v1145_v15, 0  ;;  %v1144_v18 = vpack.c.bf16 %v552_v25, %v549_v21  ;;  %v7136_v15 = vpop.f32.mrf.mxu1 }
 0x10e   :  { %v5831_v59 = vpop.f32.mrf.mxu0  ;;  %5938 = vmatpush3.bf16.xpose.msra.mxu1 %v1244_v16  ;;  %v1112_v16 = vpack.c.bf16 %v6976_v33, %v6970_v30 }
 0x10f   :  { %v1197_v39 = vsel %vm1192_vm3, %v1144_v18, 0  ;;  %5949 = vmatprep.subr.bf16.mxu1 %v8926_v19 }
 0x110   :  { %v565_v32 = vpop.f32.mrf.mxu0  ;;  %5932 = vmatpush3.bf16.xpose.msra.mxu0 %v1197_v39  ;;  %v7145_v39 = vpop.f32.mrf.mxu1 }
 0x111   :  { %5943 = vmatprep.subr.bf16.mxu0 %v8926_v19 }
 0x112   :  { %v5832_v11 = vpop.f32.mrf.mxu0 }
 0x113   :  { %v1147_v28 = vpack.c.bf16 %v5832_v11, %v5831_v59 }
 0x114   :  { %v568_v21 = vpop.f32.mrf.mxu0 }
 0x115   :  { %v1338_v18 = vsel %vm1192_vm3, %v1147_v28, 0  ;;  %v1146_v25 = vpack.c.bf16 %v568_v21, %v565_v32  ;;  %5940 = vmatmul.mubr.msk.bf16.vlgmr.msra.gmra.mxu1 %vm1192_vm3, %v8927_v23  ;;  %v7152_v28 = vpop.f32.mrf.mxu1  ;;  %v1114_v32 = vpack.c.bf16 %v6992_v41, %v6982_v36 }
 0x116   :  { %v5835_v8 = vpop.f32.mrf.mxu0  ;;  %5950 = vmatpush3.bf16.xpose.msra.mxu1 %v1338_v18  ;;  %5951 = vmatprep.mubr.msk.bf16.mxu1 %vm6682_vm2, %v8926_v19  ;;  %v8928_v18 = vpack.c.bf16 %v6986_v38, %v6978_v34 }
 0x117   :  { %5934 = vmatmul.mubr.msk.bf16.vlgmr.msra.gmra.mxu0 %vm1192_vm3, %v1112_v16  ;;  %v1291_v59 = vsel %vm1192_vm3, %v1146_v25, 0  ;;  %5961 = vmatprep.subr.bf16.mxu1 %v8926_v19  ;;  %v7157_v29 = vpop.f32.mrf.mxu1 }
 0x118   :  { %v581_v30 = vpop.f32.mrf.mxu0  ;;  %5944 = vmatpush3.bf16.xpose.msra.mxu0 %v1291_v59  ;;  %5945 = vmatprep.mubr.msk.bf16.mxu0 %vm6682_vm2, %v8926_v19 }
 0x119   :  { %5955 = vmatprep.subr.bf16.mxu0 %v8926_v19  ;;  %v7159_v11 = vpop.f32.mrf.mxu1 }
 0x11a   :  { %v5836_v31 = vpop.f32.mrf.mxu0 }
 0x11b   :  { %v1149_v33 = vpack.c.bf16 %v5836_v31, %v5835_v8  ;;  %v7168_v25 = vpop.f32.mrf.mxu1 }
 0x11c   :  { %v584_v23 = vpop.f32.mrf.mxu0 }
 0x11d   :  { %v1432_v21 = vsel %vm1192_vm3, %v1149_v33, 0  ;;  %v1148_v16 = vpack.c.bf16 %v584_v23, %v581_v30  ;;  %5952 = vmatmul.mubr.msk.bf16.vlgmr.msra.gmra.mxu1 %vm1192_vm3, %v8928_v18  ;;  %v7175_v36 = vpop.f32.mrf.mxu1  ;;  %v1116_v23 = vpack.c.bf16 %v7012_v51, %v7002_v46 }
 0x11e   :  { %v5839_v59 = vpop.f32.mrf.mxu0  ;;  %5962 = vmatpush3.bf16.xpose.msra.mxu1 %v1432_v21  ;;  %5963 = vmatprep.mubr.msk.bf16.mxu1 %vm6682_vm2, %v8926_v19 }
 0x11f   :  { %5946 = vmatmul.mubr.msk.bf16.vlgmr.msra.gmra.mxu0 %vm1192_vm3, %v1114_v32  ;;  %v1385_v8 = vsel %vm1192_vm3, %v1148_v16, 0  ;;  %5973 = vmatprep.subr.bf16.mxu1 %v8926_v19  ;;  %v7180_v34 = vpop.f32.mrf.mxu1  ;;  %v8929_v16 = vpack.c.bf16 %v7006_v48, %v6998_v44  ;;  %v1153_v48 = vpack.c.bf16 %v7136_v15, %v7131_v26  ;;  %v8930_v26 = vpack.c.bf16 %v7026_v58, %v7018_v54 }
 0x120   :  { %v597_v41 = vpop.f32.mrf.mxu0  ;;  %5956 = vmatpush3.bf16.xpose.msra.mxu0 %v1385_v8  ;;  %5957 = vmatprep.mubr.msk.bf16.mxu0 %vm6682_vm2, %v8926_v19  ;;  %v1155_v58 = vpack.c.bf16 %v7159_v11, %v7152_v28  ;;  %v8931_v28 = vpack.c.bf16 %v6990_v40, %v6980_v35 }
 0x121   :  { %5967 = vmatprep.subr.bf16.mxu0 %v8926_v19  ;;  %v7182_v31 = vpop.f32.mrf.mxu1 }
 0x122   :  { %v5840_v38 = vpop.f32.mrf.mxu0  ;;  %v1157_v40 = vpack.c.bf16 %v7182_v31, %v7175_v36  ;;  %v8932_v36 = vpack.c.bf16 %v7010_v50, %v7000_v45 }
 0x123   :  { %v1151_v30 = vpack.c.bf16 %v5840_v38, %v5839_v59  ;;  %v7191_v18 = vpop.f32.mrf.mxu1  ;;  %v1152_v38 = vpack.c.bf16 %v7145_v39, %v7134_v52 }
 0x124   :  { %v600_v33 = vpop.f32.mrf.mxu0 }
 0x125   :  { %v1526_v32 = vsel %vm1192_vm3, %v1151_v30, 0  ;;  %v1150_v21 = vpack.c.bf16 %v600_v33, %v597_v41  ;;  %5964 = vmatmul.mubr.msk.bf16.vlgmr.msra.gmra.mxu1 %vm1192_vm3, %v8929_v16  ;;  %v7200_v51 = vpop.f32.mrf.mxu1  ;;  %v1573_v39 = vsel %vm1192_vm3, %v1152_v38, 0  ;;  %v1154_v16 = vpack.c.bf16 %v7168_v25, %v7157_v29 }
 0x126   :  { %5974 = vmatpush3.bf16.xpose.msra.mxu1 %v1526_v32  ;;  %5975 = vmatprep.mubr.msk.bf16.mxu1 %vm6682_vm2, %v8926_v19  ;;  %v7195_v59 = vpop.f32.mrf.mxu0  ;;  %v1620_v32 = vsel %vm1192_vm3, %v1153_v48, 0  ;;  %v1120_v38 = vpack.c.bf16 %v6996_v43, %v6984_v37 }
 0x127   :  { %5958 = vmatmul.mubr.msk.bf16.vlgmr.msra.gmra.mxu0 %vm1192_vm3, %v1116_v23  ;;  %v1479_v46 = vsel %vm1192_vm3, %v1150_v21, 0  ;;  %5985 = vmatprep.subr.bf16.mxu1 %v8926_v19  ;;  %v7209_v8 = vpop.f32.mrf.mxu1  ;;  %v1118_v23 = vpack.c.bf16 %v7032_v61, %v7022_v56  ;;  %v1667_v25 = vsel %vm1192_vm3, %v1154_v16, 0  ;;  %v1122_v16 = vpack.c.bf16 %v7016_v53, %v7004_v47 }
 0x128   :  { %5968 = vmatpush3.bf16.xpose.msra.mxu0 %v1479_v46  ;;  %5969 = vmatprep.mubr.msk.bf16.mxu0 %vm6682_vm2, %v8926_v19  ;;  %v7204_v44 = vpop.f32.mrf.mxu0 }
 0x129   :  { %5979 = vmatprep.subr.bf16.mxu0 %v8926_v19  ;;  %v7215_v30 = vpop.f32.mrf.mxu1 }
 0x12a   :  { %v7211_v41 = vpop.f32.mrf.mxu0  ;;  %v1159_v50 = vpack.c.bf16 %v7215_v30, %v7200_v51  ;;  %v8933_v51 = vpack.c.bf16 %v7030_v60, %v7020_v55 }
 0x12b   :  { %v7226_v15 = vpop.f32.mrf.mxu1  ;;  %v1161_v60 = vpack.c.bf16 %v7211_v41, %v7195_v59  ;;  %v8934_v59 = vpack.c.bf16 %v7050_v6, %v7040_v1 }
 0x12c   :  { %v7217_v33 = vpop.f32.mrf.mxu0 }
 0x12d   :  { %5976 = vmatmul.mubr.msk.bf16.vlgmr.msra.gmra.mxu1 %vm1192_vm3, %v8930_v26  ;;  %v7235_v56 = vpop.f32.mrf.mxu1  ;;  %v1156_v26 = vpack.c.bf16 %v7191_v18, %v7180_v34 }
 0x12e   :  { %5986 = vmatpush3.bf16.xpose.msra.mxu1 %v1620_v32  ;;  %5987 = vmatprep.mubr.msk.bf16.mxu1 %vm6682_vm2, %v8926_v19  ;;  %v7230_v52 = vpop.f32.mrf.mxu0 }
 0x12f   :  { %5970 = vmatmul.mubr.msk.bf16.vlgmr.msra.gmra.mxu0 %vm1192_vm3, %v1118_v23  ;;  %5997 = vmatprep.subr.bf16.mxu1 %v8926_v19  ;;  %v7244_v61 = vpop.f32.mrf.mxu1  ;;  %v1714_v23 = vsel %vm1192_vm3, %v1155_v58, 0  ;;  %v1761_v18 = vsel %vm1192_vm3, %v1156_v26, 0  ;;  %v1124_v26 = vpack.c.bf16 %v7036_v63, %v7024_v57 }
 0x130   :  { %5980 = vmatpush3.bf16.xpose.msra.mxu0 %v1573_v39  ;;  %5981 = vmatprep.mubr.msk.bf16.mxu0 %vm6682_vm2, %v8926_v19  ;;  %v7239_v54 = vpop.f32.mrf.mxu0 }
 0x131   :  { %5991 = vmatprep.subr.bf16.mxu0 %v8926_v19  ;;  %v7250_v46 = vpop.f32.mrf.mxu1 }
 0x132   :  { %v7246_v21 = vpop.f32.mrf.mxu0 }
 0x133   :  { %v7261_v11 = vpop.f32.mrf.mxu1  ;;  %v1163_v6 = vpack.c.bf16 %v7246_v21, %v7230_v52  ;;  %v8940_v21 = vpack.c.bf16 %v7046_v4, %v7038_v0 }
 0x134   :  { %v7252_v48 = vpop.f32.mrf.mxu0 }
 0x135   :  { %5988 = vmatmul.mubr.msk.bf16.vlgmr.msra.gmra.mxu1 %vm1192_vm3, %v8931_v28  ;;  %v7270_v37 = vpop.f32.mrf.mxu1  ;;  %v1158_v28 = vpack.c.bf16 %v7226_v15, %v7209_v8  ;;  %v2090_v52 = vsel %vm1192_vm3, %v1163_v6, 0 }
 0x136   :  { %5998 = vmatpush3.bf16.xpose.msra.mxu1 %v1714_v23  ;;  %5999 = vmatprep.mubr.msk.bf16.mxu1 %vm6682_vm2, %v8926_v19  ;;  %v7265_v29 = vpop.f32.mrf.mxu0 }
 0x137   :  { %5982 = vmatmul.mubr.msk.bf16.vlgmr.msra.gmra.mxu0 %vm1192_vm3, %v1120_v38  ;;  %6009 = vmatprep.subr.bf16.mxu1 %v8926_v19  ;;  %v7279_v43 = vpop.f32.mrf.mxu1  ;;  %v1808_v38 = vsel %vm1192_vm3, %v1157_v40, 0  ;;  %v1855_v15 = vsel %vm1192_vm3, %v1158_v28, 0  ;;  %v1126_v28 = vpack.c.bf16 %v7056_v9, %v7044_v3 }
 0x138   :  { %5992 = vmatpush3.bf16.xpose.msra.mxu0 %v1667_v25  ;;  %5993 = vmatprep.mubr.msk.bf16.mxu0 %vm6682_vm2, %v8926_v19  ;;  %v7274_v35 = vpop.f32.mrf.mxu0 }
 0x139   :  { %6003 = vmatprep.subr.bf16.mxu0 %v8926_v19  ;;  %v7285_v39 = vpop.f32.mrf.mxu1 }
 0x13a   :  { %v7281_v32 = vpop.f32.mrf.mxu0 }
 0x13b   :  { %v7296_v31 = vpop.f32.mrf.mxu1  ;;  %v1165_v4 = vpack.c.bf16 %v7281_v32, %v7265_v29  ;;  %v8947_v32 = vpack.c.bf16 %v7066_v14, %v7058_v10 }
 0x13c   :  { %v7287_v58 = vpop.f32.mrf.mxu0 }
 0x13d   :  { %6000 = vmatmul.mubr.msk.bf16.vlgmr.msra.gmra.mxu1 %vm1192_vm3, %v8932_v36  ;;  %v7305_v47 = vpop.f32.mrf.mxu1  ;;  %v1160_v36 = vpack.c.bf16 %v7217_v33, %v7204_v44  ;;  %v2184_v29 = vsel %vm1192_vm3, %v1165_v4, 0  ;;  %v1132_v4 = vpack.c.bf16 %v7092_v27, %v7082_v22  ;;  %v1168_v27 = vpack.c.bf16 %v7261_v11, %v7244_v61  ;;  %v8960_v11 = vld [vmem:[#allocation6_spill] sm:$0xff] }
 0x13e   :  { %6010 = vmatpush3.bf16.xpose.msra.mxu1 %v1808_v38  ;;  %6011 = vmatprep.mubr.msk.bf16.mxu1 %vm6682_vm2, %v8926_v19  ;;  %v7300_v34 = vpop.f32.mrf.mxu0 }
 0x13f   :  { %5994 = vmatmul.mubr.msk.bf16.vlgmr.msra.gmra.mxu0 %vm1192_vm3, %v1122_v16  ;;  %6021 = vmatprep.subr.bf16.mxu1 %v8926_v19  ;;  %v7314_v53 = vpop.f32.mrf.mxu1  ;;  %v1902_v16 = vsel %vm1192_vm3, %v1159_v50, 0  ;;  %v1949_v33 = vsel %vm1192_vm3, %v1160_v36, 0 }
 0x140   :  { %6004 = vmatpush3.bf16.xpose.msra.mxu0 %v1761_v18  ;;  %6005 = vmatprep.mubr.msk.bf16.mxu0 %vm6682_vm2, %v8926_v19  ;;  %v7309_v45 = vpop.f32.mrf.mxu0 }
 0x141   :  { %6015 = vmatprep.subr.bf16.mxu0 %v8926_v19  ;;  %v7320_v25 = vpop.f32.mrf.mxu1 }
 0x142   :  { %v7316_v23 = vpop.f32.mrf.mxu0 }
 0x143   :  { %v7331_v30 = vpop.f32.mrf.mxu1  ;;  %v1167_v14 = vpack.c.bf16 %v7316_v23, %v7300_v34  ;;  %v8953_v34 = vpack.c.bf16 %v7086_v24, %v7078_v20  ;;  %v1169_v20 = vpack.c.bf16 %v7250_v46, %v7235_v56  ;;  %v2325_v56 = vsel %vm1192_vm3, %v1168_v27, 0  ;;  %v8959_v46 = vld [vmem:[#allocation7_spill] sm:$0xff] }
 0x144   :  { %v7322_v40 = vpop.f32.mrf.mxu0  ;;  %v8976_v27 = vld [vmem:[#allocation19_spill] sm:$0xff] }
 0x145   :  { %6012 = vmatmul.mubr.msk.bf16.vlgmr.msra.gmra.mxu1 %vm1192_vm3, %v8933_v51  ;;  %v7340_v57 = vpop.f32.mrf.mxu1  ;;  %v1162_v51 = vpack.c.bf16 %v7252_v48, %v7239_v54 }
 0x146   :  { %6022 = vmatpush3.bf16.xpose.msra.mxu1 %v1902_v16  ;;  %6023 = vmatprep.mubr.msk.bf16.mxu1 %vm6682_vm2, %v8926_v19  ;;  %v7335_v8 = vpop.f32.mrf.mxu0 }
 0x147   :  { %6006 = vmatmul.mubr.msk.bf16.vlgmr.msra.gmra.mxu0 %vm1192_vm3, %v1124_v26  ;;  %6033 = vmatprep.subr.bf16.mxu1 %v8926_v19  ;;  %v7349_v63 = vpop.f32.mrf.mxu1  ;;  %v1996_v26 = vsel %vm1192_vm3, %v1161_v60, 0  ;;  %v2043_v48 = vsel %vm1192_vm3, %v1162_v51, 0 }
 0x148   :  { %6016 = vmatpush3.bf16.xpose.msra.mxu0 %v1855_v15  ;;  %6017 = vmatprep.mubr.msk.bf16.mxu0 %vm6682_vm2, %v8926_v19  ;;  %v7344_v55 = vpop.f32.mrf.mxu0 }
 0x149   :  { %6027 = vmatprep.subr.bf16.mxu0 %v8926_v19  ;;  %v7355_v18 = vpop.f32.mrf.mxu1 }
 0x14a   :  { %v7351_v38 = vpop.f32.mrf.mxu0 }
 0x14b   :  { %v7366_v41 = vpop.f32.mrf.mxu1 }
 0x14c   :  { %v7357_v50 = vpop.f32.mrf.mxu0 }
 0x14d   :  { %6024 = vmatmul.mubr.msk.bf16.vlgmr.msra.gmra.mxu1 %vm1192_vm3, %v8934_v59  ;;  %v5917_v3 = vpop.f32.mrf.mxu1 }
 0x14e   :  { %6034 = vmatpush3.bf16.xpose.msra.mxu1 %v1996_v26  ;;  %6035 = vmatprep.mubr.msk.bf16.mxu1 %vm6682_vm2, %v8926_v19  ;;  %v5903_v44 = vpop.f32.mrf.mxu0  ;;  %v1128_v26 = vpack.c.bf16 %v7052_v7, %v7042_v2 }
 0x14f   :  { %6018 = vmatmul.mubr.msk.bf16.vlgmr.msra.gmra.mxu0 %vm1192_vm3, %v1126_v28  ;;  %6045 = vmatprep.subr.bf16.mxu1 %v8926_v19  ;;  %v7380_v9 = vpop.f32.mrf.mxu1 }
 0x150   :  { %6028 = vmatpush3.bf16.xpose.msra.mxu0 %v1949_v33  ;;  %6029 = vmatprep.mubr.msk.bf16.mxu0 %vm6682_vm2, %v8926_v19  ;;  %v7375_v1 = vpop.f32.mrf.mxu0  ;;  %8936 = vst [vmem:[#allocation22_spill] sm:$0xff] %v7380_v9  ;;  %v1164_v33 = vpack.c.bf16 %v7287_v58, %v7274_v35 }
 0x151   :  { %8935 = vst [vmem:[#allocation21_spill] sm:$0xff] %v7375_v1  ;;  %6039 = vmatprep.subr.bf16.mxu0 %v8926_v19  ;;  %v5918_v15 = vpop.f32.mrf.mxu1 }
 0x152   :  { %v5904_v16 = vpop.f32.mrf.mxu0  ;;  %v7386_v36 = vpack.c.bf16 %v5918_v15, %v5917_v3  ;;  %v1130_v15 = vpack.c.bf16 %v7072_v17, %v7062_v12  ;;  %v2137_v58 = vsel %vm1192_vm3, %v1164_v33, 0 }
 0x153   :  { %v7384_v60 = vpack.c.bf16 %v5904_v16, %v5903_v44  ;;  %v7397_v59 = vpop.f32.mrf.mxu1 }
 0x154   :  { %8938 = vst [vmem:[#allocation24_spill] sm:$0xff] %v7386_v36  ;;  %v7388_v28 = vpop.f32.mrf.mxu0  ;;  %8941 = vst [vmem:[#allocation26_spill] sm:$0xff] %v7397_v59 }
 0x155   :  { %8937 = vst [vmem:[#allocation23_spill] sm:$0xff] %v7384_v60  ;;  %8939 = vst [vmem:[#allocation25_spill] sm:$0xff] %v7388_v28  ;;  %6036 = vmatmul.mubr.msk.bf16.vlgmr.msra.gmra.mxu1 %vm1192_vm3, %v8940_v21  ;;  %v5921_v2 = vpop.f32.mrf.mxu1  ;;  %v1166_v21 = vpack.c.bf16 %v7322_v40, %v7309_v45 }
 0x156   :  { %6046 = vmatpush3.bf16.xpose.msra.mxu1 %v2090_v52  ;;  %6047 = vmatprep.mubr.msk.bf16.mxu1 %vm6682_vm2, %v8926_v19  ;;  %v5907_v54 = vpop.f32.mrf.mxu0 }
 0x157   :  { %6030 = vmatmul.mubr.msk.bf16.vlgmr.msra.gmra.mxu0 %vm1192_vm3, %v1128_v26  ;;  %6057 = vmatprep.subr.bf16.mxu1 %v8926_v19  ;;  %v7411_v7 = vpop.f32.mrf.mxu1  ;;  %v2231_v45 = vsel %vm1192_vm3, %v1166_v21, 0  ;;  %v8968_v21 = vld [vmem:[#allocation16_spill] sm:$0xff] }
 0x158   :  { %6040 = vmatpush3.bf16.xpose.msra.mxu0 %v2043_v48  ;;  %6041 = vmatprep.mubr.msk.bf16.mxu0 %vm6682_vm2, %v8926_v19  ;;  %v7406_v0 = vpop.f32.mrf.mxu0  ;;  %8943 = vst [vmem:[#allocation28_spill] sm:$0xff] %v7411_v7 }
 0x159   :  { %8942 = vst [vmem:[#allocation27_spill] sm:$0xff] %v7406_v0  ;;  %6051 = vmatprep.subr.bf16.mxu0 %v8926_v19  ;;  %v5922_v3 = vpop.f32.mrf.mxu1 }
 0x15a   :  { %v5908_v44 = vpop.f32.mrf.mxu0  ;;  %v7417_v16 = vpack.c.bf16 %v5922_v3, %v5921_v2  ;;  %v1134_v3 = vpack.c.bf16 %v7112_v49, %v7102_v62  ;;  %v1171_v49 = vpack.c.bf16 %v7285_v39, %v7270_v37  ;;  %v8958_v62 = vld [vmem:[#allocation8_spill] sm:$0xff]  ;;  %v8962_v39 = vld [vmem:[#allocation10_spill] sm:$0xff] }
 0x15b   :  { %v7415_v6 = vpack.c.bf16 %v5908_v44, %v5907_v54  ;;  %v7428_v26 = vpop.f32.mrf.mxu1  ;;  %v2278_v44 = vsel %vm1192_vm3, %v1167_v14, 0  ;;  %v8965_v14 = vld [vmem:[#allocation9_spill] sm:$0xff] }
 0x15c   :  { %8945 = vst [vmem:[#allocation30_spill] sm:$0xff] %v7417_v16  ;;  %v7419_v51 = vpop.f32.mrf.mxu0  ;;  %8948 = vst [vmem:[#allocation32_spill] sm:$0xff] %v7428_v26  ;;  %v2466_v61 = vsel %vm1192_vm3, %v1171_v49, 0 }
 0x15d   :  { %8944 = vst [vmem:[#allocation29_spill] sm:$0xff] %v7415_v6  ;;  %8946 = vst [vmem:[#allocation31_spill] sm:$0xff] %v7419_v51  ;;  %6048 = vmatmul.mubr.msk.bf16.vlgmr.msra.gmra.mxu1 %vm1192_vm3, %v8947_v32  ;;  %v5925_v12 = vpop.f32.mrf.mxu1  ;;  %v8961_v32 = vpack.c.bf16 %v8959_v46, %v8960_v11 }
 0x15e   :  { %6058 = vmatpush3.bf16.xpose.msra.mxu1 %v2184_v29  ;;  %6059 = vmatprep.mubr.msk.bf16.mxu1 %vm6682_vm2, %v8926_v19  ;;  %v5911_v35 = vpop.f32.mrf.mxu0  ;;  %v8957_v29 = vpack.c.bf16 %v7106_v42, %v7098_v5  ;;  %v1170_v42 = vpack.c.bf16 %v7296_v31, %v7279_v43  ;;  %v1136_v5 = vpack.c.bf16 %v8958_v62, %v7064_v13  ;;  %v8963_v31 = vld [vmem:[#allocation12_spill] sm:$0xff] }
 0x15f   :  { %6042 = vmatmul.mubr.msk.bf16.vlgmr.msra.gmra.mxu0 %vm1192_vm3, %v1130_v15  ;;  %6069 = vmatprep.subr.bf16.mxu1 %v8926_v19  ;;  %v7442_v17 = vpop.f32.mrf.mxu1  ;;  %v2372_v15 = vsel %vm1192_vm3, %v1169_v20, 0  ;;  %v1173_v13 = vpack.c.bf16 %v7320_v25, %v7305_v47  ;;  %v1172_v43 = vpack.c.bf16 %v7331_v30, %v7314_v53  ;;  %v1175_v53 = vpack.c.bf16 %v7355_v18, %v7340_v57  ;;  %v8967_v30 = vld [vmem:[#allocation14_spill] sm:$0xff] }
 0x160   :  { %6052 = vmatpush3.bf16.xpose.msra.mxu0 %v2137_v58  ;;  %6053 = vmatprep.mubr.msk.bf16.mxu0 %vm6682_vm2, %v8926_v19  ;;  %v7437_v10 = vpop.f32.mrf.mxu0  ;;  %8950 = vst [vmem:[#allocation34_spill] sm:$0xff] %v7442_v17  ;;  %v2419_v37 = vsel %vm1192_vm3, %v1170_v42, 0  ;;  %v1174_v25 = vpack.c.bf16 %v7366_v41, %v7349_v63  ;;  %v7549_v63 = vpack.c.bf16 %v7351_v38, %v7335_v8  ;;  %v8974_v41 = vld [vmem:[#allocation18_spill] sm:$0xff] }
 0x161   :  { %8949 = vst [vmem:[#allocation33_spill] sm:$0xff] %v7437_v10  ;;  %6063 = vmatprep.subr.bf16.mxu0 %v8926_v19  ;;  %v5926_v54 = vpop.f32.mrf.mxu1  ;;  %v2560_v58 = vsel %vm1192_vm3, %v1173_v13, 0  ;;  %v2513_v47 = vsel %vm1192_vm3, %v1172_v43, 0  ;;  %v7553_v18 = vpack.c.bf16 %v7357_v50, %v7344_v55 }
 0x162   :  { %v5912_v52 = vpop.f32.mrf.mxu0  ;;  %v7448_v2 = vpack.c.bf16 %v5926_v54, %v5925_v12  ;;  %v8964_v12 = vld [vmem:[#allocation11_spill] sm:$0xff]  ;;  %v1140_v54 = vpack.c.bf16 %v8968_v21, %v8967_v30  ;;  %v2607_v57 = vsel %vm1192_vm3, %v1174_v25, 0  ;;  %8972 = vst [vmem:[#allocation8_spill] sm:$0xff] %v7549_v63 }
 0x163   :  { %v7446_v48 = vpack.c.bf16 %v5912_v52, %v5911_v35  ;;  %v7457_v23 = vpop.f32.mrf.mxu1  ;;  %v1138_v35 = vpack.c.bf16 %v8963_v31, %v8962_v39  ;;  %v8966_v52 = vpack.c.bf16 %v8964_v12, %v8965_v14  ;;  %8973 = vst [vmem:[#allocation7_spill] sm:$0xff] %v7553_v18 }
 0x164   :  { %8952 = vst [vmem:[#allocation36_spill] sm:$0xff] %v7448_v2  ;;  %8954 = vst [vmem:[#allocation37_spill] sm:$0xff] %v7457_v23  ;;  %v7572_v55 = vpop.f32.mrf.mxu0 }
 0x165   :  { %8951 = vst [vmem:[#allocation35_spill] sm:$0xff] %v7446_v48  ;;  %6060 = vmatmul.mubr.msk.bf16.vlgmr.msra.gmra.mxu1 %vm1192_vm3, %v8953_v34  ;;  %v5929_v22 = vpop.f32.mrf.mxu1  ;;  %v8970_v34 = vld [vmem:[#allocation13_spill] sm:$0xff]  ;;  %8980 = vst [vmem:[#allocation10_spill] sm:$0xff] %v7572_v55 }
 0x166   :  { %6070 = vmatpush3.bf16.xpose.msra.mxu1 %v2278_v44  ;;  %6071 = vmatprep.mubr.msk.bf16.mxu1 %vm6682_vm2, %v8926_v19  ;;  %v8969_v44 = vld [vmem:[#allocation15_spill] sm:$0xff] }
 0x167   :  { %6054 = vmatmul.mubr.msk.bf16.vlgmr.msra.gmra.mxu0 %vm1192_vm3, %v1132_v4  ;;  %6081 = vmatprep.subr.bf16.mxu1 %v8926_v19  ;;  %v7469_v24 = vpop.f32.mrf.mxu1  ;;  %v2654_v4 = vsel %vm1192_vm3, %v1175_v53, 0 }
 0x168   :  { %6064 = vmatpush3.bf16.xpose.msra.mxu0 %v2231_v45  ;;  %6065 = vmatprep.mubr.msk.bf16.mxu0 %vm6682_vm2, %v8926_v19  ;;  %8955 = vst [vmem:[#allocation38_spill] sm:$0xff] %v7469_v24  ;;  %v8971_v45 = vpack.c.bf16 %v8969_v44, %v8970_v34 }
 0x169   :  { %6075 = vmatprep.subr.bf16.mxu0 %v8926_v19  ;;  %v5930_v40 = vpop.f32.mrf.mxu1 }
 0x16a   :  { %v7473_v33 = vpack.c.bf16 %v5930_v40, %v5929_v22  ;;  %v8975_v22 = vld [vmem:[#allocation20_spill] sm:$0xff]  ;;  %v8977_v40 = vld [vmem:[#allocation17_spill] sm:$0xff] }
 0x16b   :  { %v1142_v20 = vpack.c.bf16 %v8975_v22, %v8974_v41  ;;  %v7570_v8 = vpop.f32.mrf.mxu1 }
 0x16c   :  { %8956 = vst [vmem:[#allocation39_spill] sm:$0xff] %v7473_v33  ;;  %8979 = vst [vmem:[#allocation6_spill] sm:$0xff] %v7570_v8 }
 0x16d   :  { %6072 = vmatmul.mubr.msk.bf16.vlgmr.msra.gmra.mxu1 %vm1192_vm3, %v8957_v29 }
 0x16e   :  { %6082 = vmatpush3.bf16.xpose.msra.mxu1 %v2372_v15  ;;  %6083 = vmatprep.mubr.msk.bf16.mxu1 %vm6682_vm2, %v8926_v19 }
 0x16f   :  { %6066 = vmatmul.mubr.msk.bf16.vlgmr.msra.gmra.mxu0 %vm1192_vm3, %v1134_v3  ;;  %6093 = vmatprep.subr.bf16.mxu1 %v8926_v19  ;;  %v8978_v3 = vpack.c.bf16 %v8976_v27, %v8977_v40 }
 0x170   :  { %6076 = vmatpush3.bf16.xpose.msra.mxu0 %v2325_v56  ;;  %6077 = vmatprep.mubr.msk.bf16.mxu0 %vm6682_vm2, %v8926_v19 }
 0x171   :  { %6087 = vmatprep.subr.bf16.mxu0 %v8926_v19 }
 0x175   :  { %6084 = vmatmul.mubr.msk.bf16.vlgmr.msra.gmra.mxu1 %vm1192_vm3, %v8961_v32 }
 0x176   :  { %6094 = vmatpush3.bf16.xpose.msra.mxu1 %v2466_v61  ;;  %6095 = vmatprep.mubr.msk.bf16.mxu1 %vm6682_vm2, %v8926_v19 }
 0x177   :  { %6078 = vmatmul.mubr.msk.bf16.vlgmr.msra.gmra.mxu0 %vm1192_vm3, %v1136_v5  ;;  %6105 = vmatprep.subr.bf16.mxu1 %v8926_v19 }
 0x178   :  { %6088 = vmatpush3.bf16.xpose.msra.mxu0 %v2419_v37  ;;  %6089 = vmatprep.mubr.msk.bf16.mxu0 %vm6682_vm2, %v8926_v19 }
 0x179   :  { %6099 = vmatprep.subr.bf16.mxu0 %v8926_v19 }
 0x17d   :  { %6096 = vmatmul.mubr.msk.bf16.vlgmr.msra.gmra.mxu1 %vm1192_vm3, %v8966_v52 }
 0x17e   :  { %6106 = vmatpush3.bf16.xpose.msra.mxu1 %v2560_v58  ;;  %6107 = vmatprep.mubr.msk.bf16.mxu1 %vm6682_vm2, %v8926_v19 }
 0x17f   :  { %6090 = vmatmul.mubr.msk.bf16.vlgmr.msra.gmra.mxu0 %vm1192_vm3, %v1138_v35  ;;  %6117 = vmatprep.subr.bf16.mxu1 %v8926_v19 }
 0x180   :  { %6100 = vmatpush3.bf16.xpose.msra.mxu0 %v2513_v47  ;;  %6101 = vmatprep.mubr.msk.bf16.mxu0 %vm6682_vm2, %v8926_v19 }
 0x181   :  { %6111 = vmatprep.subr.bf16.mxu0 %v8926_v19 }
 0x185   :  { %6108 = vmatmul.mubr.msk.bf16.vlgmr.msra.gmra.mxu1 %vm1192_vm3, %v8971_v45 }
 0x186   :  { %6118 = vmatpush3.bf16.xpose.msra.mxu1 %v2654_v4  ;;  %6119 = vmatprep.mubr.msk.bf16.mxu1 %vm6682_vm2, %v8926_v19 }
 0x187   :  { %6102 = vmatmul.mubr.msk.bf16.vlgmr.msra.gmra.mxu0 %vm1192_vm3, %v1140_v54  ;;  %6129 = vmatprep.subr.bf16.mxu1 %v8926_v19 }
 0x188   :  { %6112 = vmatpush3.bf16.xpose.msra.mxu0 %v2607_v57  ;;  %6113 = vmatprep.mubr.msk.bf16.mxu0 %vm6682_vm2, %v8926_v19 }
 0x189   :  { %6123 = vmatprep.subr.bf16.mxu0 %v8926_v19 }
 0x18d   :  { %6120 = vmatmul.mubr.msk.bf16.vlgmr.msra.gmra.mxu1 %vm1192_vm3, %v8978_v3 }
 0x18e   :  { %6130 = vmatpush3.bf16.msra.mxu1 %v7549_v63  ;;  %6131 = vmatprep.mubr.msk.bf16.mxu1 %vm6682_vm2, %v8926_v19 }
 0x18f   :  { %6114 = vmatmul.mubr.msk.bf16.vlgmr.msra.gmra.mxu0 %vm1192_vm3, %v1142_v20  ;;  %6141 = vmatprep.subr.bf16.mxu1 %v8926_v19 }
 0x190   :  { %6124 = vmatpush3.bf16.msra.mxu0 %v7553_v18  ;;  %6125 = vmatprep.mubr.msk.bf16.mxu0 %vm6682_vm2, %v8926_v19 }
 0x191   :  { %6135 = vmatprep.subr.bf16.mxu0 %v8926_v19 }
 0x1d5   :  { %v1280_v38 = vpop.f32.mrf.mxu1 }
 0x1d6   :  { %v7574_v50 = vmul.f32 0.35355338, %v1280_v38 }
 0x1d7   :  { %v1233_v15 = vpop.f32.mrf.mxu0  ;;  %v5941_v29 = vpop.f32.mrf.mxu1 }
 0x1d8   :  { %v7576_v56 = vmul.f32 0.35355338, %v1233_v15  ;;  %v2767_v49 = vsel %vm1192_vm3, %v7574_v50, -inf }
 0x1d9   :  { %2768 = vmax.xlane.f32.xlu1 %v2767_v49  ;;  %v5935_v42 = vpop.f32.mrf.mxu0  ;;  %v1283_v62 = vpop.f32.mrf.mxu1 }
 0x1da   :  { %v7580_v5 = vmul.f32 0.35355338, %v1283_v62  ;;  %v2761_v61 = vsel %vm1192_vm3, %v7576_v56, -inf }
 0x1db   :  { %v5942_v46 = vpop.f32.mrf.mxu1  ;;  %2762 = vmax.xlane.f32.xlu0 %v2761_v61  ;;  %v1236_v11 = vpop.f32.mrf.mxu0 }
 0x1dc   :  { %v7584_v32 = vmul.f32 0.35355338, %v1236_v11  ;;  %v2770_v37 = vsel %vm1192_vm3, %v7580_v5, -inf }
 0x1dd   :  { %2771 = vmax.xlane.f32.xlu1 %v2770_v37  ;;  %v5936_v13 = vpop.f32.mrf.mxu0  ;;  %v1374_v43 = vpop.f32.mrf.mxu1 }
 0x1de   :  { %v7588_v39 = vmul.f32 0.35355338, %v1374_v43  ;;  %v2764_v31 = vsel %vm1192_vm3, %v7584_v32, -inf }
 0x1df   :  { %v5953_v35 = vpop.f32.mrf.mxu1  ;;  %2765 = vmax.xlane.f32.xlu0 %v2764_v31  ;;  %v1327_v58 = vpop.f32.mrf.mxu0 }
 0x1e0   :  { %v7592_v52 = vmul.f32 0.35355338, %v1327_v58  ;;  %v2779_v53 = vsel %vm1192_vm3, %v7588_v39, -inf }
 0x1e1   :  { %v5947_v12 = vpop.f32.mrf.mxu0  ;;  %v1377_v14 = vpop.f32.mrf.mxu1 }
 0x1e2   :  { %v7594_v47 = vmul.f32 0.35355338, %v1377_v14  ;;  %v2773_v45 = vsel %vm1192_vm3, %v7592_v52, -inf }
 0x1e3   :  { %v5954_v25 = vpop.f32.mrf.mxu1  ;;  %2780 = vmax.xlane.f32.xlu0 %v2779_v53  ;;  %v1330_v30 = vpop.f32.mrf.mxu0 }
 0x1e4   :  { %v7598_v21 = vmul.f32 0.35355338, %v1330_v30  ;;  %v2782_v54 = vsel %vm1192_vm3, %v7594_v47, -inf }
 0x1e5   :  { %2783 = vmax.xlane.f32.xlu1 %v2782_v54  ;;  %v5948_v4 = vpop.f32.mrf.mxu0  ;;  %v1468_v44 = vpop.f32.mrf.mxu1 }
 0x1e6   :  { %v7602_v34 = vmul.f32 0.35355338, %v1468_v44  ;;  %v2776_v22 = vsel %vm1192_vm3, %v7598_v21, -inf }
 0x1e7   :  { %v5965_v57 = vpop.f32.mrf.mxu1  ;;  %2774 = vmax.xlane.f32.xlu0 %v2773_v45  ;;  %v1421_v41 = vpop.f32.mrf.mxu0 }
 0x1e8   :  { %v7608_v40 = vmul.f32 0.35355338, %v1421_v41  ;;  %v2791_v38 = vsel %vm1192_vm3, %v7602_v34, -inf }
 0x1e9   :  { %v1471_v20 = vpop.f32.mrf.mxu1  ;;  %2777 = vmax.xlane.f32.xlu1 %v2776_v22  ;;  %v5959_v27 = vpop.f32.mrf.mxu0 }
 0x1ea   :  { %v7610_v3 = vmul.f32 0.35355338, %v1471_v20  ;;  %v2785_v11 = vsel %vm1192_vm3, %v7608_v40, -inf }
 0x1eb   :  { %v5966_v15 = vpop.f32.mrf.mxu1  ;;  %2792 = vmax.xlane.f32.xlu0 %v2791_v38  ;;  %v1424_v29 = vpop.f32.mrf.mxu0 }
 0x1ec   :  { %v7614_v49 = vmul.f32 0.35355338, %v1424_v29  ;;  %v2794_v42 = vsel %vm1192_vm3, %v7610_v3, -inf }
 0x1ed   :  { %v1562_v62 = vpop.f32.mrf.mxu1  ;;  %2795 = vmax.xlane.f32.xlu1 %v2794_v42  ;;  %v5960_v61 = vpop.f32.mrf.mxu0 }
 0x1ee   :  { %v7618_v46 = vmul.f32 0.35355338, %v1562_v62  ;;  %v2788_v43 = vsel %vm1192_vm3, %v7614_v49, -inf }
 0x1ef   :  { %v5977_v37 = vpop.f32.mrf.mxu1  ;;  %2786 = vmax.xlane.f32.xlu0 %v2785_v11  ;;  %v1515_v13 = vpop.f32.mrf.mxu0 }
 0x1f0   :  { %v7624_v58 = vmul.f32 0.35355338, %v1515_v13  ;;  %v2803_v14 = vsel %vm1192_vm3, %v7618_v46, -inf }
 0x1f1   :  { %v1565_v31 = vpop.f32.mrf.mxu1  ;;  %2789 = vmax.xlane.f32.xlu1 %v2788_v43  ;;  %v5971_v35 = vpop.f32.mrf.mxu0 }
 0x1f2   :  { %v7626_v12 = vmul.f32 0.35355338, %v1565_v31  ;;  %v2797_v57 = vsel %vm1192_vm3, %v7624_v58, -inf }
 0x1f3   :  { %v5978_v53 = vpop.f32.mrf.mxu1  ;;  %2804 = vmax.xlane.f32.xlu0 %v2803_v14  ;;  %v1518_v25 = vpop.f32.mrf.mxu0 }
 0x1f4   :  { %v7630_v30 = vmul.f32 0.35355338, %v1518_v25  ;;  %v2806_v54 = vsel %vm1192_vm3, %v7626_v12, -inf }
 0x1f5   :  { %v1656_v4 = vpop.f32.mrf.mxu1  ;;  %2807 = vmax.xlane.f32.xlu1 %v2806_v54  ;;  %v5972_v44 = vpop.f32.mrf.mxu0 }
 0x1f6   :  { %v7634_v45 = vmul.f32 0.35355338, %v1656_v4  ;;  %v2800_v20 = vsel %vm1192_vm3, %v7630_v30, -inf }
 0x1f7   :  { %v5989_v41 = vpop.f32.mrf.mxu1  ;;  %2798 = vmax.xlane.f32.xlu0 %v2797_v57  ;;  %v1609_v22 = vpop.f32.mrf.mxu0 }
 0x1f8   :  { %v7640_v15 = vmul.f32 0.35355338, %v1609_v22  ;;  %v2815_v42 = vsel %vm1192_vm3, %v7634_v45, -inf }
 0x1f9   :  { %v1659_v27 = vpop.f32.mrf.mxu1  ;;  %2801 = vmax.xlane.f32.xlu1 %v2800_v20  ;;  %v5983_v38 = vpop.f32.mrf.mxu0 }
 0x1fa   :  { %v7642_v29 = vmul.f32 0.35355338, %v1659_v27  ;;  %v2809_v35 = vsel %vm1192_vm3, %v7640_v15, -inf }
 0x1fb   :  { %v5990_v62 = vpop.f32.mrf.mxu1  ;;  %2816 = vmax.xlane.f32.xlu0 %v2815_v42  ;;  %v1612_v61 = vpop.f32.mrf.mxu0 }
 0x1fc   :  { %v7646_v11 = vmul.f32 0.35355338, %v1612_v61  ;;  %v2818_v37 = vsel %vm1192_vm3, %v7642_v29, -inf }
 0x1fd   :  { %v1750_v13 = vpop.f32.mrf.mxu1  ;;  %2819 = vmax.xlane.f32.xlu1 %v2818_v37  ;;  %v5984_v43 = vpop.f32.mrf.mxu0 }
 0x1fe   :  { %v7650_v31 = vmul.f32 0.35355338, %v1750_v13  ;;  %v2812_v25 = vsel %vm1192_vm3, %v7646_v11, -inf }
 0x1ff   :  { %v6001_v14 = vpop.f32.mrf.mxu1  ;;  %2810 = vmax.xlane.f32.xlu0 %v2809_v35  ;;  %v1703_v53 = vpop.f32.mrf.mxu0 }
 0x200   :  { %v7656_v44 = vmul.f32 0.35355338, %v1703_v53  ;;  %v2827_v41 = vsel %vm1192_vm3, %v7650_v31, -inf }
 0x201   :  { %v1753_v54 = vpop.f32.mrf.mxu1  ;;  %2813 = vmax.xlane.f32.xlu1 %v2812_v25  ;;  %v5995_v4 = vpop.f32.mrf.mxu0 }
 0x202   :  { %v7658_v57 = vmul.f32 0.35355338, %v1753_v54  ;;  %v2821_v37 = vsel %vm1192_vm3, %v7656_v44, -inf }
 0x203   :  { %v6002_v22 = vpop.f32.mrf.mxu1  ;;  %2828 = vmax.xlane.f32.xlu0 %v2827_v41  ;;  %v1706_v20 = vpop.f32.mrf.mxu0 }
 0x204   :  { %v7662_v27 = vmul.f32 0.35355338, %v1706_v20  ;;  %v2830_v38 = vsel %vm1192_vm3, %v7658_v57, -inf }
 0x205   :  { %v1844_v42 = vpop.f32.mrf.mxu1  ;;  %2831 = vmax.xlane.f32.xlu1 %v2830_v38  ;;  %v5996_v62 = vpop.f32.mrf.mxu0 }
 0x206   :  { %v7666_v61 = vmul.f32 0.35355338, %v1844_v42  ;;  %v2824_v35 = vsel %vm1192_vm3, %v7662_v27, -inf }
 0x207   :  { %v6013_v13 = vpop.f32.mrf.mxu1  ;;  %2822 = vmax.xlane.f32.xlu0 %v2821_v37  ;;  %v1797_v43 = vpop.f32.mrf.mxu0 }
 0x208   :  { %v7672_v25 = vmul.f32 0.35355338, %v1797_v43  ;;  %v2839_v4 = vsel %vm1192_vm3, %v7666_v61, -inf }
 0x209   :  { %v1847_v14 = vpop.f32.mrf.mxu1  ;;  %2825 = vmax.xlane.f32.xlu1 %v2824_v35  ;;  %v6007_v53 = vpop.f32.mrf.mxu0 }
 0x20a   :  { %v7674_v54 = vmul.f32 0.35355338, %v1847_v14  ;;  %v2833_v13 = vsel %vm1192_vm3, %v7672_v25, -inf }
 0x20b   :  { %v6014_v41 = vpop.f32.mrf.mxu1  ;;  %2840 = vmax.xlane.f32.xlu0 %v2839_v4  ;;  %v1800_v22 = vpop.f32.mrf.mxu0 }
 0x20c   :  { %v7678_v20 = vmul.f32 0.35355338, %v1800_v22  ;;  %v2842_v38 = vsel %vm1192_vm3, %v7674_v54, -inf }
 0x20d   :  { %v1938_v42 = vpop.f32.mrf.mxu1  ;;  %2843 = vmax.xlane.f32.xlu1 %v2842_v38  ;;  %v6008_v62 = vpop.f32.mrf.mxu0 }
 0x20e   :  { %v7682_v37 = vmul.f32 0.35355338, %v1938_v42  ;;  %v2836_v14 = vsel %vm1192_vm3, %v7678_v20, -inf }
 0x20f   :  { %v6025_v43 = vpop.f32.mrf.mxu1  ;;  %2834 = vmax.xlane.f32.xlu0 %v2833_v13  ;;  %v1891_v35 = vpop.f32.mrf.mxu0 }
 0x210   :  { %v7688_v41 = vmul.f32 0.35355338, %v1891_v35  ;;  %v2851_v38 = vsel %vm1192_vm3, %v7682_v37, -inf }
 0x211   :  { %v1941_v53 = vpop.f32.mrf.mxu1  ;;  %2837 = vmax.xlane.f32.xlu1 %v2836_v14  ;;  %v6019_v4 = vpop.f32.mrf.mxu0 }
 0x212   :  { %v7690_v22 = vmul.f32 0.35355338, %v1941_v53  ;;  %v2845_v35 = vsel %vm1192_vm3, %v7688_v41, -inf }
 0x213   :  { %v6026_v42 = vpop.f32.mrf.mxu1  ;;  %2852 = vmax.xlane.f32.xlu0 %v2851_v38  ;;  %v1894_v62 = vpop.f32.mrf.mxu0 }
 0x214   :  { %v7694_v18 = vmul.f32 0.35355338, %v1894_v62  ;;  %v2854_v13 = vsel %vm1192_vm3, %v7690_v22, -inf }
 0x215   :  { %v2032_v43 = vpop.f32.mrf.mxu1  ;;  %2855 = vmax.xlane.f32.xlu1 %v2854_v13  ;;  %v6020_v63 = vpop.f32.mrf.mxu0 }
 0x216   :  { %v7698_v14 = vmul.f32 0.35355338, %v2032_v43  ;;  %v2848_v38 = vsel %vm1192_vm3, %v7694_v18, -inf }
 0x217   :  { %v6037_v53 = vpop.f32.mrf.mxu1  ;;  %2846 = vmax.xlane.f32.xlu0 %v2845_v35  ;;  %v1985_v4 = vpop.f32.mrf.mxu0 }
 0x218   :  { %v7704_v8 = vmul.f32 0.35355338, %v1985_v4  ;;  %v2863_v63 = vsel %vm1192_vm3, %v7698_v14, -inf }
 0x219   :  { %v2035_v42 = vpop.f32.mrf.mxu1  ;;  %2849 = vmax.xlane.f32.xlu1 %v2848_v38  ;;  %v6031_v62 = vpop.f32.mrf.mxu0 }
 0x21a   :  { %v7706_v24 = vmul.f32 0.35355338, %v2035_v42  ;;  %v2857_v4 = vsel %vm1192_vm3, %v7704_v8, -inf }
 0x21b   :  { %v6038_v13 = vpop.f32.mrf.mxu1  ;;  %2864 = vmax.xlane.f32.xlu0 %v2863_v63  ;;  %v1988_v43 = vpop.f32.mrf.mxu0 }
 0x21c   :  { %v7710_v33 = vmul.f32 0.35355338, %v1988_v43  ;;  %v2866_v35 = vsel %vm1192_vm3, %v7706_v24, -inf }
 0x21d   :  { %v2126_v53 = vpop.f32.mrf.mxu1  ;;  %2867 = vmax.xlane.f32.xlu1 %v2866_v35  ;;  %v6032_v23 = vpop.f32.mrf.mxu0 }
 0x21e   :  { %v7714_v38 = vmul.f32 0.35355338, %v2126_v53  ;;  %v2860_v63 = vsel %vm1192_vm3, %v7710_v33, -inf }
 0x21f   :  { %v6049_v42 = vpop.f32.mrf.mxu1  ;;  %2858 = vmax.xlane.f32.xlu0 %v2857_v4  ;;  %v2079_v62 = vpop.f32.mrf.mxu0 }
 0x220   :  { %v7720_v17 = vmul.f32 0.35355338, %v2079_v62  ;;  %v2875_v23 = vsel %vm1192_vm3, %v7714_v38, -inf }
 0x221   :  { %v2129_v13 = vpop.f32.mrf.mxu1  ;;  %2861 = vmax.xlane.f32.xlu1 %v2860_v63  ;;  %v6043_v43 = vpop.f32.mrf.mxu0 }
 0x222   :  { %v7722_v2 = vmul.f32 0.35355338, %v2129_v13  ;;  %v2869_v62 = vsel %vm1192_vm3, %v7720_v17, -inf }
 0x223   :  { %v6050_v35 = vpop.f32.mrf.mxu1  ;;  %2876 = vmax.xlane.f32.xlu0 %v2875_v23  ;;  %v2082_v53 = vpop.f32.mrf.mxu0 }
 0x224   :  { %v7726_v26 = vmul.f32 0.35355338, %v2082_v53  ;;  %v2878_v4 = vsel %vm1192_vm3, %v7722_v2, -inf }
 0x225   :  { %v2220_v42 = vpop.f32.mrf.mxu1  ;;  %2879 = vmax.xlane.f32.xlu1 %v2878_v4  ;;  %v6044_v7 = vpop.f32.mrf.mxu0 }
 0x226   :  { %v7730_v63 = vmul.f32 0.35355338, %v2220_v42  ;;  %v2872_v23 = vsel %vm1192_vm3, %v7726_v26, -inf }
 0x227   :  { %v6061_v13 = vpop.f32.mrf.mxu1  ;;  %2870 = vmax.xlane.f32.xlu0 %v2869_v62  ;;  %v2173_v43 = vpop.f32.mrf.mxu0 }
 0x228   :  { %v7736_v16 = vmul.f32 0.35355338, %v2173_v43  ;;  %v2887_v7 = vsel %vm1192_vm3, %v7730_v63, -inf }
 0x229   :  { %v2223_v35 = vpop.f32.mrf.mxu1  ;;  %2873 = vmax.xlane.f32.xlu1 %v2872_v23  ;;  %v6055_v53 = vpop.f32.mrf.mxu0 }
 0x22a   :  { %v7738_v59 = vmul.f32 0.35355338, %v2223_v35  ;;  %v2881_v43 = vsel %vm1192_vm3, %v7736_v16, -inf }
 0x22b   :  { %v6062_v4 = vpop.f32.mrf.mxu1  ;;  %2888 = vmax.xlane.f32.xlu0 %v2887_v7  ;;  %v2176_v42 = vpop.f32.mrf.mxu0 }
 0x22c   :  { %v7742_v9 = vmul.f32 0.35355338, %v2176_v42  ;;  %v2890_v62 = vsel %vm1192_vm3, %v7738_v59, -inf }
 0x22d   :  { %v2314_v13 = vpop.f32.mrf.mxu1  ;;  %2891 = vmax.xlane.f32.xlu1 %v2890_v62  ;;  %v6056_v36 = vpop.f32.mrf.mxu0 }
 0x22e   :  { %v7746_v23 = vmul.f32 0.35355338, %v2314_v13  ;;  %v2884_v7 = vsel %vm1192_vm3, %v7742_v9, -inf }
 0x22f   :  { %v6073_v35 = vpop.f32.mrf.mxu1  ;;  %2882 = vmax.xlane.f32.xlu0 %v2881_v43  ;;  %v2267_v53 = vpop.f32.mrf.mxu0 }
 0x230   :  { %v7752_v55 = vmul.f32 0.35355338, %v2267_v53  ;;  %v2899_v36 = vsel %vm1192_vm3, %v7746_v23, -inf }
 0x231   :  { %v2317_v4 = vpop.f32.mrf.mxu1  ;;  %2885 = vmax.xlane.f32.xlu1 %v2884_v7  ;;  %v6067_v42 = vpop.f32.mrf.mxu0 }
 0x232   :  { %v7754_v10 = vmul.f32 0.35355338, %v2317_v4  ;;  %v2893_v53 = vsel %vm1192_vm3, %v7752_v55, -inf }
 0x233   :  { %v6074_v62 = vpop.f32.mrf.mxu1  ;;  %2900 = vmax.xlane.f32.xlu0 %v2899_v36  ;;  %v2270_v13 = vpop.f32.mrf.mxu0 }
 0x234   :  { %v7758_v48 = vmul.f32 0.35355338, %v2270_v13  ;;  %v2902_v43 = vsel %vm1192_vm3, %v7754_v10, -inf }
 0x235   :  { %v2408_v35 = vpop.f32.mrf.mxu1  ;;  %2903 = vmax.xlane.f32.xlu1 %v2902_v43  ;;  %v6068_v51 = vpop.f32.mrf.mxu0 }
 0x236   :  { %v7762_v7 = vmul.f32 0.35355338, %v2408_v35  ;;  %v2896_v36 = vsel %vm1192_vm3, %v7758_v48, -inf }
 0x237   :  { %v6085_v4 = vpop.f32.mrf.mxu1  ;;  %2894 = vmax.xlane.f32.xlu0 %v2893_v53  ;;  %v2361_v42 = vpop.f32.mrf.mxu0 }
 0x238   :  { %v7768_v0 = vmul.f32 0.35355338, %v2361_v42  ;;  %v2911_v51 = vsel %vm1192_vm3, %v7762_v7, -inf }
 0x239   :  { %v2411_v62 = vpop.f32.mrf.mxu1  ;;  %2897 = vmax.xlane.f32.xlu1 %v2896_v36  ;;  %v6079_v13 = vpop.f32.mrf.mxu0 }
 0x23a   :  { %8981 = vst [vmem:[#allocation12_spill] sm:$0xff] %v7768_v0  ;;  %v7770_v6 = vmul.f32 0.35355338, %v2411_v62  ;;  %v2905_v42 = vsel %vm1192_vm3, %v7768_v0, -inf }
 0x23b   :  { %v6086_v43 = vpop.f32.mrf.mxu1  ;;  %2912 = vmax.xlane.f32.xlu0 %v2911_v51  ;;  %v2364_v35 = vpop.f32.mrf.mxu0 }
 0x23c   :  { %v7774_v28 = vmul.f32 0.35355338, %v2364_v35  ;;  %v2914_v53 = vsel %vm1192_vm3, %v7770_v6, -inf }
 0x23d   :  { %v2502_v4 = vpop.f32.mrf.mxu1  ;;  %2915 = vmax.xlane.f32.xlu1 %v2914_v53  ;;  %v6080_v1 = vpop.f32.mrf.mxu0 }
 0x23e   :  { %8982 = vst [vmem:[#allocation11_spill] sm:$0xff] %v7774_v28  ;;  %v7778_v36 = vmul.f32 0.35355338, %v2502_v4  ;;  %v2908_v51 = vsel %vm1192_vm3, %v7774_v28, -inf }
 0x23f   :  { %v6097_v62 = vpop.f32.mrf.mxu1  ;;  %2906 = vmax.xlane.f32.xlu0 %v2905_v42  ;;  %v2455_v13 = vpop.f32.mrf.mxu0 }
 0x240   :  { %8983 = vst [vmem:[#allocation9_spill] sm:$0xff] %v7778_v36  ;;  %v7784_v19 = vmul.f32 0.35355338, %v2455_v13  ;;  %v2923_v1 = vsel %vm1192_vm3, %v7778_v36, -inf }
 0x241   :  { %v2505_v43 = vpop.f32.mrf.mxu1  ;;  %2909 = vmax.xlane.f32.xlu1 %v2908_v51  ;;  %v6091_v35 = vpop.f32.mrf.mxu0 }
 0x242   :  { %8984 = vst [vmem:[#allocation14_spill] sm:$0xff] %v7784_v19  ;;  %v7786_v60 = vmul.f32 0.35355338, %v2505_v43  ;;  %v2917_v13 = vsel %vm1192_vm3, %v7784_v19, -inf }
 0x243   :  { %v6098_v53 = vpop.f32.mrf.mxu1  ;;  %2924 = vmax.xlane.f32.xlu0 %v2923_v1  ;;  %v2458_v4 = vpop.f32.mrf.mxu0 }
 0x244   :  { %8985 = vst [vmem:[#allocation16_spill] sm:$0xff] %v7786_v60  ;;  %v7790_v0 = vmul.f32 0.35355338, %v2458_v4  ;;  %v2926_v42 = vsel %vm1192_vm3, %v7786_v60, -inf }
 0x245   :  { %v2596_v62 = vpop.f32.mrf.mxu1  ;;  %2927 = vmax.xlane.f32.xlu1 %v2926_v42  ;;  %v6092_v28 = vpop.f32.mrf.mxu0 }
 0x246   :  { %8986 = vst [vmem:[#allocation15_spill] sm:$0xff] %v7790_v0  ;;  %v7794_v51 = vmul.f32 0.35355338, %v2596_v62  ;;  %v2920_v1 = vsel %vm1192_vm3, %v7790_v0, -inf }
 0x247   :  { %v6109_v43 = vpop.f32.mrf.mxu1  ;;  %2918 = vmax.xlane.f32.xlu0 %v2917_v13  ;;  %v2549_v35 = vpop.f32.mrf.mxu0 }
 0x248   :  { %8987 = vst [vmem:[#allocation13_spill] sm:$0xff] %v7794_v51  ;;  %v7800_v36 = vmul.f32 0.35355338, %v2549_v35  ;;  %v2935_v28 = vsel %vm1192_vm3, %v7794_v51, -inf }
 0x249   :  { %v2599_v53 = vpop.f32.mrf.mxu1  ;;  %2921 = vmax.xlane.f32.xlu1 %v2920_v1  ;;  %v6103_v4 = vpop.f32.mrf.mxu0 }
 0x24a   :  { %8988 = vst [vmem:[#allocation18_spill] sm:$0xff] %v7800_v36  ;;  %v7802_v60 = vmul.f32 0.35355338, %v2599_v53  ;;  %v2929_v35 = vsel %vm1192_vm3, %v7800_v36, -inf }
 0x24b   :  { %v6110_v42 = vpop.f32.mrf.mxu1  ;;  %2936 = vmax.xlane.f32.xlu0 %v2935_v28  ;;  %v2552_v62 = vpop.f32.mrf.mxu0 }
 0x24c   :  { %8989 = vst [vmem:[#allocation20_spill] sm:$0xff] %v7802_v60  ;;  %v7806_v19 = vmul.f32 0.35355338, %v2552_v62  ;;  %v2938_v13 = vsel %vm1192_vm3, %v7802_v60, -inf }
 0x24d   :  { %v2690_v43 = vpop.f32.mrf.mxu1  ;;  %2939 = vmax.xlane.f32.xlu1 %v2938_v13  ;;  %v6104_v0 = vpop.f32.mrf.mxu0 }
 0x24e   :  { %v7810_v1 = vmul.f32 0.35355338, %v2690_v43  ;;  %v2932_v28 = vsel %vm1192_vm3, %v7806_v19, -inf }
 0x24f   :  { %v6121_v53 = vpop.f32.mrf.mxu1  ;;  %2930 = vmax.xlane.f32.xlu0 %v2929_v35  ;;  %v2643_v4 = vpop.f32.mrf.mxu0 }
 0x250   :  { %8990 = vst [vmem:[#allocation19_spill] sm:$0xff] %v7810_v1  ;;  %v7816_v51 = vmul.f32 0.35355338, %v2643_v4  ;;  %v2947_v0 = vsel %vm1192_vm3, %v7810_v1, -inf }
 0x251   :  { %v2693_v42 = vpop.f32.mrf.mxu1  ;;  %2933 = vmax.xlane.f32.xlu1 %v2932_v28  ;;  %v6115_v62 = vpop.f32.mrf.mxu0 }
 0x252   :  { %8991 = vst [vmem:[#allocation17_spill] sm:$0xff] %v7816_v51  ;;  %v7818_v60 = vmul.f32 0.35355338, %v2693_v42  ;;  %v2941_v28 = vsel %vm1192_vm3, %v7816_v51, -inf }
 0x253   :  { %v6122_v13 = vpop.f32.mrf.mxu1  ;;  %2948 = vmax.xlane.f32.xlu0 %v2947_v0  ;;  %v2646_v43 = vpop.f32.mrf.mxu0 }
 0x254   :  { %8992 = vst [vmem:[#allocation40_spill] sm:$0xff] %v7818_v60  ;;  %v7822_v36 = vmul.f32 0.35355338, %v2646_v43  ;;  %v2950_v35 = vsel %vm1192_vm3, %v7818_v60, -inf }
 0x255   :  { %2951 = vmax.xlane.f32.xlu1 %v2950_v35  ;;  %v6116_v53 = vpop.f32.mrf.mxu0 }
 0x256   :  { %8993 = vst [vmem:[#allocation41_spill] sm:$0xff] %v7822_v36  ;;  %v2944_v4 = vsel %vm1192_vm3, %v7822_v36, -inf }
 0x257   :  { %2942 = vmax.xlane.f32.xlu0 %v2941_v28 }
 0x259   :  { %2945 = vmax.xlane.f32.xlu1 %v2944_v4 }
 0x262   :  { %v2769_v42 = vpop.xlane.xlu1 %2768 }
 0x263   :  { %v2955_v62 = vsub.f32 %v7574_v50, %v2769_v42 }
 0x264   :  { %v2763_v0 = vpop.xlane.xlu0 %2762 }
 0x265   :  { %v3021_v13 = vmul.f32 1.442695, %v2955_v62  ;;  %v2953_v43 = vsub.f32 %v7576_v56, %v2763_v0 }
 0x266   :  { %v2772_v1 = vpop.xlane.xlu1 %2771 }
 0x267   :  { %6339 = vpow2.f32 %v3021_v13  ;;  %v3017_v60 = vmul.f32 1.442695, %v2953_v43  ;;  %v2956_v35 = vsub.f32 %v7580_v5, %v2772_v1 }
 0x268   :  { %v2766_v53 = vpop.xlane.xlu0 %2765 }
 0x269   :  { %6341 = vpow2.f32 %v3017_v60  ;;  %v3023_v51 = vmul.f32 1.442695, %v2956_v35  ;;  %v2954_v28 = vsub.f32 %v7584_v32, %v2766_v53 }
 0x26b   :  { %6343 = vpow2.f32 %v3023_v51  ;;  %v3019_v36 = vmul.f32 1.442695, %v2954_v28 }
 0x26c   :  { %v2781_v4 = vpop.xlane.xlu0 %2780 }
 0x26d   :  { %6345 = vpow2.f32 %v3019_v36  ;;  %v2959_v50 = vsub.f32 %v7588_v39, %v2781_v4 }
 0x26e   :  { %v2784_v42 = vpop.xlane.xlu1 %2783 }
 0x26f   :  { %v3029_v62 = vmul.f32 1.442695, %v2959_v50  ;;  %v2960_v56 = vsub.f32 %v7594_v47, %v2784_v42 }
 0x270   :  { %v2775_v0 = vpop.xlane.xlu0 %2774 }
 0x271   :  { %6347 = vpow2.f32 %v3029_v62  ;;  %v3031_v13 = vmul.f32 1.442695, %v2960_v56  ;;  %v2957_v5 = vsub.f32 %v7592_v52, %v2775_v0 }
 0x272   :  { %v2778_v1 = vpop.xlane.xlu1 %2777 }
 0x273   :  { %6349 = vpow2.f32 %v3031_v13  ;;  %v3025_v60 = vmul.f32 1.442695, %v2957_v5  ;;  %v2958_v32 = vsub.f32 %v7598_v21, %v2778_v1 }
 0x274   :  { %v7838_v51 = vpop.eup %6339  ;;  %v2793_v43 = vpop.xlane.xlu0 %2792 }
 0x275   :  { %6351 = vpow2.f32 %v3025_v60  ;;  %v3027_v36 = vmul.f32 1.442695, %v2958_v32  ;;  %v2963_v39 = vsub.f32 %v7602_v34, %v2793_v43  ;;  %v3151_v47 = vsel %vm1192_vm3, %v7838_v51, 0.0 }
 0x276   :  { %v7843_v35 = vpop.eup %6341  ;;  %v2796_v53 = vpop.xlane.xlu1 %2795  ;;  %3152 = vadd.xlane.f32.xlu0 %v3151_v47 }
 0x277   :  { %6353 = vpow2.f32 %v3027_v36  ;;  %v3037_v52 = vmul.f32 1.442695, %v2963_v39  ;;  %v2964_v28 = vsub.f32 %v7610_v3, %v2796_v53  ;;  %v3145_v50 = vsel %vm1192_vm3, %v7843_v35, 0.0 }
 0x278   :  { %v7846_v4 = vpop.eup %6343  ;;  %v2787_v21 = vpop.xlane.xlu0 %2786 }
 0x279   :  { %6355 = vpow2.f32 %v3037_v52  ;;  %v3039_v42 = vmul.f32 1.442695, %v2964_v28  ;;  %v2961_v34 = vsub.f32 %v7608_v40, %v2787_v21  ;;  %v3154_v62 = vsel %vm1192_vm3, %v7846_v4, 0.0 }
 0x27a   :  { %v7853_v56 = vpop.eup %6345  ;;  %v2790_v0 = vpop.xlane.xlu1 %2789  ;;  %3146 = vadd.xlane.f32.xlu0 %v3145_v50  ;;  %3155 = vadd.xlane.f32.xlu1 %v3154_v62 }
 0x27b   :  { %6357 = vpow2.f32 %v3039_v42  ;;  %v3033_v3 = vmul.f32 1.442695, %v2961_v34  ;;  %v2962_v13 = vsub.f32 %v7614_v49, %v2790_v0  ;;  %v3148_v40 = vsel %vm1192_vm3, %v7853_v56, 0.0 }
 0x27c   :  { %v2805_v5 = vpop.xlane.xlu0 %2804 }
 0x27d   :  { %6359 = vpow2.f32 %v3033_v3  ;;  %v3035_v1 = vmul.f32 1.442695, %v2962_v13  ;;  %v2967_v60 = vsub.f32 %v7618_v46, %v2805_v5 }
 0x27e   :  { %v7859_v32 = vpop.eup %6347  ;;  %v2808_v43 = vpop.xlane.xlu1 %2807  ;;  %3149 = vadd.xlane.f32.xlu1 %v3148_v40 }
 0x27f   :  { %6361 = vpow2.f32 %v3035_v1  ;;  %v3045_v36 = vmul.f32 1.442695, %v2967_v60  ;;  %v2968_v39 = vsub.f32 %v7626_v12, %v2808_v43  ;;  %v3163_v47 = vsel %vm1192_vm3, %v7859_v32, 0.0 }
 0x280   :  { %v7864_v49 = vpop.eup %6349  ;;  %v2799_v53 = vpop.xlane.xlu0 %2798  ;;  %3164 = vadd.xlane.f32.xlu0 %v3163_v47 }
 0x281   :  { %6363 = vpow2.f32 %v3045_v36  ;;  %v3047_v46 = vmul.f32 1.442695, %v2968_v39  ;;  %v2965_v52 = vsub.f32 %v7624_v58, %v2799_v53  ;;  %v3166_v28 = vsel %vm1192_vm3, %v7864_v49, 0.0 }
 0x282   :  { %v7869_v21 = vpop.eup %6351  ;;  %v2802_v50 = vpop.xlane.xlu1 %2801  ;;  %3167 = vadd.xlane.f32.xlu1 %v3166_v28 }
 0x283   :  { %6365 = vpow2.f32 %v3047_v46  ;;  %v3041_v12 = vmul.f32 1.442695, %v2965_v52  ;;  %v2966_v42 = vsub.f32 %v7630_v30, %v2802_v50  ;;  %v3157_v34 = vsel %vm1192_vm3, %v7869_v21, 0.0 }
 0x284   :  { %v7874_v62 = vpop.eup %6353  ;;  %v2817_v0 = vpop.xlane.xlu0 %2816  ;;  %3158 = vadd.xlane.f32.xlu0 %v3157_v34 }
 0x285   :  { %6367 = vpow2.f32 %v3041_v12  ;;  %v3043_v58 = vmul.f32 1.442695, %v2966_v42  ;;  %v2971_v3 = vsub.f32 %v7634_v45, %v2817_v0  ;;  %v3160_v13 = vsel %vm1192_vm3, %v7874_v62, 0.0 }
 0x286   :  { %v7879_v5 = vpop.eup %6355  ;;  %v2820_v1 = vpop.xlane.xlu1 %2819  ;;  %3161 = vadd.xlane.f32.xlu1 %v3160_v13 }
 0x287   :  { %6369 = vpow2.f32 %v3043_v58  ;;  %v3053_v30 = vmul.f32 1.442695, %v2971_v3  ;;  %v2972_v60 = vsub.f32 %v7642_v29, %v2820_v1  ;;  %v3175_v40 = vsel %vm1192_vm3, %v7879_v5, 0.0 }
 0x288   :  { %v7884_v43 = vpop.eup %6357  ;;  %v2811_v36 = vpop.xlane.xlu0 %2810  ;;  %3176 = vadd.xlane.f32.xlu0 %v3175_v40 }
 0x289   :  { %6371 = vpow2.f32 %v3053_v30  ;;  %v3055_v45 = vmul.f32 1.442695, %v2972_v60  ;;  %v2969_v39 = vsub.f32 %v7640_v15, %v2811_v36  ;;  %v3178_v47 = vsel %vm1192_vm3, %v7884_v43, 0.0 }
 0x28a   :  { %v7889_v53 = vpop.eup %6359  ;;  %v2814_v46 = vpop.xlane.xlu1 %2813  ;;  %3179 = vadd.xlane.f32.xlu1 %v3178_v47 }
 0x28b   :  { %6373 = vpow2.f32 %v3055_v45  ;;  %v3049_v29 = vmul.f32 1.442695, %v2969_v39  ;;  %v2970_v52 = vsub.f32 %v7646_v11, %v2814_v46  ;;  %v3169_v28 = vsel %vm1192_vm3, %v7889_v53, 0.0 }
 0x28c   :  { %v7894_v50 = vpop.eup %6361  ;;  %v2829_v12 = vpop.xlane.xlu0 %2828  ;;  %3170 = vadd.xlane.f32.xlu0 %v3169_v28 }
 0x28d   :  { %6375 = vpow2.f32 %v3049_v29  ;;  %v3051_v15 = vmul.f32 1.442695, %v2970_v52  ;;  %v2975_v42 = vsub.f32 %v7650_v31, %v2829_v12  ;;  %v3172_v34 = vsel %vm1192_vm3, %v7894_v50, 0.0 }
 0x28e   :  { %v7899_v0 = vpop.eup %6363  ;;  %v2832_v58 = vpop.xlane.xlu1 %2831  ;;  %3173 = vadd.xlane.f32.xlu1 %v3172_v34 }
 0x28f   :  { %6377 = vpow2.f32 %v3051_v15  ;;  %v3061_v11 = vmul.f32 1.442695, %v2975_v42  ;;  %v2976_v3 = vsub.f32 %v7658_v57, %v2832_v58  ;;  %v3187_v13 = vsel %vm1192_vm3, %v7899_v0, 0.0 }
 0x290   :  { %v7904_v1 = vpop.eup %6365  ;;  %v2823_v30 = vpop.xlane.xlu0 %2822  ;;  %3188 = vadd.xlane.f32.xlu0 %v3187_v13 }
 0x291   :  { %6379 = vpow2.f32 %v3061_v11  ;;  %v3063_v31 = vmul.f32 1.442695, %v2976_v3  ;;  %v2973_v60 = vsub.f32 %v7656_v44, %v2823_v30  ;;  %v3190_v40 = vsel %vm1192_vm3, %v7904_v1, 0.0 }
 0x292   :  { %v7909_v36 = vpop.eup %6367  ;;  %v2826_v45 = vpop.xlane.xlu1 %2825  ;;  %3191 = vadd.xlane.f32.xlu1 %v3190_v40 }
 0x293   :  { %6381 = vpow2.f32 %v3063_v31  ;;  %v3057_v57 = vmul.f32 1.442695, %v2973_v60  ;;  %v2974_v39 = vsub.f32 %v7662_v27, %v2826_v45  ;;  %v3181_v47 = vsel %vm1192_vm3, %v7909_v36, 0.0 }
 0x294   :  { %v7914_v46 = vpop.eup %6369  ;;  %v2841_v29 = vpop.xlane.xlu0 %2840  ;;  %3182 = vadd.xlane.f32.xlu0 %v3181_v47 }
 0x295   :  { %6383 = vpow2.f32 %v3057_v57  ;;  %v3059_v44 = vmul.f32 1.442695, %v2974_v39  ;;  %v2979_v52 = vsub.f32 %v7666_v61, %v2841_v29  ;;  %v3184_v28 = vsel %vm1192_vm3, %v7914_v46, 0.0 }
 0x296   :  { %v7919_v12 = vpop.eup %6371  ;;  %v2844_v15 = vpop.xlane.xlu1 %2843  ;;  %3185 = vadd.xlane.f32.xlu1 %v3184_v28 }
 0x297   :  { %6385 = vpow2.f32 %v3059_v44  ;;  %v3069_v27 = vmul.f32 1.442695, %v2979_v52  ;;  %v2980_v42 = vsub.f32 %v7674_v54, %v2844_v15  ;;  %v3199_v34 = vsel %vm1192_vm3, %v7919_v12, 0.0 }
 0x298   :  { %v7924_v58 = vpop.eup %6373  ;;  %v2835_v11 = vpop.xlane.xlu0 %2834  ;;  %3200 = vadd.xlane.f32.xlu0 %v3199_v34 }
 0x299   :  { %6387 = vpow2.f32 %v3069_v27  ;;  %v3071_v61 = vmul.f32 1.442695, %v2980_v42  ;;  %v2977_v3 = vsub.f32 %v7672_v25, %v2835_v11  ;;  %v3202_v13 = vsel %vm1192_vm3, %v7924_v58, 0.0 }
 0x29a   :  { %v7929_v30 = vpop.eup %6375  ;;  %v2838_v31 = vpop.xlane.xlu1 %2837  ;;  %3203 = vadd.xlane.f32.xlu1 %v3202_v13 }
 0x29b   :  { %6389 = vpow2.f32 %v3071_v61  ;;  %v3065_v54 = vmul.f32 1.442695, %v2977_v3  ;;  %v2978_v60 = vsub.f32 %v7678_v20, %v2838_v31  ;;  %v3193_v40 = vsel %vm1192_vm3, %v7929_v30, 0.0 }
 0x29c   :  { %v7934_v45 = vpop.eup %6377  ;;  %v2853_v57 = vpop.xlane.xlu0 %2852  ;;  %3194 = vadd.xlane.f32.xlu0 %v3193_v40 }
 0x29d   :  { %6391 = vpow2.f32 %v3065_v54  ;;  %v3067_v25 = vmul.f32 1.442695, %v2978_v60  ;;  %v2983_v39 = vsub.f32 %v7682_v37, %v2853_v57  ;;  %v3196_v47 = vsel %vm1192_vm3, %v7934_v45, 0.0 }
 0x29e   :  { %v7939_v29 = vpop.eup %6379  ;;  %v2856_v44 = vpop.xlane.xlu1 %2855  ;;  %3197 = vadd.xlane.f32.xlu1 %v3196_v47 }
 0x29f   :  { %6393 = vpow2.f32 %v3067_v25  ;;  %v3077_v20 = vmul.f32 1.442695, %v2983_v39  ;;  %v2984_v52 = vsub.f32 %v7690_v22, %v2856_v44  ;;  %v3211_v28 = vsel %vm1192_vm3, %v7939_v29, 0.0 }
 0x2a0   :  { %v7944_v15 = vpop.eup %6381  ;;  %v2847_v27 = vpop.xlane.xlu0 %2846  ;;  %3212 = vadd.xlane.f32.xlu0 %v3211_v28 }
 0x2a1   :  { %6395 = vpow2.f32 %v3077_v20  ;;  %v3079_v37 = vmul.f32 1.442695, %v2984_v52  ;;  %v2981_v42 = vsub.f32 %v7688_v41, %v2847_v27  ;;  %v3214_v34 = vsel %vm1192_vm3, %v7944_v15, 0.0 }
 0x2a2   :  { %v7949_v11 = vpop.eup %6383  ;;  %v2850_v61 = vpop.xlane.xlu1 %2849  ;;  %3215 = vadd.xlane.f32.xlu1 %v3214_v34 }
 0x2a3   :  { %6397 = vpow2.f32 %v3079_v37  ;;  %v3073_v22 = vmul.f32 1.442695, %v2981_v42  ;;  %v2982_v3 = vsub.f32 %v7694_v18, %v2850_v61  ;;  %v3205_v13 = vsel %vm1192_vm3, %v7949_v11, 0.0 }
 0x2a4   :  { %v7954_v31 = vpop.eup %6385  ;;  %v2865_v54 = vpop.xlane.xlu0 %2864  ;;  %3206 = vadd.xlane.f32.xlu0 %v3205_v13 }
 0x2a5   :  { %6399 = vpow2.f32 %v3073_v22  ;;  %v3075_v41 = vmul.f32 1.442695, %v2982_v3  ;;  %v2987_v60 = vsub.f32 %v7698_v14, %v2865_v54  ;;  %v3208_v40 = vsel %vm1192_vm3, %v7954_v31, 0.0 }
 0x2a6   :  { %v7959_v57 = vpop.eup %6387  ;;  %v2868_v25 = vpop.xlane.xlu1 %2867  ;;  %3209 = vadd.xlane.f32.xlu1 %v3208_v40 }
 0x2a7   :  { %6401 = vpow2.f32 %v3075_v41  ;;  %v3085_v18 = vmul.f32 1.442695, %v2987_v60  ;;  %v2988_v39 = vsub.f32 %v7706_v24, %v2868_v25  ;;  %v3223_v47 = vsel %vm1192_vm3, %v7959_v57, 0.0 }
 0x2a8   :  { %v7964_v44 = vpop.eup %6389  ;;  %v2859_v20 = vpop.xlane.xlu0 %2858  ;;  %3224 = vadd.xlane.f32.xlu0 %v3223_v47 }
 0x2a9   :  { %6403 = vpow2.f32 %v3085_v18  ;;  %v3087_v14 = vmul.f32 1.442695, %v2988_v39  ;;  %v2985_v52 = vsub.f32 %v7704_v8, %v2859_v20  ;;  %v3226_v28 = vsel %vm1192_vm3, %v7964_v44, 0.0 }
 0x2aa   :  { %v7969_v27 = vpop.eup %6391  ;;  %v2862_v37 = vpop.xlane.xlu1 %2861  ;;  %3227 = vadd.xlane.f32.xlu1 %v3226_v28 }
 0x2ab   :  { %6405 = vpow2.f32 %v3087_v14  ;;  %v3081_v24 = vmul.f32 1.442695, %v2985_v52  ;;  %v2986_v42 = vsub.f32 %v7710_v33, %v2862_v37  ;;  %v3217_v34 = vsel %vm1192_vm3, %v7969_v27, 0.0 }
 0x2ac   :  { %v7974_v61 = vpop.eup %6393  ;;  %v2877_v22 = vpop.xlane.xlu0 %2876  ;;  %3218 = vadd.xlane.f32.xlu0 %v3217_v34 }
 0x2ad   :  { %6407 = vpow2.f32 %v3081_v24  ;;  %v3083_v8 = vmul.f32 1.442695, %v2986_v42  ;;  %v2991_v3 = vsub.f32 %v7714_v38, %v2877_v22  ;;  %v3220_v13 = vsel %vm1192_vm3, %v7974_v61, 0.0 }
 0x2ae   :  { %v7979_v54 = vpop.eup %6395  ;;  %v2880_v41 = vpop.xlane.xlu1 %2879  ;;  %3221 = vadd.xlane.f32.xlu1 %v3220_v13 }
 0x2af   :  { %6409 = vpow2.f32 %v3083_v8  ;;  %v3093_v33 = vmul.f32 1.442695, %v2991_v3  ;;  %v2992_v60 = vsub.f32 %v7722_v2, %v2880_v41  ;;  %v3235_v40 = vsel %vm1192_vm3, %v7979_v54, 0.0 }
 0x2b0   :  { %v7984_v25 = vpop.eup %6397  ;;  %v2871_v18 = vpop.xlane.xlu0 %2870  ;;  %3236 = vadd.xlane.f32.xlu0 %v3235_v40 }
 0x2b1   :  { %6411 = vpow2.f32 %v3093_v33  ;;  %v3095_v38 = vmul.f32 1.442695, %v2992_v60  ;;  %v2989_v39 = vsub.f32 %v7720_v17, %v2871_v18  ;;  %v3238_v47 = vsel %vm1192_vm3, %v7984_v25, 0.0 }
 0x2b2   :  { %v7989_v20 = vpop.eup %6399  ;;  %v2874_v14 = vpop.xlane.xlu1 %2873  ;;  %3239 = vadd.xlane.f32.xlu1 %v3238_v47 }
 0x2b3   :  { %6413 = vpow2.f32 %v3095_v38  ;;  %v3089_v2 = vmul.f32 1.442695, %v2989_v39  ;;  %v2990_v52 = vsub.f32 %v7726_v26, %v2874_v14  ;;  %v3229_v28 = vsel %vm1192_vm3, %v7989_v20, 0.0 }
 0x2b4   :  { %v7994_v37 = vpop.eup %6401  ;;  %v2889_v24 = vpop.xlane.xlu0 %2888  ;;  %3230 = vadd.xlane.f32.xlu0 %v3229_v28 }
 0x2b5   :  { %6415 = vpow2.f32 %v3089_v2  ;;  %v3091_v17 = vmul.f32 1.442695, %v2990_v52  ;;  %v2995_v42 = vsub.f32 %v7730_v63, %v2889_v24  ;;  %v3232_v34 = vsel %vm1192_vm3, %v7994_v37, 0.0 }
 0x2b6   :  { %v7999_v22 = vpop.eup %6403  ;;  %v2892_v8 = vpop.xlane.xlu1 %2891  ;;  %3233 = vadd.xlane.f32.xlu1 %v3232_v34 }
 0x2b7   :  { %6417 = vpow2.f32 %v3091_v17  ;;  %v3101_v26 = vmul.f32 1.442695, %v2995_v42  ;;  %v2996_v3 = vsub.f32 %v7738_v59, %v2892_v8  ;;  %v3247_v13 = vsel %vm1192_vm3, %v7999_v22, 0.0 }
 0x2b8   :  { %v8004_v41 = vpop.eup %6405  ;;  %v2883_v33 = vpop.xlane.xlu0 %2882  ;;  %3248 = vadd.xlane.f32.xlu0 %v3247_v13 }
 0x2b9   :  { %6419 = vpow2.f32 %v3101_v26  ;;  %v3103_v63 = vmul.f32 1.442695, %v2996_v3  ;;  %v2993_v60 = vsub.f32 %v7736_v16, %v2883_v33  ;;  %v3250_v40 = vsel %vm1192_vm3, %v8004_v41, 0.0 }
 0x2ba   :  { %v8009_v18 = vpop.eup %6407  ;;  %v2886_v38 = vpop.xlane.xlu1 %2885  ;;  %3251 = vadd.xlane.f32.xlu1 %v3250_v40 }
 0x2bb   :  { %6421 = vpow2.f32 %v3103_v63  ;;  %v3097_v59 = vmul.f32 1.442695, %v2993_v60  ;;  %v2994_v39 = vsub.f32 %v7742_v9, %v2886_v38  ;;  %v3241_v47 = vsel %vm1192_vm3, %v8009_v18, 0.0 }
 0x2bc   :  { %v8014_v14 = vpop.eup %6409  ;;  %v2901_v2 = vpop.xlane.xlu0 %2900  ;;  %3242 = vadd.xlane.f32.xlu0 %v3241_v47 }
 0x2bd   :  { %6423 = vpow2.f32 %v3097_v59  ;;  %v3099_v16 = vmul.f32 1.442695, %v2994_v39  ;;  %v2999_v52 = vsub.f32 %v7746_v23, %v2901_v2  ;;  %v3244_v28 = vsel %vm1192_vm3, %v8014_v14, 0.0 }
 0x2be   :  { %v8019_v24 = vpop.eup %6411  ;;  %v2904_v17 = vpop.xlane.xlu1 %2903  ;;  %3245 = vadd.xlane.f32.xlu1 %v3244_v28 }
 0x2bf   :  { %6425 = vpow2.f32 %v3099_v16  ;;  %v3109_v9 = vmul.f32 1.442695, %v2999_v52  ;;  %v3000_v42 = vsub.f32 %v7754_v10, %v2904_v17  ;;  %v3259_v34 = vsel %vm1192_vm3, %v8019_v24, 0.0 }
 0x2c0   :  { %v8024_v8 = vpop.eup %6413  ;;  %v2895_v26 = vpop.xlane.xlu0 %2894  ;;  %3260 = vadd.xlane.f32.xlu0 %v3259_v34 }
 0x2c1   :  { %6427 = vpow2.f32 %v3109_v9  ;;  %v3111_v23 = vmul.f32 1.442695, %v3000_v42  ;;  %v2997_v3 = vsub.f32 %v7752_v55, %v2895_v26  ;;  %v3262_v13 = vsel %vm1192_vm3, %v8024_v8, 0.0  ;;  %v8994_v42 = vld [vmem:[#allocation12_spill] sm:$0xff] }
 0x2c2   :  { %v8029_v33 = vpop.eup %6415  ;;  %v2898_v63 = vpop.xlane.xlu1 %2897  ;;  %3263 = vadd.xlane.f32.xlu1 %v3262_v13  ;;  %v8995_v13 = vld [vmem:[#allocation11_spill] sm:$0xff] }
 0x2c3   :  { %6429 = vpow2.f32 %v3111_v23  ;;  %v3105_v10 = vmul.f32 1.442695, %v2997_v3  ;;  %v2998_v60 = vsub.f32 %v7758_v48, %v2898_v63  ;;  %v3253_v40 = vsel %vm1192_vm3, %v8029_v33, 0.0 }
 0x2c4   :  { %v8034_v38 = vpop.eup %6417  ;;  %v2913_v59 = vpop.xlane.xlu0 %2912  ;;  %3254 = vadd.xlane.f32.xlu0 %v3253_v40 }
 0x2c5   :  { %6431 = vpow2.f32 %v3105_v10  ;;  %v3107_v55 = vmul.f32 1.442695, %v2998_v60  ;;  %v3003_v39 = vsub.f32 %v7762_v7, %v2913_v59  ;;  %v3256_v47 = vsel %vm1192_vm3, %v8034_v38, 0.0 }
 0x2c6   :  { %v8039_v2 = vpop.eup %6419  ;;  %v2916_v16 = vpop.xlane.xlu1 %2915  ;;  %3257 = vadd.xlane.f32.xlu1 %v3256_v47 }
 0x2c7   :  { %6433 = vpow2.f32 %v3107_v55  ;;  %v3117_v48 = vmul.f32 1.442695, %v3003_v39  ;;  %v3004_v52 = vsub.f32 %v7770_v6, %v2916_v16  ;;  %v3271_v28 = vsel %vm1192_vm3, %v8039_v2, 0.0  ;;  %v8996_v55 = vld [vmem:[#allocation9_spill] sm:$0xff] }
 0x2c8   :  { %v8044_v17 = vpop.eup %6421  ;;  %v2907_v9 = vpop.xlane.xlu0 %2906  ;;  %3272 = vadd.xlane.f32.xlu0 %v3271_v28  ;;  %v8997_v28 = vld [vmem:[#allocation16_spill] sm:$0xff] }
 0x2c9   :  { %6435 = vpow2.f32 %v3117_v48  ;;  %v3119_v7 = vmul.f32 1.442695, %v3004_v52  ;;  %v3001_v34 = vsub.f32 %v8994_v42, %v2907_v9  ;;  %v3274_v26 = vsel %vm1192_vm3, %v8044_v17, 0.0 }
 0x2ca   :  { %v8049_v23 = vpop.eup %6423  ;;  %v2910_v3 = vpop.xlane.xlu1 %2909  ;;  %3275 = vadd.xlane.f32.xlu1 %v3274_v26 }
 0x2cb   :  { %6437 = vpow2.f32 %v3119_v7  ;;  %v3113_v6 = vmul.f32 1.442695, %v3001_v34  ;;  %v3002_v63 = vsub.f32 %v8995_v13, %v2910_v3  ;;  %v3265_v10 = vsel %vm1192_vm3, %v8049_v23, 0.0  ;;  %v8998_v3 = vld [vmem:[#allocation14_spill] sm:$0xff] }
 0x2cc   :  { %v8054_v60 = vpop.eup %6425  ;;  %v2925_v40 = vpop.xlane.xlu0 %2924  ;;  %3266 = vadd.xlane.f32.xlu0 %v3265_v10 }
 0x2cd   :  { %6439 = vpow2.f32 %v3113_v6  ;;  %v3115_v59 = vmul.f32 1.442695, %v3002_v63  ;;  %v3007_v39 = vsub.f32 %v8996_v55, %v2925_v40  ;;  %v3268_v47 = vsel %vm1192_vm3, %v8054_v60, 0.0 }
 0x2ce   :  { %v8059_v16 = vpop.eup %6427  ;;  %v2928_v48 = vpop.xlane.xlu1 %2927  ;;  %3269 = vadd.xlane.f32.xlu1 %v3268_v47 }
 0x2cf   :  { %6441 = vpow2.f32 %v3115_v59  ;;  %v3125_v52 = vmul.f32 1.442695, %v3007_v39  ;;  %v3008_v9 = vsub.f32 %v8997_v28, %v2928_v48  ;;  %v3283_v7 = vsel %vm1192_vm3, %v8059_v16, 0.0  ;;  %v8999_v59 = vld [vmem:[#allocation15_spill] sm:$0xff]  ;;  %v9001_v28 = vld [vmem:[#allocation13_spill] sm:$0xff] }
 0x2d0   :  { %v8064_v42 = vpop.eup %6429  ;;  %v2919_v34 = vpop.xlane.xlu0 %2918  ;;  %3284 = vadd.xlane.f32.xlu0 %v3283_v7 }
 0x2d1   :  { %6443 = vpow2.f32 %v3125_v52  ;;  %v3127_v26 = vmul.f32 1.442695, %v3008_v9  ;;  %v3005_v6 = vsub.f32 %v8998_v3, %v2919_v34  ;;  %v3286_v13 = vsel %vm1192_vm3, %v8064_v42, 0.0 }
 0x2d2   :  { %v8069_v63 = vpop.eup %6431  ;;  %v2922_v10 = vpop.xlane.xlu1 %2921  ;;  %3287 = vadd.xlane.f32.xlu1 %v3286_v13 }
 0x2d3   :  { %6445 = vpow2.f32 %v3127_v26  ;;  %v3121_v40 = vmul.f32 1.442695, %v3005_v6  ;;  %v3006_v55 = vsub.f32 %v8999_v59, %v2922_v10  ;;  %v3277_v39 = vsel %vm1192_vm3, %v8069_v63, 0.0  ;;  %v9003_v6 = vld [vmem:[#allocation20_spill] sm:$0xff] }
 0x2d4   :  { %v8074_v47 = vpop.eup %6433  ;;  %v2937_v48 = vpop.xlane.xlu0 %2936  ;;  %3278 = vadd.xlane.f32.xlu0 %v3277_v39  ;;  %v9005_v39 = vld [vmem:[#allocation18_spill] sm:$0xff] }
 0x2d5   :  { %9000 = vst [vmem:[#allocation12_spill] sm:$0xff] %v8074_v47  ;;  %6447 = vpow2.f32 %v3121_v40  ;;  %v3123_v52 = vmul.f32 1.442695, %v3006_v55  ;;  %v3011_v9 = vsub.f32 %v9001_v28, %v2937_v48  ;;  %v3280_v7 = vsel %vm1192_vm3, %v8074_v47, 0.0 }
 0x2d6   :  { %v8079_v34 = vpop.eup %6435  ;;  %v2940_v26 = vpop.xlane.xlu1 %2939  ;;  %3281 = vadd.xlane.f32.xlu1 %v3280_v7 }
 0x2d7   :  { %9002 = vst [vmem:[#allocation11_spill] sm:$0xff] %v8079_v34  ;;  %6449 = vpow2.f32 %v3123_v52  ;;  %v3133_v3 = vmul.f32 1.442695, %v3011_v9  ;;  %v3012_v13 = vsub.f32 %v9003_v6, %v2940_v26  ;;  %v3295_v10 = vsel %vm1192_vm3, %v8079_v34, 0.0 }
 0x2d8   :  { %v8084_v59 = vpop.eup %6437  ;;  %v2931_v40 = vpop.xlane.xlu0 %2930  ;;  %3296 = vadd.xlane.f32.xlu0 %v3295_v10 }
 0x2d9   :  { %9004 = vst [vmem:[#allocation9_spill] sm:$0xff] %v8084_v59  ;;  %6451 = vpow2.f32 %v3133_v3  ;;  %v3135_v55 = vmul.f32 1.442695, %v3012_v13  ;;  %v3009_v48 = vsub.f32 %v9005_v39, %v2931_v40  ;;  %v3298_v28 = vsel %vm1192_vm3, %v8084_v59, 0.0  ;;  %v9009_v39 = vld [vmem:[#allocation19_spill] sm:$0xff] }
 0x2da   :  { %v8089_v47 = vpop.eup %6439  ;;  %v2934_v52 = vpop.xlane.xlu1 %2933  ;;  %3299 = vadd.xlane.f32.xlu1 %v3298_v28 }
 0x2db   :  { %9006 = vst [vmem:[#allocation16_spill] sm:$0xff] %v8089_v47  ;;  %6453 = vpow2.f32 %v3135_v55  ;;  %v3129_v9 = vmul.f32 1.442695, %v3009_v48  ;;  %v3010_v7 = vsub.f32 %v7806_v19, %v2934_v52  ;;  %v3289_v26 = vsel %vm1192_vm3, %v8089_v47, 0.0 }
 0x2dc   :  { %v8094_v6 = vpop.eup %6441  ;;  %v2949_v3 = vpop.xlane.xlu0 %2948  ;;  %3290 = vadd.xlane.f32.xlu0 %v3289_v26  ;;  %v9010_v26 = vld [vmem:[#allocation40_spill] sm:$0xff] }
 0x2dd   :  { %9007 = vst [vmem:[#allocation14_spill] sm:$0xff] %v8094_v6  ;;  %6455 = vpow2.f32 %v3129_v9  ;;  %v3131_v13 = vmul.f32 1.442695, %v3010_v7  ;;  %v3292_v10 = vsel %vm1192_vm3, %v8094_v6, 0.0  ;;  %v3015_v28 = vsub.f32 %v9009_v39, %v2949_v3  ;;  %v9011_v7 = vld [vmem:[#allocation17_spill] sm:$0xff] }
 0x2de   :  { %v8098_v40 = vpop.eup %6443  ;;  %v2952_v55 = vpop.xlane.xlu1 %2951  ;;  %3293 = vadd.xlane.f32.xlu1 %v3292_v10  ;;  %v9012_v39 = vld [vmem:[#allocation41_spill] sm:$0xff] }
 0x2df   :  { %9008 = vst [vmem:[#allocation15_spill] sm:$0xff] %v8098_v40  ;;  %6457 = vpow2.f32 %v3131_v13  ;;  %v3307_v19 = vsel %vm1192_vm3, %v8098_v40, 0.0  ;;  %v3016_v9 = vsub.f32 %v9010_v26, %v2952_v55  ;;  %v3141_v3 = vmul.f32 1.442695, %v3015_v28 }
 0x2e0   :  { %v8103_v48 = vpop.eup %6445  ;;  %3308 = vadd.xlane.f32.xlu0 %v3307_v19  ;;  %v2943_v52 = vpop.xlane.xlu0 %2942 }
 0x2e1   :  { %v3013_v47 = vsub.f32 %v9011_v7, %v2943_v52  ;;  %v3310_v6 = vsel %vm1192_vm3, %v8103_v48, 0.0  ;;  %v3143_v55 = vmul.f32 1.442695, %v3016_v9 }
 0x2e2   :  { %v8109_v59 = vpop.eup %6447  ;;  %3311 = vadd.xlane.f32.xlu1 %v3310_v6  ;;  %v2946_v10 = vpop.xlane.xlu1 %2945 }
 0x2e3   :  { %v3137_v13 = vmul.f32 1.442695, %v3013_v47  ;;  %v3014_v34 = vsub.f32 %v9012_v39, %v2946_v10  ;;  %v3301_v40 = vsel %vm1192_vm3, %v8109_v59, 0.0 }
 0x2e4   :  { %v8114_v19 = vpop.eup %6449  ;;  %3302 = vadd.xlane.f32.xlu0 %v3301_v40 }
 0x2e5   :  { %6459 = vpow2.f32 %v3137_v13  ;;  %v3139_v52 = vmul.f32 1.442695, %v3014_v34  ;;  %v3304_v26 = vsel %vm1192_vm3, %v8114_v19, 0.0 }
 0x2e6   :  { %v8118_v7 = vpop.eup %6451  ;;  %6461 = vpow2.f32 %v3141_v3  ;;  %3305 = vadd.xlane.f32.xlu1 %v3304_v26 }
 0x2e7   :  { %9013 = vst [vmem:[#allocation13_spill] sm:$0xff] %v8118_v7  ;;  %6463 = vpow2.f32 %v3139_v52  ;;  %v3319_v47 = vsel %vm1192_vm3, %v8118_v7, 0.0 }
 0x2e8   :  { %v8122_v6 = vpop.eup %6453  ;;  %3320 = vadd.xlane.f32.xlu0 %v3319_v47  ;;  %6465 = vpow2.f32 %v3143_v55 }
 0x2e9   :  { %9014 = vst [vmem:[#allocation20_spill] sm:$0xff] %v8122_v6  ;;  %v3322_v40 = vsel %vm1192_vm3, %v8122_v6, 0.0 }
 0x2ea   :  { %v8126_v28 = vpop.eup %6455  ;;  %3323 = vadd.xlane.f32.xlu1 %v3322_v40 }
 0x2eb   :  { %9015 = vst [vmem:[#allocation18_spill] sm:$0xff] %v8126_v28  ;;  %v3313_v34 = vsel %vm1192_vm3, %v8126_v28, 0.0 }
 0x2ec   :  { %v8130_v9 = vpop.eup %6457  ;;  %3314 = vadd.xlane.f32.xlu0 %v3313_v34 }
 0x2ed   :  { %9016 = vst [vmem:[#allocation19_spill] sm:$0xff] %v8130_v9  ;;  %v3316_v3 = vsel %vm1192_vm3, %v8130_v9, 0.0 }
 0x2ee   :  { %3317 = vadd.xlane.f32.xlu1 %v3316_v3 }
 0x2f2   :  { %v8134_v10 = vpop.eup %6459 }
 0x2f3   :  { %9017 = vst [vmem:[#allocation40_spill] sm:$0xff] %v8134_v10  ;;  %v8136_v13 = vpop.eup %6461  ;;  %v3325_v39 = vsel %vm1192_vm3, %v8134_v10, 0.0 }
 0x2f4   :  { %9018 = vst [vmem:[#allocation17_spill] sm:$0xff] %v8136_v13  ;;  %v8140_v55 = vpop.eup %6463  ;;  %3326 = vadd.xlane.f32.xlu0 %v3325_v39  ;;  %v3331_v47 = vsel %vm1192_vm3, %v8136_v13, 0.0 }
 0x2f5   :  { %9019 = vst [vmem:[#allocation41_spill] sm:$0xff] %v8140_v55  ;;  %v3328_v52 = vsel %vm1192_vm3, %v8140_v55, 0.0  ;;  %v8144_v26 = vpop.eup %6465 }
 0x2f6   :  { %9020 = vst [vmem:[#allocation42_spill] sm:$0xff] %v8144_v26  ;;  %3329 = vadd.xlane.f32.xlu1 %v3328_v52  ;;  %v3334_v40 = vsel %vm1192_vm3, %v8144_v26, 0.0 }
 0x2f8   :  { %3332 = vadd.xlane.f32.xlu0 %v3331_v47 }
 0x2fa   :  { %3335 = vadd.xlane.f32.xlu1 %v3334_v40 }
 0x2ff   :  { %v3153_v34 = vpop.xlane.xlu0 %3152 }
 0x300   :  { %6467 = vrcp.f32 %v3153_v34 }
 0x303   :  { %v3147_v3 = vpop.xlane.xlu0 %3146  ;;  %v3156_v10 = vpop.xlane.xlu1 %3155 }
 0x304   :  { %6469 = vrcp.f32 %v3156_v10 }
 0x305   :  { %6471 = vrcp.f32 %v3147_v3 }
 0x307   :  { %v3150_v39 = vpop.xlane.xlu1 %3149 }
 0x308   :  { %6473 = vrcp.f32 %v3150_v39 }
 0x309   :  { %v3165_v55 = vpop.xlane.xlu0 %3164 }
 0x30a   :  { %6475 = vrcp.f32 %v3165_v55 }
 0x30b   :  { %v3168_v9 = vpop.xlane.xlu1 %3167 }
 0x30c   :  { %6477 = vrcp.f32 %v3168_v9 }
 0x30d   :  { %v3159_v52 = vpop.xlane.xlu0 %3158  ;;  %v6468_v47 = vpop.eup %6467 }
 0x30e   :  { %6479 = vrcp.f32 %v3159_v52  ;;  %v3403_v34 = vmul.f32 %v6468_v47, %v7838_v51  ;;  %v9022_v47 = vmov 0.0  }
 0x30f   :  { %v3162_v13 = vpop.xlane.xlu1 %3161 }
 0x310   :  { %6481 = vrcp.f32 %v3162_v13 }
 0x311   :  { %v3177_v28 = vpop.xlane.xlu0 %3176  ;;  %v6470_v26 = vpop.eup %6469 }
 0x312   :  { %6483 = vrcp.f32 %v3177_v28  ;;  %v6472_v40 = vpop.eup %6471  ;;  %v3404_v10 = vmul.f32 %v6470_v26, %v7846_v4  ;;  %v9021_v28 = vld [vmem:[#allocation23_spill] sm:$0xff]  ;;  %v9023_v26 = vld [vmem:[#allocation21_spill] sm:$0xff] }
 0x313   :  { %v3180_v3 = vpop.xlane.xlu1 %3179  ;;  %v3401_v9 = vmul.f32 %v6472_v40, %v7843_v35 }
 0x314   :  { %6485 = vrcp.f32 %v3180_v3  ;;  %v3467_v55 = vpack.c.bf16 %v3404_v10, %v3403_v34  ;;  %v9024_v3 = vld [vmem:[#allocation25_spill] sm:$0xff] }
 0x315   :  { %v6474_v39 = vpop.eup %6473  ;;  %v3171_v6 = vpop.xlane.xlu0 %3170  ;;  %v8160_v34 = vpack.c.bf16 %v9024_v3, %v9023_v26  ;;  %v9026_v26 = vld [vmem:[#allocation27_spill] sm:$0xff] }
 0x316   :  { %v3402_v52 = vmul.f32 %v6474_v39, %v7853_v56  ;;  %6487 = vrcp.f32 %v3171_v6  ;;  %6132 = vmatmul.mubr.msk.bf16.vlgmr.msra.gmra.mxu1 %vm1192_vm3, %v3467_v55  ;;  %v9027_v3 = vld [vmem:[#allocation31_spill] sm:$0xff] }
 0x317   :  { %v6476_v7 = vpop.eup %6475  ;;  %v3174_v13 = vpop.xlane.xlu1 %3173  ;;  %6142 = vmatpush3.bf16.msra.mxu1 %v9021_v28  ;;  %6143 = vmatprep.mubr.msk.bf16.mxu1 %vm6682_vm2, %v9022_v47 }
 0x318   :  { %6489 = vrcp.f32 %v3174_v13  ;;  %v3466_v51 = vpack.c.bf16 %v3402_v52, %v3401_v9  ;;  %6153 = vmatprep.subr.bf16.mxu1 %v9022_v47  ;;  %v3407_v56 = vmul.f32 %v6476_v7, %v7859_v32  ;;  %v9025_v13 = vld [vmem:[#allocation29_spill] sm:$0xff] }
 0x319   :  { %v6478_v4 = vpop.eup %6477  ;;  %v3189_v35 = vpop.xlane.xlu0 %3188 }
 0x31a   :  { %v3408_v6 = vmul.f32 %v6478_v4, %v7864_v49  ;;  %6491 = vrcp.f32 %v3189_v35  ;;  %6126 = vmatmul.mubr.msk.bf16.vlgmr.msra.gmra.mxu0 %vm1192_vm3, %v3466_v51  ;;  %v8178_v35 = vpack.c.bf16 %v9027_v3, %v9026_v26 }
 0x31b   :  { %v6480_v40 = vpop.eup %6479  ;;  %6136 = vmatpush3.bf16.msra.mxu0 %v8160_v34  ;;  %v3192_v10 = vpop.xlane.xlu1 %3191  ;;  %6137 = vmatprep.mubr.msk.bf16.mxu0 %vm6682_vm2, %v9022_v47 }
 0x31c   :  { %6493 = vrcp.f32 %v3192_v10  ;;  %v3469_v39 = vpack.c.bf16 %v3408_v6, %v3407_v56  ;;  %6147 = vmatprep.subr.bf16.mxu0 %v9022_v47  ;;  %v3405_v32 = vmul.f32 %v6480_v40, %v7869_v21 }
 0x31d   :  { %v6482_v55 = vpop.eup %6481  ;;  %v3183_v9 = vpop.xlane.xlu0 %3182 }
 0x31e   :  { %v3406_v49 = vmul.f32 %v6482_v55, %v7874_v62  ;;  %6495 = vrcp.f32 %v3183_v9  ;;  %6144 = vmatmul.mubr.msk.bf16.vlgmr.msra.gmra.mxu1 %vm1192_vm3, %v3469_v39 }
 0x31f   :  { %v6484_v7 = vpop.eup %6483  ;;  %v3186_v52 = vpop.xlane.xlu1 %3185  ;;  %6154 = vmatpush3.bf16.msra.mxu1 %v9025_v13  ;;  %6155 = vmatprep.mubr.msk.bf16.mxu1 %vm6682_vm2, %v9022_v47 }
 0x320   :  { %6497 = vrcp.f32 %v3186_v52  ;;  %v3468_v51 = vpack.c.bf16 %v3406_v49, %v3405_v32  ;;  %6165 = vmatprep.subr.bf16.mxu1 %v9022_v47  ;;  %v3411_v62 = vmul.f32 %v6484_v7, %v7879_v5  ;;  %v9028_v49 = vld [vmem:[#allocation35_spill] sm:$0xff] }
 0x321   :  { %v6486_v4 = vpop.eup %6485  ;;  %v3201_v21 = vpop.xlane.xlu0 %3200 }
 0x322   :  { %v3412_v56 = vmul.f32 %v6486_v4, %v7884_v43  ;;  %6499 = vrcp.f32 %v3201_v21  ;;  %6138 = vmatmul.mubr.msk.bf16.vlgmr.msra.gmra.mxu0 %vm1192_vm3, %v3468_v51  ;;  %v9029_v51 = vld [vmem:[#allocation33_spill] sm:$0xff]  ;;  %v9030_v4 = vld [vmem:[#allocation10_spill] sm:$0xff] }
 0x323   :  { %v6488_v6 = vpop.eup %6487  ;;  %6148 = vmatpush3.bf16.msra.mxu0 %v8178_v35  ;;  %v3204_v40 = vpop.xlane.xlu1 %3203  ;;  %6149 = vmatprep.mubr.msk.bf16.mxu0 %vm6682_vm2, %v9022_v47  ;;  %v8196_v26 = vpack.c.bf16 %v9030_v4, %v9029_v51 }
 0x324   :  { %6501 = vrcp.f32 %v3204_v40  ;;  %v3471_v10 = vpack.c.bf16 %v3412_v56, %v3411_v62  ;;  %6159 = vmatprep.subr.bf16.mxu0 %v9022_v47  ;;  %v3409_v5 = vmul.f32 %v6488_v6, %v7889_v53 }
 0x325   :  { %v6490_v39 = vpop.eup %6489  ;;  %v3195_v55 = vpop.xlane.xlu0 %3194 }
 0x326   :  { %v3410_v43 = vmul.f32 %v6490_v39, %v7894_v50  ;;  %6503 = vrcp.f32 %v3195_v55  ;;  %6156 = vmatmul.mubr.msk.bf16.vlgmr.msra.gmra.mxu1 %vm1192_vm3, %v3471_v10  ;;  %v9031_v55 = vld [vmem:[#allocation24_spill] sm:$0xff] }
 0x327   :  { %v6492_v9 = vpop.eup %6491  ;;  %v3198_v32 = vpop.xlane.xlu1 %3197  ;;  %6166 = vmatpush3.bf16.msra.mxu1 %v9028_v49  ;;  %6167 = vmatprep.mubr.msk.bf16.mxu1 %vm6682_vm2, %v9022_v47 }
 0x328   :  { %6505 = vrcp.f32 %v3198_v32  ;;  %v3470_v7 = vpack.c.bf16 %v3410_v43, %v3409_v5  ;;  %6177 = vmatprep.subr.bf16.mxu1 %v9022_v47  ;;  %v3415_v50 = vmul.f32 %v6492_v9, %v7899_v0  ;;  %v9032_v9 = vld [vmem:[#allocation22_spill] sm:$0xff] }
 0x329   :  { %v6494_v52 = vpop.eup %6493  ;;  %v3213_v53 = vpop.xlane.xlu0 %3212  ;;  %v9033_v32 = vld [vmem:[#allocation26_spill] sm:$0xff] }
 0x32a   :  { %v3416_v3 = vmul.f32 %v6494_v52, %v7904_v1  ;;  %6507 = vrcp.f32 %v3213_v53  ;;  %6150 = vmatmul.mubr.msk.bf16.vlgmr.msra.gmra.mxu0 %vm1192_vm3, %v3470_v7  ;;  %v8214_v7 = vpack.c.bf16 %v9033_v32, %v9032_v9 }
 0x32b   :  { %v6496_v21 = vpop.eup %6495  ;;  %6160 = vmatpush3.bf16.msra.mxu0 %v8196_v26  ;;  %v3216_v62 = vpop.xlane.xlu1 %3215  ;;  %6161 = vmatprep.mubr.msk.bf16.mxu0 %vm6682_vm2, %v9022_v47 }
 0x32c   :  { %6509 = vrcp.f32 %v3216_v62  ;;  %v3473_v56 = vpack.c.bf16 %v3416_v3, %v3415_v50  ;;  %6171 = vmatprep.subr.bf16.mxu0 %v9022_v47  ;;  %v3413_v0 = vmul.f32 %v6496_v21, %v7909_v36 }
 0x32d   :  { %v6498_v6 = vpop.eup %6497  ;;  %v3207_v40 = vpop.xlane.xlu0 %3206 }
 0x32e   :  { %v3414_v1 = vmul.f32 %v6498_v6, %v7914_v46  ;;  %6511 = vrcp.f32 %v3207_v40  ;;  %6168 = vmatmul.mubr.msk.bf16.vlgmr.msra.gmra.mxu1 %vm1192_vm3, %v3473_v56  ;;  %v9034_v6 = vld [vmem:[#allocation30_spill] sm:$0xff] }
 0x32f   :  { %v6500_v10 = vpop.eup %6499  ;;  %v3210_v39 = vpop.xlane.xlu1 %3209  ;;  %6178 = vmatpush3.bf16.msra.mxu1 %v9031_v55  ;;  %6179 = vmatprep.mubr.msk.bf16.mxu1 %vm6682_vm2, %v9022_v47 }
 0x330   :  { %6513 = vrcp.f32 %v3210_v39  ;;  %v3472_v5 = vpack.c.bf16 %v3414_v1, %v3413_v0  ;;  %6189 = vmatprep.subr.bf16.mxu1 %v9022_v47  ;;  %v3419_v46 = vmul.f32 %v6500_v10, %v7919_v12  ;;  %v9035_v0 = vld [vmem:[#allocation28_spill] sm:$0xff] }
 0x331   :  { %v6502_v43 = vpop.eup %6501  ;;  %v3225_v36 = vpop.xlane.xlu0 %3224  ;;  %v9036_v1 = vld [vmem:[#allocation32_spill] sm:$0xff] }
 0x332   :  { %v3420_v52 = vmul.f32 %v6502_v43, %v7924_v58  ;;  %6515 = vrcp.f32 %v3225_v36  ;;  %6162 = vmatmul.mubr.msk.bf16.vlgmr.msra.gmra.mxu0 %vm1192_vm3, %v3472_v5  ;;  %v8232_v10 = vpack.c.bf16 %v9036_v1, %v9035_v0 }
 0x333   :  { %v6504_v51 = vpop.eup %6503  ;;  %6172 = vmatpush3.bf16.msra.mxu0 %v8214_v7  ;;  %v3228_v4 = vpop.xlane.xlu1 %3227  ;;  %6173 = vmatprep.mubr.msk.bf16.mxu0 %vm6682_vm2, %v9022_v47 }
 0x334   :  { %v3475_v53 = vpack.c.bf16 %v3420_v52, %v3419_v46  ;;  %6517 = vrcp.f32 %v3228_v4  ;;  %6183 = vmatprep.subr.bf16.mxu0 %v9022_v47  ;;  %v3417_v12 = vmul.f32 %v6504_v51, %v7929_v30  ;;  %v9037_v4 = vld [vmem:[#allocation36_spill] sm:$0xff] }
 0x335   :  { %v6506_v50 = vpop.eup %6505  ;;  %v3219_v3 = vpop.xlane.xlu0 %3218 }
 0x336   :  { %v3418_v58 = vmul.f32 %v6506_v50, %v7934_v45  ;;  %6519 = vrcp.f32 %v3219_v3  ;;  %6180 = vmatmul.mubr.msk.bf16.vlgmr.msra.gmra.mxu1 %vm1192_vm3, %v3475_v53  ;;  %v9038_v50 = vld [vmem:[#allocation34_spill] sm:$0xff]  ;;  %v9039_v3 = vld [vmem:[#allocation37_spill] sm:$0xff] }
 0x337   :  { %v6508_v21 = vpop.eup %6507  ;;  %v3222_v62 = vpop.xlane.xlu1 %3221  ;;  %6190 = vmatpush3.bf16.msra.mxu1 %v9034_v6  ;;  %6191 = vmatprep.mubr.msk.bf16.mxu1 %vm6682_vm2, %v9022_v47 }
 0x338   :  { %v3474_v56 = vpack.c.bf16 %v3418_v58, %v3417_v12  ;;  %6521 = vrcp.f32 %v3222_v62  ;;  %6201 = vmatprep.subr.bf16.mxu1 %v9022_v47  ;;  %v3423_v45 = vmul.f32 %v6508_v21, %v7939_v29  ;;  %v8250_v12 = vpack.c.bf16 %v9039_v3, %v9038_v50 }
 0x339   :  { %v6510_v40 = vpop.eup %6509  ;;  %v3237_v30 = vpop.xlane.xlu0 %3236 }
 0x33a   :  { %v3424_v39 = vmul.f32 %v6510_v40, %v7944_v15  ;;  %6523 = vrcp.f32 %v3237_v30  ;;  %6174 = vmatmul.mubr.msk.bf16.vlgmr.msra.gmra.mxu0 %vm1192_vm3, %v3474_v56 }
 0x33b   :  { %v6512_v5 = vpop.eup %6511  ;;  %6184 = vmatpush3.bf16.msra.mxu0 %v8232_v10  ;;  %v3240_v43 = vpop.xlane.xlu1 %3239  ;;  %6185 = vmatprep.mubr.msk.bf16.mxu0 %vm6682_vm2, %v9022_v47 }
 0x33c   :  { %v3477_v9 = vpack.c.bf16 %v3424_v39, %v3423_v45  ;;  %6525 = vrcp.f32 %v3240_v43  ;;  %6195 = vmatprep.subr.bf16.mxu0 %v9022_v47  ;;  %v3421_v29 = vmul.f32 %v6512_v5, %v7949_v11  ;;  %v9040_v39 = vld [vmem:[#allocation39_spill] sm:$0xff]  ;;  %v9041_v43 = vld [vmem:[#allocation38_spill] sm:$0xff] }
 0x33d   :  { %v6514_v32 = vpop.eup %6513  ;;  %v3231_v36 = vpop.xlane.xlu0 %3230 }
 0x33e   :  { %v3422_v15 = vmul.f32 %v6514_v32, %v7954_v31  ;;  %6527 = vrcp.f32 %v3231_v36  ;;  %6192 = vmatmul.mubr.msk.bf16.vlgmr.msra.gmra.mxu1 %vm1192_vm3, %v3477_v9  ;;  %v9042_v9 = vld [vmem:[#allocation6_spill] sm:$0xff] }
 0x33f   :  { %v6516_v46 = vpop.eup %6515  ;;  %v3234_v52 = vpop.xlane.xlu1 %3233  ;;  %6202 = vmatpush3.bf16.msra.mxu1 %v9037_v4  ;;  %6203 = vmatprep.mubr.msk.bf16.mxu1 %vm6682_vm2, %v9022_v47  ;;  %v8268_v32 = vpack.c.bf16 %v9042_v9, %v9041_v43 }
 0x340   :  { %v3476_v51 = vpack.c.bf16 %v3422_v15, %v3421_v29  ;;  %6529 = vrcp.f32 %v3234_v52  ;;  %6213 = vmatprep.subr.bf16.mxu1 %v9022_v47  ;;  %v3427_v31 = vmul.f32 %v6516_v46, %v7959_v57 }
 0x341   :  { %v6518_v53 = vpop.eup %6517  ;;  %v3249_v11 = vpop.xlane.xlu0 %3248 }
 0x342   :  { %v3428_v58 = vmul.f32 %v6518_v53, %v7964_v44  ;;  %6531 = vrcp.f32 %v3249_v11  ;;  %6186 = vmatmul.mubr.msk.bf16.vlgmr.msra.gmra.mxu0 %vm1192_vm3, %v3476_v51  ;;  %v9043_v11 = vld [vmem:[#allocation8_spill] sm:$0xff] }
 0x343   :  { %v6520_v21 = vpop.eup %6519  ;;  %6196 = vmatpush3.bf16.msra.mxu0 %v8250_v12  ;;  %v3252_v62 = vpop.xlane.xlu1 %3251  ;;  %6197 = vmatprep.mubr.msk.bf16.mxu0 %vm6682_vm2, %v9022_v47 }
 0x344   :  { %v3479_v56 = vpack.c.bf16 %v3428_v58, %v3427_v31  ;;  %6533 = vrcp.f32 %v3252_v62  ;;  %6207 = vmatprep.subr.bf16.mxu0 %v9022_v47  ;;  %v3425_v57 = vmul.f32 %v6520_v21, %v7969_v27  ;;  %v9044_v62 = vld [vmem:[#allocation7_spill] sm:$0xff] }
 0x345   :  { %v6522_v40 = vpop.eup %6521  ;;  %v3243_v0 = vpop.xlane.xlu0 %3242 }
 0x346   :  { %v3426_v44 = vmul.f32 %v6522_v40, %v7974_v61  ;;  %6535 = vrcp.f32 %v3243_v0  ;;  %6204 = vmatmul.mubr.msk.bf16.vlgmr.msra.gmra.mxu1 %vm1192_vm3, %v3479_v56 }
 0x347   :  { %v6524_v1 = vpop.eup %6523  ;;  %v3246_v30 = vpop.xlane.xlu1 %3245  ;;  %6214 = vmatpush3.bf16.msra.mxu1 %v9040_v39  ;;  %6215 = vmatprep.mubr.msk.bf16.mxu1 %vm6682_vm2, %v9022_v47 }
 0x348   :  { %v3478_v45 = vpack.c.bf16 %v3426_v44, %v3425_v57  ;;  %6537 = vrcp.f32 %v3246_v30  ;;  %6225 = vmatprep.subr.bf16.mxu1 %v9022_v47  ;;  %v3431_v61 = vmul.f32 %v6524_v1, %v7979_v54 }
 0x349   :  { %v6526_v5 = vpop.eup %6525  ;;  %v3261_v27 = vpop.xlane.xlu0 %3260 }
 0x34a   :  { %v3432_v36 = vmul.f32 %v6526_v5, %v7984_v25  ;;  %6539 = vrcp.f32 %v3261_v27  ;;  %6198 = vmatmul.mubr.msk.bf16.vlgmr.msra.gmra.mxu0 %vm1192_vm3, %v3478_v45 }
 0x34b   :  { %v6528_v29 = vpop.eup %6527  ;;  %6208 = vmatpush3.bf16.msra.mxu0 %v8268_v32  ;;  %v3264_v15 = vpop.xlane.xlu1 %3263  ;;  %6209 = vmatprep.mubr.msk.bf16.mxu0 %vm6682_vm2, %v9022_v47 }
 0x34c   :  { %v3481_v46 = vpack.c.bf16 %v3432_v36, %v3431_v61  ;;  %6541 = vrcp.f32 %v3264_v15  ;;  %6219 = vmatprep.subr.bf16.mxu0 %v9022_v47  ;;  %v3429_v54 = vmul.f32 %v6528_v29, %v7989_v20 }
 0x34d   :  { %v6530_v52 = vpop.eup %6529  ;;  %v3255_v51 = vpop.xlane.xlu0 %3254 }
 0x34e   :  { %v3430_v25 = vmul.f32 %v6530_v52, %v7994_v37  ;;  %6543 = vrcp.f32 %v3255_v51  ;;  %6216 = vmatmul.mubr.msk.bf16.vlgmr.msra.gmra.mxu1 %vm1192_vm3, %v3481_v46 }
 0x34f   :  { %v6532_v53 = vpop.eup %6531  ;;  %v3258_v50 = vpop.xlane.xlu1 %3257  ;;  %6226 = vmatpush3.bf16.msra.mxu1 %v9043_v11  ;;  %6227 = vmatprep.mubr.msk.bf16.mxu1 %vm6682_vm2, %v9022_v47 }
 0x350   :  { %v3480_v3 = vpack.c.bf16 %v3430_v25, %v3429_v54  ;;  %6545 = vrcp.f32 %v3258_v50  ;;  %6237 = vmatprep.subr.bf16.mxu1 %v9022_v47  ;;  %v3435_v20 = vmul.f32 %v6532_v53, %v7999_v22 }
 0x351   :  { %v6534_v31 = vpop.eup %6533  ;;  %v3273_v58 = vpop.xlane.xlu0 %3272 }
 0x352   :  { %v3436_v37 = vmul.f32 %v6534_v31, %v8004_v41  ;;  %6547 = vrcp.f32 %v3273_v58  ;;  %6210 = vmatmul.mubr.msk.bf16.vlgmr.msra.gmra.mxu0 %vm1192_vm3, %v3480_v3 }
 0x353   :  { %v6536_v21 = vpop.eup %6535  ;;  %6220 = vmatpush3.bf16.msra.mxu0 %v9044_v62  ;;  %v3276_v56 = vpop.xlane.xlu1 %3275  ;;  %6221 = vmatprep.mubr.msk.bf16.mxu0 %vm6682_vm2, %v9022_v47 }
 0x354   :  { %v3483_v40 = vpack.c.bf16 %v3436_v37, %v3435_v20  ;;  %6549 = vrcp.f32 %v3276_v56  ;;  %6231 = vmatprep.subr.bf16.mxu0 %v9022_v47  ;;  %v3433_v22 = vmul.f32 %v6536_v21, %v8009_v18  ;;  %v9045_v21 = vld [vmem:[#allocation12_spill] sm:$0xff] }
 0x355   :  { %v6538_v0 = vpop.eup %6537  ;;  %v3267_v57 = vpop.xlane.xlu0 %3266 }
 0x356   :  { %v3434_v41 = vmul.f32 %v6538_v0, %v8014_v14  ;;  %6551 = vrcp.f32 %v3267_v57  ;;  %6228 = vmatmul.mubr.msk.bf16.vlgmr.msra.gmra.mxu1 %vm1192_vm3, %v3483_v40  ;;  %v9046_v57 = vld [vmem:[#allocation11_spill] sm:$0xff] }
 0x357   :  { %v6540_v44 = vpop.eup %6539  ;;  %v3270_v1 = vpop.xlane.xlu1 %3269  ;;  %6238 = vmatpush3.bf16.msra.mxu1 %v9021_v28  ;;  %6239 = vmatprep.mubr.msk.bf16.mxu1 %vm6682_vm2, %v9022_v47 }
 0x358   :  { %v3482_v30 = vpack.c.bf16 %v3434_v41, %v3433_v22  ;;  %6553 = vrcp.f32 %v3270_v1  ;;  %6249 = vmatprep.subr.bf16.mxu1 %v9022_v47  ;;  %v3439_v18 = vmul.f32 %v6540_v44, %v8019_v24  ;;  %v9047_v22 = vld [vmem:[#allocation9_spill] sm:$0xff] }
 0x359   :  { %v6542_v45 = vpop.eup %6541  ;;  %v3285_v5 = vpop.xlane.xlu0 %3284 }
 0x35a   :  { %v3440_v14 = vmul.f32 %v6542_v45, %v8024_v8  ;;  %6555 = vrcp.f32 %v3285_v5  ;;  %6222 = vmatmul.mubr.msk.bf16.vlgmr.msra.gmra.mxu0 %vm1192_vm3, %v3482_v30  ;;  %v9048_v5 = vld [vmem:[#allocation16_spill] sm:$0xff] }
 0x35b   :  { %v6544_v43 = vpop.eup %6543  ;;  %6232 = vmatpush3.bf16.msra.mxu0 %v8160_v34  ;;  %v3288_v9 = vpop.xlane.xlu1 %3287  ;;  %6233 = vmatprep.mubr.msk.bf16.mxu0 %vm6682_vm2, %v9022_v47 }
 0x35c   :  { %v3485_v28 = vpack.c.bf16 %v3440_v14, %v3439_v18  ;;  %6557 = vrcp.f32 %v3288_v9  ;;  %6243 = vmatprep.subr.bf16.mxu0 %v9022_v47  ;;  %v3437_v24 = vmul.f32 %v6544_v43, %v8029_v33  ;;  %v9049_v14 = vld [vmem:[#allocation14_spill] sm:$0xff] }
 0x35d   :  { %v6546_v27 = vpop.eup %6545  ;;  %v3279_v61 = vpop.xlane.xlu0 %3278 }
 0x35e   :  { %v3438_v8 = vmul.f32 %v6546_v27, %v8034_v38  ;;  %6559 = vrcp.f32 %v3279_v61  ;;  %6240 = vmatmul.mubr.msk.bf16.vlgmr.msra.gmra.mxu1 %vm1192_vm3, %v3485_v28  ;;  %v9050_v61 = vld [vmem:[#allocation15_spill] sm:$0xff] }
 0x35f   :  { %v6548_v36 = vpop.eup %6547  ;;  %v3282_v29 = vpop.xlane.xlu1 %3281  ;;  %6250 = vmatpush3.bf16.msra.mxu1 %v9025_v13  ;;  %6251 = vmatprep.mubr.msk.bf16.mxu1 %vm6682_vm2, %v9022_v47 }
 0x360   :  { %v3484_v34 = vpack.c.bf16 %v3438_v8, %v3437_v24  ;;  %6561 = vrcp.f32 %v3282_v29  ;;  %6261 = vmatprep.subr.bf16.mxu1 %v9022_v47  ;;  %v3443_v33 = vmul.f32 %v6548_v36, %v8039_v2 }
 0x361   :  { %v6550_v15 = vpop.eup %6549  ;;  %v3297_v46 = vpop.xlane.xlu0 %3296 }
 0x362   :  { %v3444_v38 = vmul.f32 %v6550_v15, %v8044_v17  ;;  %6563 = vrcp.f32 %v3297_v46  ;;  %6234 = vmatmul.mubr.msk.bf16.vlgmr.msra.gmra.mxu0 %vm1192_vm3, %v3484_v34 }
 0x363   :  { %v6552_v52 = vpop.eup %6551  ;;  %6244 = vmatpush3.bf16.msra.mxu0 %v8178_v35  ;;  %v3300_v51 = vpop.xlane.xlu1 %3299  ;;  %6245 = vmatprep.mubr.msk.bf16.mxu0 %vm6682_vm2, %v9022_v47 }
 0x364   :  { %v3487_v13 = vpack.c.bf16 %v3444_v38, %v3443_v33  ;;  %6565 = vrcp.f32 %v3300_v51  ;;  %6255 = vmatprep.subr.bf16.mxu0 %v9022_v47  ;;  %v3441_v2 = vmul.f32 %v6552_v52, %v8049_v23  ;;  %v9051_v51 = vld [vmem:[#allocation13_spill] sm:$0xff] }
 0x365   :  { %v6554_v54 = vpop.eup %6553  ;;  %v3291_v25 = vpop.xlane.xlu0 %3290 }
 0x366   :  { %v3442_v17 = vmul.f32 %v6554_v54, %v8054_v60  ;;  %6567 = vrcp.f32 %v3291_v25  ;;  %6252 = vmatmul.mubr.msk.bf16.vlgmr.msra.gmra.mxu1 %vm1192_vm3, %v3487_v13  ;;  %v9052_v13 = vld [vmem:[#allocation20_spill] sm:$0xff] }
 0x367   :  { %v6556_v53 = vpop.eup %6555  ;;  %v3294_v50 = vpop.xlane.xlu1 %3293  ;;  %6262 = vmatpush3.bf16.msra.mxu1 %v9028_v49  ;;  %6263 = vmatprep.mubr.msk.bf16.mxu1 %vm6682_vm2, %v9022_v47 }
 0x368   :  { %v3486_v35 = vpack.c.bf16 %v3442_v17, %v3441_v2  ;;  %6569 = vrcp.f32 %v3294_v50  ;;  %6273 = vmatprep.subr.bf16.mxu1 %v9022_v47  ;;  %v3447_v23 = vmul.f32 %v6556_v53, %v8059_v16  ;;  %v9053_v17 = vld [vmem:[#allocation18_spill] sm:$0xff]  ;;  %v9054_v50 = vld [vmem:[#allocation19_spill] sm:$0xff] }
 0x369   :  { %v6558_v3 = vpop.eup %6557  ;;  %v3309_v11 = vpop.xlane.xlu0 %3308 }
 0x36a   :  { %v3448_v60 = vmul.f32 %v6558_v3, %v8064_v42  ;;  %6571 = vrcp.f32 %v3309_v11  ;;  %6246 = vmatmul.mubr.msk.bf16.vlgmr.msra.gmra.mxu0 %vm1192_vm3, %v3486_v35 }
 0x36b   :  { %v6560_v31 = vpop.eup %6559  ;;  %6256 = vmatpush3.bf16.msra.mxu0 %v8196_v26  ;;  %v3312_v58 = vpop.xlane.xlu1 %3311  ;;  %6257 = vmatprep.mubr.msk.bf16.mxu0 %vm6682_vm2, %v9022_v47 }
 0x36c   :  { %v3489_v49 = vpack.c.bf16 %v3448_v60, %v3447_v23  ;;  %6573 = vrcp.f32 %v3312_v58  ;;  %6267 = vmatprep.subr.bf16.mxu0 %v9022_v47  ;;  %v3445_v16 = vmul.f32 %v6560_v31, %v8069_v63  ;;  %v9055_v23 = vld [vmem:[#allocation40_spill] sm:$0xff]  ;;  %v9056_v31 = vld [vmem:[#allocation41_spill] sm:$0xff] }
 0x36d   :  { %v6562_v20 = vpop.eup %6561  ;;  %v3303_v37 = vpop.xlane.xlu0 %3302 }
 0x36e   :  { %v3446_v42 = vmul.f32 %v6562_v20, %v9045_v21  ;;  %6575 = vrcp.f32 %v3303_v37  ;;  %6264 = vmatmul.mubr.msk.bf16.vlgmr.msra.gmra.mxu1 %vm1192_vm3, %v3489_v49  ;;  %v9058_v21 = vld [vmem:[#allocation42_spill] sm:$0xff] }
 0x36f   :  { %v6564_v62 = vpop.eup %6563  ;;  %v3306_v56 = vpop.xlane.xlu1 %3305  ;;  %6274 = vmatpush3.bf16.msra.mxu1 %v9031_v55  ;;  %6275 = vmatprep.mubr.msk.bf16.mxu1 %vm6682_vm2, %v9022_v47 }
 0x370   :  { %v3488_v26 = vpack.c.bf16 %v3446_v42, %v3445_v16  ;;  %6577 = vrcp.f32 %v3306_v56  ;;  %6285 = vmatprep.subr.bf16.mxu1 %v9022_v47  ;;  %v3451_v63 = vmul.f32 %v6564_v62, %v9046_v57 }
 0x371   :  { %v6566_v40 = vpop.eup %6565  ;;  %v3321_v0 = vpop.xlane.xlu0 %3320 }
 0x372   :  { %v3452_v41 = vmul.f32 %v6566_v40, %v9047_v22  ;;  %6579 = vrcp.f32 %v3321_v0  ;;  %6258 = vmatmul.mubr.msk.bf16.vlgmr.msra.gmra.mxu0 %vm1192_vm3, %v3488_v26 }
 0x373   :  { %v6568_v44 = vpop.eup %6567  ;;  %6268 = vmatpush3.bf16.msra.mxu0 %v8214_v7  ;;  %v3324_v1 = vpop.xlane.xlu1 %3323  ;;  %6269 = vmatprep.mubr.msk.bf16.mxu0 %vm6682_vm2, %v9022_v47 }
 0x374   :  { %v3491_v55 = vpack.c.bf16 %v3452_v41, %v3451_v63  ;;  %6581 = vrcp.f32 %v3324_v1  ;;  %6279 = vmatprep.subr.bf16.mxu0 %v9022_v47  ;;  %v3449_v18 = vmul.f32 %v6568_v44, %v9048_v5 }
 0x375   :  { %v6570_v30 = vpop.eup %6569  ;;  %v3315_v45 = vpop.xlane.xlu0 %3314 }
 0x376   :  { %v3450_v43 = vmul.f32 %v6570_v30, %v9049_v14  ;;  %6583 = vrcp.f32 %v3315_v45  ;;  %6276 = vmatmul.mubr.msk.bf16.vlgmr.msra.gmra.mxu1 %vm1192_vm3, %v3491_v55 }
 0x377   :  { %v6572_v9 = vpop.eup %6571  ;;  %v3318_v28 = vpop.xlane.xlu1 %3317  ;;  %6286 = vmatpush3.bf16.msra.mxu1 %v9034_v6  ;;  %6287 = vmatprep.mubr.msk.bf16.mxu1 %vm6682_vm2, %v9022_v47 }
 0x378   :  { %v3490_v7 = vpack.c.bf16 %v3450_v43, %v3449_v18  ;;  %6585 = vrcp.f32 %v3318_v28  ;;  %6297 = vmatprep.subr.bf16.mxu1 %v9022_v47  ;;  %v3455_v24 = vmul.f32 %v6572_v9, %v9050_v61 }
 0x379   :  { %v6574_v27 = vpop.eup %6573 }
 0x37a   :  { %v3456_v8 = vmul.f32 %v6574_v27, %v8103_v48  ;;  %6270 = vmatmul.mubr.msk.bf16.vlgmr.msra.gmra.mxu0 %vm1192_vm3, %v3490_v7 }
 0x37b   :  { %v6576_v36 = vpop.eup %6575  ;;  %6280 = vmatpush3.bf16.msra.mxu0 %v8232_v10  ;;  %6281 = vmatprep.mubr.msk.bf16.mxu0 %vm6682_vm2, %v9022_v47 }
 0x37c   :  { %v3493_v6 = vpack.c.bf16 %v3456_v8, %v3455_v24  ;;  %6291 = vmatprep.subr.bf16.mxu0 %v9022_v47  ;;  %v3453_v15 = vmul.f32 %v6576_v36, %v8109_v59 }
 0x37d   :  { %v6578_v29 = vpop.eup %6577  ;;  %v3327_v34 = vpop.xlane.xlu0 %3326 }
 0x37e   :  { %v3454_v46 = vmul.f32 %v6578_v29, %v8114_v19  ;;  %6587 = vrcp.f32 %v3327_v34  ;;  %6288 = vmatmul.mubr.msk.bf16.vlgmr.msra.gmra.mxu1 %vm1192_vm3, %v3493_v6 }
 0x37f   :  { %v6580_v33 = vpop.eup %6579  ;;  %v3330_v48 = vpop.xlane.xlu1 %3329  ;;  %6298 = vmatpush3.bf16.msra.mxu1 %v9037_v4  ;;  %6299 = vmatprep.mubr.msk.bf16.mxu1 %vm6682_vm2, %v9022_v47 }
 0x380   :  { %v3492_v38 = vpack.c.bf16 %v3454_v46, %v3453_v15  ;;  %6589 = vrcp.f32 %v3330_v48  ;;  %6309 = vmatprep.subr.bf16.mxu1 %v9022_v47  ;;  %v3459_v59 = vmul.f32 %v6580_v33, %v9051_v51 }
 0x381   :  { %v6582_v10 = vpop.eup %6581  ;;  %v3333_v52 = vpop.xlane.xlu0 %3332 }
 0x382   :  { %v3460_v19 = vmul.f32 %v6582_v10, %v9052_v13  ;;  %6591 = vrcp.f32 %v3333_v52  ;;  %6282 = vmatmul.mubr.msk.bf16.vlgmr.msra.gmra.mxu0 %vm1192_vm3, %v3492_v38 }
 0x383   :  { %v6584_v54 = vpop.eup %6583  ;;  %6292 = vmatpush3.bf16.msra.mxu0 %v8250_v12  ;;  %v3336_v25 = vpop.xlane.xlu1 %3335  ;;  %6293 = vmatprep.mubr.msk.bf16.mxu0 %vm6682_vm2, %v9022_v47 }
 0x384   :  { %v3495_v4 = vpack.c.bf16 %v3460_v19, %v3459_v59  ;;  %6593 = vrcp.f32 %v3336_v25  ;;  %6303 = vmatprep.subr.bf16.mxu0 %v9022_v47  ;;  %v3457_v53 = vmul.f32 %v6584_v54, %v9053_v17 }
 0x385   :  { %v6586_v2 = vpop.eup %6585 }
 0x386   :  { %v3458_v35 = vmul.f32 %v6586_v2, %v9054_v50  ;;  %6300 = vmatmul.mubr.msk.bf16.vlgmr.msra.gmra.mxu1 %vm1192_vm3, %v3495_v4 }
 0x387   :  { %6310 = vmatpush3.bf16.msra.mxu1 %v9040_v39  ;;  %6311 = vmatprep.mubr.msk.bf16.mxu1 %vm6682_vm2, %v9022_v47  ;;  %v9057_v39 = vld [vmem:[#allocation17_spill] sm:$0xff] }
 0x388   :  { %v3494_v3 = vpack.c.bf16 %v3458_v35, %v3457_v53 }
 0x38a   :  { %6294 = vmatmul.mubr.msk.bf16.vlgmr.msra.gmra.mxu0 %vm1192_vm3, %v3494_v3 }
 0x38b   :  { %v6588_v12 = vpop.eup %6587  ;;  %6304 = vmatpush3.bf16.msra.mxu0 %v8268_v32  ;;  %6305 = vmatprep.mubr.msk.bf16.mxu0 %vm6682_vm2, %v9022_v47 }
 0x38c   :  { %v3461_v60 = vmul.f32 %v6588_v12, %v9055_v23 }
 0x38d   :  { %v6590_v11 = vpop.eup %6589 }
 0x38e   :  { %v3462_v58 = vmul.f32 %v6590_v11, %v9056_v31 }
 0x38f   :  { %v6592_v49 = vpop.eup %6591 }
 0x390   :  { %v3496_v20 = vpack.c.bf16 %v3462_v58, %v3461_v60  ;;  %v3463_v16 = vmul.f32 %v6592_v49, %v9057_v39 }
 0x391   :  { %v6594_v37 = vpop.eup %6593 }
 0x392   :  { %v3464_v42 = vmul.f32 %v6594_v37, %v9058_v21  ;;  %6306 = vmatmul.mubr.msk.bf16.vlgmr.msra.gmra.mxu0 %vm1192_vm3, %v3496_v20 }
 0x394   :  { %v3497_v62 = vpack.c.bf16 %v3464_v42, %v3463_v16 }
 0x396   :  { %6312 = vmatmul.mubr.msk.bf16.vlgmr.msra.gmra.mxu1 %vm1192_vm3, %v3497_v62 }
 0x3d6   :  { %v8392_v32 = vpop.f32.mrf.mxu1 }
 0x3d8   :  { %v6133_v47 = vpop.f32.mrf.mxu1 }
 0x3da   :  { %v8394_v56 = vpop.f32.mrf.mxu0  ;;  %v8396_v26 = vpop.f32.mrf.mxu1 }
 0x3dc   :  { %v6127_v40 = vpop.f32.mrf.mxu0  ;;  %v6134_v0 = vpop.f32.mrf.mxu1 }
 0x3de   :  { %v8398_v57 = vpop.f32.mrf.mxu0  ;;  %v8400_v63 = vpop.f32.mrf.mxu1 }
 0x3e0   :  { %v6128_v22 = vpop.f32.mrf.mxu0  ;;  %v6145_v41 = vpop.f32.mrf.mxu1 }
 0x3e2   :  { %v8402_v44 = vpop.f32.mrf.mxu0  ;;  %v8404_v1 = vpop.f32.mrf.mxu1 }
 0x3e4   :  { %v6139_v55 = vpop.f32.mrf.mxu0  ;;  %v6146_v30 = vpop.f32.mrf.mxu1 }
 0x3e6   :  { %v8406_v45 = vpop.f32.mrf.mxu0  ;;  %v8408_v5 = vpop.f32.mrf.mxu1 }
 0x3e8   :  { %v6140_v18 = vpop.f32.mrf.mxu0  ;;  %v6157_v14 = vpop.f32.mrf.mxu1 }
 0x3ea   :  { %v8410_v43 = vpop.f32.mrf.mxu0  ;;  %v8412_v9 = vpop.f32.mrf.mxu1 }
 0x3ec   :  { %v6151_v28 = vpop.f32.mrf.mxu0  ;;  %v6158_v7 = vpop.f32.mrf.mxu1 }
 0x3ee   :  { %v8414_v27 = vpop.f32.mrf.mxu0  ;;  %v8416_v61 = vpop.f32.mrf.mxu1 }
 0x3f0   :  { %v6152_v24 = vpop.f32.mrf.mxu0  ;;  %v6169_v8 = vpop.f32.mrf.mxu1 }
 0x3f2   :  { %v8418_v36 = vpop.f32.mrf.mxu0  ;;  %v8420_v6 = vpop.f32.mrf.mxu1 }
 0x3f4   :  { %v6163_v29 = vpop.f32.mrf.mxu0  ;;  %v6170_v34 = vpop.f32.mrf.mxu1 }
 0x3f6   :  { %v8422_v15 = vpop.f32.mrf.mxu0  ;;  %v8424_v46 = vpop.f32.mrf.mxu1 }
 0x3f8   :  { %v6164_v33 = vpop.f32.mrf.mxu0  ;;  %v6181_v48 = vpop.f32.mrf.mxu1 }
 0x3fa   :  { %v8426_v38 = vpop.f32.mrf.mxu0  ;;  %v8428_v10 = vpop.f32.mrf.mxu1 }
 0x3fc   :  { %v6175_v52 = vpop.f32.mrf.mxu0  ;;  %v6182_v51 = vpop.f32.mrf.mxu1 }
 0x3fe   :  { %v8430_v59 = vpop.f32.mrf.mxu0  ;;  %v8432_v13 = vpop.f32.mrf.mxu1 }
 0x400   :  { %v6176_v19 = vpop.f32.mrf.mxu0  ;;  %v6193_v54 = vpop.f32.mrf.mxu1 }
 0x402   :  { %v8434_v25 = vpop.f32.mrf.mxu0  ;;  %v8436_v4 = vpop.f32.mrf.mxu1 }
 0x404   :  { %v6187_v2 = vpop.f32.mrf.mxu0  ;;  %v6194_v17 = vpop.f32.mrf.mxu1 }
 0x406   :  { %v8438_v53 = vpop.f32.mrf.mxu0  ;;  %v8440_v50 = vpop.f32.mrf.mxu1 }
 0x408   :  { %v6188_v35 = vpop.f32.mrf.mxu0  ;;  %v6205_v3 = vpop.f32.mrf.mxu1 }
 0x40a   :  { %v8442_v12 = vpop.f32.mrf.mxu0  ;;  %v8444_v11 = vpop.f32.mrf.mxu1 }
 0x40c   :  { %v6199_v23 = vpop.f32.mrf.mxu0  ;;  %v6206_v60 = vpop.f32.mrf.mxu1 }
 0x40e   :  { %v8446_v31 = vpop.f32.mrf.mxu0  ;;  %v8448_v58 = vpop.f32.mrf.mxu1 }
 0x410   :  { %v6200_v49 = vpop.f32.mrf.mxu0  ;;  %v6217_v20 = vpop.f32.mrf.mxu1 }
 0x411   :  { %v8487_v49 = vstv %s8862_s3 }
 0x412   :  { %v8450_v37 = vpop.f32.mrf.mxu0  ;;  %v8452_v39 = vpop.f32.mrf.mxu1 }
 0x414   :  { %v6211_v16 = vpop.f32.mrf.mxu0  ;;  %v6218_v21 = vpop.f32.mrf.mxu1 }
 0x416   :  { %v8454_v42 = vpop.f32.mrf.mxu0  ;;  %v8456_v62 = vpop.f32.mrf.mxu1 }
 0x418   :  { %v6212_v47 = vpop.f32.mrf.mxu0  ;;  %v6229_v40 = vpop.f32.mrf.mxu1 }
 0x41a   :  { %v8458_v0 = vpop.f32.mrf.mxu0  ;;  %v8460_v22 = vpop.f32.mrf.mxu1 }
 0x41c   :  { %v6223_v41 = vpop.f32.mrf.mxu0  ;;  %v6230_v55 = vpop.f32.mrf.mxu1 }
 0x41e   :  { %v8462_v30 = vpop.f32.mrf.mxu0  ;;  %v8464_v18 = vpop.f32.mrf.mxu1 }
 0x420   :  { %v6224_v14 = vpop.f32.mrf.mxu0  ;;  %v6241_v28 = vpop.f32.mrf.mxu1 }
 0x422   :  { %v8466_v7 = vpop.f32.mrf.mxu0  ;;  %v8468_v24 = vpop.f32.mrf.mxu1 }
 0x424   :  { %v6235_v8 = vpop.f32.mrf.mxu0  ;;  %v6242_v29 = vpop.f32.mrf.mxu1 }
 0x426   :  { %v8470_v34 = vpop.f32.mrf.mxu0  ;;  %v8472_v33 = vpop.f32.mrf.mxu1 }
 0x428   :  { %v6236_v48 = vpop.f32.mrf.mxu0  ;;  %v6253_v52 = vpop.f32.mrf.mxu1 }
 0x42a   :  { %v8474_v51 = vpop.f32.mrf.mxu0  ;;  %v8476_v19 = vpop.f32.mrf.mxu1 }
 0x42c   :  { %v6247_v54 = vpop.f32.mrf.mxu0  ;;  %v6254_v2 = vpop.f32.mrf.mxu1 }
 0x42e   :  { %v8478_v17 = vpop.f32.mrf.mxu0  ;;  %v8480_v35 = vpop.f32.mrf.mxu1 }
 0x430   :  { %v6248_v3 = vpop.f32.mrf.mxu0  ;;  %v6265_v23 = vpop.f32.mrf.mxu1 }
 0x432   :  { %v8482_v60 = vpop.f32.mrf.mxu0  ;;  %v4550_v20 = vpop.f32.mrf.mxu1 }
 0x433   :  { %v8490_v16 = vmul.f32 %v8487_v49, %v4550_v20 }
 0x434   :  { %v6259_v21 = vpop.f32.mrf.mxu0  ;;  %v6266_v47 = vpop.f32.mrf.mxu1 }
 0x436   :  { %v8492_v40 = vpop.f32.mrf.mxu0  ;;  %v4635_v41 = vpop.f32.mrf.mxu1 }
 0x437   :  { %v4925_v55 = vmul.f32 %v8487_v49, %v4635_v41 }
 0x438   :  { %v6260_v14 = vpop.f32.mrf.mxu0  ;;  %v6277_v28 = vpop.f32.mrf.mxu1 }
 0x439   :  { %v8496_v8 = vsub.f32 %v8424_v46, %v4925_v55 }
 0x43a   :  { %v4591_v29 = vpop.f32.mrf.mxu0  ;;  %v4638_v52 = vpop.f32.mrf.mxu1 }
 0x43b   :  { %v4923_v48 = vmul.f32 %v8487_v49, %v4591_v29  ;;  %v4926_v54 = vmul.f32 %v8487_v49, %v4638_v52  ;;  %v4989_v3 = vmul.f32 %v8496_v8, %v8496_v8 }
 0x43c   :  { %v6271_v2 = vpop.f32.mrf.mxu0  ;;  %v6278_v20 = vpop.f32.mrf.mxu1 }
 0x43d   :  { %v8503_v23 = vsub.f32 %v8426_v38, %v4923_v48  ;;  %v8506_v21 = vsub.f32 %v8428_v10, %v4926_v54  ;;  %v5057_v46 = vsel %vm1192_vm3, %v4989_v3, 0.0 }
 0x43e   :  { %v4594_v47 = vpop.f32.mrf.mxu0  ;;  %5058 = vadd.xlane.f32.xlu0 %v5057_v46  ;;  %v4723_v55 = vpop.f32.mrf.mxu1 }
 0x43f   :  { %v4924_v41 = vmul.f32 %v8487_v49, %v4594_v47  ;;  %v4987_v14 = vmul.f32 %v8503_v23, %v8503_v23  ;;  %v4929_v28 = vmul.f32 %v8487_v49, %v4723_v55  ;;  %v4990_v38 = vmul.f32 %v8506_v21, %v8506_v21 }
 0x440   :  { %v6272_v29 = vpop.f32.mrf.mxu0  ;;  %v6289_v10 = vpop.f32.mrf.mxu1 }
 0x441   :  { %v8516_v48 = vsub.f32 %v8430_v59, %v4924_v41  ;;  %v5051_v52 = vsel %vm1192_vm3, %v4987_v14, 0.0  ;;  %v8520_v54 = vsub.f32 %v8432_v13, %v4929_v28  ;;  %v5060_v2 = vsel %vm1192_vm3, %v4990_v38, 0.0 }
 0x442   :  { %v4679_v3 = vpop.f32.mrf.mxu0  ;;  %5061 = vadd.xlane.f32.xlu1 %v5060_v2  ;;  %v4726_v20 = vpop.f32.mrf.mxu1  ;;  %5052 = vadd.xlane.f32.xlu0 %v5051_v52 }
 0x443   :  { %v4927_v46 = vmul.f32 %v8487_v49, %v4679_v3  ;;  %v4988_v47 = vmul.f32 %v8516_v48, %v8516_v48  ;;  %v4930_v59 = vmul.f32 %v8487_v49, %v4726_v20  ;;  %v4993_v55 = vmul.f32 %v8520_v54, %v8520_v54 }
 0x444   :  { %v6283_v41 = vpop.f32.mrf.mxu0  ;;  %v6290_v14 = vpop.f32.mrf.mxu1 }
 0x445   :  { %v8530_v13 = vsub.f32 %v8434_v25, %v4927_v46  ;;  %v5054_v28 = vsel %vm1192_vm3, %v4988_v47, 0.0  ;;  %v8534_v29 = vsub.f32 %v8436_v4, %v4930_v59  ;;  %v5069_v38 = vsel %vm1192_vm3, %v4993_v55, 0.0 }
 0x446   :  { %v4682_v10 = vpop.f32.mrf.mxu0  ;;  %v4811_v52 = vpop.f32.mrf.mxu1  ;;  %5070 = vadd.xlane.f32.xlu0 %v5069_v38  ;;  %5055 = vadd.xlane.f32.xlu1 %v5054_v28 }
 0x447   :  { %v4928_v2 = vmul.f32 %v8487_v49, %v4682_v10  ;;  %v4991_v3 = vmul.f32 %v8530_v13, %v8530_v13  ;;  %v4933_v25 = vmul.f32 %v8487_v49, %v4811_v52  ;;  %v4994_v46 = vmul.f32 %v8534_v29, %v8534_v29 }
 0x448   :  { %v6284_v20 = vpop.f32.mrf.mxu0  ;;  %v6301_v47 = vpop.f32.mrf.mxu1 }
 0x449   :  { %v8544_v4 = vsub.f32 %v8438_v53, %v4928_v2  ;;  %v5063_v59 = vsel %vm1192_vm3, %v4991_v3, 0.0  ;;  %v8548_v41 = vsub.f32 %v8440_v50, %v4933_v25  ;;  %v5072_v55 = vsel %vm1192_vm3, %v4994_v46, 0.0 }
 0x44a   :  { %v4767_v14 = vpop.f32.mrf.mxu0  ;;  %v4814_v28 = vpop.f32.mrf.mxu1  ;;  %5073 = vadd.xlane.f32.xlu1 %v5072_v55  ;;  %5064 = vadd.xlane.f32.xlu0 %v5063_v59  ;;  %v4908_v20 = vmul.f32 %v8487_v49, %v8462_v30  ;;  %v4910_v30 = vmul.f32 %v8487_v49, %v8460_v22 }
 0x44b   :  { %v4931_v38 = vmul.f32 %v8487_v49, %v4767_v14  ;;  %v4992_v10 = vmul.f32 %v8544_v4, %v8544_v4  ;;  %v4934_v53 = vmul.f32 %v8487_v49, %v4814_v28  ;;  %v4997_v2 = vmul.f32 %v8548_v41, %v8548_v41 }
 0x44c   :  { %v6295_v52 = vpop.f32.mrf.mxu0  ;;  %v6302_v3 = vpop.f32.mrf.mxu1  ;;  %v8592_v22 = vsub.f32 %v8396_v26, %v4910_v30 }
 0x44d   :  { %v8558_v50 = vsub.f32 %v8442_v12, %v4931_v38  ;;  %v5066_v25 = vsel %vm1192_vm3, %v4992_v10, 0.0  ;;  %v8564_v46 = vsub.f32 %v8444_v11, %v4934_v53  ;;  %v5081_v47 = vsel %vm1192_vm3, %v4997_v2, 0.0 }
 0x44e   :  { %v4770_v59 = vpop.f32.mrf.mxu0  ;;  %5082 = vadd.xlane.f32.xlu0 %v5081_v47  ;;  %5067 = vadd.xlane.f32.xlu1 %v5066_v25  ;;  %v8579_v10 = vsub.f32 %v8398_v57, %v4908_v20  ;;  %v4907_v25 = vmul.f32 %v8487_v49, %v8458_v0 }
 0x44f   :  { %v4932_v55 = vmul.f32 %v8487_v49, %v4770_v59  ;;  %v4995_v12 = vmul.f32 %v8558_v50, %v8558_v50  ;;  %v4998_v28 = vmul.f32 %v8564_v46, %v8564_v46 }
 0x450   :  { %v6296_v14 = vpop.f32.mrf.mxu0 }
 0x451   :  { %v8573_v38 = vsub.f32 %v8446_v31, %v4932_v55  ;;  %v5075_v11 = vsel %vm1192_vm3, %v4995_v12, 0.0  ;;  %v5084_v53 = vsel %vm1192_vm3, %v4998_v28, 0.0  ;;  %v4972_v55 = vmul.f32 %v8579_v10, %v8579_v10 }
 0x452   :  { %v4855_v52 = vpop.f32.mrf.mxu0  ;;  %5085 = vadd.xlane.f32.xlu1 %v5084_v53  ;;  %5076 = vadd.xlane.f32.xlu0 %v5075_v11  ;;  %v8602_v11 = vsub.f32 %v8394_v56, %v4907_v25  ;;  %v4911_v25 = vmul.f32 %v8487_v49, %v8466_v7 }
 0x453   :  { %v4935_v2 = vmul.f32 %v8487_v49, %v4855_v52  ;;  %v4996_v3 = vmul.f32 %v8573_v38, %v8573_v38 }
 0x454   :  { %v6307_v31 = vpop.f32.mrf.mxu0 }
 0x455   :  { %v8588_v47 = vsub.f32 %v8450_v37, %v4935_v2  ;;  %v5078_v57 = vsel %vm1192_vm3, %v4996_v3, 0.0  ;;  %v4909_v37 = vmul.f32 %v8487_v49, %v8456_v62  ;;  %v5006_v2 = vsel %vm1192_vm3, %v4972_v55, 0.0 }
 0x456   :  { %v4899_v20 = vpop.f32.mrf.mxu1  ;;  %v4858_v59 = vpop.f32.mrf.mxu0  ;;  %5079 = vadd.xlane.f32.xlu1 %v5078_v57  ;;  %v4974_v3 = vmul.f32 %v8592_v22, %v8592_v22  ;;  %v4912_v55 = vmul.f32 %v8487_v49, %v8470_v34 }
 0x457   :  { %v4937_v12 = vmul.f32 %v8487_v49, %v4899_v20  ;;  %v4999_v14 = vmul.f32 %v8588_v47, %v8588_v47  ;;  %v4936_v53 = vmul.f32 %v8487_v49, %v4858_v59  ;;  %v4971_v59 = vmul.f32 %v8602_v11, %v8602_v11 }
 0x458   :  { %v6308_v0 = vpop.f32.mrf.mxu0  ;;  %v6313_v28 = vpop.f32.mrf.mxu1 }
 0x459   :  { %v8605_v26 = vsub.f32 %v8448_v58, %v4937_v12  ;;  %v5087_v30 = vsel %vm1192_vm3, %v4999_v14, 0.0  ;;  %v8616_v58 = vsub.f32 %v8392_v32, %v4909_v37  ;;  %v8629_v12 = vsub.f32 %v8454_v42, %v4936_v53 }
 0x45a   :  { %v4902_v52 = vpop.f32.mrf.mxu1  ;;  %5088 = vadd.xlane.f32.xlu0 %v5087_v30  ;;  %5007 = vadd.xlane.f32.xlu1 %v5006_v2  ;;  %v5012_v32 = vsel %vm1192_vm3, %v4974_v3, 0.0  ;;  %v4913_v14 = vmul.f32 %v8487_v49, %v8464_v18  ;;  %v8639_v37 = vsub.f32 %v8402_v44, %v4911_v25  ;;  %v5003_v42 = vsel %vm1192_vm3, %v4971_v59, 0.0 }
 0x45b   :  { %v4938_v62 = vmul.f32 %v8487_v49, %v4902_v52  ;;  %v5001_v56 = vmul.f32 %v8605_v26, %v8605_v26  ;;  %v4914_v0 = vmul.f32 %v8487_v49, %v8468_v24  ;;  %v8646_v28 = vsub.f32 %v8406_v45, %v4912_v55 }
 0x45c   :  { %v6314_v31 = vpop.f32.mrf.mxu1  ;;  %v5000_v30 = vmul.f32 %v8629_v12, %v8629_v12  ;;  %v8651_v18 = vsub.f32 %v8400_v63, %v4913_v14  ;;  %v4915_v44 = vmul.f32 %v8487_v49, %v8474_v51  ;;  %v4975_v52 = vmul.f32 %v8639_v37, %v8639_v37 }
 0x45d   :  { %v8621_v57 = vsub.f32 %v8452_v39, %v4938_v62  ;;  %v5093_v20 = vsel %vm1192_vm3, %v5001_v56, 0.0  ;;  %v4973_v39 = vmul.f32 %v8616_v58, %v8616_v58  ;;  %v8659_v24 = vsub.f32 %v8404_v1, %v4914_v0 }
 0x45e   :  { %5094 = vadd.xlane.f32.xlu0 %v5093_v20  ;;  %5013 = vadd.xlane.f32.xlu1 %v5012_v32  ;;  %v4916_v45 = vmul.f32 %v8487_v49, %v8478_v17  ;;  %v5090_v2 = vsel %vm1192_vm3, %v5000_v30, 0.0  ;;  %v4976_v63 = vmul.f32 %v8646_v28, %v8646_v28  ;;  %v4917_v51 = vmul.f32 %v8487_v49, %v8472_v33 }
 0x45f   :  { %v5002_v7 = vmul.f32 %v8621_v57, %v8621_v57  ;;  %v5009_v53 = vsel %vm1192_vm3, %v4973_v39, 0.0  ;;  %v8669_v3 = vsub.f32 %v8410_v43, %v4915_v44  ;;  %v5015_v62 = vsel %vm1192_vm3, %v4975_v52, 0.0 }
 0x460   :  { %v4977_v1 = vmul.f32 %v8651_v18, %v8651_v18  ;;  %v4918_v17 = vmul.f32 %v8487_v49, %v8476_v19  ;;  %v8677_v56 = vsub.f32 %v8414_v27, %v4916_v45  ;;  %v5018_v31 = vsel %vm1192_vm3, %v4976_v63, 0.0 }
 0x461   :  { %v5096_v34 = vsel %vm1192_vm3, %v5002_v7, 0.0  ;;  %v4978_v33 = vmul.f32 %v8659_v24, %v8659_v24  ;;  %v8683_v43 = vsub.f32 %v8408_v5, %v4917_v51  ;;  %v4919_v25 = vmul.f32 %v8487_v49, %v8482_v60 }
 0x462   :  { %5004 = vadd.xlane.f32.xlu0 %v5003_v42  ;;  %5097 = vadd.xlane.f32.xlu1 %v5096_v34  ;;  %v5021_v20 = vsel %vm1192_vm3, %v4977_v1, 0.0  ;;  %v4979_v19 = vmul.f32 %v8669_v3, %v8669_v3  ;;  %v8691_v27 = vsub.f32 %v8412_v9, %v4918_v17  ;;  %v4920_v59 = vmul.f32 %v8487_v49, %v8492_v40 }
 0x463   :  { %v5024_v55 = vsel %vm1192_vm3, %v4978_v33, 0.0  ;;  %v4980_v5 = vmul.f32 %v8677_v56, %v8677_v56  ;;  %v4921_v60 = vmul.f32 %v8487_v49, %v8480_v35  ;;  %v8701_v32 = vsub.f32 %v8418_v36, %v4919_v25 }
 0x464   :  { %v5027_v7 = vsel %vm1192_vm3, %v4979_v19, 0.0  ;;  %v4981_v9 = vmul.f32 %v8683_v43, %v8683_v43  ;;  %v8707_v40 = vsub.f32 %v8422_v15, %v4920_v59  ;;  %v4982_v14 = vmul.f32 %v8691_v27, %v8691_v27 }
 0x465   :  { %v5030_v39 = vsel %vm1192_vm3, %v4980_v5, 0.0  ;;  %v8713_v35 = vsub.f32 %v8416_v61, %v4921_v60  ;;  %v4983_v49 = vmul.f32 %v8701_v32, %v8701_v32  ;;  %v8720_v34 = vsub.f32 %v8420_v6, %v8490_v16 }
 0x466   :  { %5010 = vadd.xlane.f32.xlu0 %v5009_v53  ;;  %5091 = vadd.xlane.f32.xlu1 %v5090_v2  ;;  %v5033_v36 = vsel %vm1192_vm3, %v4981_v9, 0.0  ;;  %v5036_v15 = vsel %vm1192_vm3, %v4982_v14, 0.0  ;;  %v4984_v42 = vmul.f32 %v8707_v40, %v8707_v40 }
 0x467   :  { %v5039_v0 = vsel %vm1192_vm3, %v4983_v49, 0.0  ;;  %v4985_v61 = vmul.f32 %v8713_v35, %v8713_v35  ;;  %v4986_v44 = vmul.f32 %v8720_v34, %v8720_v34 }
 0x468   :  { %v5042_v30 = vsel %vm1192_vm3, %v4984_v42, 0.0 }
 0x469   :  { %v5045_v6 = vsel %vm1192_vm3, %v4985_v61, 0.0  ;;  %v5048_v16 = vsel %vm1192_vm3, %v4986_v44, 0.0 }
 0x46a   :  { %5016 = vadd.xlane.f32.xlu0 %v5015_v62  ;;  %5019 = vadd.xlane.f32.xlu1 %v5018_v31 }
 0x46e   :  { %5022 = vadd.xlane.f32.xlu0 %v5021_v20  ;;  %5025 = vadd.xlane.f32.xlu1 %v5024_v55 }
 0x472   :  { %5028 = vadd.xlane.f32.xlu0 %v5027_v7  ;;  %5031 = vadd.xlane.f32.xlu1 %v5030_v39 }
 0x476   :  { %5034 = vadd.xlane.f32.xlu0 %v5033_v36  ;;  %5037 = vadd.xlane.f32.xlu1 %v5036_v15 }
 0x47a   :  { %5040 = vadd.xlane.f32.xlu0 %v5039_v0  ;;  %5043 = vadd.xlane.f32.xlu1 %v5042_v30  ;;  %v8736_v0 = vld [vmem:[%s8861_s2] ss:$0 sm:$0xff]  ;;  %s6684_s2 = smov [#allocation3]  }
 0x47b   :  { %s5369_s27 = sshll.u32 %s6684_s2, 4  ;;  %s5370_s27 = int_to_ptr.vmem [resolvable:$true] %s5369_s27 }
 0x47c   :  { %s6659_s28 = scalar_lea.vmem %s5370_s27, 2048  ;;  %p6664_p1 = scmp.lt.s32.totalorder %s5370_s27, %s5370_s27 }
 0x47d   :  { %p6660_p0 = scmp.ne.s32.totalorder %s5370_s27, %s6659_s28  ;;  %p6665_p2 = scmp.lt.s32.totalorder %s6659_s28, %s6659_s28 }
 0x47e   :  { %5046 = vadd.xlane.f32.xlu0 %v5045_v6  ;;  %5049 = vadd.xlane.f32.xlu1 %v5048_v16 }
 0x47f   :  { %p6666_p3 = por %p6665_p2, %p6664_p1 }
 0x481   :  { %p6667_p4 = pnand %p6666_p3, %p6660_p0 }
 0x4c7   :  { %v5059_v53 = vpop.xlane.xlu0 %5058 }
 0x4c8   :  { %v5118_v52 = vmul.f32 0.0625, %v5059_v53 }
 0x4ca   :  { %v5150_v45 = vadd.f32 1e-05, %v5118_v52 }
 0x4cb   :  { %v5062_v2 = vpop.xlane.xlu1 %5061  ;;  %v5053_v63 = vpop.xlane.xlu0 %5052 }
 0x4cc   :  { %6595 = vrsqrt.f32 %v5150_v45  ;;  %v5119_v51 = vmul.f32 0.0625, %v5062_v2  ;;  %v5116_v62 = vmul.f32 0.0625, %v5053_v63 }
 0x4ce   :  { %v5151_v1 = vadd.f32 1e-05, %v5119_v51  ;;  %v5148_v17 = vadd.f32 1e-05, %v5116_v62 }
 0x4cf   :  { %v5071_v31 = vpop.xlane.xlu0 %5070  ;;  %v5056_v33 = vpop.xlane.xlu1 %5055 }
 0x4d0   :  { %6597 = vrsqrt.f32 %v5151_v1  ;;  %v5122_v25 = vmul.f32 0.0625, %v5071_v31  ;;  %v5117_v20 = vmul.f32 0.0625, %v5056_v33 }
 0x4d1   :  { %6599 = vrsqrt.f32 %v5148_v17 }
 0x4d2   :  { %v5154_v19 = vadd.f32 1e-05, %v5122_v25  ;;  %v5149_v59 = vadd.f32 1e-05, %v5117_v20 }
 0x4d3   :  { %v5074_v55 = vpop.xlane.xlu1 %5073  ;;  %v5065_v5 = vpop.xlane.xlu0 %5064 }
 0x4d4   :  { %6601 = vrsqrt.f32 %v5154_v19  ;;  %v5123_v60 = vmul.f32 0.0625, %v5074_v55  ;;  %v5120_v7 = vmul.f32 0.0625, %v5065_v5 }
 0x4d5   :  { %6603 = vrsqrt.f32 %v5149_v59 }
 0x4d6   :  { %v5155_v9 = vadd.f32 1e-05, %v5123_v60  ;;  %v5152_v39 = vadd.f32 1e-05, %v5120_v7 }
 0x4d7   :  { %v5083_v14 = vpop.xlane.xlu0 %5082  ;;  %v5068_v36 = vpop.xlane.xlu1 %5067 }
 0x4d8   :  { %6605 = vrsqrt.f32 %v5155_v9  ;;  %v5126_v49 = vmul.f32 0.0625, %v5083_v14  ;;  %v5121_v15 = vmul.f32 0.0625, %v5068_v36 }
 0x4d9   :  { %v6596_v42 = vpop.eup %6595  ;;  %6607 = vrsqrt.f32 %v5152_v39 }
 0x4da   :  { %v5158_v61 = vadd.f32 1e-05, %v5126_v49  ;;  %v5153_v30 = vadd.f32 1e-05, %v5121_v15  ;;  %v5214_v44 = vmul.f32 %v6596_v42, %v8496_v8 }
 0x4db   :  { %v5086_v6 = vpop.xlane.xlu1 %5085  ;;  %v5077_v16 = vpop.xlane.xlu0 %5076 }
 0x4dc   :  { %6609 = vrsqrt.f32 %v5158_v61  ;;  %v5127_v53 = vmul.f32 0.0625, %v5086_v6  ;;  %v5124_v52 = vmul.f32 0.0625, %v5077_v16  ;;  %v5253_v45 = vmul.f32 %v8736_v0, %v5214_v44 }
 0x4dd   :  { %v6598_v2 = vpop.eup %6597  ;;  %6611 = vrsqrt.f32 %v5153_v30 }
 0x4de   :  { %v6600_v63 = vpop.eup %6599  ;;  %v5159_v51 = vadd.f32 1e-05, %v5127_v53  ;;  %v5156_v62 = vadd.f32 1e-05, %v5124_v52  ;;  %5287 = vrot.lane.b32.xlu1 %v5253_v45, %s6683_s26  ;;  %v5215_v1 = vmul.f32 %v6598_v2, %v8506_v21 }
 0x4df   :  { %v5080_v17 = vpop.xlane.xlu1 %5079  ;;  %v5212_v8 = vmul.f32 %v6600_v63, %v8503_v23 }
 0x4e0   :  { %6613 = vrsqrt.f32 %v5159_v51  ;;  %v5125_v31 = vmul.f32 0.0625, %v5080_v17  ;;  %v5254_v33 = vmul.f32 %v8736_v0, %v5215_v1 }
 0x4e1   :  { %v6602_v25 = vpop.eup %6601  ;;  %6615 = vrsqrt.f32 %v5156_v62  ;;  %v5251_v20 = vmul.f32 %v8736_v0, %v5212_v8 }
 0x4e2   :  { %v6604_v19 = vpop.eup %6603  ;;  %v5157_v59 = vadd.f32 1e-05, %v5125_v31  ;;  %5289 = vrot.lane.b32.xlu1 %v5254_v33, %s6683_s26  ;;  %v5218_v5 = vmul.f32 %v6602_v25, %v8520_v54 }
 0x4e3   :  { %v5089_v55 = vpop.xlane.xlu0 %5088  ;;  %5283 = vrot.lane.b32.xlu0 %v5251_v20, %s6683_s26  ;;  %v5008_v21 = vpop.xlane.xlu1 %5007  ;;  %v5213_v23 = vmul.f32 %v6604_v19, %v8516_v48 }
 0x4e4   :  { %v5128_v60 = vmul.f32 0.0625, %v5089_v55  ;;  %6617 = vrsqrt.f32 %v5157_v59  ;;  %v5101_v7 = vmul.f32 0.0625, %v5008_v21  ;;  %v5257_v9 = vmul.f32 %v8736_v0, %v5218_v5 }
 0x4e5   :  { %v6606_v39 = vpop.eup %6605  ;;  %v5252_v36 = vmul.f32 %v8736_v0, %v5213_v23 }
 0x4e6   :  { %v5160_v14 = vadd.f32 1e-05, %v5128_v60  ;;  %v6608_v49 = vpop.eup %6607  ;;  %v5133_v15 = vadd.f32 1e-05, %v5101_v7  ;;  %v5219_v61 = vmul.f32 %v6606_v39, %v8534_v29 }
 0x4e7   :  { %v5095_v42 = vpop.xlane.xlu0 %5094  ;;  %5295 = vrot.lane.b32.xlu0 %v5257_v9, %s6683_s26  ;;  %5285 = vrot.lane.b32.xlu1 %v5252_v36, %s6683_s26  ;;  %v5014_v54 = vpop.xlane.xlu1 %5013  ;;  %v5216_v30 = vmul.f32 %v6608_v49, %v8530_v13 }
 0x4e8   :  { %6619 = vrsqrt.f32 %v5160_v14  ;;  %v5130_v48 = vmul.f32 0.0625, %v5095_v42  ;;  %v5103_v44 = vmul.f32 0.0625, %v5014_v54  ;;  %v5258_v6 = vmul.f32 %v8736_v0, %v5219_v61 }
 0x4e9   :  { %6621 = vrsqrt.f32 %v5133_v15  ;;  %v6610_v16 = vpop.eup %6609  ;;  %v5255_v52 = vmul.f32 %v8736_v0, %v5216_v30 }
 0x4ea   :  { %v5162_v53 = vadd.f32 1e-05, %v5130_v48  ;;  %v6612_v45 = vpop.eup %6611  ;;  %v5135_v2 = vadd.f32 1e-05, %v5103_v44  ;;  %v5222_v29 = vmul.f32 %v6610_v16, %v8548_v41 }
 0x4eb   :  { %5291 = vrot.lane.b32.xlu0 %v5255_v52, %s6683_s26  ;;  %5297 = vrot.lane.b32.xlu1 %v5258_v6, %s6683_s26  ;;  %v5098_v63 = vpop.xlane.xlu1 %5097  ;;  %v5217_v13 = vmul.f32 %v6612_v45, %v8544_v4 }
 0x4ec   :  { %6623 = vrsqrt.f32 %v5162_v53  ;;  %v5131_v51 = vmul.f32 0.0625, %v5098_v63  ;;  %v5261_v62 = vmul.f32 %v8736_v0, %v5222_v29 }
 0x4ed   :  { %6625 = vrsqrt.f32 %v5135_v2  ;;  %v6614_v1 = vpop.eup %6613  ;;  %v5256_v17 = vmul.f32 %v8736_v0, %v5217_v13 }
 0x4ee   :  { %v6616_v8 = vpop.eup %6615  ;;  %v5223_v31 = vmul.f32 %v6614_v1, %v8564_v46  ;;  %v5163_v33 = vadd.f32 1e-05, %v5131_v51 }
 0x4ef   :  { %5303 = vrot.lane.b32.xlu0 %v5261_v62, %s6683_s26  ;;  %5293 = vrot.lane.b32.xlu1 %v5256_v17, %s6683_s26  ;;  %v5092_v41 = vpop.xlane.xlu1 %5091  ;;  %v5220_v25 = vmul.f32 %v6616_v8, %v8558_v50 }
 0x4f0   :  { %v5129_v20 = vmul.f32 0.0625, %v5092_v41  ;;  %v5262_v4 = vmul.f32 %v8736_v0, %v5223_v31  ;;  %6627 = vrsqrt.f32 %v5163_v33 }
 0x4f1   :  { %v6618_v19 = vpop.eup %6617  ;;  %v5259_v59 = vmul.f32 %v8736_v0, %v5220_v25 }
 0x4f2   :  { %v5161_v55 = vadd.f32 1e-05, %v5129_v20  ;;  %v5221_v5 = vmul.f32 %v6618_v19, %v8573_v38 }
 0x4f3   :  { %5299 = vrot.lane.b32.xlu0 %v5259_v59, %s6683_s26  ;;  %5305 = vrot.lane.b32.xlu1 %v5262_v4, %s6683_s26  ;;  %v5020_v30 = vpop.xlane.xlu1 %5019 }
 0x4f4   :  { %6629 = vrsqrt.f32 %v5161_v55  ;;  %v5260_v21 = vmul.f32 %v8736_v0, %v5221_v5  ;;  %v5105_v8 = vmul.f32 0.0625, %v5020_v30 }
 0x4f5   :  { %v6620_v46 = vpop.eup %6619 }
 0x4f6   :  { %v6622_v60 = vpop.eup %6621  ;;  %v5224_v50 = vmul.f32 %v6620_v46, %v8588_v47  ;;  %v5137_v25 = vadd.f32 1e-05, %v5105_v8 }
 0x4f7   :  { %v5197_v23 = vmul.f32 %v6622_v60, %v8579_v10  ;;  %5301 = vrot.lane.b32.xlu1 %v5260_v21, %s6683_s26  ;;  %v5026_v16 = vpop.xlane.xlu1 %5025 }
 0x4f8   :  { %v5263_v7 = vmul.f32 %v8736_v0, %v5224_v50  ;;  %v5107_v51 = vmul.f32 0.0625, %v5026_v16 }
 0x4f9   :  { %v6624_v9 = vpop.eup %6623  ;;  %v8778_v38 = vmul.f32 %v8736_v0, %v5197_v23 }
 0x4fa   :  { %v6626_v39 = vpop.eup %6625  ;;  %5307 = vrot.lane.b32.xlu0 %v5263_v7, %s6683_s26  ;;  %v5226_v14 = vmul.f32 %v6624_v9, %v8605_v26  ;;  %v5139_v31 = vadd.f32 1e-05, %v5107_v51 }
 0x4fb   :  { %v5199_v36 = vmul.f32 %v6626_v39, %v8592_v22  ;;  %v5005_v22 = vpop.xlane.xlu0 %5004 }
 0x4fc   :  { %v5265_v49 = vmul.f32 %v8736_v0, %v5226_v14  ;;  %v5100_v45 = vmul.f32 0.0625, %v5005_v22 }
 0x4fd   :  { %v8785_v47 = vmul.f32 %v8736_v0, %v5199_v36  ;;  %v6628_v10 = vpop.eup %6627 }
 0x4fe   :  { %5311 = vrot.lane.b32.xlu0 %v5265_v49, %s6683_s26  ;;  %v5227_v54 = vmul.f32 %v6628_v10, %v8621_v57  ;;  %v5132_v29 = vadd.f32 1e-05, %v5100_v45 }
 0x4ff   :  { %v5011_v48 = vpop.xlane.xlu0 %5010 }
 0x500   :  { %v5266_v26 = vmul.f32 %v8736_v0, %v5227_v54  ;;  %v5102_v6 = vmul.f32 0.0625, %v5011_v48 }
 0x501   :  { %v6630_v15 = vpop.eup %6629 }
 0x502   :  { %v5225_v42 = vmul.f32 %v6630_v15, %v8629_v12  ;;  %v5134_v52 = vadd.f32 1e-05, %v5102_v6  ;;  %v5032_v12 = vpop.xlane.xlu1 %5031 }
 0x503   :  { %v5017_v44 = vpop.xlane.xlu0 %5016  ;;  %v5109_v21 = vmul.f32 0.0625, %v5032_v12 }
 0x504   :  { %v5264_v61 = vmul.f32 %v8736_v0, %v5225_v42  ;;  %6631 = vrsqrt.f32 %v5134_v52  ;;  %v5104_v63 = vmul.f32 0.0625, %v5017_v44 }
 0x505   :  { %6633 = vrsqrt.f32 %v5132_v29  ;;  %v5141_v14 = vadd.f32 1e-05, %v5109_v21 }
 0x506   :  { %5309 = vrot.lane.b32.xlu1 %v5264_v61, %s6683_s26  ;;  %v5038_v62 = vpop.xlane.xlu1 %5037  ;;  %v5136_v17 = vadd.f32 1e-05, %v5104_v63 }
 0x507   :  { %v5023_v53 = vpop.xlane.xlu0 %5022  ;;  %v5111_v59 = vmul.f32 0.0625, %v5038_v62 }
 0x508   :  { %v5106_v57 = vmul.f32 0.0625, %v5023_v53 }
 0x509   :  { %v5143_v60 = vadd.f32 1e-05, %v5111_v59 }
 0x50a   :  { %5313 = vrot.lane.b32.xlu1 %v5266_v26, %s6683_s26  ;;  %v5138_v13 = vadd.f32 1e-05, %v5106_v57  ;;  %v5044_v41 = vpop.xlane.xlu1 %5043 }
 0x50b   :  { %v5029_v2 = vpop.xlane.xlu0 %5028  ;;  %v5113_v57 = vmul.f32 0.0625, %v5044_v41 }
 0x50c   :  { %6635 = vrsqrt.f32 %v5138_v13  ;;  %v5108_v20 = vmul.f32 0.0625, %v5029_v2 }
 0x50d   :  { %6637 = vrsqrt.f32 %v5136_v17 }
 0x50e   :  { %6639 = vrsqrt.f32 %v5139_v31  ;;  %v5140_v5 = vadd.f32 1e-05, %v5108_v20  ;;  %v5050_v50 = vpop.xlane.xlu1 %5049  ;;  %v5145_v31 = vadd.f32 1e-05, %v5113_v57 }
 0x50f   :  { %v5035_v1 = vpop.xlane.xlu0 %5034  ;;  %6641 = vrsqrt.f32 %v5137_v25 }
 0x510   :  { %v5110_v33 = vmul.f32 0.0625, %v5035_v1 }
 0x511   :  { %v6632_v4 = vpop.eup %6631 }
 0x512   :  { %v5142_v19 = vadd.f32 1e-05, %v5110_v33  ;;  %v5198_v46 = vmul.f32 %v6632_v4, %v8616_v58  ;;  %v6634_v23 = vpop.eup %6633  ;;  %v5115_v33 = vmul.f32 0.0625, %v5050_v50 }
 0x513   :  { %v5041_v55 = vpop.xlane.xlu0 %5040  ;;  %v5196_v49 = vmul.f32 %v6634_v23, %v8602_v11 }
 0x514   :  { %6643 = vrsqrt.f32 %v5142_v19  ;;  %v5112_v7 = vmul.f32 0.0625, %v5041_v55  ;;  %v5237_v39 = vmul.f32 %v8736_v0, %v5198_v46  ;;  %v5147_v46 = vadd.f32 1e-05, %v5115_v33 }
 0x515   :  { %6645 = vrsqrt.f32 %v5140_v5  ;;  %v5235_v54 = vmul.f32 %v8736_v0, %v5196_v49 }
 0x516   :  { %6647 = vrsqrt.f32 %v5143_v60  ;;  %v5144_v58 = vadd.f32 1e-05, %v5112_v7 }
 0x517   :  { %v5047_v9 = vpop.xlane.xlu0 %5046  ;;  %6649 = vrsqrt.f32 %v5141_v14 }
 0x518   :  { %v5114_v42 = vmul.f32 0.0625, %v5047_v9  ;;  %6651 = vrsqrt.f32 %v5144_v58 }
 0x519   :  { %v6636_v10 = vpop.eup %6635 }
 0x51a   :  { %v6638_v61 = vpop.eup %6637  ;;  %v5202_v22 = vmul.f32 %v6636_v10, %v8651_v18  ;;  %v5146_v11 = vadd.f32 1e-05, %v5114_v42 }
 0x51b   :  { %v6640_v48 = vpop.eup %6639  ;;  %v5200_v52 = vmul.f32 %v6638_v61, %v8639_v37 }
 0x51c   :  { %v6642_v16 = vpop.eup %6641  ;;  %v5241_v53 = vmul.f32 %v8736_v0, %v5202_v22  ;;  %v5203_v18 = vmul.f32 %v6640_v48, %v8659_v24  ;;  %6653 = vrsqrt.f32 %v5146_v11 }
 0x51d   :  { %v5239_v13 = vmul.f32 %v8736_v0, %v5200_v52  ;;  %v5201_v51 = vmul.f32 %v6642_v16, %v8646_v28  ;;  %6655 = vrsqrt.f32 %v5145_v31 }
 0x51e   :  { %v5242_v37 = vmul.f32 %v8736_v0, %v5203_v18  ;;  %6657 = vrsqrt.f32 %v5147_v46 }
 0x51f   :  { %v5240_v25 = vmul.f32 %v8736_v0, %v5201_v51 }
 0x521   :  { %v6644_v45 = vpop.eup %6643 }
 0x522   :  { %v6646_v63 = vpop.eup %6645  ;;  %v5206_v24 = vmul.f32 %v6644_v45, %v8683_v43 }
 0x523   :  { %v6648_v62 = vpop.eup %6647  ;;  %v5204_v43 = vmul.f32 %v6646_v63, %v8669_v3 }
 0x524   :  { %v5245_v41 = vmul.f32 %v8736_v0, %v5206_v24  ;;  %v5207_v28 = vmul.f32 %v6648_v62, %v8691_v27  ;;  %v6650_v20 = vpop.eup %6649 }
 0x525   :  { %v6652_v5 = vpop.eup %6651  ;;  %v5243_v21 = vmul.f32 %v8736_v0, %v5204_v43  ;;  %v5205_v27 = vmul.f32 %v6650_v20, %v8677_v56 }
 0x526   :  { %v5246_v3 = vmul.f32 %v8736_v0, %v5207_v28  ;;  %v5208_v9 = vmul.f32 %v6652_v5, %v8701_v32 }
 0x527   :  { %v5244_v14 = vmul.f32 %v8736_v0, %v5205_v27 }
 0x528   :  { %v5247_v56 = vmul.f32 %v8736_v0, %v5208_v9 }
 0x550   :  { %v5288_v36 = vpop.permute.xlu1 %5287 }
 0x551   :  { %v5333_v15 = vsel %vm1192_vm3, %v5237_v39, %v5288_v36  ;;  %v6654_v39 = vpop.eup %6653 }
 0x552   :  { %5350 = vst.msk [vmem:[#allocation3 + $0x10] sm:$0xff] %vm5347_vm4, %v5333_v15  ;;  %v5210_v10 = vmul.f32 %v6654_v39, %v8713_v35  ;;  %v6656_v61 = vpop.eup %6655 }
 0x553   :  { %v6658_v22 = vpop.eup %6657 }
 0x554   :  { %v5290_v26 = vpop.permute.xlu1 %5289  ;;  %v5249_v58 = vmul.f32 %v8736_v0, %v5210_v10  ;;  %v5211_v48 = vmul.f32 %v6658_v22, %v8720_v34 }
 0x555   :  { %v5284_v30 = vpop.permute.xlu0 %5283  ;;  %v5334_v44 = vsel %vm1192_vm3, %v8785_v47, %v5290_v26  ;;  %v5209_v26 = vmul.f32 %v6656_v61, %v8707_v40 }
 0x556   :  { %v5331_v6 = vsel %vm1192_vm3, %v5235_v54, %v5284_v30  ;;  %5351 = vst.msk [vmem:[#allocation3 + $0x18] sm:$0xff] %vm5347_vm4, %v5334_v44  ;;  %v5250_v11 = vmul.f32 %v8736_v0, %v5211_v48 }
 0x557   :  { %5348 = vst.msk [vmem:[#allocation3] sm:$0xff] %vm5347_vm4, %v5331_v6  ;;  %v5248_v35 = vmul.f32 %v8736_v0, %v5209_v26 }
 0x559   :  { %v5296_v12 = vpop.permute.xlu0 %5295  ;;  %v5286_v2 = vpop.permute.xlu1 %5285 }
 0x55a   :  { %v5337_v47 = vsel %vm1192_vm3, %v5241_v53, %v5296_v12  ;;  %v5332_v29 = vsel %vm1192_vm3, %v8778_v38, %v5286_v2 }
 0x55b   :  { %5354 = vst.msk [vmem:[#allocation3 + $0x30] sm:$0xff] %vm5347_vm4, %v5337_v47  ;;  %5349 = vst.msk [vmem:[#allocation3 + $0x8] sm:$0xff] %vm5347_vm4, %v5332_v29 }
 0x55d   :  { %v5292_v1 = vpop.permute.xlu0 %5291  ;;  %v5298_v17 = vpop.permute.xlu1 %5297 }
 0x55e   :  { %v5335_v8 = vsel %vm1192_vm3, %v5239_v13, %v5292_v1  ;;  %v5338_v38 = vsel %vm1192_vm3, %v5242_v37, %v5298_v17 }
 0x55f   :  { %5352 = vst.msk [vmem:[#allocation3 + $0x20] sm:$0xff] %vm5347_vm4, %v5335_v8  ;;  %5355 = vst.msk [vmem:[#allocation3 + $0x38] sm:$0xff] %vm5347_vm4, %v5338_v38 }
 0x561   :  { %v5304_v4 = vpop.permute.xlu0 %5303  ;;  %v5294_v19 = vpop.permute.xlu1 %5293 }
 0x562   :  { %v5341_v59 = vsel %vm1192_vm3, %v5245_v41, %v5304_v4  ;;  %v5336_v55 = vsel %vm1192_vm3, %v5240_v25, %v5294_v19 }
 0x563   :  { %5358 = vst.msk [vmem:[#allocation3 + $0x50] sm:$0xff] %vm5347_vm4, %v5341_v59  ;;  %5353 = vst.msk [vmem:[#allocation3 + $0x28] sm:$0xff] %vm5347_vm4, %v5336_v55 }
 0x565   :  { %v5300_v60 = vpop.permute.xlu0 %5299  ;;  %v5306_v50 = vpop.permute.xlu1 %5305 }
 0x566   :  { %v5339_v23 = vsel %vm1192_vm3, %v5243_v21, %v5300_v60  ;;  %v5342_v7 = vsel %vm1192_vm3, %v5246_v3, %v5306_v50 }
 0x567   :  { %5356 = vst.msk [vmem:[#allocation3 + $0x40] sm:$0xff] %vm5347_vm4, %v5339_v23  ;;  %5359 = vst.msk [vmem:[#allocation3 + $0x58] sm:$0xff] %vm5347_vm4, %v5342_v7 }
 0x569   :  { %v5302_v36 = vpop.permute.xlu1 %5301 }
 0x56a   :  { %v5340_v49 = vsel %vm1192_vm3, %v5244_v14, %v5302_v36 }
 0x56b   :  { %5357 = vst.msk [vmem:[#allocation3 + $0x48] sm:$0xff] %vm5347_vm4, %v5340_v49 }
 0x56c   :  { %v5308_v15 = vpop.permute.xlu0 %5307 }
 0x56d   :  { %v5343_v32 = vsel %vm1192_vm3, %v5247_v56, %v5308_v15 }
 0x56e   :  { %5360 = vst.msk [vmem:[#allocation3 + $0x60] sm:$0xff] %vm5347_vm4, %v5343_v32 }
 0x570   :  { %v5312_v42 = vpop.permute.xlu0 %5311 }
 0x571   :  { %v5345_v54 = vsel %vm1192_vm3, %v5249_v58, %v5312_v42 }
 0x572   :  { %5362 = vst.msk [vmem:[#allocation3 + $0x70] sm:$0xff] %vm5347_vm4, %v5345_v54 }
 0x578   :  { %v5310_v30 = vpop.permute.xlu1 %5309 }
 0x579   :  { %v5344_v44 = vsel %vm1192_vm3, %v5248_v35, %v5310_v30 }
 0x57a   :  { %5361 = vst.msk [vmem:[#allocation3 + $0x68] sm:$0xff] %vm5347_vm4, %v5344_v44 }
 0x57c   :  { %v5314_v6 = vpop.permute.xlu1 %5313 }
 0x57d   :  { %v5346_v16 = vsel %vm1192_vm3, %v5250_v11, %v5314_v6 }
 0x57e   :  { %5363 = vst.msk [vmem:[#allocation3 + $0x78] sm:$0xff] %vm5347_vm4, %v5346_v16 }
 0x57f   :  { %6670 = shalt.err (!%p6667_p4)
}
 0x580   :  { %s6685_s29 = smov 128   ;;  %s6686_s30 = smov 8  }
 0x581   :  { %5375 = dma.vmem_to_hbm [thread:$0]  %s5370_s27, 2048, %s8863_s4, [#allocation4], %s6685_s29, %s6685_s29, %s6686_s30  }
 0x582   :  { %6679 = dma.done.wait [#allocation4], 2048  }
 0x583   :  { %6680 = vsyncadd [#allocation4], 4294965248 }
 0x584   :  { %5379 = vsyncpa [#allocation4], 1 }

</bundles_post_ra>
